<compile_context>
chip_gen: v6e
topology: v6e:2x2x1
jax: 0.10.0
libtpu: 0.0.40
codegen_flags: <defaults>
</compile_context>

<pallas_src>
import functools

import jax
import jax.numpy as jnp
from jax import lax
from jax.experimental import pallas as pl
from jax.experimental.pallas import tpu as pltpu

K = 7          # conv kernel size
PAD = K // 2   # 3


def _round_up(a, b):
    return (a + b - 1) // b * b


def _vmem_budget_bytes():
    """Generation-aware VMEM request (leave headroom for Mosaic internals)."""
    try:
        cap = int(getattr(pltpu.get_tpu_info(), "vmem_capacity_bytes", 64 << 20))
    except Exception:  # query unavailable -> conservative default
        cap = 64 << 20
    # ~51 MiB on 64 MiB parts (v7x), ~102 MiB on 128 MiB parts (v5e/v6e).
    return max(16 << 20, int(cap * 0.80))


def _vmem_use_bytes(bt, ct, H, W, HW, HP, WP):
    x_blk = 2 * bt * ct * HW * 4                                  # dbl-buffered input
    o_blk = 2 * bt * _round_up(H, 8) * _round_up(W, 128) * 4      # dbl-buffered output
    accs = 2 * bt * 8 * HW * 4                                    # running sum + max
    maps = 2 * HP * WP * 4                                        # padded pooled maps
    return x_blk + o_blk + accs + maps + (2 << 20)                # + slack


def _spatial_attn_kernel(w_ref, x_ref, o_ref, sum8_ref, max8_ref, maps_ref, *,
                         B_TILE, C, C_TILE, H, W, HW, HP, WP, need_cmask):
    """Grid = (batch blocks [parallel], channel blocks [arbitrary/reduction]).

    w_ref    : SMEM (2*K*K,)              flattened conv weight (out=1, in=2, K, K)
    x_ref    : VMEM (B_TILE, C_TILE, HW)  lane-dense input block
    o_ref    : VMEM (B_TILE, 1, H, W)     sigmoid(conv(...)) output block
    sum8_ref : VMEM (B_TILE, 8, HW)       running channel partial sums
    max8_ref : VMEM (B_TILE, 8, HW)       running channel partial maxes
    maps_ref : VMEM (2, HP, WP)           zero-padded pooled maps (scratch)
    """
    k = pl.program_id(1)

    # ---- init running accumulators at the start of the channel reduction ----
    @pl.when(k == 0)
    def _init():
        sum8_ref[...] = jnp.zeros(sum8_ref.shape, jnp.float32)
        max8_ref[...] = jnp.full(max8_ref.shape, -jnp.inf, jnp.float32)

    # ---- streaming partial channel reduce: elementwise (VPU), no per-chunk XLU
    for i in range(B_TILE):
        for c0 in range(0, C_TILE, 8):
            c1 = min(c0 + 8, C_TILE)
            cc = c1 - c0
            blk = x_ref[i, c0:c1, :]                               # (cc, HW)
            if need_cmask:
                # last channel block may read past C (undefined data) -> mask.
                ch = (k * C_TILE + c0
                      + lax.broadcasted_iota(jnp.int32, (cc, HW), 0))
                valid = ch < C
                blk_s = jnp.where(valid, blk, 0.0)
                blk_m = jnp.where(valid, blk, -jnp.inf)
            else:
                blk_s = blk
                blk_m = blk
            sum8_ref[i, 0:cc, :] = sum8_ref[i, 0:cc, :] + blk_s
            max8_ref[i, 0:cc, :] = jnp.maximum(max8_ref[i, 0:cc, :], blk_m)

    # ---- last channel step: finish reduce, pad, 7x7 conv, sigmoid, store -----
    @pl.when(k == pl.num_programs(1) - 1)
    def _finalize():
        inv_c = jnp.float32(1.0 / C)

        # Zero only the padding ring; the interior is fully overwritten below.
        for c in range(2):
            maps_ref[c, 0:PAD, :] = jnp.zeros((PAD, WP), jnp.float32)
            maps_ref[c, PAD + H:HP, :] = jnp.zeros((HP - PAD - H, WP), jnp.float32)
            maps_ref[c, PAD:PAD + H, 0:PAD] = jnp.zeros((H, PAD), jnp.float32)
            maps_ref[c, PAD:PAD + H, PAD + W:WP] = (
                jnp.zeros((H, WP - PAD - W), jnp.float32))

        for i in range(B_TILE):
            # single cross-sublane reduce per map (instead of one per chunk)
            avg_flat = jnp.sum(sum8_ref[i], axis=0, keepdims=True) * inv_c  # (1,HW)
            max_flat = jnp.max(max8_ref[i], axis=0, keepdims=True)          # (1,HW)

            # scatter pooled rows into the zero-padded 2-D maps (interior only)
            for h in range(H):
                lo = h * W
                r = PAD + h
                maps_ref[0, r:r + 1, PAD:PAD + W] = avg_flat[:, lo:lo + W]
                maps_ref[1, r:r + 1, PAD:PAD + W] = max_flat[:, lo:lo + W]

            # 7x7 "valid" conv over the padded maps, relayouts hoisted:
            # 7 lane-shifted full-height copies per map, reused for every kh.
            acc = jnp.zeros((H, W), jnp.float32)
            for c in range(2):
                mc = maps_ref[c]                                    # (HP, WP)
                shifted = [mc[:, kw:kw + W] for kw in range(K)]     # each (HP, W)
                for kh in range(K):
                    base = c * K * K + kh * K
                    v = w_ref[base] * shifted[0]
                    for kw in range(1, K):
                        v = v + w_ref[base + kw] * shifted[kw]
                    acc = acc + v[kh:kh + H, :]                     # sublane slice

            # single (H, W) block store per batch element
            o_ref[i, 0, :, :] = jax.nn.sigmoid(acc)


def spatial_attention(x, conv_weight, *, b_tile=None, c_tile=None):
    """x: (N, C, H, W) f32; conv_weight: (1, 2, K, K) f32 -> (N, 1, H, W) f32."""
    N, C, H, W = x.shape
    HW = H * W
    HP = _round_up(H + 2 * PAD, 8)      # sublane-padded pooled-map height
    WP = _round_up(W + 2 * PAD, 128)    # lane-padded pooled-map width

    x_flat = x.reshape(N, C, HW)                             # free (contiguous)
    w_flat = conv_weight.astype(jnp.float32).reshape(-1)     # (2*K*K,)

    vmem_limit = _vmem_budget_bytes()
    usable = int(vmem_limit * 0.85)

    # ---- tile selection ------------------------------------------------------
    b_explicit = b_tile is not None
    if b_tile is None:
        b_tile = 1
        per_batch = C * HW * 4
        if per_batch < (1 << 20):       # pack tiny problems (per-step overhead)
            for d in range(1, min(N, 16) + 1):
                if (N % d == 0 and d * per_batch <= (1 << 20)
                        and _vmem_use_bytes(d, C, H, W, HW, HP, WP) <= usable):
                    b_tile = d
    if c_tile is None:
        if _vmem_use_bytes(b_tile, C, H, W, HW, HP, WP) <= usable:
            c_tile = C                  # whole channel stack in one step
        else:
            if not b_explicit:
                b_tile = 1
            c_tile = min(C, max(8, (C // 8) * 8))
            while (c_tile > 8
                   and _vmem_use_bytes(b_tile, c_tile, H, W, HW, HP, WP) > usable):
                c_tile -= 8

    assert N % b_tile == 0, "b_tile must divide the batch size"
    assert 1 <= c_tile <= C
    assert c_tile == C or c_tile % 8 == 0, "c_tile must be C or a multiple of 8"

    nb = N // b_tile
    nk = pl.cdiv(C, c_tile)
    need_cmask = (C % c_tile) != 0

    kernel = functools.partial(
        _spatial_attn_kernel, B_TILE=b_tile, C=C, C_TILE=c_tile,
        H=H, W=W, HW=HW, HP=HP, WP=WP, need_cmask=need_cmask)

    cost = pl.CostEstimate(
        flops=N * HW * (2 * C + 4 * K * K),
        transcendentals=N * HW,
        bytes_accessed=4 * (N * C * HW + N * HW + 2 * K * K))

    # TODO(synk): on v7x with tiny N, a second parallel axis over output row
    # blocks (PAD-row halo) would keep both TensorCores busy; not implemented.
    out = pl.pallas_call(
        kernel,
        out_shape=jax.ShapeDtypeStruct((N, 1, H, W), jnp.float32),
        grid=(nb, nk),
        in_specs=[
            pl.BlockSpec(memory_space=pltpu.MemorySpace.SMEM),             # weights
            pl.BlockSpec((b_tile, c_tile, HW), lambda b, k: (b, k, 0)),    # x (flat)
        ],
        out_specs=pl.BlockSpec((b_tile, 1, H, W), lambda b, k: (b, 0, 0, 0)),
        scratch_shapes=[
            pltpu.VMEM((b_tile, 8, HW), jnp.float32),    # running channel sums
            pltpu.VMEM((b_tile, 8, HW), jnp.float32),    # running channel maxes
            pltpu.VMEM((2, HP, WP), jnp.float32),        # zero-padded pooled maps
        ],
        compiler_params=pltpu.CompilerParams(
            dimension_semantics=("parallel", "arbitrary"),
            vmem_limit_bytes=vmem_limit),
        cost_estimate=cost,
    )(w_flat, x_flat)

    return out


def _reference(x, conv_weight):
    """Plain-JAX reference reproducing the PyTorch forward."""
    avg_out = jnp.mean(x, axis=1, keepdims=True)
    max_out = jnp.max(x, axis=1, keepdims=True)
    cat = jnp.concatenate([avg_out, max_out], axis=1)          # (N, 2, H, W)
    y = lax.conv_general_dilated(
        cat, conv_weight,
        window_strides=(1, 1), padding=((PAD, PAD), (PAD, PAD)),
        dimension_numbers=("NCHW", "OIHW", "NCHW"))
    return jax.nn.sigmoid(y)


if __name__ == "__main__":
    key = jax.random.PRNGKey(0)
    kx, kw, kx2, kw2 = jax.random.split(key, 4)

    fan_in = 2 * K * K
    bound = 1.0 / (fan_in ** 0.5)

    # ---- primary demo shape --------------------------------------------------
    N, C, H, W = 2, 4, 16, 16
    x = jax.random.normal(kx, (N, C, H, W), dtype=jnp.float32)
    conv_weight = jax.random.uniform(
        kw, (1, 2, K, K), minval=-bound, maxval=bound, dtype=jnp.float32)

    out = jax.block_until_ready(spatial_attention(x, conv_weight))
    ref = _reference(x, conv_weight)
    assert out.shape == (N, 1, H, W)
    assert jnp.allclose(out, ref, atol=1e-5, rtol=1e-5), "mismatch vs reference"

    # ---- exercise the C-tiled reduction / masking / batch-packing paths ------
    N2, C2, H2, W2 = 4, 20, 12, 20
    x2 = jax.random.normal(kx2, (N2, C2, H2, W2), dtype=jnp.float32)
    conv_weight2 = jax.random.uniform(
        kw2, (1, 2, K, K), minval=-bound, maxval=bound, dtype=jnp.float32)

    out2 = jax.block_until_ready(
        spatial_attention(x2, conv_weight2, b_tile=2, c_tile=8))
    ref2 = _reference(x2, conv_weight2)
    assert out2.shape == (N2, 1, H2, W2)
    assert jnp.allclose(out2, ref2, atol=1e-5, rtol=1e-5), "mismatch (tiled path)"

    print("KERNEL_OK")
</pallas_src>

<mosaic_0001>
module attributes {stable_mosaic.version = 11 : i64} {
  func.func @_spatial_attn_kernel(%arg0: i32, %arg1: i32, %arg2: memref<98xf32, #tpu.memory_space<smem>>, %arg3: memref<2x4x256xf32, #tpu.memory_space<vmem>>, %arg4: memref<2x1x16x16xf32, #tpu.memory_space<vmem>>, %arg5: memref<2x8x256xf32, #tpu.memory_space<vmem>>, %arg6: memref<2x8x256xf32, #tpu.memory_space<vmem>>, %arg7: memref<2x24x128xf32, #tpu.memory_space<vmem>>) attributes {dimension_semantics = [#tpu.dimension_semantics<parallel>, #tpu.dimension_semantics<arbitrary>], iteration_bounds = array<i64: 1, 1>, scalar_prefetch = 0 : i64, scratch_operands = 3 : i64, tpu.core_type = #tpu.core_type<tc>, window_params = [{transform_indices = @transform_0, window_bounds = array<i64: 98>}, {transform_indices = @transform_1, window_bounds = array<i64: 2, 4, 256>}, {transform_indices = @transform_2, window_bounds = array<i64: 2, 1, 16, 16>}]} {
    %c0_i32 = arith.constant 0 : i32
    %0 = arith.cmpi eq, %arg1, %c0_i32 : i32
    %1 = arith.extui %0 : i1 to i32
    %c0_i32_0 = arith.constant 0 : i32
    %2 = arith.cmpi ne, %1, %c0_i32_0 : i32
    scf.if %2 {
      %cst = arith.constant 0.000000e+00 : f32
      %34 = vector.broadcast %cst : f32 to vector<2x8x256xf32>
      %c0_31 = arith.constant 0 : index
      %c0_32 = arith.constant 0 : index
      %c0_33 = arith.constant 0 : index
      %35 = vector.load %arg5[%c0_31, %c0_32, %c0_33] : memref<2x8x256xf32, #tpu.memory_space<vmem>>, vector<2x8x256xf32>
      tpu.vector_store %arg5[%c0_31, %c0_32, %c0_33], %34 {strides = array<i32>} : memref<2x8x256xf32, #tpu.memory_space<vmem>>, vector<2x8x256xf32>,
      %cst_34 = arith.constant 0xFF800000 : f32
      %36 = vector.broadcast %cst_34 : f32 to vector<2x8x256xf32>
      %c0_35 = arith.constant 0 : index
      %c0_36 = arith.constant 0 : index
      %c0_37 = arith.constant 0 : index
      %37 = vector.load %arg6[%c0_35, %c0_36, %c0_37] : memref<2x8x256xf32, #tpu.memory_space<vmem>>, vector<2x8x256xf32>
      tpu.vector_store %arg6[%c0_35, %c0_36, %c0_37], %36 {strides = array<i32>} : memref<2x8x256xf32, #tpu.memory_space<vmem>>, vector<2x8x256xf32>,
    } else {
    }
    %c0 = arith.constant 0 : index
    %c0_1 = arith.constant 0 : index
    %c0_2 = arith.constant 0 : index
    %3 = vector.load %arg3[%c0, %c0_1, %c0_2] : memref<2x4x256xf32, #tpu.memory_space<vmem>>, vector<1x4x256xf32>
    %4 = vector.shape_cast %3 : vector<1x4x256xf32> to vector<4x256xf32>
    %c0_3 = arith.constant 0 : index
    %c0_4 = arith.constant 0 : index
    %c0_5 = arith.constant 0 : index
    %5 = vector.load %arg5[%c0_3, %c0_4, %c0_5] : memref<2x8x256xf32, #tpu.memory_space<vmem>>, vector<1x4x256xf32>
    %6 = vector.shape_cast %5 : vector<1x4x256xf32> to vector<4x256xf32>
    %7 = arith.addf %6, %4 : vector<4x256xf32>
    %c0_6 = arith.constant 0 : index
    %c0_7 = arith.constant 0 : index
    %c0_8 = arith.constant 0 : index
    %8 = vector.load %arg5[%c0_6, %c0_7, %c0_8] : memref<2x8x256xf32, #tpu.memory_space<vmem>>, vector<1x4x256xf32>
    %9 = vector.shape_cast %8 : vector<1x4x256xf32> to vector<4x256xf32>
    %10 = vector.shape_cast %7 : vector<4x256xf32> to vector<1x4x256xf32>
    tpu.vector_store %arg5[%c0_6, %c0_7, %c0_8], %10 {strides = array<i32>} : memref<2x8x256xf32, #tpu.memory_space<vmem>>, vector<1x4x256xf32>,
    %c0_9 = arith.constant 0 : index
    %c0_10 = arith.constant 0 : index
    %c0_11 = arith.constant 0 : index
    %11 = vector.load %arg6[%c0_9, %c0_10, %c0_11] : memref<2x8x256xf32, #tpu.memory_space<vmem>>, vector<1x4x256xf32>
    %12 = vector.shape_cast %11 : vector<1x4x256xf32> to vector<4x256xf32>
    %13 = arith.maximumf %12, %4 : vector<4x256xf32>
    %c0_12 = arith.constant 0 : index
    %c0_13 = arith.constant 0 : index
    %c0_14 = arith.constant 0 : index
    %14 = vector.load %arg6[%c0_12, %c0_13, %c0_14] : memref<2x8x256xf32, #tpu.memory_space<vmem>>, vector<1x4x256xf32>
    %15 = vector.shape_cast %14 : vector<1x4x256xf32> to vector<4x256xf32>
    %16 = vector.shape_cast %13 : vector<4x256xf32> to vector<1x4x256xf32>
    tpu.vector_store %arg6[%c0_12, %c0_13, %c0_14], %16 {strides = array<i32>} : memref<2x8x256xf32, #tpu.memory_space<vmem>>, vector<1x4x256xf32>,
    %c1 = arith.constant 1 : index
    %c0_15 = arith.constant 0 : index
    %c0_16 = arith.constant 0 : index
    %17 = vector.load %arg3[%c1, %c0_15, %c0_16] : memref<2x4x256xf32, #tpu.memory_space<vmem>>, vector<1x4x256xf32>
    %18 = vector.shape_cast %17 : vector<1x4x256xf32> to vector<4x256xf32>
    %c1_17 = arith.constant 1 : index
    %c0_18 = arith.constant 0 : index
    %c0_19 = arith.constant 0 : index
    %19 = vector.load %arg5[%c1_17, %c0_18, %c0_19] : memref<2x8x256xf32, #tpu.memory_space<vmem>>, vector<1x4x256xf32>
    %20 = vector.shape_cast %19 : vector<1x4x256xf32> to vector<4x256xf32>
    %21 = arith.addf %20, %18 : vector<4x256xf32>
    %c1_20 = arith.constant 1 : index
    %c0_21 = arith.constant 0 : index
    %c0_22 = arith.constant 0 : index
    %22 = vector.load %arg5[%c1_20, %c0_21, %c0_22] : memref<2x8x256xf32, #tpu.memory_space<vmem>>, vector<1x4x256xf32>
    %23 = vector.shape_cast %22 : vector<1x4x256xf32> to vector<4x256xf32>
    %24 = vector.shape_cast %21 : vector<4x256xf32> to vector<1x4x256xf32>
    tpu.vector_store %arg5[%c1_20, %c0_21, %c0_22], %24 {strides = array<i32>} : memref<2x8x256xf32, #tpu.memory_space<vmem>>, vector<1x4x256xf32>,
    %c1_23 = arith.constant 1 : index
    %c0_24 = arith.constant 0 : index
    %c0_25 = arith.constant 0 : index
    %25 = vector.load %arg6[%c1_23, %c0_24, %c0_25] : memref<2x8x256xf32, #tpu.memory_space<vmem>>, vector<1x4x256xf32>
    %26 = vector.shape_cast %25 : vector<1x4x256xf32> to vector<4x256xf32>
    %27 = arith.maximumf %26, %18 : vector<4x256xf32>
    %c1_26 = arith.constant 1 : index
    %c0_27 = arith.constant 0 : index
    %c0_28 = arith.constant 0 : index
    %28 = vector.load %arg6[%c1_26, %c0_27, %c0_28] : memref<2x8x256xf32, #tpu.memory_space<vmem>>, vector<1x4x256xf32>
    %29 = vector.shape_cast %28 : vector<1x4x256xf32> to vector<4x256xf32>
    %30 = vector.shape_cast %27 : vector<4x256xf32> to vector<1x4x256xf32>
    tpu.vector_store %arg6[%c1_26, %c0_27, %c0_28], %30 {strides = array<i32>} : memref<2x8x256xf32, #tpu.memory_space<vmem>>, vector<1x4x256xf32>,
    %c0_i32_29 = arith.constant 0 : i32
    %31 = arith.cmpi eq, %arg1, %c0_i32_29 : i32
    %32 = arith.extui %31 : i1 to i32
    %c0_i32_30 = arith.constant 0 : i32
    %33 = arith.cmpi ne, %32, %c0_i32_30 : i32
    scf.if %33 {
      %cst = arith.constant 0.000000e+00 : f32
      %34 = vector.broadcast %cst : f32 to vector<3x128xf32>
      %c0_31 = arith.constant 0 : index
      %c0_32 = arith.constant 0 : index
      %c0_33 = arith.constant 0 : index
      %35 = vector.load %arg7[%c0_31, %c0_32, %c0_33] : memref<2x24x128xf32, #tpu.memory_space<vmem>>, vector<1x3x128xf32>
      %36 = vector.shape_cast %35 : vector<1x3x128xf32> to vector<3x128xf32>
      %37 = vector.shape_cast %34 : vector<3x128xf32> to vector<1x3x128xf32>
      tpu.vector_store %arg7[%c0_31, %c0_32, %c0_33], %37 {strides = array<i32>} : memref<2x24x128xf32, #tpu.memory_space<vmem>>, vector<1x3x128xf32>,
      %cst_34 = arith.constant 0.000000e+00 : f32
      %38 = vector.broadcast %cst_34 : f32 to vector<5x128xf32>
      %c0_35 = arith.constant 0 : index
      %c19 = arith.constant 19 : index
      %c0_36 = arith.constant 0 : index
      %39 = vector.load %arg7[%c0_35, %c19, %c0_36] : memref<2x24x128xf32, #tpu.memory_space<vmem>>, vector<1x5x128xf32>
      %40 = vector.shape_cast %39 : vector<1x5x128xf32> to vector<5x128xf32>
      %41 = vector.shape_cast %38 : vector<5x128xf32> to vector<1x5x128xf32>
      tpu.vector_store %arg7[%c0_35, %c19, %c0_36], %41 {strides = array<i32>} : memref<2x24x128xf32, #tpu.memory_space<vmem>>, vector<1x5x128xf32>,
      %cst_37 = arith.constant 0.000000e+00 : f32
      %42 = vector.broadcast %cst_37 : f32 to vector<16x3xf32>
      %c0_38 = arith.constant 0 : index
      %c3 = arith.constant 3 : index
      %c0_39 = arith.constant 0 : index
      %43 = vector.load %arg7[%c0_38, %c3, %c0_39] : memref<2x24x128xf32, #tpu.memory_space<vmem>>, vector<1x16x3xf32>
      %44 = vector.shape_cast %43 : vector<1x16x3xf32> to vector<16x3xf32>
      %45 = vector.shape_cast %42 : vector<16x3xf32> to vector<1x16x3xf32>
      tpu.vector_store %arg7[%c0_38, %c3, %c0_39], %45 {strides = array<i32>} : memref<2x24x128xf32, #tpu.memory_space<vmem>>, vector<1x16x3xf32>,
      %cst_40 = arith.constant 0.000000e+00 : f32
      %46 = vector.broadcast %cst_40 : f32 to vector<16x109xf32>
      %c0_41 = arith.constant 0 : index
      %c3_42 = arith.constant 3 : index
      %c19_43 = arith.constant 19 : index
      %47 = vector.load %arg7[%c0_41, %c3_42, %c19_43] : memref<2x24x128xf32, #tpu.memory_space<vmem>>, vector<1x16x109xf32>
      %48 = vector.shape_cast %47 : vector<1x16x109xf32> to vector<16x109xf32>
      %49 = vector.shape_cast %46 : vector<16x109xf32> to vector<1x16x109xf32>
      tpu.vector_store %arg7[%c0_41, %c3_42, %c19_43], %49 {strides = array<i32>} : memref<2x24x128xf32, #tpu.memory_space<vmem>>, vector<1x16x109xf32>,
      %cst_44 = arith.constant 0.000000e+00 : f32
      %50 = vector.broadcast %cst_44 : f32 to vector<3x128xf32>
      %c1_45 = arith.constant 1 : index
      %c0_46 = arith.constant 0 : index
      %c0_47 = arith.constant 0 : index
      %51 = vector.load %arg7[%c1_45, %c0_46, %c0_47] : memref<2x24x128xf32, #tpu.memory_space<vmem>>, vector<1x3x128xf32>
      %52 = vector.shape_cast %51 : vector<1x3x128xf32> to vector<3x128xf32>
      %53 = vector.shape_cast %50 : vector<3x128xf32> to vector<1x3x128xf32>
      tpu.vector_store %arg7[%c1_45, %c0_46, %c0_47], %53 {strides = array<i32>} : memref<2x24x128xf32, #tpu.memory_space<vmem>>, vector<1x3x128xf32>,
      %cst_48 = arith.constant 0.000000e+00 : f32
      %54 = vector.broadcast %cst_48 : f32 to vector<5x128xf32>
      %c1_49 = arith.constant 1 : index
      %c19_50 = arith.constant 19 : index
      %c0_51 = arith.constant 0 : index
      %55 = vector.load %arg7[%c1_49, %c19_50, %c0_51] : memref<2x24x128xf32, #tpu.memory_space<vmem>>, vector<1x5x128xf32>
      %56 = vector.shape_cast %55 : vector<1x5x128xf32> to vector<5x128xf32>
      %57 = vector.shape_cast %54 : vector<5x128xf32> to vector<1x5x128xf32>
      tpu.vector_store %arg7[%c1_49, %c19_50, %c0_51], %57 {strides = array<i32>} : memref<2x24x128xf32, #tpu.memory_space<vmem>>, vector<1x5x128xf32>,
      %cst_52 = arith.constant 0.000000e+00 : f32
      %58 = vector.broadcast %cst_52 : f32 to vector<16x3xf32>
      %c1_53 = arith.constant 1 : index
      %c3_54 = arith.constant 3 : index
      %c0_55 = arith.constant 0 : index
      %59 = vector.load %arg7[%c1_53, %c3_54, %c0_55] : memref<2x24x128xf32, #tpu.memory_space<vmem>>, vector<1x16x3xf32>
      %60 = vector.shape_cast %59 : vector<1x16x3xf32> to vector<16x3xf32>
      %61 = vector.shape_cast %58 : vector<16x3xf32> to vector<1x16x3xf32>
      tpu.vector_store %arg7[%c1_53, %c3_54, %c0_55], %61 {strides = array<i32>} : memref<2x24x128xf32, #tpu.memory_space<vmem>>, vector<1x16x3xf32>,
      %cst_56 = arith.constant 0.000000e+00 : f32
      %62 = vector.broadcast %cst_56 : f32 to vector<16x109xf32>
      %c1_57 = arith.constant 1 : index
      %c3_58 = arith.constant 3 : index
      %c19_59 = arith.constant 19 : index
      %63 = vector.load %arg7[%c1_57, %c3_58, %c19_59] : memref<2x24x128xf32, #tpu.memory_space<vmem>>, vector<1x16x109xf32>
      %64 = vector.shape_cast %63 : vector<1x16x109xf32> to vector<16x109xf32>
      %65 = vector.shape_cast %62 : vector<16x109xf32> to vector<1x16x109xf32>
      tpu.vector_store %arg7[%c1_57, %c3_58, %c19_59], %65 {strides = array<i32>} : memref<2x24x128xf32, #tpu.memory_space<vmem>>, vector<1x16x109xf32>,
      %c0_60 = arith.constant 0 : index
      %c0_61 = arith.constant 0 : index
      %c0_62 = arith.constant 0 : index
      %66 = vector.load %arg5[%c0_60, %c0_61, %c0_62] : memref<2x8x256xf32, #tpu.memory_space<vmem>>, vector<1x8x256xf32>
      %67 = vector.shape_cast %66 : vector<1x8x256xf32> to vector<8x256xf32>
      %cst_63 = arith.constant dense<0.000000e+00> : vector<256xf32>
      %68 = vector.multi_reduction <add>, %67, %cst_63 [0] : vector<8x256xf32> to vector<256xf32>
      %69 = vector.shape_cast %68 : vector<256xf32> to vector<1x256xf32>
      %cst_64 = arith.constant 2.500000e-01 : f32
      %70 = vector.broadcast %cst_64 : f32 to vector<1x256xf32>
      %71 = arith.mulf %69, %70 : vector<1x256xf32>
      %c0_65 = arith.constant 0 : index
      %c0_66 = arith.constant 0 : index
      %c0_67 = arith.constant 0 : index
      %72 = vector.load %arg6[%c0_65, %c0_66, %c0_67] : memref<2x8x256xf32, #tpu.memory_space<vmem>>, vector<1x8x256xf32>
      %73 = vector.shape_cast %72 : vector<1x8x256xf32> to vector<8x256xf32>
      %cst_68 = arith.constant dense<0xFF800000> : vector<256xf32>
      %74 = vector.multi_reduction <maximumf>, %73, %cst_68 [0] : vector<8x256xf32> to vector<256xf32>
      %75 = vector.shape_cast %74 : vector<256xf32> to vector<1x256xf32>
      %76 = vector.extract_strided_slice %71 {offsets = [0, 0], sizes = [1, 16], strides = [1, 1]} : vector<1x256xf32> to vector<1x16xf32>
      %c0_69 = arith.constant 0 : index
      %c3_70 = arith.constant 3 : index
      %c3_71 = arith.constant 3 : index
      %77 = vector.load %arg7[%c0_69, %c3_70, %c3_71] : memref<2x24x128xf32, #tpu.memory_space<vmem>>, vector<1x1x16xf32>
      %78 = vector.shape_cast %77 : vector<1x1x16xf32> to vector<1x16xf32>
      %79 = vector.shape_cast %76 : vector<1x16xf32> to vector<1x1x16xf32>
      tpu.vector_store %arg7[%c0_69, %c3_70, %c3_71], %79 {strides = array<i32>} : memref<2x24x128xf32, #tpu.memory_space<vmem>>, vector<1x1x16xf32>,
      %80 = vector.extract_strided_slice %75 {offsets = [0, 0], sizes = [1, 16], strides = [1, 1]} : vector<1x256xf32> to vector<1x16xf32>
      %c1_72 = arith.constant 1 : index
      %c3_73 = arith.constant 3 : index
      %c3_74 = arith.constant 3 : index
      %81 = vector.load %arg7[%c1_72, %c3_73, %c3_74] : memref<2x24x128xf32, #tpu.memory_space<vmem>>, vector<1x1x16xf32>
      %82 = vector.shape_cast %81 : vector<1x1x16xf32> to vector<1x16xf32>
      %83 = vector.shape_cast %80 : vector<1x16xf32> to vector<1x1x16xf32>
      tpu.vector_store %arg7[%c1_72, %c3_73, %c3_74], %83 {strides = array<i32>} : memref<2x24x128xf32, #tpu.memory_space<vmem>>, vector<1x1x16xf32>,
      %84 = vector.extract_strided_slice %71 {offsets = [0, 16], sizes = [1, 16], strides = [1, 1]} : vector<1x256xf32> to vector<1x16xf32>
      %c0_75 = arith.constant 0 : index
      %c4 = arith.constant 4 : index
      %c3_76 = arith.constant 3 : index
      %85 = vector.load %arg7[%c0_75, %c4, %c3_76] : memref<2x24x128xf32, #tpu.memory_space<vmem>>, vector<1x1x16xf32>
      %86 = vector.shape_cast %85 : vector<1x1x16xf32> to vector<1x16xf32>
      %87 = vector.shape_cast %84 : vector<1x16xf32> to vector<1x1x16xf32>
      tpu.vector_store %arg7[%c0_75, %c4, %c3_76], %87 {strides = array<i32>} : memref<2x24x128xf32, #tpu.memory_space<vmem>>, vector<1x1x16xf32>,
      %88 = vector.extract_strided_slice %75 {offsets = [0, 16], sizes = [1, 16], strides = [1, 1]} : vector<1x256xf32> to vector<1x16xf32>
      %c1_77 = arith.constant 1 : index
      %c4_78 = arith.constant 4 : index
      %c3_79 = arith.constant 3 : index
      %89 = vector.load %arg7[%c1_77, %c4_78, %c3_79] : memref<2x24x128xf32, #tpu.memory_space<vmem>>, vector<1x1x16xf32>
      %90 = vector.shape_cast %89 : vector<1x1x16xf32> to vector<1x16xf32>
      %91 = vector.shape_cast %88 : vector<1x16xf32> to vector<1x1x16xf32>
      tpu.vector_store %arg7[%c1_77, %c4_78, %c3_79], %91 {strides = array<i32>} : memref<2x24x128xf32, #tpu.memory_space<vmem>>, vector<1x1x16xf32>,
      %92 = vector.extract_strided_slice %71 {offsets = [0, 32], sizes = [1, 16], strides = [1, 1]} : vector<1x256xf32> to vector<1x16xf32>
      %c0_80 = arith.constant 0 : index
      %c5 = arith.constant 5 : index
      %c3_81 = arith.constant 3 : index
      %93 = vector.load %arg7[%c0_80, %c5, %c3_81] : memref<2x24x128xf32, #tpu.memory_space<vmem>>, vector<1x1x16xf32>
      %94 = vector.shape_cast %93 : vector<1x1x16xf32> to vector<1x16xf32>
      %95 = vector.shape_cast %92 : vector<1x16xf32> to vector<1x1x16xf32>
      tpu.vector_store %arg7[%c0_80, %c5, %c3_81], %95 {strides = array<i32>} : memref<2x24x128xf32, #tpu.memory_space<vmem>>, vector<1x1x16xf32>,
      %96 = vector.extract_strided_slice %75 {offsets = [0, 32], sizes = [1, 16], strides = [1, 1]} : vector<1x256xf32> to vector<1x16xf32>
      %c1_82 = arith.constant 1 : index
      %c5_83 = arith.constant 5 : index
      %c3_84 = arith.constant 3 : index
      %97 = vector.load %arg7[%c1_82, %c5_83, %c3_84] : memref<2x24x128xf32, #tpu.memory_space<vmem>>, vector<1x1x16xf32>
      %98 = vector.shape_cast %97 : vector<1x1x16xf32> to vector<1x16xf32>
      %99 = vector.shape_cast %96 : vector<1x16xf32> to vector<1x1x16xf32>
      tpu.vector_store %arg7[%c1_82, %c5_83, %c3_84], %99 {strides = array<i32>} : memref<2x24x128xf32, #tpu.memory_space<vmem>>, vector<1x1x16xf32>,
      %100 = vector.extract_strided_slice %71 {offsets = [0, 48], sizes = [1, 16], strides = [1, 1]} : vector<1x256xf32> to vector<1x16xf32>
      %c0_85 = arith.constant 0 : index
      %c6 = arith.constant 6 : index
      %c3_86 = arith.constant 3 : index
      %101 = vector.load %arg7[%c0_85, %c6, %c3_86] : memref<2x24x128xf32, #tpu.memory_space<vmem>>, vector<1x1x16xf32>
      %102 = vector.shape_cast %101 : vector<1x1x16xf32> to vector<1x16xf32>
      %103 = vector.shape_cast %100 : vector<1x16xf32> to vector<1x1x16xf32>
      tpu.vector_store %arg7[%c0_85, %c6, %c3_86], %103 {strides = array<i32>} : memref<2x24x128xf32, #tpu.memory_space<vmem>>, vector<1x1x16xf32>,
      %104 = vector.extract_strided_slice %75 {offsets = [0, 48], sizes = [1, 16], strides = [1, 1]} : vector<1x256xf32> to vector<1x16xf32>
      %c1_87 = arith.constant 1 : index
      %c6_88 = arith.constant 6 : index
      %c3_89 = arith.constant 3 : index
      %105 = vector.load %arg7[%c1_87, %c6_88, %c3_89] : memref<2x24x128xf32, #tpu.memory_space<vmem>>, vector<1x1x16xf32>
      %106 = vector.shape_cast %105 : vector<1x1x16xf32> to vector<1x16xf32>
      %107 = vector.shape_cast %104 : vector<1x16xf32> to vector<1x1x16xf32>
      tpu.vector_store %arg7[%c1_87, %c6_88, %c3_89], %107 {strides = array<i32>} : memref<2x24x128xf32, #tpu.memory_space<vmem>>, vector<1x1x16xf32>,
      %108 = vector.extract_strided_slice %71 {offsets = [0, 64], sizes = [1, 16], strides = [1, 1]} : vector<1x256xf32> to vector<1x16xf32>
      %c0_90 = arith.constant 0 : index
      %c7 = arith.constant 7 : index
      %c3_91 = arith.constant 3 : index
      %109 = vector.load %arg7[%c0_90, %c7, %c3_91] : memref<2x24x128xf32, #tpu.memory_space<vmem>>, vector<1x1x16xf32>
      %110 = vector.shape_cast %109 : vector<1x1x16xf32> to vector<1x16xf32>
      %111 = vector.shape_cast %108 : vector<1x16xf32> to vector<1x1x16xf32>
      tpu.vector_store %arg7[%c0_90, %c7, %c3_91], %111 {strides = array<i32>} : memref<2x24x128xf32, #tpu.memory_space<vmem>>, vector<1x1x16xf32>,
      %112 = vector.extract_strided_slice %75 {offsets = [0, 64], sizes = [1, 16], strides = [1, 1]} : vector<1x256xf32> to vector<1x16xf32>
      %c1_92 = arith.constant 1 : index
      %c7_93 = arith.constant 7 : index
      %c3_94 = arith.constant 3 : index
      %113 = vector.load %arg7[%c1_92, %c7_93, %c3_94] : memref<2x24x128xf32, #tpu.memory_space<vmem>>, vector<1x1x16xf32>
      %114 = vector.shape_cast %113 : vector<1x1x16xf32> to vector<1x16xf32>
      %115 = vector.shape_cast %112 : vector<1x16xf32> to vector<1x1x16xf32>
      tpu.vector_store %arg7[%c1_92, %c7_93, %c3_94], %115 {strides = array<i32>} : memref<2x24x128xf32, #tpu.memory_space<vmem>>, vector<1x1x16xf32>,
      %116 = vector.extract_strided_slice %71 {offsets = [0, 80], sizes = [1, 16], strides = [1, 1]} : vector<1x256xf32> to vector<1x16xf32>
      %c0_95 = arith.constant 0 : index
      %c8 = arith.constant 8 : index
      %c3_96 = arith.constant 3 : index
      %117 = vector.load %arg7[%c0_95, %c8, %c3_96] : memref<2x24x128xf32, #tpu.memory_space<vmem>>, vector<1x1x16xf32>
      %118 = vector.shape_cast %117 : vector<1x1x16xf32> to vector<1x16xf32>
      %119 = vector.shape_cast %116 : vector<1x16xf32> to vector<1x1x16xf32>
      tpu.vector_store %arg7[%c0_95, %c8, %c3_96], %119 {strides = array<i32>} : memref<2x24x128xf32, #tpu.memory_space<vmem>>, vector<1x1x16xf32>,
      %120 = vector.extract_strided_slice %75 {offsets = [0, 80], sizes = [1, 16], strides = [1, 1]} : vector<1x256xf32> to vector<1x16xf32>
      %c1_97 = arith.constant 1 : index
      %c8_98 = arith.constant 8 : index
      %c3_99 = arith.constant 3 : index
      %121 = vector.load %arg7[%c1_97, %c8_98, %c3_99] : memref<2x24x128xf32, #tpu.memory_space<vmem>>, vector<1x1x16xf32>
      %122 = vector.shape_cast %121 : vector<1x1x16xf32> to vector<1x16xf32>
      %123 = vector.shape_cast %120 : vector<1x16xf32> to vector<1x1x16xf32>
      tpu.vector_store %arg7[%c1_97, %c8_98, %c3_99], %123 {strides = array<i32>} : memref<2x24x128xf32, #tpu.memory_space<vmem>>, vector<1x1x16xf32>,
      %124 = vector.extract_strided_slice %71 {offsets = [0, 96], sizes = [1, 16], strides = [1, 1]} : vector<1x256xf32> to vector<1x16xf32>
      %c0_100 = arith.constant 0 : index
      %c9 = arith.constant 9 : index
      %c3_101 = arith.constant 3 : index
      %125 = vector.load %arg7[%c0_100, %c9, %c3_101] : memref<2x24x128xf32, #tpu.memory_space<vmem>>, vector<1x1x16xf32>
      %126 = vector.shape_cast %125 : vector<1x1x16xf32> to vector<1x16xf32>
      %127 = vector.shape_cast %124 : vector<1x16xf32> to vector<1x1x16xf32>
      tpu.vector_store %arg7[%c0_100, %c9, %c3_101], %127 {strides = array<i32>} : memref<2x24x128xf32, #tpu.memory_space<vmem>>, vector<1x1x16xf32>,
      %128 = vector.extract_strided_slice %75 {offsets = [0, 96], sizes = [1, 16], strides = [1, 1]} : vector<1x256xf32> to vector<1x16xf32>
      %c1_102 = arith.constant 1 : index
      %c9_103 = arith.constant 9 : index
      %c3_104 = arith.constant 3 : index
      %129 = vector.load %arg7[%c1_102, %c9_103, %c3_104] : memref<2x24x128xf32, #tpu.memory_space<vmem>>, vector<1x1x16xf32>
      %130 = vector.shape_cast %129 : vector<1x1x16xf32> to vector<1x16xf32>
      %131 = vector.shape_cast %128 : vector<1x16xf32> to vector<1x1x16xf32>
      tpu.vector_store %arg7[%c1_102, %c9_103, %c3_104], %131 {strides = array<i32>} : memref<2x24x128xf32, #tpu.memory_space<vmem>>, vector<1x1x16xf32>,
      %132 = vector.extract_strided_slice %71 {offsets = [0, 112], sizes = [1, 16], strides = [1, 1]} : vector<1x256xf32> to vector<1x16xf32>
      %c0_105 = arith.constant 0 : index
      %c10 = arith.constant 10 : index
      %c3_106 = arith.constant 3 : index
      %133 = vector.load %arg7[%c0_105, %c10, %c3_106] : memref<2x24x128xf32, #tpu.memory_space<vmem>>, vector<1x1x16xf32>
      %134 = vector.shape_cast %133 : vector<1x1x16xf32> to vector<1x16xf32>
      %135 = vector.shape_cast %132 : vector<1x16xf32> to vector<1x1x16xf32>
      tpu.vector_store %arg7[%c0_105, %c10, %c3_106], %135 {strides = array<i32>} : memref<2x24x128xf32, #tpu.memory_space<vmem>>, vector<1x1x16xf32>,
      %136 = vector.extract_strided_slice %75 {offsets = [0, 112], sizes = [1, 16], strides = [1, 1]} : vector<1x256xf32> to vector<1x16xf32>
      %c1_107 = arith.constant 1 : index
      %c10_108 = arith.constant 10 : index
      %c3_109 = arith.constant 3 : index
      %137 = vector.load %arg7[%c1_107, %c10_108, %c3_109] : memref<2x24x128xf32, #tpu.memory_space<vmem>>, vector<1x1x16xf32>
      %138 = vector.shape_cast %137 : vector<1x1x16xf32> to vector<1x16xf32>
      %139 = vector.shape_cast %136 : vector<1x16xf32> to vector<1x1x16xf32>
      tpu.vector_store %arg7[%c1_107, %c10_108, %c3_109], %139 {strides = array<i32>} : memref<2x24x128xf32, #tpu.memory_space<vmem>>, vector<1x1x16xf32>,
      %140 = vector.extract_strided_slice %71 {offsets = [0, 128], sizes = [1, 16], strides = [1, 1]} : vector<1x256xf32> to vector<1x16xf32>
      %c0_110 = arith.constant 0 : index
      %c11 = arith.constant 11 : index
      %c3_111 = arith.constant 3 : index
      %141 = vector.load %arg7[%c0_110, %c11, %c3_111] : memref<2x24x128xf32, #tpu.memory_space<vmem>>, vector<1x1x16xf32>
      %142 = vector.shape_cast %141 : vector<1x1x16xf32> to vector<1x16xf32>
      %143 = vector.shape_cast %140 : vector<1x16xf32> to vector<1x1x16xf32>
      tpu.vector_store %arg7[%c0_110, %c11, %c3_111], %143 {strides = array<i32>} : memref<2x24x128xf32, #tpu.memory_space<vmem>>, vector<1x1x16xf32>,
      %144 = vector.extract_strided_slice %75 {offsets = [0, 128], sizes = [1, 16], strides = [1, 1]} : vector<1x256xf32> to vector<1x16xf32>
      %c1_112 = arith.constant 1 : index
      %c11_113 = arith.constant 11 : index
      %c3_114 = arith.constant 3 : index
      %145 = vector.load %arg7[%c1_112, %c11_113, %c3_114] : memref<2x24x128xf32, #tpu.memory_space<vmem>>, vector<1x1x16xf32>
      %146 = vector.shape_cast %145 : vector<1x1x16xf32> to vector<1x16xf32>
      %147 = vector.shape_cast %144 : vector<1x16xf32> to vector<1x1x16xf32>
      tpu.vector_store %arg7[%c1_112, %c11_113, %c3_114], %147 {strides = array<i32>} : memref<2x24x128xf32, #tpu.memory_space<vmem>>, vector<1x1x16xf32>,
      %148 = vector.extract_strided_slice %71 {offsets = [0, 144], sizes = [1, 16], strides = [1, 1]} : vector<1x256xf32> to vector<1x16xf32>
      %c0_115 = arith.constant 0 : index
      %c12 = arith.constant 12 : index
      %c3_116 = arith.constant 3 : index
      %149 = vector.load %arg7[%c0_115, %c12, %c3_116] : memref<2x24x128xf32, #tpu.memory_space<vmem>>, vector<1x1x16xf32>
      %150 = vector.shape_cast %149 : vector<1x1x16xf32> to vector<1x16xf32>
      %151 = vector.shape_cast %148 : vector<1x16xf32> to vector<1x1x16xf32>
      tpu.vector_store %arg7[%c0_115, %c12, %c3_116], %151 {strides = array<i32>} : memref<2x24x128xf32, #tpu.memory_space<vmem>>, vector<1x1x16xf32>,
      %152 = vector.extract_strided_slice %75 {offsets = [0, 144], sizes = [1, 16], strides = [1, 1]} : vector<1x256xf32> to vector<1x16xf32>
      %c1_117 = arith.constant 1 : index
      %c12_118 = arith.constant 12 : index
      %c3_119 = arith.constant 3 : index
      %153 = vector.load %arg7[%c1_117, %c12_118, %c3_119] : memref<2x24x128xf32, #tpu.memory_space<vmem>>, vector<1x1x16xf32>
      %154 = vector.shape_cast %153 : vector<1x1x16xf32> to vector<1x16xf32>
      %155 = vector.shape_cast %152 : vector<1x16xf32> to vector<1x1x16xf32>
      tpu.vector_store %arg7[%c1_117, %c12_118, %c3_119], %155 {strides = array<i32>} : memref<2x24x128xf32, #tpu.memory_space<vmem>>, vector<1x1x16xf32>,
      %156 = vector.extract_strided_slice %71 {offsets = [0, 160], sizes = [1, 16], strides = [1, 1]} : vector<1x256xf32> to vector<1x16xf32>
      %c0_120 = arith.constant 0 : index
      %c13 = arith.constant 13 : index
      %c3_121 = arith.constant 3 : index
      %157 = vector.load %arg7[%c0_120, %c13, %c3_121] : memref<2x24x128xf32, #tpu.memory_space<vmem>>, vector<1x1x16xf32>
      %158 = vector.shape_cast %157 : vector<1x1x16xf32> to vector<1x16xf32>
      %159 = vector.shape_cast %156 : vector<1x16xf32> to vector<1x1x16xf32>
      tpu.vector_store %arg7[%c0_120, %c13, %c3_121], %159 {strides = array<i32>} : memref<2x24x128xf32, #tpu.memory_space<vmem>>, vector<1x1x16xf32>,
      %160 = vector.extract_strided_slice %75 {offsets = [0, 160], sizes = [1, 16], strides = [1, 1]} : vector<1x256xf32> to vector<1x16xf32>
      %c1_122 = arith.constant 1 : index
      %c13_123 = arith.constant 13 : index
      %c3_124 = arith.constant 3 : index
      %161 = vector.load %arg7[%c1_122, %c13_123, %c3_124] : memref<2x24x128xf32, #tpu.memory_space<vmem>>, vector<1x1x16xf32>
      %162 = vector.shape_cast %161 : vector<1x1x16xf32> to vector<1x16xf32>
      %163 = vector.shape_cast %160 : vector<1x16xf32> to vector<1x1x16xf32>
      tpu.vector_store %arg7[%c1_122, %c13_123, %c3_124], %163 {strides = array<i32>} : memref<2x24x128xf32, #tpu.memory_space<vmem>>, vector<1x1x16xf32>,
      %164 = vector.extract_strided_slice %71 {offsets = [0, 176], sizes = [1, 16], strides = [1, 1]} : vector<1x256xf32> to vector<1x16xf32>
      %c0_125 = arith.constant 0 : index
      %c14 = arith.constant 14 : index
      %c3_126 = arith.constant 3 : index
      %165 = vector.load %arg7[%c0_125, %c14, %c3_126] : memref<2x24x128xf32, #tpu.memory_space<vmem>>, vector<1x1x16xf32>
      %166 = vector.shape_cast %165 : vector<1x1x16xf32> to vector<1x16xf32>
      %167 = vector.shape_cast %164 : vector<1x16xf32> to vector<1x1x16xf32>
      tpu.vector_store %arg7[%c0_125, %c14, %c3_126], %167 {strides = array<i32>} : memref<2x24x128xf32, #tpu.memory_space<vmem>>, vector<1x1x16xf32>,
      %168 = vector.extract_strided_slice %75 {offsets = [0, 176], sizes = [1, 16], strides = [1, 1]} : vector<1x256xf32> to vector<1x16xf32>
      %c1_127 = arith.constant 1 : index
      %c14_128 = arith.constant 14 : index
      %c3_129 = arith.constant 3 : index
      %169 = vector.load %arg7[%c1_127, %c14_128, %c3_129] : memref<2x24x128xf32, #tpu.memory_space<vmem>>, vector<1x1x16xf32>
      %170 = vector.shape_cast %169 : vector<1x1x16xf32> to vector<1x16xf32>
      %171 = vector.shape_cast %168 : vector<1x16xf32> to vector<1x1x16xf32>
      tpu.vector_store %arg7[%c1_127, %c14_128, %c3_129], %171 {strides = array<i32>} : memref<2x24x128xf32, #tpu.memory_space<vmem>>, vector<1x1x16xf32>,
      %172 = vector.extract_strided_slice %71 {offsets = [0, 192], sizes = [1, 16], strides = [1, 1]} : vector<1x256xf32> to vector<1x16xf32>
      %c0_130 = arith.constant 0 : index
      %c15 = arith.constant 15 : index
      %c3_131 = arith.constant 3 : index
      %173 = vector.load %arg7[%c0_130, %c15, %c3_131] : memref<2x24x128xf32, #tpu.memory_space<vmem>>, vector<1x1x16xf32>
      %174 = vector.shape_cast %173 : vector<1x1x16xf32> to vector<1x16xf32>
      %175 = vector.shape_cast %172 : vector<1x16xf32> to vector<1x1x16xf32>
      tpu.vector_store %arg7[%c0_130, %c15, %c3_131], %175 {strides = array<i32>} : memref<2x24x128xf32, #tpu.memory_space<vmem>>, vector<1x1x16xf32>,
      %176 = vector.extract_strided_slice %75 {offsets = [0, 192], sizes = [1, 16], strides = [1, 1]} : vector<1x256xf32> to vector<1x16xf32>
      %c1_132 = arith.constant 1 : index
      %c15_133 = arith.constant 15 : index
      %c3_134 = arith.constant 3 : index
      %177 = vector.load %arg7[%c1_132, %c15_133, %c3_134] : memref<2x24x128xf32, #tpu.memory_space<vmem>>, vector<1x1x16xf32>
      %178 = vector.shape_cast %177 : vector<1x1x16xf32> to vector<1x16xf32>
      %179 = vector.shape_cast %176 : vector<1x16xf32> to vector<1x1x16xf32>
      tpu.vector_store %arg7[%c1_132, %c15_133, %c3_134], %179 {strides = array<i32>} : memref<2x24x128xf32, #tpu.memory_space<vmem>>, vector<1x1x16xf32>,
      %180 = vector.extract_strided_slice %71 {offsets = [0, 208], sizes = [1, 16], strides = [1, 1]} : vector<1x256xf32> to vector<1x16xf32>
      %c0_135 = arith.constant 0 : index
      %c16 = arith.constant 16 : index
      %c3_136 = arith.constant 3 : index
      %181 = vector.load %arg7[%c0_135, %c16, %c3_136] : memref<2x24x128xf32, #tpu.memory_space<vmem>>, vector<1x1x16xf32>
      %182 = vector.shape_cast %181 : vector<1x1x16xf32> to vector<1x16xf32>
      %183 = vector.shape_cast %180 : vector<1x16xf32> to vector<1x1x16xf32>
      tpu.vector_store %arg7[%c0_135, %c16, %c3_136], %183 {strides = array<i32>} : memref<2x24x128xf32, #tpu.memory_space<vmem>>, vector<1x1x16xf32>,
      %184 = vector.extract_strided_slice %75 {offsets = [0, 208], sizes = [1, 16], strides = [1, 1]} : vector<1x256xf32> to vector<1x16xf32>
      %c1_137 = arith.constant 1 : index
      %c16_138 = arith.constant 16 : index
      %c3_139 = arith.constant 3 : index
      %185 = vector.load %arg7[%c1_137, %c16_138, %c3_139] : memref<2x24x128xf32, #tpu.memory_space<vmem>>, vector<1x1x16xf32>
      %186 = vector.shape_cast %185 : vector<1x1x16xf32> to vector<1x16xf32>
      %187 = vector.shape_cast %184 : vector<1x16xf32> to vector<1x1x16xf32>
      tpu.vector_store %arg7[%c1_137, %c16_138, %c3_139], %187 {strides = array<i32>} : memref<2x24x128xf32, #tpu.memory_space<vmem>>, vector<1x1x16xf32>,
      %188 = vector.extract_strided_slice %71 {offsets = [0, 224], sizes = [1, 16], strides = [1, 1]} : vector<1x256xf32> to vector<1x16xf32>
      %c0_140 = arith.constant 0 : index
      %c17 = arith.constant 17 : index
      %c3_141 = arith.constant 3 : index
      %189 = vector.load %arg7[%c0_140, %c17, %c3_141] : memref<2x24x128xf32, #tpu.memory_space<vmem>>, vector<1x1x16xf32>
      %190 = vector.shape_cast %189 : vector<1x1x16xf32> to vector<1x16xf32>
      %191 = vector.shape_cast %188 : vector<1x16xf32> to vector<1x1x16xf32>
      tpu.vector_store %arg7[%c0_140, %c17, %c3_141], %191 {strides = array<i32>} : memref<2x24x128xf32, #tpu.memory_space<vmem>>, vector<1x1x16xf32>,
      %192 = vector.extract_strided_slice %75 {offsets = [0, 224], sizes = [1, 16], strides = [1, 1]} : vector<1x256xf32> to vector<1x16xf32>
      %c1_142 = arith.constant 1 : index
      %c17_143 = arith.constant 17 : index
      %c3_144 = arith.constant 3 : index
      %193 = vector.load %arg7[%c1_142, %c17_143, %c3_144] : memref<2x24x128xf32, #tpu.memory_space<vmem>>, vector<1x1x16xf32>
      %194 = vector.shape_cast %193 : vector<1x1x16xf32> to vector<1x16xf32>
      %195 = vector.shape_cast %192 : vector<1x16xf32> to vector<1x1x16xf32>
      tpu.vector_store %arg7[%c1_142, %c17_143, %c3_144], %195 {strides = array<i32>} : memref<2x24x128xf32, #tpu.memory_space<vmem>>, vector<1x1x16xf32>,
      %196 = vector.extract_strided_slice %71 {offsets = [0, 240], sizes = [1, 16], strides = [1, 1]} : vector<1x256xf32> to vector<1x16xf32>
      %c0_145 = arith.constant 0 : index
      %c18 = arith.constant 18 : index
      %c3_146 = arith.constant 3 : index
      %197 = vector.load %arg7[%c0_145, %c18, %c3_146] : memref<2x24x128xf32, #tpu.memory_space<vmem>>, vector<1x1x16xf32>
      %198 = vector.shape_cast %197 : vector<1x1x16xf32> to vector<1x16xf32>
      %199 = vector.shape_cast %196 : vector<1x16xf32> to vector<1x1x16xf32>
      tpu.vector_store %arg7[%c0_145, %c18, %c3_146], %199 {strides = array<i32>} : memref<2x24x128xf32, #tpu.memory_space<vmem>>, vector<1x1x16xf32>,
      %200 = vector.extract_strided_slice %75 {offsets = [0, 240], sizes = [1, 16], strides = [1, 1]} : vector<1x256xf32> to vector<1x16xf32>
      %c1_147 = arith.constant 1 : index
      %c18_148 = arith.constant 18 : index
      %c3_149 = arith.constant 3 : index
      %201 = vector.load %arg7[%c1_147, %c18_148, %c3_149] : memref<2x24x128xf32, #tpu.memory_space<vmem>>, vector<1x1x16xf32>
      %202 = vector.shape_cast %201 : vector<1x1x16xf32> to vector<1x16xf32>
      %203 = vector.shape_cast %200 : vector<1x16xf32> to vector<1x1x16xf32>
      tpu.vector_store %arg7[%c1_147, %c18_148, %c3_149], %203 {strides = array<i32>} : memref<2x24x128xf32, #tpu.memory_space<vmem>>, vector<1x1x16xf32>,
      %cst_150 = arith.constant 0.000000e+00 : f32
      %204 = vector.broadcast %cst_150 : f32 to vector<16x16xf32>
      %c0_151 = arith.constant 0 : index
      %c0_152 = arith.constant 0 : index
      %c0_153 = arith.constant 0 : index
      %205 = vector.load %arg7[%c0_151, %c0_152, %c0_153] : memref<2x24x128xf32, #tpu.memory_space<vmem>>, vector<1x24x128xf32>
      %206 = vector.shape_cast %205 : vector<1x24x128xf32> to vector<24x128xf32>
      %207 = vector.extract_strided_slice %206 {offsets = [0, 0], sizes = [24, 16], strides = [1, 1]} : vector<24x128xf32> to vector<24x16xf32>
      %208 = vector.extract_strided_slice %206 {offsets = [0, 1], sizes = [24, 16], strides = [1, 1]} : vector<24x128xf32> to vector<24x16xf32>
      %209 = vector.extract_strided_slice %206 {offsets = [0, 2], sizes = [24, 16], strides = [1, 1]} : vector<24x128xf32> to vector<24x16xf32>
      %210 = vector.extract_strided_slice %206 {offsets = [0, 3], sizes = [24, 16], strides = [1, 1]} : vector<24x128xf32> to vector<24x16xf32>
      %211 = vector.extract_strided_slice %206 {offsets = [0, 4], sizes = [24, 16], strides = [1, 1]} : vector<24x128xf32> to vector<24x16xf32>
      %212 = vector.extract_strided_slice %206 {offsets = [0, 5], sizes = [24, 16], strides = [1, 1]} : vector<24x128xf32> to vector<24x16xf32>
      %213 = vector.extract_strided_slice %206 {offsets = [0, 6], sizes = [24, 16], strides = [1, 1]} : vector<24x128xf32> to vector<24x16xf32>
      %c0_154 = arith.constant 0 : index
      %214 = memref.load %arg2[%c0_154] : memref<98xf32, #tpu.memory_space<smem>>
      %215 = vector.broadcast %214 : f32 to vector<24x16xf32>
      %216 = arith.mulf %215, %207 : vector<24x16xf32>
      %c1_155 = arith.constant 1 : index
      %217 = memref.load %arg2[%c1_155] : memref<98xf32, #tpu.memory_space<smem>>
      %218 = vector.broadcast %217 : f32 to vector<24x16xf32>
      %219 = arith.mulf %218, %208 : vector<24x16xf32>
      %220 = arith.addf %216, %219 : vector<24x16xf32>
      %c2 = arith.constant 2 : index
      %221 = memref.load %arg2[%c2] : memref<98xf32, #tpu.memory_space<smem>>
      %222 = vector.broadcast %221 : f32 to vector<24x16xf32>
      %223 = arith.mulf %222, %209 : vector<24x16xf32>
      %224 = arith.addf %220, %223 : vector<24x16xf32>
      %c3_156 = arith.constant 3 : index
      %225 = memref.load %arg2[%c3_156] : memref<98xf32, #tpu.memory_space<smem>>
      %226 = vector.broadcast %225 : f32 to vector<24x16xf32>
      %227 = arith.mulf %226, %210 : vector<24x16xf32>
      %228 = arith.addf %224, %227 : vector<24x16xf32>
      %c4_157 = arith.constant 4 : index
      %229 = memref.load %arg2[%c4_157] : memref<98xf32, #tpu.memory_space<smem>>
      %230 = vector.broadcast %229 : f32 to vector<24x16xf32>
      %231 = arith.mulf %230, %211 : vector<24x16xf32>
      %232 = arith.addf %228, %231 : vector<24x16xf32>
      %c5_158 = arith.constant 5 : index
      %233 = memref.load %arg2[%c5_158] : memref<98xf32, #tpu.memory_space<smem>>
      %234 = vector.broadcast %233 : f32 to vector<24x16xf32>
      %235 = arith.mulf %234, %212 : vector<24x16xf32>
      %236 = arith.addf %232, %235 : vector<24x16xf32>
      %c6_159 = arith.constant 6 : index
      %237 = memref.load %arg2[%c6_159] : memref<98xf32, #tpu.memory_space<smem>>
      %238 = vector.broadcast %237 : f32 to vector<24x16xf32>
      %239 = arith.mulf %238, %213 : vector<24x16xf32>
      %240 = arith.addf %236, %239 : vector<24x16xf32>
      %241 = vector.extract_strided_slice %240 {offsets = [0, 0], sizes = [16, 16], strides = [1, 1]} : vector<24x16xf32> to vector<16x16xf32>
      %242 = arith.addf %204, %241 : vector<16x16xf32>
      %c7_160 = arith.constant 7 : index
      %243 = memref.load %arg2[%c7_160] : memref<98xf32, #tpu.memory_space<smem>>
      %244 = vector.broadcast %243 : f32 to vector<24x16xf32>
      %245 = arith.mulf %244, %207 : vector<24x16xf32>
      %c8_161 = arith.constant 8 : index
      %246 = memref.load %arg2[%c8_161] : memref<98xf32, #tpu.memory_space<smem>>
      %247 = vector.broadcast %246 : f32 to vector<24x16xf32>
      %248 = arith.mulf %247, %208 : vector<24x16xf32>
      %249 = arith.addf %245, %248 : vector<24x16xf32>
      %c9_162 = arith.constant 9 : index
      %250 = memref.load %arg2[%c9_162] : memref<98xf32, #tpu.memory_space<smem>>
      %251 = vector.broadcast %250 : f32 to vector<24x16xf32>
      %252 = arith.mulf %251, %209 : vector<24x16xf32>
      %253 = arith.addf %249, %252 : vector<24x16xf32>
      %c10_163 = arith.constant 10 : index
      %254 = memref.load %arg2[%c10_163] : memref<98xf32, #tpu.memory_space<smem>>
      %255 = vector.broadcast %254 : f32 to vector<24x16xf32>
      %256 = arith.mulf %255, %210 : vector<24x16xf32>
      %257 = arith.addf %253, %256 : vector<24x16xf32>
      %c11_164 = arith.constant 11 : index
      %258 = memref.load %arg2[%c11_164] : memref<98xf32, #tpu.memory_space<smem>>
      %259 = vector.broadcast %258 : f32 to vector<24x16xf32>
      %260 = arith.mulf %259, %211 : vector<24x16xf32>
      %261 = arith.addf %257, %260 : vector<24x16xf32>
      %c12_165 = arith.constant 12 : index
      %262 = memref.load %arg2[%c12_165] : memref<98xf32, #tpu.memory_space<smem>>
      %263 = vector.broadcast %262 : f32 to vector<24x16xf32>
      %264 = arith.mulf %263, %212 : vector<24x16xf32>
      %265 = arith.addf %261, %264 : vector<24x16xf32>
      %c13_166 = arith.constant 13 : index
      %266 = memref.load %arg2[%c13_166] : memref<98xf32, #tpu.memory_space<smem>>
      %267 = vector.broadcast %266 : f32 to vector<24x16xf32>
      %268 = arith.mulf %267, %213 : vector<24x16xf32>
      %269 = arith.addf %265, %268 : vector<24x16xf32>
      %270 = vector.extract_strided_slice %269 {offsets = [1, 0], sizes = [16, 16], strides = [1, 1]} : vector<24x16xf32> to vector<16x16xf32>
      %271 = arith.addf %242, %270 : vector<16x16xf32>
      %c14_167 = arith.constant 14 : index
      %272 = memref.load %arg2[%c14_167] : memref<98xf32, #tpu.memory_space<smem>>
      %273 = vector.broadcast %272 : f32 to vector<24x16xf32>
      %274 = arith.mulf %273, %207 : vector<24x16xf32>
      %c15_168 = arith.constant 15 : index
      %275 = memref.load %arg2[%c15_168] : memref<98xf32, #tpu.memory_space<smem>>
      %276 = vector.broadcast %275 : f32 to vector<24x16xf32>
      %277 = arith.mulf %276, %208 : vector<24x16xf32>
      %278 = arith.addf %274, %277 : vector<24x16xf32>
      %c16_169 = arith.constant 16 : index
      %279 = memref.load %arg2[%c16_169] : memref<98xf32, #tpu.memory_space<smem>>
      %280 = vector.broadcast %279 : f32 to vector<24x16xf32>
      %281 = arith.mulf %280, %209 : vector<24x16xf32>
      %282 = arith.addf %278, %281 : vector<24x16xf32>
      %c17_170 = arith.constant 17 : index
      %283 = memref.load %arg2[%c17_170] : memref<98xf32, #tpu.memory_space<smem>>
      %284 = vector.broadcast %283 : f32 to vector<24x16xf32>
      %285 = arith.mulf %284, %210 : vector<24x16xf32>
      %286 = arith.addf %282, %285 : vector<24x16xf32>
      %c18_171 = arith.constant 18 : index
      %287 = memref.load %arg2[%c18_171] : memref<98xf32, #tpu.memory_space<smem>>
      %288 = vector.broadcast %287 : f32 to vector<24x16xf32>
      %289 = arith.mulf %288, %211 : vector<24x16xf32>
      %290 = arith.addf %286, %289 : vector<24x16xf32>
      %c19_172 = arith.constant 19 : index
      %291 = memref.load %arg2[%c19_172] : memref<98xf32, #tpu.memory_space<smem>>
      %292 = vector.broadcast %291 : f32 to vector<24x16xf32>
      %293 = arith.mulf %292, %212 : vector<24x16xf32>
      %294 = arith.addf %290, %293 : vector<24x16xf32>
      %c20 = arith.constant 20 : index
      %295 = memref.load %arg2[%c20] : memref<98xf32, #tpu.memory_space<smem>>
      %296 = vector.broadcast %295 : f32 to vector<24x16xf32>
      %297 = arith.mulf %296, %213 : vector<24x16xf32>
      %298 = arith.addf %294, %297 : vector<24x16xf32>
      %299 = vector.extract_strided_slice %298 {offsets = [2, 0], sizes = [16, 16], strides = [1, 1]} : vector<24x16xf32> to vector<16x16xf32>
      %300 = arith.addf %271, %299 : vector<16x16xf32>
      %c21 = arith.constant 21 : index
      %301 = memref.load %arg2[%c21] : memref<98xf32, #tpu.memory_space<smem>>
      %302 = vector.broadcast %301 : f32 to vector<24x16xf32>
      %303 = arith.mulf %302, %207 : vector<24x16xf32>
      %c22 = arith.constant 22 : index
      %304 = memref.load %arg2[%c22] : memref<98xf32, #tpu.memory_space<smem>>
      %305 = vector.broadcast %304 : f32 to vector<24x16xf32>
      %306 = arith.mulf %305, %208 : vector<24x16xf32>
      %307 = arith.addf %303, %306 : vector<24x16xf32>
      %c23 = arith.constant 23 : index
      %308 = memref.load %arg2[%c23] : memref<98xf32, #tpu.memory_space<smem>>
      %309 = vector.broadcast %308 : f32 to vector<24x16xf32>
      %310 = arith.mulf %309, %209 : vector<24x16xf32>
      %311 = arith.addf %307, %310 : vector<24x16xf32>
      %c24 = arith.constant 24 : index
      %312 = memref.load %arg2[%c24] : memref<98xf32, #tpu.memory_space<smem>>
      %313 = vector.broadcast %312 : f32 to vector<24x16xf32>
      %314 = arith.mulf %313, %210 : vector<24x16xf32>
      %315 = arith.addf %311, %314 : vector<24x16xf32>
      %c25 = arith.constant 25 : index
      %316 = memref.load %arg2[%c25] : memref<98xf32, #tpu.memory_space<smem>>
      %317 = vector.broadcast %316 : f32 to vector<24x16xf32>
      %318 = arith.mulf %317, %211 : vector<24x16xf32>
      %319 = arith.addf %315, %318 : vector<24x16xf32>
      %c26 = arith.constant 26 : index
      %320 = memref.load %arg2[%c26] : memref<98xf32, #tpu.memory_space<smem>>
      %321 = vector.broadcast %320 : f32 to vector<24x16xf32>
      %322 = arith.mulf %321, %212 : vector<24x16xf32>
      %323 = arith.addf %319, %322 : vector<24x16xf32>
      %c27 = arith.constant 27 : index
      %324 = memref.load %arg2[%c27] : memref<98xf32, #tpu.memory_space<smem>>
      %325 = vector.broadcast %324 : f32 to vector<24x16xf32>
      %326 = arith.mulf %325, %213 : vector<24x16xf32>
      %327 = arith.addf %323, %326 : vector<24x16xf32>
      %328 = vector.extract_strided_slice %327 {offsets = [3, 0], sizes = [16, 16], strides = [1, 1]} : vector<24x16xf32> to vector<16x16xf32>
      %329 = arith.addf %300, %328 : vector<16x16xf32>
      %c28 = arith.constant 28 : index
      %330 = memref.load %arg2[%c28] : memref<98xf32, #tpu.memory_space<smem>>
      %331 = vector.broadcast %330 : f32 to vector<24x16xf32>
      %332 = arith.mulf %331, %207 : vector<24x16xf32>
      %c29 = arith.constant 29 : index
      %333 = memref.load %arg2[%c29] : memref<98xf32, #tpu.memory_space<smem>>
      %334 = vector.broadcast %333 : f32 to vector<24x16xf32>
      %335 = arith.mulf %334, %208 : vector<24x16xf32>
      %336 = arith.addf %332, %335 : vector<24x16xf32>
      %c30 = arith.constant 30 : index
      %337 = memref.load %arg2[%c30] : memref<98xf32, #tpu.memory_space<smem>>
      %338 = vector.broadcast %337 : f32 to vector<24x16xf32>
      %339 = arith.mulf %338, %209 : vector<24x16xf32>
      %340 = arith.addf %336, %339 : vector<24x16xf32>
      %c31 = arith.constant 31 : index
      %341 = memref.load %arg2[%c31] : memref<98xf32, #tpu.memory_space<smem>>
      %342 = vector.broadcast %341 : f32 to vector<24x16xf32>
      %343 = arith.mulf %342, %210 : vector<24x16xf32>
      %344 = arith.addf %340, %343 : vector<24x16xf32>
      %c32 = arith.constant 32 : index
      %345 = memref.load %arg2[%c32] : memref<98xf32, #tpu.memory_space<smem>>
      %346 = vector.broadcast %345 : f32 to vector<24x16xf32>
      %347 = arith.mulf %346, %211 : vector<24x16xf32>
      %348 = arith.addf %344, %347 : vector<24x16xf32>
      %c33 = arith.constant 33 : index
      %349 = memref.load %arg2[%c33] : memref<98xf32, #tpu.memory_space<smem>>
      %350 = vector.broadcast %349 : f32 to vector<24x16xf32>
      %351 = arith.mulf %350, %212 : vector<24x16xf32>
      %352 = arith.addf %348, %351 : vector<24x16xf32>
      %c34 = arith.constant 34 : index
      %353 = memref.load %arg2[%c34] : memref<98xf32, #tpu.memory_space<smem>>
      %354 = vector.broadcast %353 : f32 to vector<24x16xf32>
      %355 = arith.mulf %354, %213 : vector<24x16xf32>
      %356 = arith.addf %352, %355 : vector<24x16xf32>
      %357 = vector.extract_strided_slice %356 {offsets = [4, 0], sizes = [16, 16], strides = [1, 1]} : vector<24x16xf32> to vector<16x16xf32>
      %358 = arith.addf %329, %357 : vector<16x16xf32>
      %c35 = arith.constant 35 : index
      %359 = memref.load %arg2[%c35] : memref<98xf32, #tpu.memory_space<smem>>
      %360 = vector.broadcast %359 : f32 to vector<24x16xf32>
      %361 = arith.mulf %360, %207 : vector<24x16xf32>
      %c36 = arith.constant 36 : index
      %362 = memref.load %arg2[%c36] : memref<98xf32, #tpu.memory_space<smem>>
      %363 = vector.broadcast %362 : f32 to vector<24x16xf32>
      %364 = arith.mulf %363, %208 : vector<24x16xf32>
      %365 = arith.addf %361, %364 : vector<24x16xf32>
      %c37 = arith.constant 37 : index
      %366 = memref.load %arg2[%c37] : memref<98xf32, #tpu.memory_space<smem>>
      %367 = vector.broadcast %366 : f32 to vector<24x16xf32>
      %368 = arith.mulf %367, %209 : vector<24x16xf32>
      %369 = arith.addf %365, %368 : vector<24x16xf32>
      %c38 = arith.constant 38 : index
      %370 = memref.load %arg2[%c38] : memref<98xf32, #tpu.memory_space<smem>>
      %371 = vector.broadcast %370 : f32 to vector<24x16xf32>
      %372 = arith.mulf %371, %210 : vector<24x16xf32>
      %373 = arith.addf %369, %372 : vector<24x16xf32>
      %c39 = arith.constant 39 : index
      %374 = memref.load %arg2[%c39] : memref<98xf32, #tpu.memory_space<smem>>
      %375 = vector.broadcast %374 : f32 to vector<24x16xf32>
      %376 = arith.mulf %375, %211 : vector<24x16xf32>
      %377 = arith.addf %373, %376 : vector<24x16xf32>
      %c40 = arith.constant 40 : index
      %378 = memref.load %arg2[%c40] : memref<98xf32, #tpu.memory_space<smem>>
      %379 = vector.broadcast %378 : f32 to vector<24x16xf32>
      %380 = arith.mulf %379, %212 : vector<24x16xf32>
      %381 = arith.addf %377, %380 : vector<24x16xf32>
      %c41 = arith.constant 41 : index
      %382 = memref.load %arg2[%c41] : memref<98xf32, #tpu.memory_space<smem>>
      %383 = vector.broadcast %382 : f32 to vector<24x16xf32>
      %384 = arith.mulf %383, %213 : vector<24x16xf32>
      %385 = arith.addf %381, %384 : vector<24x16xf32>
      %386 = vector.extract_strided_slice %385 {offsets = [5, 0], sizes = [16, 16], strides = [1, 1]} : vector<24x16xf32> to vector<16x16xf32>
      %387 = arith.addf %358, %386 : vector<16x16xf32>
      %c42 = arith.constant 42 : index
      %388 = memref.load %arg2[%c42] : memref<98xf32, #tpu.memory_space<smem>>
      %389 = vector.broadcast %388 : f32 to vector<24x16xf32>
      %390 = arith.mulf %389, %207 : vector<24x16xf32>
      %c43 = arith.constant 43 : index
      %391 = memref.load %arg2[%c43] : memref<98xf32, #tpu.memory_space<smem>>
      %392 = vector.broadcast %391 : f32 to vector<24x16xf32>
      %393 = arith.mulf %392, %208 : vector<24x16xf32>
      %394 = arith.addf %390, %393 : vector<24x16xf32>
      %c44 = arith.constant 44 : index
      %395 = memref.load %arg2[%c44] : memref<98xf32, #tpu.memory_space<smem>>
      %396 = vector.broadcast %395 : f32 to vector<24x16xf32>
      %397 = arith.mulf %396, %209 : vector<24x16xf32>
      %398 = arith.addf %394, %397 : vector<24x16xf32>
      %c45 = arith.constant 45 : index
      %399 = memref.load %arg2[%c45] : memref<98xf32, #tpu.memory_space<smem>>
      %400 = vector.broadcast %399 : f32 to vector<24x16xf32>
      %401 = arith.mulf %400, %210 : vector<24x16xf32>
      %402 = arith.addf %398, %401 : vector<24x16xf32>
      %c46 = arith.constant 46 : index
      %403 = memref.load %arg2[%c46] : memref<98xf32, #tpu.memory_space<smem>>
      %404 = vector.broadcast %403 : f32 to vector<24x16xf32>
      %405 = arith.mulf %404, %211 : vector<24x16xf32>
      %406 = arith.addf %402, %405 : vector<24x16xf32>
      %c47 = arith.constant 47 : index
      %407 = memref.load %arg2[%c47] : memref<98xf32, #tpu.memory_space<smem>>
      %408 = vector.broadcast %407 : f32 to vector<24x16xf32>
      %409 = arith.mulf %408, %212 : vector<24x16xf32>
      %410 = arith.addf %406, %409 : vector<24x16xf32>
      %c48 = arith.constant 48 : index
      %411 = memref.load %arg2[%c48] : memref<98xf32, #tpu.memory_space<smem>>
      %412 = vector.broadcast %411 : f32 to vector<24x16xf32>
      %413 = arith.mulf %412, %213 : vector<24x16xf32>
      %414 = arith.addf %410, %413 : vector<24x16xf32>
      %415 = vector.extract_strided_slice %414 {offsets = [6, 0], sizes = [16, 16], strides = [1, 1]} : vector<24x16xf32> to vector<16x16xf32>
      %416 = arith.addf %387, %415 : vector<16x16xf32>
      %c1_173 = arith.constant 1 : index
      %c0_174 = arith.constant 0 : index
      %c0_175 = arith.constant 0 : index
      %417 = vector.load %arg7[%c1_173, %c0_174, %c0_175] : memref<2x24x128xf32, #tpu.memory_space<vmem>>, vector<1x24x128xf32>
      %418 = vector.shape_cast %417 : vector<1x24x128xf32> to vector<24x128xf32>
      %419 = vector.extract_strided_slice %418 {offsets = [0, 0], sizes = [24, 16], strides = [1, 1]} : vector<24x128xf32> to vector<24x16xf32>
      %420 = vector.extract_strided_slice %418 {offsets = [0, 1], sizes = [24, 16], strides = [1, 1]} : vector<24x128xf32> to vector<24x16xf32>
      %421 = vector.extract_strided_slice %418 {offsets = [0, 2], sizes = [24, 16], strides = [1, 1]} : vector<24x128xf32> to vector<24x16xf32>
      %422 = vector.extract_strided_slice %418 {offsets = [0, 3], sizes = [24, 16], strides = [1, 1]} : vector<24x128xf32> to vector<24x16xf32>
      %423 = vector.extract_strided_slice %418 {offsets = [0, 4], sizes = [24, 16], strides = [1, 1]} : vector<24x128xf32> to vector<24x16xf32>
      %424 = vector.extract_strided_slice %418 {offsets = [0, 5], sizes = [24, 16], strides = [1, 1]} : vector<24x128xf32> to vector<24x16xf32>
      %425 = vector.extract_strided_slice %418 {offsets = [0, 6], sizes = [24, 16], strides = [1, 1]} : vector<24x128xf32> to vector<24x16xf32>
      %c49 = arith.constant 49 : index
      %426 = memref.load %arg2[%c49] : memref<98xf32, #tpu.memory_space<smem>>
      %427 = vector.broadcast %426 : f32 to vector<24x16xf32>
      %428 = arith.mulf %427, %419 : vector<24x16xf32>
      %c50 = arith.constant 50 : index
      %429 = memref.load %arg2[%c50] : memref<98xf32, #tpu.memory_space<smem>>
      %430 = vector.broadcast %429 : f32 to vector<24x16xf32>
      %431 = arith.mulf %430, %420 : vector<24x16xf32>
      %432 = arith.addf %428, %431 : vector<24x16xf32>
      %c51 = arith.constant 51 : index
      %433 = memref.load %arg2[%c51] : memref<98xf32, #tpu.memory_space<smem>>
      %434 = vector.broadcast %433 : f32 to vector<24x16xf32>
      %435 = arith.mulf %434, %421 : vector<24x16xf32>
      %436 = arith.addf %432, %435 : vector<24x16xf32>
      %c52 = arith.constant 52 : index
      %437 = memref.load %arg2[%c52] : memref<98xf32, #tpu.memory_space<smem>>
      %438 = vector.broadcast %437 : f32 to vector<24x16xf32>
      %439 = arith.mulf %438, %422 : vector<24x16xf32>
      %440 = arith.addf %436, %439 : vector<24x16xf32>
      %c53 = arith.constant 53 : index
      %441 = memref.load %arg2[%c53] : memref<98xf32, #tpu.memory_space<smem>>
      %442 = vector.broadcast %441 : f32 to vector<24x16xf32>
      %443 = arith.mulf %442, %423 : vector<24x16xf32>
      %444 = arith.addf %440, %443 : vector<24x16xf32>
      %c54 = arith.constant 54 : index
      %445 = memref.load %arg2[%c54] : memref<98xf32, #tpu.memory_space<smem>>
      %446 = vector.broadcast %445 : f32 to vector<24x16xf32>
      %447 = arith.mulf %446, %424 : vector<24x16xf32>
      %448 = arith.addf %444, %447 : vector<24x16xf32>
      %c55 = arith.constant 55 : index
      %449 = memref.load %arg2[%c55] : memref<98xf32, #tpu.memory_space<smem>>
      %450 = vector.broadcast %449 : f32 to vector<24x16xf32>
      %451 = arith.mulf %450, %425 : vector<24x16xf32>
      %452 = arith.addf %448, %451 : vector<24x16xf32>
      %453 = vector.extract_strided_slice %452 {offsets = [0, 0], sizes = [16, 16], strides = [1, 1]} : vector<24x16xf32> to vector<16x16xf32>
      %454 = arith.addf %416, %453 : vector<16x16xf32>
      %c56 = arith.constant 56 : index
      %455 = memref.load %arg2[%c56] : memref<98xf32, #tpu.memory_space<smem>>
      %456 = vector.broadcast %455 : f32 to vector<24x16xf32>
      %457 = arith.mulf %456, %419 : vector<24x16xf32>
      %c57 = arith.constant 57 : index
      %458 = memref.load %arg2[%c57] : memref<98xf32, #tpu.memory_space<smem>>
      %459 = vector.broadcast %458 : f32 to vector<24x16xf32>
      %460 = arith.mulf %459, %420 : vector<24x16xf32>
      %461 = arith.addf %457, %460 : vector<24x16xf32>
      %c58 = arith.constant 58 : index
      %462 = memref.load %arg2[%c58] : memref<98xf32, #tpu.memory_space<smem>>
      %463 = vector.broadcast %462 : f32 to vector<24x16xf32>
      %464 = arith.mulf %463, %421 : vector<24x16xf32>
      %465 = arith.addf %461, %464 : vector<24x16xf32>
      %c59 = arith.constant 59 : index
      %466 = memref.load %arg2[%c59] : memref<98xf32, #tpu.memory_space<smem>>
      %467 = vector.broadcast %466 : f32 to vector<24x16xf32>
      %468 = arith.mulf %467, %422 : vector<24x16xf32>
      %469 = arith.addf %465, %468 : vector<24x16xf32>
      %c60 = arith.constant 60 : index
      %470 = memref.load %arg2[%c60] : memref<98xf32, #tpu.memory_space<smem>>
      %471 = vector.broadcast %470 : f32 to vector<24x16xf32>
      %472 = arith.mulf %471, %423 : vector<24x16xf32>
      %473 = arith.addf %469, %472 : vector<24x16xf32>
      %c61 = arith.constant 61 : index
      %474 = memref.load %arg2[%c61] : memref<98xf32, #tpu.memory_space<smem>>
      %475 = vector.broadcast %474 : f32 to vector<24x16xf32>
      %476 = arith.mulf %475, %424 : vector<24x16xf32>
      %477 = arith.addf %473, %476 : vector<24x16xf32>
      %c62 = arith.constant 62 : index
      %478 = memref.load %arg2[%c62] : memref<98xf32, #tpu.memory_space<smem>>
      %479 = vector.broadcast %478 : f32 to vector<24x16xf32>
      %480 = arith.mulf %479, %425 : vector<24x16xf32>
      %481 = arith.addf %477, %480 : vector<24x16xf32>
      %482 = vector.extract_strided_slice %481 {offsets = [1, 0], sizes = [16, 16], strides = [1, 1]} : vector<24x16xf32> to vector<16x16xf32>
      %483 = arith.addf %454, %482 : vector<16x16xf32>
      %c63 = arith.constant 63 : index
      %484 = memref.load %arg2[%c63] : memref<98xf32, #tpu.memory_space<smem>>
      %485 = vector.broadcast %484 : f32 to vector<24x16xf32>
      %486 = arith.mulf %485, %419 : vector<24x16xf32>
      %c64 = arith.constant 64 : index
      %487 = memref.load %arg2[%c64] : memref<98xf32, #tpu.memory_space<smem>>
      %488 = vector.broadcast %487 : f32 to vector<24x16xf32>
      %489 = arith.mulf %488, %420 : vector<24x16xf32>
      %490 = arith.addf %486, %489 : vector<24x16xf32>
      %c65 = arith.constant 65 : index
      %491 = memref.load %arg2[%c65] : memref<98xf32, #tpu.memory_space<smem>>
      %492 = vector.broadcast %491 : f32 to vector<24x16xf32>
      %493 = arith.mulf %492, %421 : vector<24x16xf32>
      %494 = arith.addf %490, %493 : vector<24x16xf32>
      %c66 = arith.constant 66 : index
      %495 = memref.load %arg2[%c66] : memref<98xf32, #tpu.memory_space<smem>>
      %496 = vector.broadcast %495 : f32 to vector<24x16xf32>
      %497 = arith.mulf %496, %422 : vector<24x16xf32>
      %498 = arith.addf %494, %497 : vector<24x16xf32>
      %c67 = arith.constant 67 : index
      %499 = memref.load %arg2[%c67] : memref<98xf32, #tpu.memory_space<smem>>
      %500 = vector.broadcast %499 : f32 to vector<24x16xf32>
      %501 = arith.mulf %500, %423 : vector<24x16xf32>
      %502 = arith.addf %498, %501 : vector<24x16xf32>
      %c68 = arith.constant 68 : index
      %503 = memref.load %arg2[%c68] : memref<98xf32, #tpu.memory_space<smem>>
      %504 = vector.broadcast %503 : f32 to vector<24x16xf32>
      %505 = arith.mulf %504, %424 : vector<24x16xf32>
      %506 = arith.addf %502, %505 : vector<24x16xf32>
      %c69 = arith.constant 69 : index
      %507 = memref.load %arg2[%c69] : memref<98xf32, #tpu.memory_space<smem>>
      %508 = vector.broadcast %507 : f32 to vector<24x16xf32>
      %509 = arith.mulf %508, %425 : vector<24x16xf32>
      %510 = arith.addf %506, %509 : vector<24x16xf32>
      %511 = vector.extract_strided_slice %510 {offsets = [2, 0], sizes = [16, 16], strides = [1, 1]} : vector<24x16xf32> to vector<16x16xf32>
      %512 = arith.addf %483, %511 : vector<16x16xf32>
      %c70 = arith.constant 70 : index
      %513 = memref.load %arg2[%c70] : memref<98xf32, #tpu.memory_space<smem>>
      %514 = vector.broadcast %513 : f32 to vector<24x16xf32>
      %515 = arith.mulf %514, %419 : vector<24x16xf32>
      %c71 = arith.constant 71 : index
      %516 = memref.load %arg2[%c71] : memref<98xf32, #tpu.memory_space<smem>>
      %517 = vector.broadcast %516 : f32 to vector<24x16xf32>
      %518 = arith.mulf %517, %420 : vector<24x16xf32>
      %519 = arith.addf %515, %518 : vector<24x16xf32>
      %c72 = arith.constant 72 : index
      %520 = memref.load %arg2[%c72] : memref<98xf32, #tpu.memory_space<smem>>
      %521 = vector.broadcast %520 : f32 to vector<24x16xf32>
      %522 = arith.mulf %521, %421 : vector<24x16xf32>
      %523 = arith.addf %519, %522 : vector<24x16xf32>
      %c73 = arith.constant 73 : index
      %524 = memref.load %arg2[%c73] : memref<98xf32, #tpu.memory_space<smem>>
      %525 = vector.broadcast %524 : f32 to vector<24x16xf32>
      %526 = arith.mulf %525, %422 : vector<24x16xf32>
      %527 = arith.addf %523, %526 : vector<24x16xf32>
      %c74 = arith.constant 74 : index
      %528 = memref.load %arg2[%c74] : memref<98xf32, #tpu.memory_space<smem>>
      %529 = vector.broadcast %528 : f32 to vector<24x16xf32>
      %530 = arith.mulf %529, %423 : vector<24x16xf32>
      %531 = arith.addf %527, %530 : vector<24x16xf32>
      %c75 = arith.constant 75 : index
      %532 = memref.load %arg2[%c75] : memref<98xf32, #tpu.memory_space<smem>>
      %533 = vector.broadcast %532 : f32 to vector<24x16xf32>
      %534 = arith.mulf %533, %424 : vector<24x16xf32>
      %535 = arith.addf %531, %534 : vector<24x16xf32>
      %c76 = arith.constant 76 : index
      %536 = memref.load %arg2[%c76] : memref<98xf32, #tpu.memory_space<smem>>
      %537 = vector.broadcast %536 : f32 to vector<24x16xf32>
      %538 = arith.mulf %537, %425 : vector<24x16xf32>
      %539 = arith.addf %535, %538 : vector<24x16xf32>
      %540 = vector.extract_strided_slice %539 {offsets = [3, 0], sizes = [16, 16], strides = [1, 1]} : vector<24x16xf32> to vector<16x16xf32>
      %541 = arith.addf %512, %540 : vector<16x16xf32>
      %c77 = arith.constant 77 : index
      %542 = memref.load %arg2[%c77] : memref<98xf32, #tpu.memory_space<smem>>
      %543 = vector.broadcast %542 : f32 to vector<24x16xf32>
      %544 = arith.mulf %543, %419 : vector<24x16xf32>
      %c78 = arith.constant 78 : index
      %545 = memref.load %arg2[%c78] : memref<98xf32, #tpu.memory_space<smem>>
      %546 = vector.broadcast %545 : f32 to vector<24x16xf32>
      %547 = arith.mulf %546, %420 : vector<24x16xf32>
      %548 = arith.addf %544, %547 : vector<24x16xf32>
      %c79 = arith.constant 79 : index
      %549 = memref.load %arg2[%c79] : memref<98xf32, #tpu.memory_space<smem>>
      %550 = vector.broadcast %549 : f32 to vector<24x16xf32>
      %551 = arith.mulf %550, %421 : vector<24x16xf32>
      %552 = arith.addf %548, %551 : vector<24x16xf32>
      %c80 = arith.constant 80 : index
      %553 = memref.load %arg2[%c80] : memref<98xf32, #tpu.memory_space<smem>>
      %554 = vector.broadcast %553 : f32 to vector<24x16xf32>
      %555 = arith.mulf %554, %422 : vector<24x16xf32>
      %556 = arith.addf %552, %555 : vector<24x16xf32>
      %c81 = arith.constant 81 : index
      %557 = memref.load %arg2[%c81] : memref<98xf32, #tpu.memory_space<smem>>
      %558 = vector.broadcast %557 : f32 to vector<24x16xf32>
      %559 = arith.mulf %558, %423 : vector<24x16xf32>
      %560 = arith.addf %556, %559 : vector<24x16xf32>
      %c82 = arith.constant 82 : index
      %561 = memref.load %arg2[%c82] : memref<98xf32, #tpu.memory_space<smem>>
      %562 = vector.broadcast %561 : f32 to vector<24x16xf32>
      %563 = arith.mulf %562, %424 : vector<24x16xf32>
      %564 = arith.addf %560, %563 : vector<24x16xf32>
      %c83 = arith.constant 83 : index
      %565 = memref.load %arg2[%c83] : memref<98xf32, #tpu.memory_space<smem>>
      %566 = vector.broadcast %565 : f32 to vector<24x16xf32>
      %567 = arith.mulf %566, %425 : vector<24x16xf32>
      %568 = arith.addf %564, %567 : vector<24x16xf32>
      %569 = vector.extract_strided_slice %568 {offsets = [4, 0], sizes = [16, 16], strides = [1, 1]} : vector<24x16xf32> to vector<16x16xf32>
      %570 = arith.addf %541, %569 : vector<16x16xf32>
      %c84 = arith.constant 84 : index
      %571 = memref.load %arg2[%c84] : memref<98xf32, #tpu.memory_space<smem>>
      %572 = vector.broadcast %571 : f32 to vector<24x16xf32>
      %573 = arith.mulf %572, %419 : vector<24x16xf32>
      %c85 = arith.constant 85 : index
      %574 = memref.load %arg2[%c85] : memref<98xf32, #tpu.memory_space<smem>>
      %575 = vector.broadcast %574 : f32 to vector<24x16xf32>
      %576 = arith.mulf %575, %420 : vector<24x16xf32>
      %577 = arith.addf %573, %576 : vector<24x16xf32>
      %c86 = arith.constant 86 : index
      %578 = memref.load %arg2[%c86] : memref<98xf32, #tpu.memory_space<smem>>
      %579 = vector.broadcast %578 : f32 to vector<24x16xf32>
      %580 = arith.mulf %579, %421 : vector<24x16xf32>
      %581 = arith.addf %577, %580 : vector<24x16xf32>
      %c87 = arith.constant 87 : index
      %582 = memref.load %arg2[%c87] : memref<98xf32, #tpu.memory_space<smem>>
      %583 = vector.broadcast %582 : f32 to vector<24x16xf32>
      %584 = arith.mulf %583, %422 : vector<24x16xf32>
      %585 = arith.addf %581, %584 : vector<24x16xf32>
      %c88 = arith.constant 88 : index
      %586 = memref.load %arg2[%c88] : memref<98xf32, #tpu.memory_space<smem>>
      %587 = vector.broadcast %586 : f32 to vector<24x16xf32>
      %588 = arith.mulf %587, %423 : vector<24x16xf32>
      %589 = arith.addf %585, %588 : vector<24x16xf32>
      %c89 = arith.constant 89 : index
      %590 = memref.load %arg2[%c89] : memref<98xf32, #tpu.memory_space<smem>>
      %591 = vector.broadcast %590 : f32 to vector<24x16xf32>
      %592 = arith.mulf %591, %424 : vector<24x16xf32>
      %593 = arith.addf %589, %592 : vector<24x16xf32>
      %c90 = arith.constant 90 : index
      %594 = memref.load %arg2[%c90] : memref<98xf32, #tpu.memory_space<smem>>
      %595 = vector.broadcast %594 : f32 to vector<24x16xf32>
      %596 = arith.mulf %595, %425 : vector<24x16xf32>
      %597 = arith.addf %593, %596 : vector<24x16xf32>
      %598 = vector.extract_strided_slice %597 {offsets = [5, 0], sizes = [16, 16], strides = [1, 1]} : vector<24x16xf32> to vector<16x16xf32>
      %599 = arith.addf %570, %598 : vector<16x16xf32>
      %c91 = arith.constant 91 : index
      %600 = memref.load %arg2[%c91] : memref<98xf32, #tpu.memory_space<smem>>
      %601 = vector.broadcast %600 : f32 to vector<24x16xf32>
      %602 = arith.mulf %601, %419 : vector<24x16xf32>
      %c92 = arith.constant 92 : index
      %603 = memref.load %arg2[%c92] : memref<98xf32, #tpu.memory_space<smem>>
      %604 = vector.broadcast %603 : f32 to vector<24x16xf32>
      %605 = arith.mulf %604, %420 : vector<24x16xf32>
      %606 = arith.addf %602, %605 : vector<24x16xf32>
      %c93 = arith.constant 93 : index
      %607 = memref.load %arg2[%c93] : memref<98xf32, #tpu.memory_space<smem>>
      %608 = vector.broadcast %607 : f32 to vector<24x16xf32>
      %609 = arith.mulf %608, %421 : vector<24x16xf32>
      %610 = arith.addf %606, %609 : vector<24x16xf32>
      %c94 = arith.constant 94 : index
      %611 = memref.load %arg2[%c94] : memref<98xf32, #tpu.memory_space<smem>>
      %612 = vector.broadcast %611 : f32 to vector<24x16xf32>
      %613 = arith.mulf %612, %422 : vector<24x16xf32>
      %614 = arith.addf %610, %613 : vector<24x16xf32>
      %c95 = arith.constant 95 : index
      %615 = memref.load %arg2[%c95] : memref<98xf32, #tpu.memory_space<smem>>
      %616 = vector.broadcast %615 : f32 to vector<24x16xf32>
      %617 = arith.mulf %616, %423 : vector<24x16xf32>
      %618 = arith.addf %614, %617 : vector<24x16xf32>
      %c96 = arith.constant 96 : index
      %619 = memref.load %arg2[%c96] : memref<98xf32, #tpu.memory_space<smem>>
      %620 = vector.broadcast %619 : f32 to vector<24x16xf32>
      %621 = arith.mulf %620, %424 : vector<24x16xf32>
      %622 = arith.addf %618, %621 : vector<24x16xf32>
      %c97 = arith.constant 97 : index
      %623 = memref.load %arg2[%c97] : memref<98xf32, #tpu.memory_space<smem>>
      %624 = vector.broadcast %623 : f32 to vector<24x16xf32>
      %625 = arith.mulf %624, %425 : vector<24x16xf32>
      %626 = arith.addf %622, %625 : vector<24x16xf32>
      %627 = vector.extract_strided_slice %626 {offsets = [6, 0], sizes = [16, 16], strides = [1, 1]} : vector<24x16xf32> to vector<16x16xf32>
      %628 = arith.addf %599, %627 : vector<16x16xf32>
      %629 = arith.negf %628 : vector<16x16xf32>
      %630 = math.exp %629 : vector<16x16xf32>
      %cst_176 = arith.constant 1.000000e+00 : f32
      %631 = vector.broadcast %cst_176 : f32 to vector<16x16xf32>
      %632 = arith.addf %631, %630 : vector<16x16xf32>
      %633 = arith.divf %631, %632 : vector<16x16xf32>
      %c0_177 = arith.constant 0 : index
      %c0_178 = arith.constant 0 : index
      %c0_179 = arith.constant 0 : index
      %c0_180 = arith.constant 0 : index
      %634 = vector.load %arg4[%c0_177, %c0_178, %c0_179, %c0_180] : memref<2x1x16x16xf32, #tpu.memory_space<vmem>>, vector<1x1x16x16xf32>
      %635 = vector.shape_cast %634 : vector<1x1x16x16xf32> to vector<16x16xf32>
      %636 = vector.shape_cast %633 : vector<16x16xf32> to vector<1x1x16x16xf32>
      tpu.vector_store %arg4[%c0_177, %c0_178, %c0_179, %c0_180], %636 {strides = array<i32>} : memref<2x1x16x16xf32, #tpu.memory_space<vmem>>, vector<1x1x16x16xf32>,
      %c1_181 = arith.constant 1 : index
      %c0_182 = arith.constant 0 : index
      %c0_183 = arith.constant 0 : index
      %637 = vector.load %arg5[%c1_181, %c0_182, %c0_183] : memref<2x8x256xf32, #tpu.memory_space<vmem>>, vector<1x8x256xf32>
      %638 = vector.shape_cast %637 : vector<1x8x256xf32> to vector<8x256xf32>
      %cst_184 = arith.constant dense<0.000000e+00> : vector<256xf32>
      %639 = vector.multi_reduction <add>, %638, %cst_184 [0] : vector<8x256xf32> to vector<256xf32>
      %640 = vector.shape_cast %639 : vector<256xf32> to vector<1x256xf32>
      %cst_185 = arith.constant 2.500000e-01 : f32
      %641 = vector.broadcast %cst_185 : f32 to vector<1x256xf32>
      %642 = arith.mulf %640, %641 : vector<1x256xf32>
      %c1_186 = arith.constant 1 : index
      %c0_187 = arith.constant 0 : index
      %c0_188 = arith.constant 0 : index
      %643 = vector.load %arg6[%c1_186, %c0_187, %c0_188] : memref<2x8x256xf32, #tpu.memory_space<vmem>>, vector<1x8x256xf32>
      %644 = vector.shape_cast %643 : vector<1x8x256xf32> to vector<8x256xf32>
      %cst_189 = arith.constant dense<0xFF800000> : vector<256xf32>
      %645 = vector.multi_reduction <maximumf>, %644, %cst_189 [0] : vector<8x256xf32> to vector<256xf32>
      %646 = vector.shape_cast %645 : vector<256xf32> to vector<1x256xf32>
      %647 = vector.extract_strided_slice %642 {offsets = [0, 0], sizes = [1, 16], strides = [1, 1]} : vector<1x256xf32> to vector<1x16xf32>
      %c0_190 = arith.constant 0 : index
      %c3_191 = arith.constant 3 : index
      %c3_192 = arith.constant 3 : index
      %648 = vector.load %arg7[%c0_190, %c3_191, %c3_192] : memref<2x24x128xf32, #tpu.memory_space<vmem>>, vector<1x1x16xf32>
      %649 = vector.shape_cast %648 : vector<1x1x16xf32> to vector<1x16xf32>
      %650 = vector.shape_cast %647 : vector<1x16xf32> to vector<1x1x16xf32>
      tpu.vector_store %arg7[%c0_190, %c3_191, %c3_192], %650 {strides = array<i32>} : memref<2x24x128xf32, #tpu.memory_space<vmem>>, vector<1x1x16xf32>,
      %651 = vector.extract_strided_slice %646 {offsets = [0, 0], sizes = [1, 16], strides = [1, 1]} : vector<1x256xf32> to vector<1x16xf32>
      %c1_193 = arith.constant 1 : index
      %c3_194 = arith.constant 3 : index
      %c3_195 = arith.constant 3 : index
      %652 = vector.load %arg7[%c1_193, %c3_194, %c3_195] : memref<2x24x128xf32, #tpu.memory_space<vmem>>, vector<1x1x16xf32>
      %653 = vector.shape_cast %652 : vector<1x1x16xf32> to vector<1x16xf32>
      %654 = vector.shape_cast %651 : vector<1x16xf32> to vector<1x1x16xf32>
      tpu.vector_store %arg7[%c1_193, %c3_194, %c3_195], %654 {strides = array<i32>} : memref<2x24x128xf32, #tpu.memory_space<vmem>>, vector<1x1x16xf32>,
      %655 = vector.extract_strided_slice %642 {offsets = [0, 16], sizes = [1, 16], strides = [1, 1]} : vector<1x256xf32> to vector<1x16xf32>
      %c0_196 = arith.constant 0 : index
      %c4_197 = arith.constant 4 : index
      %c3_198 = arith.constant 3 : index
      %656 = vector.load %arg7[%c0_196, %c4_197, %c3_198] : memref<2x24x128xf32, #tpu.memory_space<vmem>>, vector<1x1x16xf32>
      %657 = vector.shape_cast %656 : vector<1x1x16xf32> to vector<1x16xf32>
      %658 = vector.shape_cast %655 : vector<1x16xf32> to vector<1x1x16xf32>
      tpu.vector_store %arg7[%c0_196, %c4_197, %c3_198], %658 {strides = array<i32>} : memref<2x24x128xf32, #tpu.memory_space<vmem>>, vector<1x1x16xf32>,
      %659 = vector.extract_strided_slice %646 {offsets = [0, 16], sizes = [1, 16], strides = [1, 1]} : vector<1x256xf32> to vector<1x16xf32>
      %c1_199 = arith.constant 1 : index
      %c4_200 = arith.constant 4 : index
      %c3_201 = arith.constant 3 : index
      %660 = vector.load %arg7[%c1_199, %c4_200, %c3_201] : memref<2x24x128xf32, #tpu.memory_space<vmem>>, vector<1x1x16xf32>
      %661 = vector.shape_cast %660 : vector<1x1x16xf32> to vector<1x16xf32>
      %662 = vector.shape_cast %659 : vector<1x16xf32> to vector<1x1x16xf32>
      tpu.vector_store %arg7[%c1_199, %c4_200, %c3_201], %662 {strides = array<i32>} : memref<2x24x128xf32, #tpu.memory_space<vmem>>, vector<1x1x16xf32>,
      %663 = vector.extract_strided_slice %642 {offsets = [0, 32], sizes = [1, 16], strides = [1, 1]} : vector<1x256xf32> to vector<1x16xf32>
      %c0_202 = arith.constant 0 : index
      %c5_203 = arith.constant 5 : index
      %c3_204 = arith.constant 3 : index
      %664 = vector.load %arg7[%c0_202, %c5_203, %c3_204] : memref<2x24x128xf32, #tpu.memory_space<vmem>>, vector<1x1x16xf32>
      %665 = vector.shape_cast %664 : vector<1x1x16xf32> to vector<1x16xf32>
      %666 = vector.shape_cast %663 : vector<1x16xf32> to vector<1x1x16xf32>
      tpu.vector_store %arg7[%c0_202, %c5_203, %c3_204], %666 {strides = array<i32>} : memref<2x24x128xf32, #tpu.memory_space<vmem>>, vector<1x1x16xf32>,
      %667 = vector.extract_strided_slice %646 {offsets = [0, 32], sizes = [1, 16], strides = [1, 1]} : vector<1x256xf32> to vector<1x16xf32>
      %c1_205 = arith.constant 1 : index
      %c5_206 = arith.constant 5 : index
      %c3_207 = arith.constant 3 : index
      %668 = vector.load %arg7[%c1_205, %c5_206, %c3_207] : memref<2x24x128xf32, #tpu.memory_space<vmem>>, vector<1x1x16xf32>
      %669 = vector.shape_cast %668 : vector<1x1x16xf32> to vector<1x16xf32>
      %670 = vector.shape_cast %667 : vector<1x16xf32> to vector<1x1x16xf32>
      tpu.vector_store %arg7[%c1_205, %c5_206, %c3_207], %670 {strides = array<i32>} : memref<2x24x128xf32, #tpu.memory_space<vmem>>, vector<1x1x16xf32>,
      %671 = vector.extract_strided_slice %642 {offsets = [0, 48], sizes = [1, 16], strides = [1, 1]} : vector<1x256xf32> to vector<1x16xf32>
      %c0_208 = arith.constant 0 : index
      %c6_209 = arith.constant 6 : index
      %c3_210 = arith.constant 3 : index
      %672 = vector.load %arg7[%c0_208, %c6_209, %c3_210] : memref<2x24x128xf32, #tpu.memory_space<vmem>>, vector<1x1x16xf32>
      %673 = vector.shape_cast %672 : vector<1x1x16xf32> to vector<1x16xf32>
      %674 = vector.shape_cast %671 : vector<1x16xf32> to vector<1x1x16xf32>
      tpu.vector_store %arg7[%c0_208, %c6_209, %c3_210], %674 {strides = array<i32>} : memref<2x24x128xf32, #tpu.memory_space<vmem>>, vector<1x1x16xf32>,
      %675 = vector.extract_strided_slice %646 {offsets = [0, 48], sizes = [1, 16], strides = [1, 1]} : vector<1x256xf32> to vector<1x16xf32>
      %c1_211 = arith.constant 1 : index
      %c6_212 = arith.constant 6 : index
      %c3_213 = arith.constant 3 : index
      %676 = vector.load %arg7[%c1_211, %c6_212, %c3_213] : memref<2x24x128xf32, #tpu.memory_space<vmem>>, vector<1x1x16xf32>
      %677 = vector.shape_cast %676 : vector<1x1x16xf32> to vector<1x16xf32>
      %678 = vector.shape_cast %675 : vector<1x16xf32> to vector<1x1x16xf32>
      tpu.vector_store %arg7[%c1_211, %c6_212, %c3_213], %678 {strides = array<i32>} : memref<2x24x128xf32, #tpu.memory_space<vmem>>, vector<1x1x16xf32>,
      %679 = vector.extract_strided_slice %642 {offsets = [0, 64], sizes = [1, 16], strides = [1, 1]} : vector<1x256xf32> to vector<1x16xf32>
      %c0_214 = arith.constant 0 : index
      %c7_215 = arith.constant 7 : index
      %c3_216 = arith.constant 3 : index
      %680 = vector.load %arg7[%c0_214, %c7_215, %c3_216] : memref<2x24x128xf32, #tpu.memory_space<vmem>>, vector<1x1x16xf32>
      %681 = vector.shape_cast %680 : vector<1x1x16xf32> to vector<1x16xf32>
      %682 = vector.shape_cast %679 : vector<1x16xf32> to vector<1x1x16xf32>
      tpu.vector_store %arg7[%c0_214, %c7_215, %c3_216], %682 {strides = array<i32>} : memref<2x24x128xf32, #tpu.memory_space<vmem>>, vector<1x1x16xf32>,
      %683 = vector.extract_strided_slice %646 {offsets = [0, 64], sizes = [1, 16], strides = [1, 1]} : vector<1x256xf32> to vector<1x16xf32>
      %c1_217 = arith.constant 1 : index
      %c7_218 = arith.constant 7 : index
      %c3_219 = arith.constant 3 : index
      %684 = vector.load %arg7[%c1_217, %c7_218, %c3_219] : memref<2x24x128xf32, #tpu.memory_space<vmem>>, vector<1x1x16xf32>
      %685 = vector.shape_cast %684 : vector<1x1x16xf32> to vector<1x16xf32>
      %686 = vector.shape_cast %683 : vector<1x16xf32> to vector<1x1x16xf32>
      tpu.vector_store %arg7[%c1_217, %c7_218, %c3_219], %686 {strides = array<i32>} : memref<2x24x128xf32, #tpu.memory_space<vmem>>, vector<1x1x16xf32>,
      %687 = vector.extract_strided_slice %642 {offsets = [0, 80], sizes = [1, 16], strides = [1, 1]} : vector<1x256xf32> to vector<1x16xf32>
      %c0_220 = arith.constant 0 : index
      %c8_221 = arith.constant 8 : index
      %c3_222 = arith.constant 3 : index
      %688 = vector.load %arg7[%c0_220, %c8_221, %c3_222] : memref<2x24x128xf32, #tpu.memory_space<vmem>>, vector<1x1x16xf32>
      %689 = vector.shape_cast %688 : vector<1x1x16xf32> to vector<1x16xf32>
      %690 = vector.shape_cast %687 : vector<1x16xf32> to vector<1x1x16xf32>
      tpu.vector_store %arg7[%c0_220, %c8_221, %c3_222], %690 {strides = array<i32>} : memref<2x24x128xf32, #tpu.memory_space<vmem>>, vector<1x1x16xf32>,
      %691 = vector.extract_strided_slice %646 {offsets = [0, 80], sizes = [1, 16], strides = [1, 1]} : vector<1x256xf32> to vector<1x16xf32>
      %c1_223 = arith.constant 1 : index
      %c8_224 = arith.constant 8 : index
      %c3_225 = arith.constant 3 : index
      %692 = vector.load %arg7[%c1_223, %c8_224, %c3_225] : memref<2x24x128xf32, #tpu.memory_space<vmem>>, vector<1x1x16xf32>
      %693 = vector.shape_cast %692 : vector<1x1x16xf32> to vector<1x16xf32>
      %694 = vector.shape_cast %691 : vector<1x16xf32> to vector<1x1x16xf32>
      tpu.vector_store %arg7[%c1_223, %c8_224, %c3_225], %694 {strides = array<i32>} : memref<2x24x128xf32, #tpu.memory_space<vmem>>, vector<1x1x16xf32>,
      %695 = vector.extract_strided_slice %642 {offsets = [0, 96], sizes = [1, 16], strides = [1, 1]} : vector<1x256xf32> to vector<1x16xf32>
      %c0_226 = arith.constant 0 : index
      %c9_227 = arith.constant 9 : index
      %c3_228 = arith.constant 3 : index
      %696 = vector.load %arg7[%c0_226, %c9_227, %c3_228] : memref<2x24x128xf32, #tpu.memory_space<vmem>>, vector<1x1x16xf32>
      %697 = vector.shape_cast %696 : vector<1x1x16xf32> to vector<1x16xf32>
      %698 = vector.shape_cast %695 : vector<1x16xf32> to vector<1x1x16xf32>
      tpu.vector_store %arg7[%c0_226, %c9_227, %c3_228], %698 {strides = array<i32>} : memref<2x24x128xf32, #tpu.memory_space<vmem>>, vector<1x1x16xf32>,
      %699 = vector.extract_strided_slice %646 {offsets = [0, 96], sizes = [1, 16], strides = [1, 1]} : vector<1x256xf32> to vector<1x16xf32>
      %c1_229 = arith.constant 1 : index
      %c9_230 = arith.constant 9 : index
      %c3_231 = arith.constant 3 : index
      %700 = vector.load %arg7[%c1_229, %c9_230, %c3_231] : memref<2x24x128xf32, #tpu.memory_space<vmem>>, vector<1x1x16xf32>
      %701 = vector.shape_cast %700 : vector<1x1x16xf32> to vector<1x16xf32>
      %702 = vector.shape_cast %699 : vector<1x16xf32> to vector<1x1x16xf32>
      tpu.vector_store %arg7[%c1_229, %c9_230, %c3_231], %702 {strides = array<i32>} : memref<2x24x128xf32, #tpu.memory_space<vmem>>, vector<1x1x16xf32>,
      %703 = vector.extract_strided_slice %642 {offsets = [0, 112], sizes = [1, 16], strides = [1, 1]} : vector<1x256xf32> to vector<1x16xf32>
      %c0_232 = arith.constant 0 : index
      %c10_233 = arith.constant 10 : index
      %c3_234 = arith.constant 3 : index
      %704 = vector.load %arg7[%c0_232, %c10_233, %c3_234] : memref<2x24x128xf32, #tpu.memory_space<vmem>>, vector<1x1x16xf32>
      %705 = vector.shape_cast %704 : vector<1x1x16xf32> to vector<1x16xf32>
      %706 = vector.shape_cast %703 : vector<1x16xf32> to vector<1x1x16xf32>
      tpu.vector_store %arg7[%c0_232, %c10_233, %c3_234], %706 {strides = array<i32>} : memref<2x24x128xf32, #tpu.memory_space<vmem>>, vector<1x1x16xf32>,
      %707 = vector.extract_strided_slice %646 {offsets = [0, 112], sizes = [1, 16], strides = [1, 1]} : vector<1x256xf32> to vector<1x16xf32>
      %c1_235 = arith.constant 1 : index
      %c10_236 = arith.constant 10 : index
      %c3_237 = arith.constant 3 : index
      %708 = vector.load %arg7[%c1_235, %c10_236, %c3_237] : memref<2x24x128xf32, #tpu.memory_space<vmem>>, vector<1x1x16xf32>
      %709 = vector.shape_cast %708 : vector<1x1x16xf32> to vector<1x16xf32>
      %710 = vector.shape_cast %707 : vector<1x16xf32> to vector<1x1x16xf32>
      tpu.vector_store %arg7[%c1_235, %c10_236, %c3_237], %710 {strides = array<i32>} : memref<2x24x128xf32, #tpu.memory_space<vmem>>, vector<1x1x16xf32>,
      %711 = vector.extract_strided_slice %642 {offsets = [0, 128], sizes = [1, 16], strides = [1, 1]} : vector<1x256xf32> to vector<1x16xf32>
      %c0_238 = arith.constant 0 : index
      %c11_239 = arith.constant 11 : index
      %c3_240 = arith.constant 3 : index
      %712 = vector.load %arg7[%c0_238, %c11_239, %c3_240] : memref<2x24x128xf32, #tpu.memory_space<vmem>>, vector<1x1x16xf32>
      %713 = vector.shape_cast %712 : vector<1x1x16xf32> to vector<1x16xf32>
      %714 = vector.shape_cast %711 : vector<1x16xf32> to vector<1x1x16xf32>
      tpu.vector_store %arg7[%c0_238, %c11_239, %c3_240], %714 {strides = array<i32>} : memref<2x24x128xf32, #tpu.memory_space<vmem>>, vector<1x1x16xf32>,
      %715 = vector.extract_strided_slice %646 {offsets = [0, 128], sizes = [1, 16], strides = [1, 1]} : vector<1x256xf32> to vector<1x16xf32>
      %c1_241 = arith.constant 1 : index
      %c11_242 = arith.constant 11 : index
      %c3_243 = arith.constant 3 : index
      %716 = vector.load %arg7[%c1_241, %c11_242, %c3_243] : memref<2x24x128xf32, #tpu.memory_space<vmem>>, vector<1x1x16xf32>
      %717 = vector.shape_cast %716 : vector<1x1x16xf32> to vector<1x16xf32>
      %718 = vector.shape_cast %715 : vector<1x16xf32> to vector<1x1x16xf32>
      tpu.vector_store %arg7[%c1_241, %c11_242, %c3_243], %718 {strides = array<i32>} : memref<2x24x128xf32, #tpu.memory_space<vmem>>, vector<1x1x16xf32>,
      %719 = vector.extract_strided_slice %642 {offsets = [0, 144], sizes = [1, 16], strides = [1, 1]} : vector<1x256xf32> to vector<1x16xf32>
      %c0_244 = arith.constant 0 : index
      %c12_245 = arith.constant 12 : index
      %c3_246 = arith.constant 3 : index
      %720 = vector.load %arg7[%c0_244, %c12_245, %c3_246] : memref<2x24x128xf32, #tpu.memory_space<vmem>>, vector<1x1x16xf32>
      %721 = vector.shape_cast %720 : vector<1x1x16xf32> to vector<1x16xf32>
      %722 = vector.shape_cast %719 : vector<1x16xf32> to vector<1x1x16xf32>
      tpu.vector_store %arg7[%c0_244, %c12_245, %c3_246], %722 {strides = array<i32>} : memref<2x24x128xf32, #tpu.memory_space<vmem>>, vector<1x1x16xf32>,
      %723 = vector.extract_strided_slice %646 {offsets = [0, 144], sizes = [1, 16], strides = [1, 1]} : vector<1x256xf32> to vector<1x16xf32>
      %c1_247 = arith.constant 1 : index
      %c12_248 = arith.constant 12 : index
      %c3_249 = arith.constant 3 : index
      %724 = vector.load %arg7[%c1_247, %c12_248, %c3_249] : memref<2x24x128xf32, #tpu.memory_space<vmem>>, vector<1x1x16xf32>
      %725 = vector.shape_cast %724 : vector<1x1x16xf32> to vector<1x16xf32>
      %726 = vector.shape_cast %723 : vector<1x16xf32> to vector<1x1x16xf32>
      tpu.vector_store %arg7[%c1_247, %c12_248, %c3_249], %726 {strides = array<i32>} : memref<2x24x128xf32, #tpu.memory_space<vmem>>, vector<1x1x16xf32>,
      %727 = vector.extract_strided_slice %642 {offsets = [0, 160], sizes = [1, 16], strides = [1, 1]} : vector<1x256xf32> to vector<1x16xf32>
      %c0_250 = arith.constant 0 : index
      %c13_251 = arith.constant 13 : index
      %c3_252 = arith.constant 3 : index
      %728 = vector.load %arg7[%c0_250, %c13_251, %c3_252] : memref<2x24x128xf32, #tpu.memory_space<vmem>>, vector<1x1x16xf32>
      %729 = vector.shape_cast %728 : vector<1x1x16xf32> to vector<1x16xf32>
      %730 = vector.shape_cast %727 : vector<1x16xf32> to vector<1x1x16xf32>
      tpu.vector_store %arg7[%c0_250, %c13_251, %c3_252], %730 {strides = array<i32>} : memref<2x24x128xf32, #tpu.memory_space<vmem>>, vector<1x1x16xf32>,
      %731 = vector.extract_strided_slice %646 {offsets = [0, 160], sizes = [1, 16], strides = [1, 1]} : vector<1x256xf32> to vector<1x16xf32>
      %c1_253 = arith.constant 1 : index
      %c13_254 = arith.constant 13 : index
      %c3_255 = arith.constant 3 : index
      %732 = vector.load %arg7[%c1_253, %c13_254, %c3_255] : memref<2x24x128xf32, #tpu.memory_space<vmem>>, vector<1x1x16xf32>
      %733 = vector.shape_cast %732 : vector<1x1x16xf32> to vector<1x16xf32>
      %734 = vector.shape_cast %731 : vector<1x16xf32> to vector<1x1x16xf32>
      tpu.vector_store %arg7[%c1_253, %c13_254, %c3_255], %734 {strides = array<i32>} : memref<2x24x128xf32, #tpu.memory_space<vmem>>, vector<1x1x16xf32>,
      %735 = vector.extract_strided_slice %642 {offsets = [0, 176], sizes = [1, 16], strides = [1, 1]} : vector<1x256xf32> to vector<1x16xf32>
      %c0_256 = arith.constant 0 : index
      %c14_257 = arith.constant 14 : index
      %c3_258 = arith.constant 3 : index
      %736 = vector.load %arg7[%c0_256, %c14_257, %c3_258] : memref<2x24x128xf32, #tpu.memory_space<vmem>>, vector<1x1x16xf32>
      %737 = vector.shape_cast %736 : vector<1x1x16xf32> to vector<1x16xf32>
      %738 = vector.shape_cast %735 : vector<1x16xf32> to vector<1x1x16xf32>
      tpu.vector_store %arg7[%c0_256, %c14_257, %c3_258], %738 {strides = array<i32>} : memref<2x24x128xf32, #tpu.memory_space<vmem>>, vector<1x1x16xf32>,
      %739 = vector.extract_strided_slice %646 {offsets = [0, 176], sizes = [1, 16], strides = [1, 1]} : vector<1x256xf32> to vector<1x16xf32>
      %c1_259 = arith.constant 1 : index
      %c14_260 = arith.constant 14 : index
      %c3_261 = arith.constant 3 : index
      %740 = vector.load %arg7[%c1_259, %c14_260, %c3_261] : memref<2x24x128xf32, #tpu.memory_space<vmem>>, vector<1x1x16xf32>
      %741 = vector.shape_cast %740 : vector<1x1x16xf32> to vector<1x16xf32>
      %742 = vector.shape_cast %739 : vector<1x16xf32> to vector<1x1x16xf32>
      tpu.vector_store %arg7[%c1_259, %c14_260, %c3_261], %742 {strides = array<i32>} : memref<2x24x128xf32, #tpu.memory_space<vmem>>, vector<1x1x16xf32>,
      %743 = vector.extract_strided_slice %642 {offsets = [0, 192], sizes = [1, 16], strides = [1, 1]} : vector<1x256xf32> to vector<1x16xf32>
      %c0_262 = arith.constant 0 : index
      %c15_263 = arith.constant 15 : index
      %c3_264 = arith.constant 3 : index
      %744 = vector.load %arg7[%c0_262, %c15_263, %c3_264] : memref<2x24x128xf32, #tpu.memory_space<vmem>>, vector<1x1x16xf32>
      %745 = vector.shape_cast %744 : vector<1x1x16xf32> to vector<1x16xf32>
      %746 = vector.shape_cast %743 : vector<1x16xf32> to vector<1x1x16xf32>
      tpu.vector_store %arg7[%c0_262, %c15_263, %c3_264], %746 {strides = array<i32>} : memref<2x24x128xf32, #tpu.memory_space<vmem>>, vector<1x1x16xf32>,
      %747 = vector.extract_strided_slice %646 {offsets = [0, 192], sizes = [1, 16], strides = [1, 1]} : vector<1x256xf32> to vector<1x16xf32>
      %c1_265 = arith.constant 1 : index
      %c15_266 = arith.constant 15 : index
      %c3_267 = arith.constant 3 : index
      %748 = vector.load %arg7[%c1_265, %c15_266, %c3_267] : memref<2x24x128xf32, #tpu.memory_space<vmem>>, vector<1x1x16xf32>
      %749 = vector.shape_cast %748 : vector<1x1x16xf32> to vector<1x16xf32>
      %750 = vector.shape_cast %747 : vector<1x16xf32> to vector<1x1x16xf32>
      tpu.vector_store %arg7[%c1_265, %c15_266, %c3_267], %750 {strides = array<i32>} : memref<2x24x128xf32, #tpu.memory_space<vmem>>, vector<1x1x16xf32>,
      %751 = vector.extract_strided_slice %642 {offsets = [0, 208], sizes = [1, 16], strides = [1, 1]} : vector<1x256xf32> to vector<1x16xf32>
      %c0_268 = arith.constant 0 : index
      %c16_269 = arith.constant 16 : index
      %c3_270 = arith.constant 3 : index
      %752 = vector.load %arg7[%c0_268, %c16_269, %c3_270] : memref<2x24x128xf32, #tpu.memory_space<vmem>>, vector<1x1x16xf32>
      %753 = vector.shape_cast %752 : vector<1x1x16xf32> to vector<1x16xf32>
      %754 = vector.shape_cast %751 : vector<1x16xf32> to vector<1x1x16xf32>
      tpu.vector_store %arg7[%c0_268, %c16_269, %c3_270], %754 {strides = array<i32>} : memref<2x24x128xf32, #tpu.memory_space<vmem>>, vector<1x1x16xf32>,
      %755 = vector.extract_strided_slice %646 {offsets = [0, 208], sizes = [1, 16], strides = [1, 1]} : vector<1x256xf32> to vector<1x16xf32>
      %c1_271 = arith.constant 1 : index
      %c16_272 = arith.constant 16 : index
      %c3_273 = arith.constant 3 : index
      %756 = vector.load %arg7[%c1_271, %c16_272, %c3_273] : memref<2x24x128xf32, #tpu.memory_space<vmem>>, vector<1x1x16xf32>
      %757 = vector.shape_cast %756 : vector<1x1x16xf32> to vector<1x16xf32>
      %758 = vector.shape_cast %755 : vector<1x16xf32> to vector<1x1x16xf32>
      tpu.vector_store %arg7[%c1_271, %c16_272, %c3_273], %758 {strides = array<i32>} : memref<2x24x128xf32, #tpu.memory_space<vmem>>, vector<1x1x16xf32>,
      %759 = vector.extract_strided_slice %642 {offsets = [0, 224], sizes = [1, 16], strides = [1, 1]} : vector<1x256xf32> to vector<1x16xf32>
      %c0_274 = arith.constant 0 : index
      %c17_275 = arith.constant 17 : index
      %c3_276 = arith.constant 3 : index
      %760 = vector.load %arg7[%c0_274, %c17_275, %c3_276] : memref<2x24x128xf32, #tpu.memory_space<vmem>>, vector<1x1x16xf32>
      %761 = vector.shape_cast %760 : vector<1x1x16xf32> to vector<1x16xf32>
      %762 = vector.shape_cast %759 : vector<1x16xf32> to vector<1x1x16xf32>
      tpu.vector_store %arg7[%c0_274, %c17_275, %c3_276], %762 {strides = array<i32>} : memref<2x24x128xf32, #tpu.memory_space<vmem>>, vector<1x1x16xf32>,
      %763 = vector.extract_strided_slice %646 {offsets = [0, 224], sizes = [1, 16], strides = [1, 1]} : vector<1x256xf32> to vector<1x16xf32>
      %c1_277 = arith.constant 1 : index
      %c17_278 = arith.constant 17 : index
      %c3_279 = arith.constant 3 : index
      %764 = vector.load %arg7[%c1_277, %c17_278, %c3_279] : memref<2x24x128xf32, #tpu.memory_space<vmem>>, vector<1x1x16xf32>
      %765 = vector.shape_cast %764 : vector<1x1x16xf32> to vector<1x16xf32>
      %766 = vector.shape_cast %763 : vector<1x16xf32> to vector<1x1x16xf32>
      tpu.vector_store %arg7[%c1_277, %c17_278, %c3_279], %766 {strides = array<i32>} : memref<2x24x128xf32, #tpu.memory_space<vmem>>, vector<1x1x16xf32>,
      %767 = vector.extract_strided_slice %642 {offsets = [0, 240], sizes = [1, 16], strides = [1, 1]} : vector<1x256xf32> to vector<1x16xf32>
      %c0_280 = arith.constant 0 : index
      %c18_281 = arith.constant 18 : index
      %c3_282 = arith.constant 3 : index
      %768 = vector.load %arg7[%c0_280, %c18_281, %c3_282] : memref<2x24x128xf32, #tpu.memory_space<vmem>>, vector<1x1x16xf32>
      %769 = vector.shape_cast %768 : vector<1x1x16xf32> to vector<1x16xf32>
      %770 = vector.shape_cast %767 : vector<1x16xf32> to vector<1x1x16xf32>
      tpu.vector_store %arg7[%c0_280, %c18_281, %c3_282], %770 {strides = array<i32>} : memref<2x24x128xf32, #tpu.memory_space<vmem>>, vector<1x1x16xf32>,
      %771 = vector.extract_strided_slice %646 {offsets = [0, 240], sizes = [1, 16], strides = [1, 1]} : vector<1x256xf32> to vector<1x16xf32>
      %c1_283 = arith.constant 1 : index
      %c18_284 = arith.constant 18 : index
      %c3_285 = arith.constant 3 : index
      %772 = vector.load %arg7[%c1_283, %c18_284, %c3_285] : memref<2x24x128xf32, #tpu.memory_space<vmem>>, vector<1x1x16xf32>
      %773 = vector.shape_cast %772 : vector<1x1x16xf32> to vector<1x16xf32>
      %774 = vector.shape_cast %771 : vector<1x16xf32> to vector<1x1x16xf32>
      tpu.vector_store %arg7[%c1_283, %c18_284, %c3_285], %774 {strides = array<i32>} : memref<2x24x128xf32, #tpu.memory_space<vmem>>, vector<1x1x16xf32>,
      %cst_286 = arith.constant 0.000000e+00 : f32
      %775 = vector.broadcast %cst_286 : f32 to vector<16x16xf32>
      %c0_287 = arith.constant 0 : index
      %c0_288 = arith.constant 0 : index
      %c0_289 = arith.constant 0 : index
      %776 = vector.load %arg7[%c0_287, %c0_288, %c0_289] : memref<2x24x128xf32, #tpu.memory_space<vmem>>, vector<1x24x128xf32>
      %777 = vector.shape_cast %776 : vector<1x24x128xf32> to vector<24x128xf32>
      %778 = vector.extract_strided_slice %777 {offsets = [0, 0], sizes = [24, 16], strides = [1, 1]} : vector<24x128xf32> to vector<24x16xf32>
      %779 = vector.extract_strided_slice %777 {offsets = [0, 1], sizes = [24, 16], strides = [1, 1]} : vector<24x128xf32> to vector<24x16xf32>
      %780 = vector.extract_strided_slice %777 {offsets = [0, 2], sizes = [24, 16], strides = [1, 1]} : vector<24x128xf32> to vector<24x16xf32>
      %781 = vector.extract_strided_slice %777 {offsets = [0, 3], sizes = [24, 16], strides = [1, 1]} : vector<24x128xf32> to vector<24x16xf32>
      %782 = vector.extract_strided_slice %777 {offsets = [0, 4], sizes = [24, 16], strides = [1, 1]} : vector<24x128xf32> to vector<24x16xf32>
      %783 = vector.extract_strided_slice %777 {offsets = [0, 5], sizes = [24, 16], strides = [1, 1]} : vector<24x128xf32> to vector<24x16xf32>
      %784 = vector.extract_strided_slice %777 {offsets = [0, 6], sizes = [24, 16], strides = [1, 1]} : vector<24x128xf32> to vector<24x16xf32>
      %c0_290 = arith.constant 0 : index
      %785 = memref.load %arg2[%c0_290] : memref<98xf32, #tpu.memory_space<smem>>
      %786 = vector.broadcast %785 : f32 to vector<24x16xf32>
      %787 = arith.mulf %786, %778 : vector<24x16xf32>
      %c1_291 = arith.constant 1 : index
      %788 = memref.load %arg2[%c1_291] : memref<98xf32, #tpu.memory_space<smem>>
      %789 = vector.broadcast %788 : f32 to vector<24x16xf32>
      %790 = arith.mulf %789, %779 : vector<24x16xf32>
      %791 = arith.addf %787, %790 : vector<24x16xf32>
      %c2_292 = arith.constant 2 : index
      %792 = memref.load %arg2[%c2_292] : memref<98xf32, #tpu.memory_space<smem>>
      %793 = vector.broadcast %792 : f32 to vector<24x16xf32>
      %794 = arith.mulf %793, %780 : vector<24x16xf32>
      %795 = arith.addf %791, %794 : vector<24x16xf32>
      %c3_293 = arith.constant 3 : index
      %796 = memref.load %arg2[%c3_293] : memref<98xf32, #tpu.memory_space<smem>>
      %797 = vector.broadcast %796 : f32 to vector<24x16xf32>
      %798 = arith.mulf %797, %781 : vector<24x16xf32>
      %799 = arith.addf %795, %798 : vector<24x16xf32>
      %c4_294 = arith.constant 4 : index
      %800 = memref.load %arg2[%c4_294] : memref<98xf32, #tpu.memory_space<smem>>
      %801 = vector.broadcast %800 : f32 to vector<24x16xf32>
      %802 = arith.mulf %801, %782 : vector<24x16xf32>
      %803 = arith.addf %799, %802 : vector<24x16xf32>
      %c5_295 = arith.constant 5 : index
      %804 = memref.load %arg2[%c5_295] : memref<98xf32, #tpu.memory_space<smem>>
      %805 = vector.broadcast %804 : f32 to vector<24x16xf32>
      %806 = arith.mulf %805, %783 : vector<24x16xf32>
      %807 = arith.addf %803, %806 : vector<24x16xf32>
      %c6_296 = arith.constant 6 : index
      %808 = memref.load %arg2[%c6_296] : memref<98xf32, #tpu.memory_space<smem>>
      %809 = vector.broadcast %808 : f32 to vector<24x16xf32>
      %810 = arith.mulf %809, %784 : vector<24x16xf32>
      %811 = arith.addf %807, %810 : vector<24x16xf32>
      %812 = vector.extract_strided_slice %811 {offsets = [0, 0], sizes = [16, 16], strides = [1, 1]} : vector<24x16xf32> to vector<16x16xf32>
      %813 = arith.addf %775, %812 : vector<16x16xf32>
      %c7_297 = arith.constant 7 : index
      %814 = memref.load %arg2[%c7_297] : memref<98xf32, #tpu.memory_space<smem>>
      %815 = vector.broadcast %814 : f32 to vector<24x16xf32>
      %816 = arith.mulf %815, %778 : vector<24x16xf32>
      %c8_298 = arith.constant 8 : index
      %817 = memref.load %arg2[%c8_298] : memref<98xf32, #tpu.memory_space<smem>>
      %818 = vector.broadcast %817 : f32 to vector<24x16xf32>
      %819 = arith.mulf %818, %779 : vector<24x16xf32>
      %820 = arith.addf %816, %819 : vector<24x16xf32>
      %c9_299 = arith.constant 9 : index
      %821 = memref.load %arg2[%c9_299] : memref<98xf32, #tpu.memory_space<smem>>
      %822 = vector.broadcast %821 : f32 to vector<24x16xf32>
      %823 = arith.mulf %822, %780 : vector<24x16xf32>
      %824 = arith.addf %820, %823 : vector<24x16xf32>
      %c10_300 = arith.constant 10 : index
      %825 = memref.load %arg2[%c10_300] : memref<98xf32, #tpu.memory_space<smem>>
      %826 = vector.broadcast %825 : f32 to vector<24x16xf32>
      %827 = arith.mulf %826, %781 : vector<24x16xf32>
      %828 = arith.addf %824, %827 : vector<24x16xf32>
      %c11_301 = arith.constant 11 : index
      %829 = memref.load %arg2[%c11_301] : memref<98xf32, #tpu.memory_space<smem>>
      %830 = vector.broadcast %829 : f32 to vector<24x16xf32>
      %831 = arith.mulf %830, %782 : vector<24x16xf32>
      %832 = arith.addf %828, %831 : vector<24x16xf32>
      %c12_302 = arith.constant 12 : index
      %833 = memref.load %arg2[%c12_302] : memref<98xf32, #tpu.memory_space<smem>>
      %834 = vector.broadcast %833 : f32 to vector<24x16xf32>
      %835 = arith.mulf %834, %783 : vector<24x16xf32>
      %836 = arith.addf %832, %835 : vector<24x16xf32>
      %c13_303 = arith.constant 13 : index
      %837 = memref.load %arg2[%c13_303] : memref<98xf32, #tpu.memory_space<smem>>
      %838 = vector.broadcast %837 : f32 to vector<24x16xf32>
      %839 = arith.mulf %838, %784 : vector<24x16xf32>
      %840 = arith.addf %836, %839 : vector<24x16xf32>
      %841 = vector.extract_strided_slice %840 {offsets = [1, 0], sizes = [16, 16], strides = [1, 1]} : vector<24x16xf32> to vector<16x16xf32>
      %842 = arith.addf %813, %841 : vector<16x16xf32>
      %c14_304 = arith.constant 14 : index
      %843 = memref.load %arg2[%c14_304] : memref<98xf32, #tpu.memory_space<smem>>
      %844 = vector.broadcast %843 : f32 to vector<24x16xf32>
      %845 = arith.mulf %844, %778 : vector<24x16xf32>
      %c15_305 = arith.constant 15 : index
      %846 = memref.load %arg2[%c15_305] : memref<98xf32, #tpu.memory_space<smem>>
      %847 = vector.broadcast %846 : f32 to vector<24x16xf32>
      %848 = arith.mulf %847, %779 : vector<24x16xf32>
      %849 = arith.addf %845, %848 : vector<24x16xf32>
      %c16_306 = arith.constant 16 : index
      %850 = memref.load %arg2[%c16_306] : memref<98xf32, #tpu.memory_space<smem>>
      %851 = vector.broadcast %850 : f32 to vector<24x16xf32>
      %852 = arith.mulf %851, %780 : vector<24x16xf32>
      %853 = arith.addf %849, %852 : vector<24x16xf32>
      %c17_307 = arith.constant 17 : index
      %854 = memref.load %arg2[%c17_307] : memref<98xf32, #tpu.memory_space<smem>>
      %855 = vector.broadcast %854 : f32 to vector<24x16xf32>
      %856 = arith.mulf %855, %781 : vector<24x16xf32>
      %857 = arith.addf %853, %856 : vector<24x16xf32>
      %c18_308 = arith.constant 18 : index
      %858 = memref.load %arg2[%c18_308] : memref<98xf32, #tpu.memory_space<smem>>
      %859 = vector.broadcast %858 : f32 to vector<24x16xf32>
      %860 = arith.mulf %859, %782 : vector<24x16xf32>
      %861 = arith.addf %857, %860 : vector<24x16xf32>
      %c19_309 = arith.constant 19 : index
      %862 = memref.load %arg2[%c19_309] : memref<98xf32, #tpu.memory_space<smem>>
      %863 = vector.broadcast %862 : f32 to vector<24x16xf32>
      %864 = arith.mulf %863, %783 : vector<24x16xf32>
      %865 = arith.addf %861, %864 : vector<24x16xf32>
      %c20_310 = arith.constant 20 : index
      %866 = memref.load %arg2[%c20_310] : memref<98xf32, #tpu.memory_space<smem>>
      %867 = vector.broadcast %866 : f32 to vector<24x16xf32>
      %868 = arith.mulf %867, %784 : vector<24x16xf32>
      %869 = arith.addf %865, %868 : vector<24x16xf32>
      %870 = vector.extract_strided_slice %869 {offsets = [2, 0], sizes = [16, 16], strides = [1, 1]} : vector<24x16xf32> to vector<16x16xf32>
      %871 = arith.addf %842, %870 : vector<16x16xf32>
      %c21_311 = arith.constant 21 : index
      %872 = memref.load %arg2[%c21_311] : memref<98xf32, #tpu.memory_space<smem>>
      %873 = vector.broadcast %872 : f32 to vector<24x16xf32>
      %874 = arith.mulf %873, %778 : vector<24x16xf32>
      %c22_312 = arith.constant 22 : index
      %875 = memref.load %arg2[%c22_312] : memref<98xf32, #tpu.memory_space<smem>>
      %876 = vector.broadcast %875 : f32 to vector<24x16xf32>
      %877 = arith.mulf %876, %779 : vector<24x16xf32>
      %878 = arith.addf %874, %877 : vector<24x16xf32>
      %c23_313 = arith.constant 23 : index
      %879 = memref.load %arg2[%c23_313] : memref<98xf32, #tpu.memory_space<smem>>
      %880 = vector.broadcast %879 : f32 to vector<24x16xf32>
      %881 = arith.mulf %880, %780 : vector<24x16xf32>
      %882 = arith.addf %878, %881 : vector<24x16xf32>
      %c24_314 = arith.constant 24 : index
      %883 = memref.load %arg2[%c24_314] : memref<98xf32, #tpu.memory_space<smem>>
      %884 = vector.broadcast %883 : f32 to vector<24x16xf32>
      %885 = arith.mulf %884, %781 : vector<24x16xf32>
      %886 = arith.addf %882, %885 : vector<24x16xf32>
      %c25_315 = arith.constant 25 : index
      %887 = memref.load %arg2[%c25_315] : memref<98xf32, #tpu.memory_space<smem>>
      %888 = vector.broadcast %887 : f32 to vector<24x16xf32>
      %889 = arith.mulf %888, %782 : vector<24x16xf32>
      %890 = arith.addf %886, %889 : vector<24x16xf32>
      %c26_316 = arith.constant 26 : index
      %891 = memref.load %arg2[%c26_316] : memref<98xf32, #tpu.memory_space<smem>>
      %892 = vector.broadcast %891 : f32 to vector<24x16xf32>
      %893 = arith.mulf %892, %783 : vector<24x16xf32>
      %894 = arith.addf %890, %893 : vector<24x16xf32>
      %c27_317 = arith.constant 27 : index
      %895 = memref.load %arg2[%c27_317] : memref<98xf32, #tpu.memory_space<smem>>
      %896 = vector.broadcast %895 : f32 to vector<24x16xf32>
      %897 = arith.mulf %896, %784 : vector<24x16xf32>
      %898 = arith.addf %894, %897 : vector<24x16xf32>
      %899 = vector.extract_strided_slice %898 {offsets = [3, 0], sizes = [16, 16], strides = [1, 1]} : vector<24x16xf32> to vector<16x16xf32>
      %900 = arith.addf %871, %899 : vector<16x16xf32>
      %c28_318 = arith.constant 28 : index
      %901 = memref.load %arg2[%c28_318] : memref<98xf32, #tpu.memory_space<smem>>
      %902 = vector.broadcast %901 : f32 to vector<24x16xf32>
      %903 = arith.mulf %902, %778 : vector<24x16xf32>
      %c29_319 = arith.constant 29 : index
      %904 = memref.load %arg2[%c29_319] : memref<98xf32, #tpu.memory_space<smem>>
      %905 = vector.broadcast %904 : f32 to vector<24x16xf32>
      %906 = arith.mulf %905, %779 : vector<24x16xf32>
      %907 = arith.addf %903, %906 : vector<24x16xf32>
      %c30_320 = arith.constant 30 : index
      %908 = memref.load %arg2[%c30_320] : memref<98xf32, #tpu.memory_space<smem>>
      %909 = vector.broadcast %908 : f32 to vector<24x16xf32>
      %910 = arith.mulf %909, %780 : vector<24x16xf32>
      %911 = arith.addf %907, %910 : vector<24x16xf32>
      %c31_321 = arith.constant 31 : index
      %912 = memref.load %arg2[%c31_321] : memref<98xf32, #tpu.memory_space<smem>>
      %913 = vector.broadcast %912 : f32 to vector<24x16xf32>
      %914 = arith.mulf %913, %781 : vector<24x16xf32>
      %915 = arith.addf %911, %914 : vector<24x16xf32>
      %c32_322 = arith.constant 32 : index
      %916 = memref.load %arg2[%c32_322] : memref<98xf32, #tpu.memory_space<smem>>
      %917 = vector.broadcast %916 : f32 to vector<24x16xf32>
      %918 = arith.mulf %917, %782 : vector<24x16xf32>
      %919 = arith.addf %915, %918 : vector<24x16xf32>
      %c33_323 = arith.constant 33 : index
      %920 = memref.load %arg2[%c33_323] : memref<98xf32, #tpu.memory_space<smem>>
      %921 = vector.broadcast %920 : f32 to vector<24x16xf32>
      %922 = arith.mulf %921, %783 : vector<24x16xf32>
      %923 = arith.addf %919, %922 : vector<24x16xf32>
      %c34_324 = arith.constant 34 : index
      %924 = memref.load %arg2[%c34_324] : memref<98xf32, #tpu.memory_space<smem>>
      %925 = vector.broadcast %924 : f32 to vector<24x16xf32>
      %926 = arith.mulf %925, %784 : vector<24x16xf32>
      %927 = arith.addf %923, %926 : vector<24x16xf32>
      %928 = vector.extract_strided_slice %927 {offsets = [4, 0], sizes = [16, 16], strides = [1, 1]} : vector<24x16xf32> to vector<16x16xf32>
      %929 = arith.addf %900, %928 : vector<16x16xf32>
      %c35_325 = arith.constant 35 : index
      %930 = memref.load %arg2[%c35_325] : memref<98xf32, #tpu.memory_space<smem>>
      %931 = vector.broadcast %930 : f32 to vector<24x16xf32>
      %932 = arith.mulf %931, %778 : vector<24x16xf32>
      %c36_326 = arith.constant 36 : index
      %933 = memref.load %arg2[%c36_326] : memref<98xf32, #tpu.memory_space<smem>>
      %934 = vector.broadcast %933 : f32 to vector<24x16xf32>
      %935 = arith.mulf %934, %779 : vector<24x16xf32>
      %936 = arith.addf %932, %935 : vector<24x16xf32>
      %c37_327 = arith.constant 37 : index
      %937 = memref.load %arg2[%c37_327] : memref<98xf32, #tpu.memory_space<smem>>
      %938 = vector.broadcast %937 : f32 to vector<24x16xf32>
      %939 = arith.mulf %938, %780 : vector<24x16xf32>
      %940 = arith.addf %936, %939 : vector<24x16xf32>
      %c38_328 = arith.constant 38 : index
      %941 = memref.load %arg2[%c38_328] : memref<98xf32, #tpu.memory_space<smem>>
      %942 = vector.broadcast %941 : f32 to vector<24x16xf32>
      %943 = arith.mulf %942, %781 : vector<24x16xf32>
      %944 = arith.addf %940, %943 : vector<24x16xf32>
      %c39_329 = arith.constant 39 : index
      %945 = memref.load %arg2[%c39_329] : memref<98xf32, #tpu.memory_space<smem>>
      %946 = vector.broadcast %945 : f32 to vector<24x16xf32>
      %947 = arith.mulf %946, %782 : vector<24x16xf32>
      %948 = arith.addf %944, %947 : vector<24x16xf32>
      %c40_330 = arith.constant 40 : index
      %949 = memref.load %arg2[%c40_330] : memref<98xf32, #tpu.memory_space<smem>>
      %950 = vector.broadcast %949 : f32 to vector<24x16xf32>
      %951 = arith.mulf %950, %783 : vector<24x16xf32>
      %952 = arith.addf %948, %951 : vector<24x16xf32>
      %c41_331 = arith.constant 41 : index
      %953 = memref.load %arg2[%c41_331] : memref<98xf32, #tpu.memory_space<smem>>
      %954 = vector.broadcast %953 : f32 to vector<24x16xf32>
      %955 = arith.mulf %954, %784 : vector<24x16xf32>
      %956 = arith.addf %952, %955 : vector<24x16xf32>
      %957 = vector.extract_strided_slice %956 {offsets = [5, 0], sizes = [16, 16], strides = [1, 1]} : vector<24x16xf32> to vector<16x16xf32>
      %958 = arith.addf %929, %957 : vector<16x16xf32>
      %c42_332 = arith.constant 42 : index
      %959 = memref.load %arg2[%c42_332] : memref<98xf32, #tpu.memory_space<smem>>
      %960 = vector.broadcast %959 : f32 to vector<24x16xf32>
      %961 = arith.mulf %960, %778 : vector<24x16xf32>
      %c43_333 = arith.constant 43 : index
      %962 = memref.load %arg2[%c43_333] : memref<98xf32, #tpu.memory_space<smem>>
      %963 = vector.broadcast %962 : f32 to vector<24x16xf32>
      %964 = arith.mulf %963, %779 : vector<24x16xf32>
      %965 = arith.addf %961, %964 : vector<24x16xf32>
      %c44_334 = arith.constant 44 : index
      %966 = memref.load %arg2[%c44_334] : memref<98xf32, #tpu.memory_space<smem>>
      %967 = vector.broadcast %966 : f32 to vector<24x16xf32>
      %968 = arith.mulf %967, %780 : vector<24x16xf32>
      %969 = arith.addf %965, %968 : vector<24x16xf32>
      %c45_335 = arith.constant 45 : index
      %970 = memref.load %arg2[%c45_335] : memref<98xf32, #tpu.memory_space<smem>>
      %971 = vector.broadcast %970 : f32 to vector<24x16xf32>
      %972 = arith.mulf %971, %781 : vector<24x16xf32>
      %973 = arith.addf %969, %972 : vector<24x16xf32>
      %c46_336 = arith.constant 46 : index
      %974 = memref.load %arg2[%c46_336] : memref<98xf32, #tpu.memory_space<smem>>
      %975 = vector.broadcast %974 : f32 to vector<24x16xf32>
      %976 = arith.mulf %975, %782 : vector<24x16xf32>
      %977 = arith.addf %973, %976 : vector<24x16xf32>
      %c47_337 = arith.constant 47 : index
      %978 = memref.load %arg2[%c47_337] : memref<98xf32, #tpu.memory_space<smem>>
      %979 = vector.broadcast %978 : f32 to vector<24x16xf32>
      %980 = arith.mulf %979, %783 : vector<24x16xf32>
      %981 = arith.addf %977, %980 : vector<24x16xf32>
      %c48_338 = arith.constant 48 : index
      %982 = memref.load %arg2[%c48_338] : memref<98xf32, #tpu.memory_space<smem>>
      %983 = vector.broadcast %982 : f32 to vector<24x16xf32>
      %984 = arith.mulf %983, %784 : vector<24x16xf32>
      %985 = arith.addf %981, %984 : vector<24x16xf32>
      %986 = vector.extract_strided_slice %985 {offsets = [6, 0], sizes = [16, 16], strides = [1, 1]} : vector<24x16xf32> to vector<16x16xf32>
      %987 = arith.addf %958, %986 : vector<16x16xf32>
      %c1_339 = arith.constant 1 : index
      %c0_340 = arith.constant 0 : index
      %c0_341 = arith.constant 0 : index
      %988 = vector.load %arg7[%c1_339, %c0_340, %c0_341] : memref<2x24x128xf32, #tpu.memory_space<vmem>>, vector<1x24x128xf32>
      %989 = vector.shape_cast %988 : vector<1x24x128xf32> to vector<24x128xf32>
      %990 = vector.extract_strided_slice %989 {offsets = [0, 0], sizes = [24, 16], strides = [1, 1]} : vector<24x128xf32> to vector<24x16xf32>
      %991 = vector.extract_strided_slice %989 {offsets = [0, 1], sizes = [24, 16], strides = [1, 1]} : vector<24x128xf32> to vector<24x16xf32>
      %992 = vector.extract_strided_slice %989 {offsets = [0, 2], sizes = [24, 16], strides = [1, 1]} : vector<24x128xf32> to vector<24x16xf32>
      %993 = vector.extract_strided_slice %989 {offsets = [0, 3], sizes = [24, 16], strides = [1, 1]} : vector<24x128xf32> to vector<24x16xf32>
      %994 = vector.extract_strided_slice %989 {offsets = [0, 4], sizes = [24, 16], strides = [1, 1]} : vector<24x128xf32> to vector<24x16xf32>
      %995 = vector.extract_strided_slice %989 {offsets = [0, 5], sizes = [24, 16], strides = [1, 1]} : vector<24x128xf32> to vector<24x16xf32>
      %996 = vector.extract_strided_slice %989 {offsets = [0, 6], sizes = [24, 16], strides = [1, 1]} : vector<24x128xf32> to vector<24x16xf32>
      %c49_342 = arith.constant 49 : index
      %997 = memref.load %arg2[%c49_342] : memref<98xf32, #tpu.memory_space<smem>>
      %998 = vector.broadcast %997 : f32 to vector<24x16xf32>
      %999 = arith.mulf %998, %990 : vector<24x16xf32>
      %c50_343 = arith.constant 50 : index
      %1000 = memref.load %arg2[%c50_343] : memref<98xf32, #tpu.memory_space<smem>>
      %1001 = vector.broadcast %1000 : f32 to vector<24x16xf32>
      %1002 = arith.mulf %1001, %991 : vector<24x16xf32>
      %1003 = arith.addf %999, %1002 : vector<24x16xf32>
      %c51_344 = arith.constant 51 : index
      %1004 = memref.load %arg2[%c51_344] : memref<98xf32, #tpu.memory_space<smem>>
      %1005 = vector.broadcast %1004 : f32 to vector<24x16xf32>
      %1006 = arith.mulf %1005, %992 : vector<24x16xf32>
      %1007 = arith.addf %1003, %1006 : vector<24x16xf32>
      %c52_345 = arith.constant 52 : index
      %1008 = memref.load %arg2[%c52_345] : memref<98xf32, #tpu.memory_space<smem>>
      %1009 = vector.broadcast %1008 : f32 to vector<24x16xf32>
      %1010 = arith.mulf %1009, %993 : vector<24x16xf32>
      %1011 = arith.addf %1007, %1010 : vector<24x16xf32>
      %c53_346 = arith.constant 53 : index
      %1012 = memref.load %arg2[%c53_346] : memref<98xf32, #tpu.memory_space<smem>>
      %1013 = vector.broadcast %1012 : f32 to vector<24x16xf32>
      %1014 = arith.mulf %1013, %994 : vector<24x16xf32>
      %1015 = arith.addf %1011, %1014 : vector<24x16xf32>
      %c54_347 = arith.constant 54 : index
      %1016 = memref.load %arg2[%c54_347] : memref<98xf32, #tpu.memory_space<smem>>
      %1017 = vector.broadcast %1016 : f32 to vector<24x16xf32>
      %1018 = arith.mulf %1017, %995 : vector<24x16xf32>
      %1019 = arith.addf %1015, %1018 : vector<24x16xf32>
      %c55_348 = arith.constant 55 : index
      %1020 = memref.load %arg2[%c55_348] : memref<98xf32, #tpu.memory_space<smem>>
      %1021 = vector.broadcast %1020 : f32 to vector<24x16xf32>
      %1022 = arith.mulf %1021, %996 : vector<24x16xf32>
      %1023 = arith.addf %1019, %1022 : vector<24x16xf32>
      %1024 = vector.extract_strided_slice %1023 {offsets = [0, 0], sizes = [16, 16], strides = [1, 1]} : vector<24x16xf32> to vector<16x16xf32>
      %1025 = arith.addf %987, %1024 : vector<16x16xf32>
      %c56_349 = arith.constant 56 : index
      %1026 = memref.load %arg2[%c56_349] : memref<98xf32, #tpu.memory_space<smem>>
      %1027 = vector.broadcast %1026 : f32 to vector<24x16xf32>
      %1028 = arith.mulf %1027, %990 : vector<24x16xf32>
      %c57_350 = arith.constant 57 : index
      %1029 = memref.load %arg2[%c57_350] : memref<98xf32, #tpu.memory_space<smem>>
      %1030 = vector.broadcast %1029 : f32 to vector<24x16xf32>
      %1031 = arith.mulf %1030, %991 : vector<24x16xf32>
      %1032 = arith.addf %1028, %1031 : vector<24x16xf32>
      %c58_351 = arith.constant 58 : index
      %1033 = memref.load %arg2[%c58_351] : memref<98xf32, #tpu.memory_space<smem>>
      %1034 = vector.broadcast %1033 : f32 to vector<24x16xf32>
      %1035 = arith.mulf %1034, %992 : vector<24x16xf32>
      %1036 = arith.addf %1032, %1035 : vector<24x16xf32>
      %c59_352 = arith.constant 59 : index
      %1037 = memref.load %arg2[%c59_352] : memref<98xf32, #tpu.memory_space<smem>>
      %1038 = vector.broadcast %1037 : f32 to vector<24x16xf32>
      %1039 = arith.mulf %1038, %993 : vector<24x16xf32>
      %1040 = arith.addf %1036, %1039 : vector<24x16xf32>
      %c60_353 = arith.constant 60 : index
      %1041 = memref.load %arg2[%c60_353] : memref<98xf32, #tpu.memory_space<smem>>
      %1042 = vector.broadcast %1041 : f32 to vector<24x16xf32>
      %1043 = arith.mulf %1042, %994 : vector<24x16xf32>
      %1044 = arith.addf %1040, %1043 : vector<24x16xf32>
      %c61_354 = arith.constant 61 : index
      %1045 = memref.load %arg2[%c61_354] : memref<98xf32, #tpu.memory_space<smem>>
      %1046 = vector.broadcast %1045 : f32 to vector<24x16xf32>
      %1047 = arith.mulf %1046, %995 : vector<24x16xf32>
      %1048 = arith.addf %1044, %1047 : vector<24x16xf32>
      %c62_355 = arith.constant 62 : index
      %1049 = memref.load %arg2[%c62_355] : memref<98xf32, #tpu.memory_space<smem>>
      %1050 = vector.broadcast %1049 : f32 to vector<24x16xf32>
      %1051 = arith.mulf %1050, %996 : vector<24x16xf32>
      %1052 = arith.addf %1048, %1051 : vector<24x16xf32>
      %1053 = vector.extract_strided_slice %1052 {offsets = [1, 0], sizes = [16, 16], strides = [1, 1]} : vector<24x16xf32> to vector<16x16xf32>
      %1054 = arith.addf %1025, %1053 : vector<16x16xf32>
      %c63_356 = arith.constant 63 : index
      %1055 = memref.load %arg2[%c63_356] : memref<98xf32, #tpu.memory_space<smem>>
      %1056 = vector.broadcast %1055 : f32 to vector<24x16xf32>
      %1057 = arith.mulf %1056, %990 : vector<24x16xf32>
      %c64_357 = arith.constant 64 : index
      %1058 = memref.load %arg2[%c64_357] : memref<98xf32, #tpu.memory_space<smem>>
      %1059 = vector.broadcast %1058 : f32 to vector<24x16xf32>
      %1060 = arith.mulf %1059, %991 : vector<24x16xf32>
      %1061 = arith.addf %1057, %1060 : vector<24x16xf32>
      %c65_358 = arith.constant 65 : index
      %1062 = memref.load %arg2[%c65_358] : memref<98xf32, #tpu.memory_space<smem>>
      %1063 = vector.broadcast %1062 : f32 to vector<24x16xf32>
      %1064 = arith.mulf %1063, %992 : vector<24x16xf32>
      %1065 = arith.addf %1061, %1064 : vector<24x16xf32>
      %c66_359 = arith.constant 66 : index
      %1066 = memref.load %arg2[%c66_359] : memref<98xf32, #tpu.memory_space<smem>>
      %1067 = vector.broadcast %1066 : f32 to vector<24x16xf32>
      %1068 = arith.mulf %1067, %993 : vector<24x16xf32>
      %1069 = arith.addf %1065, %1068 : vector<24x16xf32>
      %c67_360 = arith.constant 67 : index
      %1070 = memref.load %arg2[%c67_360] : memref<98xf32, #tpu.memory_space<smem>>
      %1071 = vector.broadcast %1070 : f32 to vector<24x16xf32>
      %1072 = arith.mulf %1071, %994 : vector<24x16xf32>
      %1073 = arith.addf %1069, %1072 : vector<24x16xf32>
      %c68_361 = arith.constant 68 : index
      %1074 = memref.load %arg2[%c68_361] : memref<98xf32, #tpu.memory_space<smem>>
      %1075 = vector.broadcast %1074 : f32 to vector<24x16xf32>
      %1076 = arith.mulf %1075, %995 : vector<24x16xf32>
      %1077 = arith.addf %1073, %1076 : vector<24x16xf32>
      %c69_362 = arith.constant 69 : index
      %1078 = memref.load %arg2[%c69_362] : memref<98xf32, #tpu.memory_space<smem>>
      %1079 = vector.broadcast %1078 : f32 to vector<24x16xf32>
      %1080 = arith.mulf %1079, %996 : vector<24x16xf32>
      %1081 = arith.addf %1077, %1080 : vector<24x16xf32>
      %1082 = vector.extract_strided_slice %1081 {offsets = [2, 0], sizes = [16, 16], strides = [1, 1]} : vector<24x16xf32> to vector<16x16xf32>
      %1083 = arith.addf %1054, %1082 : vector<16x16xf32>
      %c70_363 = arith.constant 70 : index
      %1084 = memref.load %arg2[%c70_363] : memref<98xf32, #tpu.memory_space<smem>>
      %1085 = vector.broadcast %1084 : f32 to vector<24x16xf32>
      %1086 = arith.mulf %1085, %990 : vector<24x16xf32>
      %c71_364 = arith.constant 71 : index
      %1087 = memref.load %arg2[%c71_364] : memref<98xf32, #tpu.memory_space<smem>>
      %1088 = vector.broadcast %1087 : f32 to vector<24x16xf32>
      %1089 = arith.mulf %1088, %991 : vector<24x16xf32>
      %1090 = arith.addf %1086, %1089 : vector<24x16xf32>
      %c72_365 = arith.constant 72 : index
      %1091 = memref.load %arg2[%c72_365] : memref<98xf32, #tpu.memory_space<smem>>
      %1092 = vector.broadcast %1091 : f32 to vector<24x16xf32>
      %1093 = arith.mulf %1092, %992 : vector<24x16xf32>
      %1094 = arith.addf %1090, %1093 : vector<24x16xf32>
      %c73_366 = arith.constant 73 : index
      %1095 = memref.load %arg2[%c73_366] : memref<98xf32, #tpu.memory_space<smem>>
      %1096 = vector.broadcast %1095 : f32 to vector<24x16xf32>
      %1097 = arith.mulf %1096, %993 : vector<24x16xf32>
      %1098 = arith.addf %1094, %1097 : vector<24x16xf32>
      %c74_367 = arith.constant 74 : index
      %1099 = memref.load %arg2[%c74_367] : memref<98xf32, #tpu.memory_space<smem>>
      %1100 = vector.broadcast %1099 : f32 to vector<24x16xf32>
      %1101 = arith.mulf %1100, %994 : vector<24x16xf32>
      %1102 = arith.addf %1098, %1101 : vector<24x16xf32>
      %c75_368 = arith.constant 75 : index
      %1103 = memref.load %arg2[%c75_368] : memref<98xf32, #tpu.memory_space<smem>>
      %1104 = vector.broadcast %1103 : f32 to vector<24x16xf32>
      %1105 = arith.mulf %1104, %995 : vector<24x16xf32>
      %1106 = arith.addf %1102, %1105 : vector<24x16xf32>
      %c76_369 = arith.constant 76 : index
      %1107 = memref.load %arg2[%c76_369] : memref<98xf32, #tpu.memory_space<smem>>
      %1108 = vector.broadcast %1107 : f32 to vector<24x16xf32>
      %1109 = arith.mulf %1108, %996 : vector<24x16xf32>
      %1110 = arith.addf %1106, %1109 : vector<24x16xf32>
      %1111 = vector.extract_strided_slice %1110 {offsets = [3, 0], sizes = [16, 16], strides = [1, 1]} : vector<24x16xf32> to vector<16x16xf32>
      %1112 = arith.addf %1083, %1111 : vector<16x16xf32>
      %c77_370 = arith.constant 77 : index
      %1113 = memref.load %arg2[%c77_370] : memref<98xf32, #tpu.memory_space<smem>>
      %1114 = vector.broadcast %1113 : f32 to vector<24x16xf32>
      %1115 = arith.mulf %1114, %990 : vector<24x16xf32>
      %c78_371 = arith.constant 78 : index
      %1116 = memref.load %arg2[%c78_371] : memref<98xf32, #tpu.memory_space<smem>>
      %1117 = vector.broadcast %1116 : f32 to vector<24x16xf32>
      %1118 = arith.mulf %1117, %991 : vector<24x16xf32>
      %1119 = arith.addf %1115, %1118 : vector<24x16xf32>
      %c79_372 = arith.constant 79 : index
      %1120 = memref.load %arg2[%c79_372] : memref<98xf32, #tpu.memory_space<smem>>
      %1121 = vector.broadcast %1120 : f32 to vector<24x16xf32>
      %1122 = arith.mulf %1121, %992 : vector<24x16xf32>
      %1123 = arith.addf %1119, %1122 : vector<24x16xf32>
      %c80_373 = arith.constant 80 : index
      %1124 = memref.load %arg2[%c80_373] : memref<98xf32, #tpu.memory_space<smem>>
      %1125 = vector.broadcast %1124 : f32 to vector<24x16xf32>
      %1126 = arith.mulf %1125, %993 : vector<24x16xf32>
      %1127 = arith.addf %1123, %1126 : vector<24x16xf32>
      %c81_374 = arith.constant 81 : index
      %1128 = memref.load %arg2[%c81_374] : memref<98xf32, #tpu.memory_space<smem>>
      %1129 = vector.broadcast %1128 : f32 to vector<24x16xf32>
      %1130 = arith.mulf %1129, %994 : vector<24x16xf32>
      %1131 = arith.addf %1127, %1130 : vector<24x16xf32>
      %c82_375 = arith.constant 82 : index
      %1132 = memref.load %arg2[%c82_375] : memref<98xf32, #tpu.memory_space<smem>>
      %1133 = vector.broadcast %1132 : f32 to vector<24x16xf32>
      %1134 = arith.mulf %1133, %995 : vector<24x16xf32>
      %1135 = arith.addf %1131, %1134 : vector<24x16xf32>
      %c83_376 = arith.constant 83 : index
      %1136 = memref.load %arg2[%c83_376] : memref<98xf32, #tpu.memory_space<smem>>
      %1137 = vector.broadcast %1136 : f32 to vector<24x16xf32>
      %1138 = arith.mulf %1137, %996 : vector<24x16xf32>
      %1139 = arith.addf %1135, %1138 : vector<24x16xf32>
      %1140 = vector.extract_strided_slice %1139 {offsets = [4, 0], sizes = [16, 16], strides = [1, 1]} : vector<24x16xf32> to vector<16x16xf32>
      %1141 = arith.addf %1112, %1140 : vector<16x16xf32>
      %c84_377 = arith.constant 84 : index
      %1142 = memref.load %arg2[%c84_377] : memref<98xf32, #tpu.memory_space<smem>>
      %1143 = vector.broadcast %1142 : f32 to vector<24x16xf32>
      %1144 = arith.mulf %1143, %990 : vector<24x16xf32>
      %c85_378 = arith.constant 85 : index
      %1145 = memref.load %arg2[%c85_378] : memref<98xf32, #tpu.memory_space<smem>>
      %1146 = vector.broadcast %1145 : f32 to vector<24x16xf32>
      %1147 = arith.mulf %1146, %991 : vector<24x16xf32>
      %1148 = arith.addf %1144, %1147 : vector<24x16xf32>
      %c86_379 = arith.constant 86 : index
      %1149 = memref.load %arg2[%c86_379] : memref<98xf32, #tpu.memory_space<smem>>
      %1150 = vector.broadcast %1149 : f32 to vector<24x16xf32>
      %1151 = arith.mulf %1150, %992 : vector<24x16xf32>
      %1152 = arith.addf %1148, %1151 : vector<24x16xf32>
      %c87_380 = arith.constant 87 : index
      %1153 = memref.load %arg2[%c87_380] : memref<98xf32, #tpu.memory_space<smem>>
      %1154 = vector.broadcast %1153 : f32 to vector<24x16xf32>
      %1155 = arith.mulf %1154, %993 : vector<24x16xf32>
      %1156 = arith.addf %1152, %1155 : vector<24x16xf32>
      %c88_381 = arith.constant 88 : index
      %1157 = memref.load %arg2[%c88_381] : memref<98xf32, #tpu.memory_space<smem>>
      %1158 = vector.broadcast %1157 : f32 to vector<24x16xf32>
      %1159 = arith.mulf %1158, %994 : vector<24x16xf32>
      %1160 = arith.addf %1156, %1159 : vector<24x16xf32>
      %c89_382 = arith.constant 89 : index
      %1161 = memref.load %arg2[%c89_382] : memref<98xf32, #tpu.memory_space<smem>>
      %1162 = vector.broadcast %1161 : f32 to vector<24x16xf32>
      %1163 = arith.mulf %1162, %995 : vector<24x16xf32>
      %1164 = arith.addf %1160, %1163 : vector<24x16xf32>
      %c90_383 = arith.constant 90 : index
      %1165 = memref.load %arg2[%c90_383] : memref<98xf32, #tpu.memory_space<smem>>
      %1166 = vector.broadcast %1165 : f32 to vector<24x16xf32>
      %1167 = arith.mulf %1166, %996 : vector<24x16xf32>
      %1168 = arith.addf %1164, %1167 : vector<24x16xf32>
      %1169 = vector.extract_strided_slice %1168 {offsets = [5, 0], sizes = [16, 16], strides = [1, 1]} : vector<24x16xf32> to vector<16x16xf32>
      %1170 = arith.addf %1141, %1169 : vector<16x16xf32>
      %c91_384 = arith.constant 91 : index
      %1171 = memref.load %arg2[%c91_384] : memref<98xf32, #tpu.memory_space<smem>>
      %1172 = vector.broadcast %1171 : f32 to vector<24x16xf32>
      %1173 = arith.mulf %1172, %990 : vector<24x16xf32>
      %c92_385 = arith.constant 92 : index
      %1174 = memref.load %arg2[%c92_385] : memref<98xf32, #tpu.memory_space<smem>>
      %1175 = vector.broadcast %1174 : f32 to vector<24x16xf32>
      %1176 = arith.mulf %1175, %991 : vector<24x16xf32>
      %1177 = arith.addf %1173, %1176 : vector<24x16xf32>
      %c93_386 = arith.constant 93 : index
      %1178 = memref.load %arg2[%c93_386] : memref<98xf32, #tpu.memory_space<smem>>
      %1179 = vector.broadcast %1178 : f32 to vector<24x16xf32>
      %1180 = arith.mulf %1179, %992 : vector<24x16xf32>
      %1181 = arith.addf %1177, %1180 : vector<24x16xf32>
      %c94_387 = arith.constant 94 : index
      %1182 = memref.load %arg2[%c94_387] : memref<98xf32, #tpu.memory_space<smem>>
      %1183 = vector.broadcast %1182 : f32 to vector<24x16xf32>
      %1184 = arith.mulf %1183, %993 : vector<24x16xf32>
      %1185 = arith.addf %1181, %1184 : vector<24x16xf32>
      %c95_388 = arith.constant 95 : index
      %1186 = memref.load %arg2[%c95_388] : memref<98xf32, #tpu.memory_space<smem>>
      %1187 = vector.broadcast %1186 : f32 to vector<24x16xf32>
      %1188 = arith.mulf %1187, %994 : vector<24x16xf32>
      %1189 = arith.addf %1185, %1188 : vector<24x16xf32>
      %c96_389 = arith.constant 96 : index
      %1190 = memref.load %arg2[%c96_389] : memref<98xf32, #tpu.memory_space<smem>>
      %1191 = vector.broadcast %1190 : f32 to vector<24x16xf32>
      %1192 = arith.mulf %1191, %995 : vector<24x16xf32>
      %1193 = arith.addf %1189, %1192 : vector<24x16xf32>
      %c97_390 = arith.constant 97 : index
      %1194 = memref.load %arg2[%c97_390] : memref<98xf32, #tpu.memory_space<smem>>
      %1195 = vector.broadcast %1194 : f32 to vector<24x16xf32>
      %1196 = arith.mulf %1195, %996 : vector<24x16xf32>
      %1197 = arith.addf %1193, %1196 : vector<24x16xf32>
      %1198 = vector.extract_strided_slice %1197 {offsets = [6, 0], sizes = [16, 16], strides = [1, 1]} : vector<24x16xf32> to vector<16x16xf32>
      %1199 = arith.addf %1170, %1198 : vector<16x16xf32>
      %1200 = arith.negf %1199 : vector<16x16xf32>
      %1201 = math.exp %1200 : vector<16x16xf32>
      %cst_391 = arith.constant 1.000000e+00 : f32
      %1202 = vector.broadcast %cst_391 : f32 to vector<16x16xf32>
      %1203 = arith.addf %1202, %1201 : vector<16x16xf32>
      %1204 = arith.divf %1202, %1203 : vector<16x16xf32>
      %c1_392 = arith.constant 1 : index
      %c0_393 = arith.constant 0 : index
      %c0_394 = arith.constant 0 : index
      %c0_395 = arith.constant 0 : index
      %1205 = vector.load %arg4[%c1_392, %c0_393, %c0_394, %c0_395] : memref<2x1x16x16xf32, #tpu.memory_space<vmem>>, vector<1x1x16x16xf32>
      %1206 = vector.shape_cast %1205 : vector<1x1x16x16xf32> to vector<16x16xf32>
      %1207 = vector.shape_cast %1204 : vector<16x16xf32> to vector<1x1x16x16xf32>
      tpu.vector_store %arg4[%c1_392, %c0_393, %c0_394, %c0_395], %1207 {strides = array<i32>} : memref<2x1x16x16xf32, #tpu.memory_space<vmem>>, vector<1x1x16x16xf32>,
    } else {
    }
    return
  }
  func.func @transform_0(%arg0: i32, %arg1: i32) -> i32 {
    %c0_i32 = arith.constant 0 : i32
    %c0_i32_0 = arith.constant 0 : i32
    return %c0_i32 : i32
  }
  func.func @transform_1(%arg0: i32, %arg1: i32) -> (i32, i32, i32) {
    %c0_i32 = arith.constant 0 : i32
    %c0_i32_0 = arith.constant 0 : i32
    return %arg0, %arg1, %c0_i32 : i32, i32, i32
  }
  func.func @transform_2(%arg0: i32, %arg1: i32) -> (i32, i32, i32, i32) {
    %c0_i32 = arith.constant 0 : i32
    %c0_i32_0 = arith.constant 0 : i32
    %c0_i32_1 = arith.constant 0 : i32
    %c0_i32_2 = arith.constant 0 : i32
    return %arg0, %c0_i32, %c0_i32_0, %c0_i32_1 : i32, i32, i32, i32
  }
}

</mosaic_0001>

<bundles_post_ra>
// kernel: tpu_custom_call.1
= control target key start
LH: loop header
LB: loop body
LE: loop exit
PB: predicated region body
PF: predicated region fallthrough
CT: control target
= control target key end

     0   :  { %7 = vsyncpa [#allocation8], 0  ;;  %s6997_s0 = inlined_call_operand.hbm [shape: f32[98], index: 0, kind: input, shape index: {}]   ;;  %s6998_s1 = inlined_call_operand.hbm [shape: f32[2,4,256], index: 1, kind: input, shape index: {}]   ;;  %s6999_s2 = inlined_call_operand.hbm [shape: f32[2,1,16,16], index: 2, kind: output, shape index: {}]  }
   0x1   :  { %8 = vsyncpa [#allocation6], 0 }
   0x2   :  { %9 = vsyncpa [#allocation7], 0  ;;  %s4444_s9 = smov [#allocation5]   ;;  %s4445_s12 = smov [#allocation9]  }
   0x3   :  { %17 = dma.hbm_to_smem %s6997_s0, 16, %s4444_s9, [#allocation8]  }
   0x4   :  { %s23_s13 = sshll.u32 %s4445_s12, 4  ;;  %s24_s13 = int_to_ptr.vmem [resolvable:$true] %s23_s13 }
   0x5   :  { %s4406_s14 = scalar_lea.vmem %s24_s13, 256  ;;  %p4411_p1 = scmp.lt.s32.totalorder %s24_s13, %s24_s13 }
   0x6   :  { %p4407_p0 = scmp.ne.s32.totalorder %s24_s13, %s4406_s14  ;;  %p4412_p2 = scmp.lt.s32.totalorder %s4406_s14, %s4406_s14 }
   0x8   :  { %p4413_p3 = por %p4412_p2, %p4411_p1 }
   0xa   :  { %p4414_p4 = pnand %p4413_p3, %p4407_p0 }
   0xc   :  { %4417 = shalt.err (!%p4414_p4)
}
   0xd   :  { %s4446_s15 = smov 128   ;;  %s4447_s16 = smov 8  }
   0xe   :  { %29 = dma.hbm_to_vmem [thread:$0]  %s6998_s1, 256, %s24_s13, [#allocation6], %s4446_s15, %s4446_s15, %s4447_s16  }
   0xf   :  { %4438 = dma.done.wait [#allocation8], 16  }
  0x10   :  { %4439 = vsyncadd [#allocation8], 4294967280 }
  0x11   :  { %4440 = dma.done.wait [#allocation6], 256  }
  0x12   :  { %4441 = vsyncadd [#allocation6], 4294967040 }
  0x13   :  { %36 = sfence }
  0x14   :  { %vm89_vm0 = vcmask 23552   ;;  %v4448_v0 = vmov -inf   ;;  %v4449_v1 = vmov 0.0   ;;  %vm92_vm1 = vcmask 1047704   ;;  %v49_v2 = vld [vmem:[#allocation9] sm:$0xff]  ;;  %s4450_s0 = smov 115  }
  0x15   :  { %45 = vst [vmem:[#allocation3] sm:$0xff] %v4448_v0  ;;  %46 = vst [vmem:[#allocation3 + $0x18] sm:$0xff] %v4448_v0  ;;  %v53_v3 = vcombine.high %v49_v2, %v49_v2  ;;  %s4451_s1 = smov 3   ;;  %s4452_s19 = smov 99   ;;  %vm136_vm2 = vcmask 147480   ;;  %vm486_vm3 = vcmask 1046528  }
  0x16   :  { %47 = vst [vmem:[#allocation3 + $0x8] sm:$0xff] %v4448_v0  ;;  %48 = vst [vmem:[#allocation3 + $0x10] sm:$0xff] %v4448_v0  ;;  %s4453_s20 = smov 83   ;;  %s4454_s21 = smov 67   ;;  %vm624_vm4 = vcmask 1045504   ;;  %vm762_vm5 = vcmask 1044480  }
  0x17   :  { %41 = vst [vmem:[#allocation2 + $0x10] sm:$0xff] %v4449_v1  ;;  %42 = vst [vmem:[#allocation2] sm:$0xff] %v4449_v1  ;;  %s4455_s22 = smov 51   ;;  %s4456_s23 = smov 35   ;;  %vm900_vm6 = vcmask 1043456   ;;  %vm1038_vm7 = vcmask 1042432  }
  0x18   :  { %43 = vst [vmem:[#allocation2 + $0x18] sm:$0xff] %v4449_v1  ;;  %44 = vst [vmem:[#allocation2 + $0x8] sm:$0xff] %v4449_v1  ;;  %s4457_s24 = smov 19   ;;  %s4541_s25 = sld [smem:[#allocation5 + $0x1]]  ;;  %vm1176_vm8 = vcmask 1041408   ;;  %vm2113_vm9 = vcmask 130048  }
  0x19   :  { %87 = vst [vmem:[#allocation4] sm:$0x7] %v4449_v1  ;;  %88 = vst [vmem:[#allocation4 + $0x13] sm:$0x1f] %v4449_v1  ;;  %s4545_s26 = sld [smem:[#allocation5 + $0x2]]  ;;  %s4458_s29 = smov 127  }
  0x1a   :  { %96 = vst [vmem:[#allocation4 + $0x18] sm:$0x7] %v4449_v1  ;;  %97 = vst [vmem:[#allocation4 + $0x2b] sm:$0x1f] %v4449_v1  ;;  %s4550_s27 = sld [smem:[#allocation5 + $0x3]]  ;;  %s4459_s3 = smov 126  }
  0x1b   :  { %98 = vst.msk [vmem:[#allocation4 + $0x1b] sm:$0xff] %vm89_vm0, %v4449_v1  ;;  %90 = vst.msk [vmem:[#allocation4 + $0x3] sm:$0xff] %vm89_vm0, %v4449_v1  ;;  %s4558_s28 = sld [smem:[#allocation5 + $0x4]]  ;;  %s4460_s5 = smov 125  }
  0x1c   :  { %91 = vst.msk [vmem:[#allocation4 + $0xb] sm:$0xff] %vm89_vm0, %v4449_v1  ;;  %99 = vst.msk [vmem:[#allocation4 + $0x23] sm:$0xff] %vm89_vm0, %v4449_v1  ;;  %v59_v4 = vld [vmem:[#allocation3] sm:$0xf]  ;;  %v60_v6 = vld [vmem:[#allocation3 + $0x18] sm:$0xf] }
  0x1d   :  { %100 = vst.msk [vmem:[#allocation4 + $0x1b] sm:$0xff] %vm92_vm1, %v4449_v1  ;;  %93 = vst.msk [vmem:[#allocation4 + $0x3] sm:$0xff] %vm92_vm1, %v4449_v1  ;;  %v61_v7 = vmax.f32 %v59_v4, %v49_v2  ;;  %v62_v9 = vmax.f32 %v60_v6, %v53_v3  ;;  %s4565_s30 = sld [smem:[#allocation5 + $0x5]]  ;;  %s4461_s7 = smov 124  }
  0x1e   :  { %94 = vst.msk [vmem:[#allocation4 + $0xb] sm:$0xff] %vm92_vm1, %v4449_v1  ;;  %101 = vst.msk [vmem:[#allocation4 + $0x23] sm:$0xff] %vm92_vm1, %v4449_v1  ;;  %v50_v5 = vld [vmem:[#allocation2 + $0x10] sm:$0xf]  ;;  %v51_v10 = vld [vmem:[#allocation2] sm:$0xf]  ;;  %v273_v62 = vstv %s4541_s25 }
  0x1f   :  { %v55_v8 = vadd.f32 %v50_v5, %v49_v2  ;;  %v56_v11 = vadd.f32 %v53_v3, %v51_v10  ;;  %63 = vst [vmem:[#allocation3] sm:$0xf] %v61_v7  ;;  %64 = vst [vmem:[#allocation3 + $0x18] sm:$0xf] %v62_v9  ;;  %v287_v3 = vstv %s4545_s26  ;;  %s4572_s4 = sld [smem:[#allocation5 + $0x6]]  ;;  %s4462_s8 = smov 123  }
  0x20   :  { %v301_v7 = vstv %s4550_s27  ;;  %s4148_s6 = sld [smem:[#allocation5 + $0x8]]  ;;  %s4463_s9 = smov 122  }
  0x21   :  { %57 = vst [vmem:[#allocation2 + $0x10] sm:$0xf] %v55_v8  ;;  %58 = vst [vmem:[#allocation2] sm:$0xf] %v56_v11  ;;  %v315_v11 = vstv %s4558_s28  ;;  %s4149_s10 = sld [smem:[#allocation5 + $0x9]] }
  0x22   :  { %s4150_s11 = sld [smem:[#allocation5 + $0xa]] }
  0x23   :  { %s4151_s12 = sld [smem:[#allocation5 + $0xb]] }
  0x24   :  { %s4152_s13 = sld [smem:[#allocation5 + $0xc]] }
  0x25   :  { %s4153_s14 = sld [smem:[#allocation5 + $0xd]] }
  0x26   :  { %v118_v12 = vld [vmem:[#allocation3] sm:$0xff]  ;;  %v119_v27 = vld [vmem:[#allocation3 + $0x18] sm:$0xff]  ;;  %s4155_s17 = sld [smem:[#allocation5 + $0xf]] }
  0x27   :  { %v120_v14 = vrot.slane %v118_v12, 4  ;;  %v126_v29 = vrot.slane %v119_v27, 4  ;;  %s4156_s18 = sld [smem:[#allocation5 + $0x10]] }
  0x28   :  { %v102_v13 = vld [vmem:[#allocation2 + $0x10] sm:$0xff]  ;;  %v103_v28 = vld [vmem:[#allocation2] sm:$0xff]  ;;  %s4157_s25 = sld [smem:[#allocation5 + $0x11]] }
  0x29   :  { %v104_v15 = vrot.slane %v102_v13, 4  ;;  %v121_v16 = vmax.f32 %v118_v12, %v120_v14  ;;  %v110_v30 = vrot.slane %v103_v28, 4  ;;  %v127_v31 = vmax.f32 %v119_v27, %v126_v29  ;;  %s4158_s26 = sld [smem:[#allocation5 + $0x12]] }
  0x2a   :  { %s4159_s27 = sld [smem:[#allocation5 + $0x13]] }
  0x2b   :  { %v105_v17 = vadd.f32 %v104_v15, %v102_v13  ;;  %v122_v18 = vrot.slane %v121_v16, 2  ;;  %v111_v32 = vadd.f32 %v110_v30, %v103_v28  ;;  %v128_v33 = vrot.slane %v127_v31, 2  ;;  %s4160_s28 = sld [smem:[#allocation5 + $0x14]] }
  0x2c   :  { %v329_v15 = vstv %s4565_s30  ;;  %s4162_s30 = sld [smem:[#allocation5 + $0x16]] }
  0x2d   :  { %v106_v19 = vrot.slane %v105_v17, 2  ;;  %v123_v20 = vmax.f32 %v121_v16, %v122_v18  ;;  %v112_v34 = vrot.slane %v111_v32, 2  ;;  %v129_v35 = vmax.f32 %v127_v31, %v128_v33 }
  0x2f   :  { %v107_v21 = vadd.f32 %v106_v19, %v105_v17  ;;  %v124_v22 = vrot.slane %v123_v20, 1  ;;  %v113_v36 = vadd.f32 %v112_v34, %v111_v32  ;;  %v130_v37 = vrot.slane %v129_v35, 1 }
  0x30   :  { %v384_v32 = vstv %s4149_s10  ;;  %s4165_s10 = sld [smem:[#allocation5 + $0x19]] }
  0x31   :  { %v108_v23 = vrot.slane %v107_v21, 1  ;;  %v125_v24 = vmax.f32 %v123_v20, %v124_v22  ;;  %v114_v38 = vrot.slane %v113_v36, 1  ;;  %v131_v39 = vmax.f32 %v129_v35, %v130_v37 }
  0x32   :  { %v404_v35 = vstv %s4150_s11  ;;  %s4166_s11 = sld [smem:[#allocation5 + $0x1a]] }
  0x33   :  { %v109_v25 = vadd.f32 %v108_v23, %v107_v21  ;;  %147 = vrot.lane.b32.xlu1 %v125_v24, %s4450_s0  ;;  %139 = vrot.lane.b32.xlu0 %v125_v24, %s4451_s1  ;;  %v115_v40 = vadd.f32 %v114_v38, %v113_v36  ;;  %v343_v21 = vstv %s4572_s4  ;;  %s4163_s4 = sld [smem:[#allocation5 + $0x17]] }
  0x35   :  { %v116_v26 = vmul.f32 0.25, %v109_v25  ;;  %v117_v41 = vmul.f32 0.25, %v115_v40  ;;  %v424_v40 = vstv %s4151_s12  ;;  %s4167_s12 = sld [smem:[#allocation5 + $0x1b]] }
  0x37   :  { %155 = vrot.lane.b32.xlu1 %v125_v24, %s4452_s19  ;;  %133 = vrot.lane.b32.xlu0 %v116_v26, %s4451_s1 }
  0x3b   :  { %163 = vrot.lane.b32.xlu1 %v125_v24, %s4453_s20  ;;  %151 = vrot.lane.b32.xlu0 %v116_v26, %s4452_s19 }
  0x3f   :  { %171 = vrot.lane.b32.xlu1 %v125_v24, %s4454_s21  ;;  %159 = vrot.lane.b32.xlu0 %v116_v26, %s4453_s20 }
  0x43   :  { %179 = vrot.lane.b32.xlu1 %v125_v24, %s4455_s22  ;;  %167 = vrot.lane.b32.xlu0 %v116_v26, %s4454_s21 }
  0x47   :  { %187 = vrot.lane.b32.xlu1 %v125_v24, %s4456_s23  ;;  %175 = vrot.lane.b32.xlu0 %v116_v26, %s4455_s22 }
  0x4b   :  { %195 = vrot.lane.b32.xlu1 %v125_v24, %s4457_s24  ;;  %183 = vrot.lane.b32.xlu0 %v116_v26, %s4456_s23 }
  0x4f   :  { %205 = vrot.lane.b32.xlu1 %v131_v39, %s4451_s1  ;;  %191 = vrot.lane.b32.xlu0 %v116_v26, %s4457_s24 }
  0x53   :  { %143 = vrot.lane.b32.xlu1 %v116_v26, %s4450_s0  ;;  %200 = vrot.lane.b32.xlu0 %v117_v41, %s4451_s1  ;;  %v364_v26 = vstv %s4148_s6  ;;  %s4164_s6 = sld [smem:[#allocation5 + $0x18]] }
  0x57   :  { %213 = vrot.lane.b32.xlu1 %v131_v39, %s4450_s0  ;;  %209 = vrot.lane.b32.xlu0 %v117_v41, %s4450_s0 }
  0x5b   :  { %221 = vrot.lane.b32.xlu1 %v131_v39, %s4452_s19  ;;  %217 = vrot.lane.b32.xlu0 %v117_v41, %s4452_s19 }
  0x5f   :  { %229 = vrot.lane.b32.xlu1 %v131_v39, %s4453_s20  ;;  %225 = vrot.lane.b32.xlu0 %v117_v41, %s4453_s20 }
  0x63   :  { %237 = vrot.lane.b32.xlu1 %v131_v39, %s4454_s21  ;;  %233 = vrot.lane.b32.xlu0 %v117_v41, %s4454_s21 }
  0x67   :  { %241 = vrot.lane.b32.xlu0 %v117_v41, %s4455_s22  ;;  %245 = vrot.lane.b32.xlu1 %v131_v39, %s4455_s22 }
  0x6b   :  { %249 = vrot.lane.b32.xlu0 %v117_v41, %s4456_s23  ;;  %253 = vrot.lane.b32.xlu1 %v131_v39, %s4456_s23 }
  0x6f   :  { %257 = vrot.lane.b32.xlu0 %v117_v41, %s4457_s24  ;;  %261 = vrot.lane.b32.xlu1 %v131_v39, %s4457_s24 }
  0xa5   :  { %v148_v42 = vpop.permute.xlu1 %147  ;;  %v140_v43 = vpop.permute.xlu0 %139 }
  0xa6   :  { %150 = vst.msk [vmem:[#allocation4 + $0x1c] sm:$0x1] %vm136_vm2, %v148_v42  ;;  %142 = vst.msk [vmem:[#allocation4 + $0x1b] sm:$0x1] %vm136_vm2, %v140_v43  ;;  %v444_v43 = vstv %s4152_s13  ;;  %s4169_s13 = sld [smem:[#allocation5 + $0x1d]] }
  0xa9   :  { %v156_v44 = vpop.permute.xlu1 %155  ;;  %v134_v45 = vpop.permute.xlu0 %133 }
  0xaa   :  { %158 = vst.msk [vmem:[#allocation4 + $0x1d] sm:$0x1] %vm136_vm2, %v156_v44  ;;  %137 = vst.msk [vmem:[#allocation4 + $0x3] sm:$0x1] %vm136_vm2, %v134_v45 }
  0xad   :  { %v164_v46 = vpop.permute.xlu1 %163  ;;  %v152_v47 = vpop.permute.xlu0 %151 }
  0xae   :  { %166 = vst.msk [vmem:[#allocation4 + $0x1e] sm:$0x1] %vm136_vm2, %v164_v46  ;;  %154 = vst.msk [vmem:[#allocation4 + $0x5] sm:$0x1] %vm136_vm2, %v152_v47 }
  0xb1   :  { %v172_v48 = vpop.permute.xlu1 %171  ;;  %v160_v49 = vpop.permute.xlu0 %159 }
  0xb2   :  { %174 = vst.msk [vmem:[#allocation4 + $0x1f] sm:$0x1] %vm136_vm2, %v172_v48  ;;  %162 = vst.msk [vmem:[#allocation4 + $0x6] sm:$0x1] %vm136_vm2, %v160_v49  ;;  %v464_v48 = vstv %s4153_s14  ;;  %s4170_s14 = sld [smem:[#allocation5 + $0x1e]] }
  0xb5   :  { %v180_v50 = vpop.permute.xlu1 %179  ;;  %v168_v51 = vpop.permute.xlu0 %167 }
  0xb6   :  { %182 = vst.msk [vmem:[#allocation4 + $0x20] sm:$0x1] %vm136_vm2, %v180_v50  ;;  %170 = vst.msk [vmem:[#allocation4 + $0x7] sm:$0x1] %vm136_vm2, %v168_v51  ;;  %v502_v51 = vstv %s4155_s17  ;;  %s4171_s17 = sld [smem:[#allocation5 + $0x1f]] }
  0xb9   :  { %v188_v52 = vpop.permute.xlu1 %187  ;;  %v176_v53 = vpop.permute.xlu0 %175 }
  0xba   :  { %190 = vst.msk [vmem:[#allocation4 + $0x21] sm:$0x1] %vm136_vm2, %v188_v52  ;;  %178 = vst.msk [vmem:[#allocation4 + $0x8] sm:$0x1] %vm136_vm2, %v176_v53 }
  0xbd   :  { %v196_v54 = vpop.permute.xlu1 %195  ;;  %v184_v55 = vpop.permute.xlu0 %183 }
  0xbe   :  { %198 = vst.msk [vmem:[#allocation4 + $0x22] sm:$0x1] %vm136_vm2, %v196_v54  ;;  %186 = vst.msk [vmem:[#allocation4 + $0x9] sm:$0x1] %vm136_vm2, %v184_v55 }
  0xc1   :  { %v206_v56 = vpop.permute.xlu1 %205  ;;  %v192_v57 = vpop.permute.xlu0 %191 }
  0xc2   :  { %208 = vst.msk [vmem:[#allocation4 + $0x23] sm:$0x1] %vm136_vm2, %v206_v56  ;;  %194 = vst.msk [vmem:[#allocation4 + $0xa] sm:$0x1] %vm136_vm2, %v192_v57  ;;  %v522_v56 = vstv %s4156_s18  ;;  %s4172_s18 = sld [smem:[#allocation5 + $0x20]] }
  0xc5   :  { %v144_v58 = vpop.permute.xlu1 %143  ;;  %v201_v59 = vpop.permute.xlu0 %200 }
  0xc6   :  { %146 = vst.msk [vmem:[#allocation4 + $0x4] sm:$0x1] %vm136_vm2, %v144_v58  ;;  %203 = vst.msk [vmem:[#allocation4 + $0xb] sm:$0x1] %vm136_vm2, %v201_v59  ;;  %v542_v59 = vstv %s4157_s25  ;;  %s4173_s25 = sld [smem:[#allocation5 + $0x21]] }
  0xc9   :  { %v214_v60 = vpop.permute.xlu1 %213  ;;  %v210_v61 = vpop.permute.xlu0 %209 }
  0xca   :  { %216 = vst.msk [vmem:[#allocation4 + $0x24] sm:$0x1] %vm136_vm2, %v214_v60  ;;  %212 = vst.msk [vmem:[#allocation4 + $0xc] sm:$0x1] %vm136_vm2, %v210_v61 }
  0xcd   :  { %v4552_v63 = vld [vmem:[#allocation4] sm:$0xff]  ;;  %v222_v0 = vpop.permute.xlu1 %221  ;;  %v218_v1 = vpop.permute.xlu0 %217 }
  0xce   :  { %224 = vst.msk [vmem:[#allocation4 + $0x25] sm:$0x1] %vm136_vm2, %v222_v0  ;;  %220 = vst.msk [vmem:[#allocation4 + $0xd] sm:$0x1] %vm136_vm2, %v218_v1  ;;  %v274_v2 = vmul.f32 %v273_v62, %v4552_v63  ;;  %v288_v6 = vmul.f32 %v287_v3, %v4552_v63  ;;  %v302_v10 = vmul.f32 %v301_v7, %v4552_v63  ;;  %v562_v1 = vstv %s4158_s26  ;;  %s4174_s26 = sld [smem:[#allocation5 + $0x22]] }
  0xcf   :  { %v316_v14 = vmul.f32 %v315_v11, %v4552_v63  ;;  %v330_v19 = vmul.f32 %v329_v15, %v4552_v63  ;;  %v344_v24 = vmul.f32 %v343_v21, %v4552_v63  ;;  %v365_v27 = vmul.f32 %v364_v26, %v4552_v63 }
  0xd0   :  { %278 = vrot.lane.b32.xlu0 %v274_v2, %s4458_s29  ;;  %v405_v37 = vmul.f32 %v404_v35, %v4552_v63  ;;  %v385_v41 = vmul.f32 %v384_v32, %v4552_v63  ;;  %v445_v45 = vmul.f32 %v444_v43, %v4552_v63  ;;  %v425_v49 = vmul.f32 %v424_v40, %v4552_v63 }
  0xd1   :  { %v230_v4 = vpop.permute.xlu1 %229  ;;  %v226_v5 = vpop.permute.xlu0 %225  ;;  %v503_v53 = vmul.f32 %v502_v51, %v4552_v63  ;;  %v465_v57 = vmul.f32 %v464_v48, %v4552_v63  ;;  %v543_v61 = vmul.f32 %v542_v59, %v4552_v63  ;;  %v523_v2 = vmul.f32 %v522_v56, %v4552_v63 }
  0xd2   :  { %232 = vst.msk [vmem:[#allocation4 + $0x26] sm:$0x1] %vm136_vm2, %v230_v4  ;;  %228 = vst.msk [vmem:[#allocation4 + $0xe] sm:$0x1] %vm136_vm2, %v226_v5  ;;  %v582_v4 = vstv %s4159_s27  ;;  %s4176_s27 = sld [smem:[#allocation5 + $0x24]] }
  0xd4   :  { %292 = vrot.lane.b32.xlu0 %v288_v6, %s4459_s3  ;;  %v583_v6 = vmul.f32 %v582_v4, %v4552_v63 }
  0xd5   :  { %v238_v8 = vpop.permute.xlu1 %237  ;;  %v234_v9 = vpop.permute.xlu0 %233 }
  0xd6   :  { %240 = vst.msk [vmem:[#allocation4 + $0x27] sm:$0x1] %vm136_vm2, %v238_v8  ;;  %236 = vst.msk [vmem:[#allocation4 + $0xf] sm:$0x1] %vm136_vm2, %v234_v9  ;;  %v602_v9 = vstv %s4160_s28  ;;  %s4177_s28 = sld [smem:[#allocation5 + $0x25]] }
  0xd8   :  { %306 = vrot.lane.b32.xlu0 %v302_v10, %s4460_s5  ;;  %v563_v10 = vmul.f32 %v562_v1, %v4552_v63 }
  0xd9   :  { %v242_v12 = vpop.permute.xlu0 %241  ;;  %v246_v13 = vpop.permute.xlu1 %245 }
  0xda   :  { %244 = vst.msk [vmem:[#allocation4 + $0x10] sm:$0x1] %vm136_vm2, %v242_v12  ;;  %248 = vst.msk [vmem:[#allocation4 + $0x28] sm:$0x1] %vm136_vm2, %v246_v13  ;;  %v640_v12 = vstv %s4162_s30  ;;  %s4178_s30 = sld [smem:[#allocation5 + $0x26]] }
  0xdc   :  { %320 = vrot.lane.b32.xlu0 %v316_v14, %s4461_s7  ;;  %v641_v14 = vmul.f32 %v640_v12, %v4552_v63 }
  0xdd   :  { %v4580_v16 = vld [vmem:[#allocation4 + $0x8] sm:$0xff]  ;;  %v250_v17 = vpop.permute.xlu0 %249  ;;  %v254_v18 = vpop.permute.xlu1 %253 }
  0xde   :  { %252 = vst.msk [vmem:[#allocation4 + $0x11] sm:$0x1] %vm136_vm2, %v250_v17  ;;  %v275_v20 = vmul.f32 %v273_v62, %v4580_v16  ;;  %256 = vst.msk [vmem:[#allocation4 + $0x29] sm:$0x1] %vm136_vm2, %v254_v18  ;;  %v289_v25 = vmul.f32 %v287_v3, %v4580_v16  ;;  %v303_v28 = vmul.f32 %v301_v7, %v4580_v16  ;;  %v660_v18 = vstv %s4163_s4  ;;  %s4179_s4 = sld [smem:[#allocation5 + $0x27]] }
  0xdf   :  { %v317_v30 = vmul.f32 %v315_v11, %v4580_v16  ;;  %v331_v33 = vmul.f32 %v329_v15, %v4580_v16  ;;  %v386_v34 = vmul.f32 %v384_v32, %v4580_v16  ;;  %v345_v36 = vmul.f32 %v343_v21, %v4580_v16 }
  0xe0   :  { %334 = vrot.lane.b32.xlu0 %v330_v19, %s4462_s8  ;;  %280 = vrot.lane.b32.xlu1 %v275_v20, %s4458_s29  ;;  %v366_v38 = vmul.f32 %v364_v26, %v4580_v16  ;;  %v426_v42 = vmul.f32 %v424_v40, %v4580_v16  ;;  %v406_v46 = vmul.f32 %v404_v35, %v4580_v16  ;;  %v680_v21 = vstv %s4164_s6  ;;  %s4180_s6 = sld [smem:[#allocation5 + $0x28]] }
  0xe1   :  { %v258_v22 = vpop.permute.xlu0 %257  ;;  %v262_v23 = vpop.permute.xlu1 %261  ;;  %v466_v50 = vmul.f32 %v464_v48, %v4580_v16  ;;  %v446_v54 = vmul.f32 %v444_v43, %v4580_v16  ;;  %v524_v58 = vmul.f32 %v522_v56, %v4580_v16  ;;  %v504_v62 = vmul.f32 %v502_v51, %v4580_v16 }
  0xe2   :  { %260 = vst.msk [vmem:[#allocation4 + $0x12] sm:$0x1] %vm136_vm2, %v258_v22  ;;  %264 = vst.msk [vmem:[#allocation4 + $0x2a] sm:$0x1] %vm136_vm2, %v262_v23  ;;  %v564_v3 = vmul.f32 %v562_v1, %v4580_v16  ;;  %v544_v7 = vmul.f32 %v542_v59, %v4580_v16  ;;  %v604_v11 = vmul.f32 %v602_v9, %v4580_v16 }
  0xe3   :  { %v584_v15 = vmul.f32 %v582_v4, %v4580_v16  ;;  %v603_v19 = vmul.f32 %v602_v9, %v4552_v63  ;;  %v662_v20 = vmul.f32 %v660_v18, %v4580_v16  ;;  %v681_v23 = vmul.f32 %v680_v21, %v4552_v63 }
  0xe4   :  { %348 = vrot.lane.b32.xlu0 %v344_v24, %s4463_s9  ;;  %294 = vrot.lane.b32.xlu1 %v289_v25, %s4459_s3  ;;  %v642_v24 = vmul.f32 %v640_v12, %v4580_v16 }
  0xe8   :  { %371 = vrot.lane.b32.xlu0 %v365_v27, %s4458_s29  ;;  %308 = vrot.lane.b32.xlu1 %v303_v28, %s4460_s5  ;;  %v661_v28 = vmul.f32 %v660_v18, %v4552_v63 }
  0xe9   :  { %v4599_v29 = vld [vmem:[#allocation4 + $0x10] sm:$0xff] }
  0xea   :  { %v367_v31 = vmul.f32 %v364_v26, %v4599_v29  ;;  %v407_v39 = vmul.f32 %v404_v35, %v4599_v29  ;;  %v387_v44 = vmul.f32 %v384_v32, %v4599_v29  ;;  %v447_v47 = vmul.f32 %v444_v43, %v4599_v29 }
  0xeb   :  { %v427_v52 = vmul.f32 %v424_v40, %v4599_v29  ;;  %v505_v55 = vmul.f32 %v502_v51, %v4599_v29  ;;  %v467_v60 = vmul.f32 %v464_v48, %v4599_v29  ;;  %v545_v0 = vmul.f32 %v542_v59, %v4599_v29 }
  0xec   :  { %322 = vrot.lane.b32.xlu1 %v317_v30, %s4461_s7  ;;  %375 = vrot.lane.b32.xlu0 %v367_v31, %s4458_s29  ;;  %v525_v5 = vmul.f32 %v522_v56, %v4599_v29  ;;  %v585_v8 = vmul.f32 %v582_v4, %v4599_v29  ;;  %v565_v13 = vmul.f32 %v562_v1, %v4599_v29  ;;  %v700_v26 = vstv %s4165_s10  ;;  %s4181_s10 = sld [smem:[#allocation5 + $0x29]] }
  0xed   :  { %v643_v17 = vmul.f32 %v640_v12, %v4599_v29  ;;  %v605_v22 = vmul.f32 %v602_v9, %v4599_v29  ;;  %v683_v25 = vmul.f32 %v680_v21, %v4599_v29  ;;  %v702_v30 = vmul.f32 %v700_v26, %v4580_v16 }
  0xee   :  { %v720_v31 = vstv %s4166_s11  ;;  %v701_v40 = vmul.f32 %v700_v26, %v4552_v63  ;;  %v798_v51 = vstv %s4170_s14  ;;  %v818_v56 = vstv %s4171_s17  ;;  %s4183_s11 = sld [smem:[#allocation5 + $0x2b]] }
  0xef   :  { %v821_v1 = vmul.f32 %v818_v56, %v4599_v29  ;;  %s4186_s14 = sld [smem:[#allocation5 + $0x2e]] }
  0xf0   :  { %336 = vrot.lane.b32.xlu1 %v331_v33, %s4462_s8  ;;  %393 = vrot.lane.b32.xlu0 %v386_v34, %s4459_s3  ;;  %v663_v33 = vmul.f32 %v660_v18, %v4599_v29  ;;  %v721_v34 = vmul.f32 %v720_v31, %v4552_v63  ;;  %s4187_s17 = sld [smem:[#allocation5 + $0x2f]] }
  0xf4   :  { %350 = vrot.lane.b32.xlu1 %v345_v36, %s4463_s9  ;;  %411 = vrot.lane.b32.xlu0 %v405_v37, %s4460_s5  ;;  %v682_v36 = vmul.f32 %v680_v21, %v4580_v16  ;;  %v723_v37 = vmul.f32 %v720_v31, %v4599_v29 }
  0xf8   :  { %373 = vrot.lane.b32.xlu1 %v366_v38, %s4458_s29  ;;  %415 = vrot.lane.b32.xlu0 %v407_v39, %s4460_s5  ;;  %v740_v38 = vstv %s4167_s12  ;;  %s4184_s12 = sld [smem:[#allocation5 + $0x2c]] }
  0xf9   :  { %v743_v59 = vmul.f32 %v740_v38, %v4599_v29 }
  0xfc   :  { %391 = vrot.lane.b32.xlu1 %v385_v41, %s4459_s3  ;;  %433 = vrot.lane.b32.xlu0 %v426_v42, %s4461_s7  ;;  %v742_v41 = vmul.f32 %v740_v38, %v4580_v16  ;;  %v778_v42 = vstv %s4169_s13  ;;  %s4185_s13 = sld [smem:[#allocation5 + $0x2d]] }
 0x100   :  { %395 = vrot.lane.b32.xlu1 %v387_v44, %s4459_s3  ;;  %451 = vrot.lane.b32.xlu0 %v445_v45, %s4462_s8  ;;  %v703_v45 = vmul.f32 %v700_v26, %v4599_v29 }
 0x104   :  { %413 = vrot.lane.b32.xlu1 %v406_v46, %s4460_s5  ;;  %455 = vrot.lane.b32.xlu0 %v447_v47, %s4462_s8  ;;  %v779_v46 = vmul.f32 %v778_v42, %v4552_v63 }
 0x108   :  { %431 = vrot.lane.b32.xlu1 %v425_v49, %s4461_s7  ;;  %473 = vrot.lane.b32.xlu0 %v466_v50, %s4463_s9  ;;  %v722_v49 = vmul.f32 %v720_v31, %v4580_v16  ;;  %v781_v50 = vmul.f32 %v778_v42, %v4599_v29 }
 0x10c   :  { %435 = vrot.lane.b32.xlu1 %v427_v52, %s4461_s7  ;;  %509 = vrot.lane.b32.xlu0 %v503_v53, %s4458_s29 }
 0x110   :  { %453 = vrot.lane.b32.xlu1 %v446_v54, %s4462_s8  ;;  %513 = vrot.lane.b32.xlu0 %v505_v55, %s4458_s29  ;;  %v741_v54 = vmul.f32 %v740_v38, %v4552_v63  ;;  %v800_v55 = vmul.f32 %v798_v51, %v4580_v16 }
 0x114   :  { %471 = vrot.lane.b32.xlu1 %v465_v57, %s4463_s9  ;;  %531 = vrot.lane.b32.xlu0 %v524_v58, %s4459_s3 }
 0x118   :  { %475 = vrot.lane.b32.xlu1 %v467_v60, %s4463_s9  ;;  %549 = vrot.lane.b32.xlu0 %v543_v61, %s4460_s5  ;;  %v819_v60 = vmul.f32 %v818_v56, %v4552_v63 }
 0x11c   :  { %511 = vrot.lane.b32.xlu1 %v504_v62, %s4458_s29  ;;  %553 = vrot.lane.b32.xlu0 %v545_v0, %s4460_s5  ;;  %v780_v0 = vmul.f32 %v778_v42, %v4580_v16 }
 0x120   :  { %529 = vrot.lane.b32.xlu1 %v523_v2, %s4459_s3  ;;  %571 = vrot.lane.b32.xlu0 %v564_v3, %s4461_s7  ;;  %v838_v2 = vstv %s4172_s18  ;;  %s4188_s18 = sld [smem:[#allocation5 + $0x30]] }
 0x124   :  { %533 = vrot.lane.b32.xlu1 %v525_v5, %s4459_s3  ;;  %589 = vrot.lane.b32.xlu0 %v583_v6, %s4462_s8  ;;  %v799_v5 = vmul.f32 %v798_v51, %v4552_v63  ;;  %v840_v6 = vmul.f32 %v838_v2, %v4580_v16 }
 0x128   :  { %551 = vrot.lane.b32.xlu1 %v544_v7, %s4460_s5  ;;  %593 = vrot.lane.b32.xlu0 %v585_v8, %s4462_s8  ;;  %v858_v7 = vstv %s4173_s25  ;;  %s4911_s25 = sld [smem:[#allocation5 + $0x32]] }
 0x129   :  { %v860_v31 = vmul.f32 %v858_v7, %v4580_v16 }
 0x12c   :  { %569 = vrot.lane.b32.xlu1 %v563_v10, %s4461_s7  ;;  %611 = vrot.lane.b32.xlu0 %v604_v11, %s4463_s9  ;;  %v801_v10 = vmul.f32 %v798_v51, %v4599_v29  ;;  %v859_v11 = vmul.f32 %v858_v7, %v4552_v63 }
 0x130   :  { %573 = vrot.lane.b32.xlu1 %v565_v13, %s4461_s7  ;;  %647 = vrot.lane.b32.xlu0 %v641_v14, %s4458_s29  ;;  %v820_v14 = vmul.f32 %v818_v56, %v4580_v16  ;;  %v976_v56 = vstv %s4179_s4  ;;  %s4967_s4 = sld [smem:[#allocation5 + $0x37]] }
 0x134   :  { %591 = vrot.lane.b32.xlu1 %v584_v15, %s4462_s8  ;;  %651 = vrot.lane.b32.xlu0 %v643_v17, %s4458_s29  ;;  %v861_v15 = vmul.f32 %v858_v7, %v4599_v29  ;;  %v878_v17 = vstv %s4174_s26  ;;  %s4921_s26 = sld [smem:[#allocation5 + $0x33]] }
 0x135   :  { %v880_v21 = vmul.f32 %v878_v17, %v4580_v16  ;;  %v879_v38 = vmul.f32 %v878_v17, %v4552_v63 }
 0x138   :  { %609 = vrot.lane.b32.xlu1 %v603_v19, %s4463_s9  ;;  %669 = vrot.lane.b32.xlu0 %v662_v20, %s4459_s3  ;;  %v839_v20 = vmul.f32 %v838_v2, %v4552_v63 }
 0x13c   :  { %613 = vrot.lane.b32.xlu1 %v605_v22, %s4463_s9  ;;  %687 = vrot.lane.b32.xlu0 %v681_v23, %s4460_s5  ;;  %v916_v22 = vstv %s4176_s27  ;;  %s4934_s27 = sld [smem:[#allocation5 + $0x34]] }
 0x13d   :  { %v917_v26 = vmul.f32 %v916_v22, %v4552_v63 }
 0x140   :  { %649 = vrot.lane.b32.xlu1 %v642_v24, %s4458_s29  ;;  %691 = vrot.lane.b32.xlu0 %v683_v25, %s4460_s5  ;;  %v841_v25 = vmul.f32 %v838_v2, %v4599_v29  ;;  %v996_v2 = vstv %s4180_s6  ;;  %s4197_s6 = sld [smem:[#allocation5 + $0x39]] }
 0x142   :  { %v4689_v27 = vpop.permute.xlu0 %278 }
 0x144   :  { %667 = vrot.lane.b32.xlu1 %v661_v28, %s4459_s3  ;;  %709 = vrot.lane.b32.xlu0 %v702_v30, %s4461_s7 }
 0x146   :  { %v4695_v32 = vpop.permute.xlu0 %292 }
 0x148   :  { %671 = vrot.lane.b32.xlu1 %v663_v33, %s4459_s3  ;;  %727 = vrot.lane.b32.xlu0 %v721_v34, %s4462_s8  ;;  %v919_v33 = vmul.f32 %v916_v22, %v4599_v29  ;;  %v936_v34 = vstv %s4177_s28  ;;  %s4945_s28 = sld [smem:[#allocation5 + $0x35]] }
 0x149   :  { %v939_v7 = vmul.f32 %v936_v34, %v4599_v29 }
 0x14a   :  { %v4701_v35 = vpop.permute.xlu0 %306 }
 0x14c   :  { %689 = vrot.lane.b32.xlu1 %v682_v36, %s4460_s5  ;;  %731 = vrot.lane.b32.xlu0 %v723_v37, %s4462_s8 }
 0x14e   :  { %v4707_v39 = vpop.permute.xlu0 %320 }
 0x150   :  { %707 = vrot.lane.b32.xlu1 %v701_v40, %s4461_s7  ;;  %749 = vrot.lane.b32.xlu0 %v742_v41, %s4463_s9  ;;  %v938_v40 = vmul.f32 %v936_v34, %v4580_v16  ;;  %v956_v41 = vstv %s4178_s30  ;;  %s4956_s30 = sld [smem:[#allocation5 + $0x36]] }
 0x152   :  { %v4713_v43 = vpop.permute.xlu1 %280  ;;  %v4715_v44 = vpop.permute.xlu0 %334 }
 0x153   :  { %7000 = vst [vmem:[#allocation14_spill] sm:$0xff] %v4715_v44 }
 0x154   :  { %711 = vrot.lane.b32.xlu1 %v703_v45, %s4461_s7  ;;  %785 = vrot.lane.b32.xlu0 %v779_v46, %s4458_s29  ;;  %v881_v46 = vmul.f32 %v878_v17, %v4599_v29  ;;  %v999_v17 = vmul.f32 %v996_v2, %v4599_v29 }
 0x156   :  { %v4721_v47 = vpop.permute.xlu1 %294  ;;  %v4723_v48 = vpop.permute.xlu0 %348 }
 0x157   :  { %7001 = vst [vmem:[#allocation15_spill] sm:$0xff] %v4723_v48 }
 0x158   :  { %729 = vrot.lane.b32.xlu1 %v722_v49, %s4462_s8  ;;  %789 = vrot.lane.b32.xlu0 %v781_v50, %s4458_s29  ;;  %v957_v49 = vmul.f32 %v956_v41, %v4552_v63 }
 0x15a   :  { %v4729_v52 = vpop.permute.xlu1 %308  ;;  %v4731_v53 = vpop.permute.xlu0 %371 }
 0x15c   :  { %747 = vrot.lane.b32.xlu1 %v741_v54, %s4463_s9  ;;  %807 = vrot.lane.b32.xlu0 %v800_v55, %s4459_s3  ;;  %v918_v54 = vmul.f32 %v916_v22, %v4580_v16  ;;  %v959_v55 = vmul.f32 %v956_v41, %v4599_v29 }
 0x15e   :  { %v4737_v57 = vpop.permute.xlu1 %322  ;;  %v4739_v58 = vpop.permute.xlu0 %375 }
 0x15f   :  { %7002 = vst [vmem:[#allocation16_spill] sm:$0xff] %v4737_v57 }
 0x160   :  { %751 = vrot.lane.b32.xlu1 %v743_v59, %s4463_s9  ;;  %825 = vrot.lane.b32.xlu0 %v819_v60, %s4460_s5 }
 0x162   :  { %v4745_v61 = vpop.permute.xlu1 %336  ;;  %v4747_v62 = vpop.permute.xlu0 %393 }
 0x163   :  { %7003 = vst [vmem:[#allocation17_spill] sm:$0xff] %v4745_v61  ;;  %v1222_v61 = vstv %s4934_s27  ;;  %s4208_s27 = sld [smem:[#allocation5 + $0x44]] }
 0x164   :  { %787 = vrot.lane.b32.xlu1 %v780_v0, %s4458_s29  ;;  %829 = vrot.lane.b32.xlu0 %v821_v1, %s4460_s5  ;;  %v937_v0 = vmul.f32 %v936_v34, %v4552_v63  ;;  %v978_v1 = vmul.f32 %v976_v56, %v4580_v16 }
 0x166   :  { %v4753_v3 = vpop.permute.xlu1 %350  ;;  %v4755_v4 = vpop.permute.xlu0 %411 }
 0x167   :  { %7004 = vst [vmem:[#allocation18_spill] sm:$0xff] %v4753_v3 }
 0x168   :  { %805 = vrot.lane.b32.xlu1 %v799_v5, %s4459_s3  ;;  %847 = vrot.lane.b32.xlu0 %v840_v6, %s4461_s7 }
 0x16a   :  { %v4761_v8 = vpop.permute.xlu1 %373  ;;  %v4763_v9 = vpop.permute.xlu0 %415 }
 0x16c   :  { %809 = vrot.lane.b32.xlu1 %v801_v10, %s4459_s3  ;;  %865 = vrot.lane.b32.xlu0 %v859_v11, %s4462_s8  ;;  %v997_v10 = vmul.f32 %v996_v2, %v4552_v63 }
 0x16e   :  { %v4769_v12 = vpop.permute.xlu1 %391  ;;  %v4771_v13 = vpop.permute.xlu0 %433 }
 0x170   :  { %827 = vrot.lane.b32.xlu1 %v820_v14, %s4460_s5  ;;  %869 = vrot.lane.b32.xlu0 %v861_v15, %s4462_s8  ;;  %v958_v15 = vmul.f32 %v956_v41, %v4580_v16 }
 0x172   :  { %v4777_v18 = vpop.permute.xlu1 %395  ;;  %v4779_v19 = vpop.permute.xlu0 %451 }
 0x174   :  { %845 = vrot.lane.b32.xlu1 %v839_v20, %s4461_s7  ;;  %887 = vrot.lane.b32.xlu0 %v880_v21, %s4463_s9  ;;  %v1016_v20 = vstv %s4181_s10  ;;  %s4198_s10 = sld [smem:[#allocation5 + $0x3a]] }
 0x176   :  { %v4785_v23 = vpop.permute.xlu1 %413  ;;  %v4787_v24 = vpop.permute.xlu0 %455 }
 0x178   :  { %849 = vrot.lane.b32.xlu1 %v841_v25, %s4461_s7  ;;  %923 = vrot.lane.b32.xlu0 %v917_v26, %s4458_s29  ;;  %v977_v25 = vmul.f32 %v976_v56, %v4552_v63  ;;  %v1018_v26 = vmul.f32 %v1016_v20, %v4580_v16 }
 0x17a   :  { %v4793_v28 = vpop.permute.xlu1 %431  ;;  %v4795_v30 = vpop.permute.xlu0 %473 }
 0x17c   :  { %867 = vrot.lane.b32.xlu1 %v860_v31, %s4462_s8  ;;  %927 = vrot.lane.b32.xlu0 %v919_v33, %s4458_s29  ;;  %v1054_v31 = vstv %s4183_s11  ;;  %s4199_s11 = sld [smem:[#allocation5 + $0x3b]] }
 0x17e   :  { %v4801_v36 = vpop.permute.xlu1 %435  ;;  %v4803_v37 = vpop.permute.xlu0 %509 }
 0x180   :  { %885 = vrot.lane.b32.xlu1 %v879_v38, %s4463_s9  ;;  %945 = vrot.lane.b32.xlu0 %v938_v40, %s4459_s3  ;;  %v979_v38 = vmul.f32 %v976_v56, %v4599_v29  ;;  %v1055_v40 = vmul.f32 %v1054_v31, %v4552_v63 }
 0x182   :  { %v4809_v42 = vpop.permute.xlu1 %453  ;;  %v4811_v45 = vpop.permute.xlu0 %513 }
 0x184   :  { %889 = vrot.lane.b32.xlu1 %v881_v46, %s4463_s9  ;;  %963 = vrot.lane.b32.xlu0 %v957_v49, %s4460_s5  ;;  %v998_v49 = vmul.f32 %v996_v2, %v4580_v16 }
 0x186   :  { %v4817_v50 = vpop.permute.xlu1 %471  ;;  %v4819_v51 = vpop.permute.xlu0 %531 }
 0x188   :  { %925 = vrot.lane.b32.xlu1 %v918_v54, %s4458_s29  ;;  %967 = vrot.lane.b32.xlu0 %v959_v55, %s4460_s5  ;;  %v1057_v54 = vmul.f32 %v1054_v31, %v4599_v29  ;;  %v1074_v55 = vstv %s4184_s12  ;;  %s4200_s12 = sld [smem:[#allocation5 + $0x3c]] }
 0x18a   :  { %v4825_v59 = vpop.permute.xlu1 %475  ;;  %v4827_v60 = vpop.permute.xlu0 %549 }
 0x18c   :  { %943 = vrot.lane.b32.xlu1 %v937_v0, %s4459_s3  ;;  %985 = vrot.lane.b32.xlu0 %v978_v1, %s4461_s7  ;;  %v1017_v1 = vmul.f32 %v1016_v20, %v4552_v63 }
 0x18e   :  { %v4833_v5 = vpop.permute.xlu1 %511  ;;  %v4835_v6 = vpop.permute.xlu0 %553 }
 0x18f   :  { %7005 = vst [vmem:[#allocation19_spill] sm:$0xff] %v4835_v6 }
 0x190   :  { %947 = vrot.lane.b32.xlu1 %v939_v7, %s4459_s3  ;;  %1003 = vrot.lane.b32.xlu0 %v997_v10, %s4462_s8  ;;  %v1076_v7 = vmul.f32 %v1074_v55, %v4580_v16  ;;  %v1094_v10 = vstv %s4185_s13  ;;  %s4201_s13 = sld [smem:[#allocation5 + $0x3d]] }
 0x192   :  { %v4841_v11 = vpop.permute.xlu1 %529  ;;  %v4843_v14 = vpop.permute.xlu0 %571 }
 0x193   :  { %7006 = vst [vmem:[#allocation20_spill] sm:$0xff] %v4843_v14 }
 0x194   :  { %965 = vrot.lane.b32.xlu1 %v958_v15, %s4460_s5  ;;  %1007 = vrot.lane.b32.xlu0 %v999_v17, %s4462_s8  ;;  %v1019_v17 = vmul.f32 %v1016_v20, %v4599_v29  ;;  %v1114_v20 = vstv %s4186_s14  ;;  %s4202_s14 = sld [smem:[#allocation5 + $0x3e]] }
 0x196   :  { %v4849_v21 = vpop.permute.xlu1 %533  ;;  %v4851_v22 = vpop.permute.xlu0 %589 }
 0x197   :  { %7007 = vst [vmem:[#allocation21_spill] sm:$0xff] %v4851_v22  ;;  %v1208_v22 = vstv %s4921_s26  ;;  %s4207_s26 = sld [smem:[#allocation5 + $0x43]] }
 0x198   :  { %983 = vrot.lane.b32.xlu1 %v977_v25, %s4461_s7  ;;  %1025 = vrot.lane.b32.xlu0 %v1018_v26, %s4463_s9  ;;  %v1095_v25 = vmul.f32 %v1094_v10, %v4552_v63 }
 0x19a   :  { %v4857_v33 = vpop.permute.xlu1 %551  ;;  %v4859_v34 = vpop.permute.xlu0 %593 }
 0x19b   :  { %7008 = vst [vmem:[#allocation22_spill] sm:$0xff] %v4859_v34 }
 0x19c   :  { %987 = vrot.lane.b32.xlu1 %v979_v38, %s4461_s7  ;;  %1061 = vrot.lane.b32.xlu0 %v1055_v40, %s4458_s29  ;;  %v1056_v40 = vmul.f32 %v1054_v31, %v4580_v16 }
 0x19e   :  { %v4865_v41 = vpop.permute.xlu1 %569  ;;  %v4867_v46 = vpop.permute.xlu0 %611 }
 0x19f   :  { %7009 = vst [vmem:[#allocation23_spill] sm:$0xff] %v4865_v41  ;;  %7010 = vst [vmem:[#allocation24_spill] sm:$0xff] %v4867_v46 }
 0x1a0   :  { %1005 = vrot.lane.b32.xlu1 %v998_v49, %s4462_s8  ;;  %1065 = vrot.lane.b32.xlu0 %v1057_v54, %s4458_s29  ;;  %v1097_v49 = vmul.f32 %v1094_v10, %v4599_v29 }
 0x1a2   :  { %v4873_v56 = vpop.permute.xlu1 %573  ;;  %v4875_v0 = vpop.permute.xlu0 %647 }
 0x1a3   :  { %7011 = vst [vmem:[#allocation25_spill] sm:$0xff] %v4873_v56  ;;  %7012 = vst [vmem:[#allocation26_spill] sm:$0xff] %v4875_v0 }
 0x1a4   :  { %1023 = vrot.lane.b32.xlu1 %v1017_v1, %s4463_s9  ;;  %1083 = vrot.lane.b32.xlu0 %v1076_v7, %s4459_s3  ;;  %v1075_v7 = vmul.f32 %v1074_v55, %v4552_v63 }
 0x1a6   :  { %v4881_v2 = vpop.permute.xlu1 %591  ;;  %v4883_v15 = vpop.permute.xlu0 %651 }
 0x1a7   :  { %7013 = vst [vmem:[#allocation27_spill] sm:$0xff] %v4881_v2  ;;  %7014 = vst [vmem:[#allocation28_spill] sm:$0xff] %v4883_v15  ;;  %v4381_v15 = vld [vmem:[#allocation4 + $0x18] sm:$0xff] }
 0x1a8   :  { %1027 = vrot.lane.b32.xlu1 %v1019_v17, %s4463_s9  ;;  %1101 = vrot.lane.b32.xlu0 %v1095_v25, %s4460_s5  ;;  %v1116_v17 = vmul.f32 %v1114_v20, %v4580_v16  ;;  %v1134_v25 = vstv %s4187_s17  ;;  %s4204_s17 = sld [smem:[#allocation5 + $0x40]] }
 0x1aa   :  { %v4889_v26 = vpop.permute.xlu1 %609  ;;  %v4891_v38 = vpop.permute.xlu0 %669 }
 0x1ab   :  { %7015 = vst [vmem:[#allocation29_spill] sm:$0xff] %v4889_v26  ;;  %7016 = vst [vmem:[#allocation30_spill] sm:$0xff] %v4891_v38  ;;  %v1137_v26 = vmul.f32 %v1134_v25, %v4599_v29 }
 0x1ac   :  { %1063 = vrot.lane.b32.xlu1 %v1056_v40, %s4458_s29  ;;  %1105 = vrot.lane.b32.xlu0 %v1097_v49, %s4460_s5  ;;  %v1077_v49 = vmul.f32 %v1074_v55, %v4599_v29  ;;  %v1154_v55 = vstv %s4188_s18  ;;  %s4205_s18 = sld [smem:[#allocation5 + $0x41]] }
 0x1ae   :  { %v4897_v54 = vpop.permute.xlu1 %613  ;;  %v4899_v1 = vpop.permute.xlu0 %687 }
 0x1af   :  { %7017 = vst [vmem:[#allocation31_spill] sm:$0xff] %v4897_v54  ;;  %7018 = vst [vmem:[#allocation32_spill] sm:$0xff] %v4899_v1  ;;  %v1135_v54 = vmul.f32 %v1134_v25, %v4552_v63  ;;  %v4931_v1 = vld [vmem:[#allocation4 + $0x18] sm:$0xff] }
 0x1b0   :  { %1081 = vrot.lane.b32.xlu1 %v1075_v7, %s4459_s3  ;;  %1123 = vrot.lane.b32.xlu0 %v1116_v17, %s4461_s7  ;;  %v1096_v17 = vmul.f32 %v1094_v10, %v4580_v16  ;;  %v1194_v10 = vstv %s4911_s25  ;;  %s4206_s25 = sld [smem:[#allocation5 + $0x42]] }
 0x1b1   :  { %v1195_v34 = vmul.f32 %v1194_v10, %v4931_v1 }
 0x1b2   :  { %v4905_v31 = vpop.permute.xlu1 %649  ;;  %v4907_v40 = vpop.permute.xlu0 %691 }
 0x1b3   :  { %7019 = vst [vmem:[#allocation33_spill] sm:$0xff] %v4907_v40 }
 0x1b4   :  { %1085 = vrot.lane.b32.xlu1 %v1077_v49, %s4459_s3  ;;  %1141 = vrot.lane.b32.xlu0 %v1135_v54, %s4462_s8  ;;  %v1115_v54 = vmul.f32 %v1114_v20, %v4552_v63 }
 0x1b6   :  { %v4915_v3 = vpop.permute.xlu1 %667  ;;  %v4917_v7 = vpop.permute.xlu0 %709 }
 0x1b7   :  { %7020 = vst [vmem:[#allocation34_spill] sm:$0xff] %v4915_v3  ;;  %7021 = vst [vmem:[#allocation35_spill] sm:$0xff] %v4917_v7  ;;  %v1156_v7 = vmul.f32 %v1154_v55, %v4580_v16 }
 0x1b8   :  { %1103 = vrot.lane.b32.xlu1 %v1096_v17, %s4460_s5  ;;  %1145 = vrot.lane.b32.xlu0 %v1137_v26, %s4462_s8 }
 0x1ba   :  { %v4925_v40 = vpop.permute.xlu1 %671  ;;  %v4927_v49 = vpop.permute.xlu0 %727 }
 0x1bb   :  { %7022 = vst [vmem:[#allocation36_spill] sm:$0xff] %v4925_v40  ;;  %7023 = vst [vmem:[#allocation37_spill] sm:$0xff] %v4927_v49  ;;  %v1117_v49 = vmul.f32 %v1114_v20, %v4599_v29 }
 0x1bc   :  { %1121 = vrot.lane.b32.xlu1 %v1115_v54, %s4461_s7  ;;  %1163 = vrot.lane.b32.xlu0 %v1156_v7, %s4463_s9  ;;  %v1136_v7 = vmul.f32 %v1134_v25, %v4580_v16 }
 0x1be   :  { %v4938_v26 = vpop.permute.xlu1 %689  ;;  %v4940_v17 = vpop.permute.xlu0 %731 }
 0x1bf   :  { %7024 = vst [vmem:[#allocation38_spill] sm:$0xff] %v4938_v26  ;;  %7025 = vst [vmem:[#allocation39_spill] sm:$0xff] %v4940_v17  ;;  %v1209_v17 = vmul.f32 %v1208_v22, %v4931_v1 }
 0x1c0   :  { %1125 = vrot.lane.b32.xlu1 %v1117_v49, %s4461_s7  ;;  %1199 = vrot.lane.b32.xlu0 %v1195_v34, %s4458_s29  ;;  %v1155_v34 = vmul.f32 %v1154_v55, %v4552_v63  ;;  %v1250_v63 = vstv %s4956_s30  ;;  %s4211_s30 = sld [smem:[#allocation5 + $0x47]] }
 0x1c2   :  { %v4949_v46 = vpop.permute.xlu1 %707  ;;  %v4951_v54 = vpop.permute.xlu0 %749 }
 0x1c3   :  { %7026 = vst [vmem:[#allocation40_spill] sm:$0xff] %v4949_v46  ;;  %7027 = vst [vmem:[#allocation41_spill] sm:$0xff] %v4951_v54  ;;  %v1223_v54 = vmul.f32 %v1222_v61, %v4931_v1  ;;  %v1236_v46 = vstv %s4945_s28  ;;  %s4209_s28 = sld [smem:[#allocation5 + $0x45]] }
 0x1c4   :  { %1143 = vrot.lane.b32.xlu1 %v1136_v7, %s4462_s8  ;;  %1213 = vrot.lane.b32.xlu0 %v1209_v17, %s4459_s3  ;;  %v1157_v17 = vmul.f32 %v1154_v55, %v4599_v29  ;;  %v1237_v7 = vmul.f32 %v1236_v46, %v4931_v1 }
 0x1c6   :  { %v4960_v20 = vpop.permute.xlu1 %711  ;;  %v4962_v49 = vpop.permute.xlu0 %785 }
 0x1c7   :  { %7028 = vst [vmem:[#allocation42_spill] sm:$0xff] %v4960_v20  ;;  %7029 = vst [vmem:[#allocation43_spill] sm:$0xff] %v4962_v49  ;;  %v4977_v20 = vld [vmem:[#allocation4 + $0x20] sm:$0xff] }
 0x1c8   :  { %1161 = vrot.lane.b32.xlu1 %v1155_v34, %s4463_s9  ;;  %1227 = vrot.lane.b32.xlu0 %v1223_v54, %s4460_s5  ;;  %v1196_v54 = vmul.f32 %v1194_v10, %v4977_v20 }
 0x1ca   :  { %v4971_v16 = vpop.permute.xlu1 %729  ;;  %v4973_v25 = vpop.permute.xlu0 %789 }
 0x1cb   :  { %7030 = vst [vmem:[#allocation44_spill] sm:$0xff] %v4971_v16  ;;  %7031 = vst [vmem:[#allocation45_spill] sm:$0xff] %v4973_v25  ;;  %v1251_v16 = vmul.f32 %v1250_v63, %v4931_v1  ;;  %v1264_v25 = vstv %s4967_s4  ;;  %s4212_s4 = sld [smem:[#allocation5 + $0x48]] }
 0x1cc   :  { %1165 = vrot.lane.b32.xlu1 %v1157_v17, %s4463_s9  ;;  %1241 = vrot.lane.b32.xlu0 %v1237_v7, %s4461_s7  ;;  %v1210_v17 = vmul.f32 %v1208_v22, %v4977_v20  ;;  %v1265_v7 = vmul.f32 %v1264_v25, %v4931_v1 }
 0x1ce   :  { %v4982_v49 = vpop.permute.xlu1 %747  ;;  %v4984_v34 = vpop.permute.xlu0 %807 }
 0x1cf   :  { %7032 = vst [vmem:[#allocation46_spill] sm:$0xff] %v4982_v49  ;;  %7033 = vst [vmem:[#allocation47_spill] sm:$0xff] %v4984_v34  ;;  %v1285_v49 = vstv %s4197_s6  ;;  %s4213_s6 = sld [smem:[#allocation5 + $0x49]] }
 0x1d0   :  { %1201 = vrot.lane.b32.xlu1 %v1196_v54, %s4458_s29  ;;  %1255 = vrot.lane.b32.xlu0 %v1251_v16, %s4462_s8  ;;  %v1224_v16 = vmul.f32 %v1222_v61, %v4977_v20  ;;  %v1286_v54 = vmul.f32 %v1285_v49, %v4931_v1  ;;  %v1305_v61 = vstv %s4198_s10  ;;  %s4214_s10 = sld [smem:[#allocation5 + $0x4a]] }
 0x1d2   :  { %v4991_v29 = vpop.permute.xlu1 %751  ;;  %v4993_v55 = vpop.permute.xlu0 %825 }
 0x1d3   :  { %7034 = vst [vmem:[#allocation48_spill] sm:$0xff] %v4991_v29  ;;  %7035 = vst [vmem:[#allocation49_spill] sm:$0xff] %v4993_v55  ;;  %v5005_v29 = vld [vmem:[#allocation4 + $0x28] sm:$0xff] }
 0x1d4   :  { %1215 = vrot.lane.b32.xlu1 %v1210_v17, %s4459_s3  ;;  %1269 = vrot.lane.b32.xlu0 %v1265_v7, %s4463_s9  ;;  %v1238_v7 = vmul.f32 %v1236_v46, %v4977_v20  ;;  %v1288_v55 = vmul.f32 %v1285_v49, %v5005_v29 }
 0x1d6   :  { %v4999_v10 = vpop.permute.xlu1 %787  ;;  %v5001_v34 = vpop.permute.xlu0 %829 }
 0x1d7   :  { %7036 = vst [vmem:[#allocation50_spill] sm:$0xff] %v4999_v10  ;;  %7037 = vst [vmem:[#allocation51_spill] sm:$0xff] %v5001_v34 }
 0x1d8   :  { %1229 = vrot.lane.b32.xlu1 %v1224_v16, %s4460_s5  ;;  %1292 = vrot.lane.b32.xlu0 %v1286_v54, %s4458_s29  ;;  %v1252_v16 = vmul.f32 %v1250_v63, %v4977_v20  ;;  %v1307_v54 = vmul.f32 %v1305_v61, %v4977_v20 }
 0x1da   :  { %v5009_v22 = vpop.permute.xlu1 %805  ;;  %v5011_v17 = vpop.permute.xlu0 %847 }
 0x1db   :  { %7038 = vst [vmem:[#allocation52_spill] sm:$0xff] %v5009_v22  ;;  %7039 = vst [vmem:[#allocation53_spill] sm:$0xff] %v5011_v17  ;;  %v1325_v22 = vstv %s4199_s11  ;;  %s4215_s11 = sld [smem:[#allocation5 + $0x4b]] }
 0x1dc   :  { %1243 = vrot.lane.b32.xlu1 %v1238_v7, %s4461_s7  ;;  %1296 = vrot.lane.b32.xlu0 %v1288_v55, %s4458_s29  ;;  %v1266_v55 = vmul.f32 %v1264_v25, %v4977_v20  ;;  %v1326_v17 = vmul.f32 %v1325_v22, %v4931_v1  ;;  %v1345_v25 = vstv %s4200_s12  ;;  %s4216_s12 = sld [smem:[#allocation5 + $0x4c]] }
 0x1de   :  { %v5017_v34 = vpop.permute.xlu1 %809  ;;  %v5019_v10 = vpop.permute.xlu0 %865 }
 0x1df   :  { %7040 = vst [vmem:[#allocation54_spill] sm:$0xff] %v5017_v34  ;;  %7041 = vst [vmem:[#allocation55_spill] sm:$0xff] %v5019_v10 }
 0x1e0   :  { %1257 = vrot.lane.b32.xlu1 %v1252_v16, %s4462_s8  ;;  %1314 = vrot.lane.b32.xlu0 %v1307_v54, %s4459_s3  ;;  %v1287_v16 = vmul.f32 %v1285_v49, %v4977_v20  ;;  %v1328_v54 = vmul.f32 %v1325_v22, %v5005_v29 }
 0x1e2   :  { %v5025_v46 = vpop.permute.xlu1 %827  ;;  %v5027_v7 = vpop.permute.xlu0 %869 }
 0x1e3   :  { %7042 = vst [vmem:[#allocation56_spill] sm:$0xff] %v5025_v46  ;;  %7043 = vst [vmem:[#allocation57_spill] sm:$0xff] %v5027_v7 }
 0x1e4   :  { %1271 = vrot.lane.b32.xlu1 %v1266_v55, %s4463_s9  ;;  %1332 = vrot.lane.b32.xlu0 %v1326_v17, %s4460_s5  ;;  %v1306_v55 = vmul.f32 %v1305_v61, %v4931_v1  ;;  %v1347_v17 = vmul.f32 %v1345_v25, %v4977_v20 }
 0x1e6   :  { %v5033_v63 = vpop.permute.xlu1 %845  ;;  %v5035_v10 = vpop.permute.xlu0 %887 }
 0x1e7   :  { %7044 = vst [vmem:[#allocation58_spill] sm:$0xff] %v5033_v63  ;;  %7045 = vst [vmem:[#allocation59_spill] sm:$0xff] %v5035_v10  ;;  %v1365_v63 = vstv %s4201_s13  ;;  %s4218_s13 = sld [smem:[#allocation5 + $0x4e]] }
 0x1e8   :  { %1294 = vrot.lane.b32.xlu1 %v1287_v16, %s4458_s29  ;;  %1336 = vrot.lane.b32.xlu0 %v1328_v54, %s4460_s5  ;;  %v1308_v54 = vmul.f32 %v1305_v61, %v5005_v29  ;;  %v1366_v10 = vmul.f32 %v1365_v63, %v4931_v1  ;;  %v1385_v61 = vstv %s4202_s14  ;;  %s4219_s14 = sld [smem:[#allocation5 + $0x4f]] }
 0x1ea   :  { %v5041_v7 = vpop.permute.xlu1 %849  ;;  %v5043_v46 = vpop.permute.xlu0 %923 }
 0x1eb   :  { %7046 = vst [vmem:[#allocation60_spill] sm:$0xff] %v5041_v7  ;;  %7047 = vst [vmem:[#allocation61_spill] sm:$0xff] %v5043_v46 }
 0x1ec   :  { %1312 = vrot.lane.b32.xlu1 %v1306_v55, %s4459_s3  ;;  %1354 = vrot.lane.b32.xlu0 %v1347_v17, %s4461_s7  ;;  %v1327_v55 = vmul.f32 %v1325_v22, %v4977_v20  ;;  %v1368_v17 = vmul.f32 %v1365_v63, %v5005_v29 }
 0x1ee   :  { %v5049_v49 = vpop.permute.xlu1 %867  ;;  %v5051_v16 = vpop.permute.xlu0 %927 }
 0x1ef   :  { %7048 = vst [vmem:[#allocation62_spill] sm:$0xff] %v5049_v49  ;;  %7049 = vst [vmem:[#allocation63_spill] sm:$0xff] %v5051_v16 }
 0x1f0   :  { %1316 = vrot.lane.b32.xlu1 %v1308_v54, %s4459_s3  ;;  %1372 = vrot.lane.b32.xlu0 %v1366_v10, %s4462_s8  ;;  %v1346_v54 = vmul.f32 %v1345_v25, %v4931_v1  ;;  %v1387_v10 = vmul.f32 %v1385_v61, %v4977_v20 }
 0x1f2   :  { %v5057_v7 = vpop.permute.xlu1 %885  ;;  %v5059_v46 = vpop.permute.xlu0 %945 }
 0x1f3   :  { %7050 = vst [vmem:[#allocation64_spill] sm:$0xff] %v5057_v7  ;;  %7051 = vst [vmem:[#allocation65_spill] sm:$0xff] %v5059_v46  ;;  %v1422_v7 = vstv %s4204_s17  ;;  %s4220_s17 = sld [smem:[#allocation5 + $0x50]] }
 0x1f4   :  { %1334 = vrot.lane.b32.xlu1 %v1327_v55, %s4460_s5  ;;  %1376 = vrot.lane.b32.xlu0 %v1368_v17, %s4462_s8  ;;  %v1348_v17 = vmul.f32 %v1345_v25, %v5005_v29  ;;  %v1442_v25 = vstv %s4205_s18  ;;  %s4221_s18 = sld [smem:[#allocation5 + $0x51]] }
 0x1f6   :  { %v5065_v49 = vpop.permute.xlu1 %889  ;;  %v5067_v16 = vpop.permute.xlu0 %963 }
 0x1f7   :  { %7052 = vst [vmem:[#allocation66_spill] sm:$0xff] %v5065_v49  ;;  %7053 = vst [vmem:[#allocation67_spill] sm:$0xff] %v5067_v16  ;;  %v1423_v49 = vmul.f32 %v1422_v7, %v4931_v1 }
 0x1f8   :  { %1352 = vrot.lane.b32.xlu1 %v1346_v54, %s4461_s7  ;;  %1394 = vrot.lane.b32.xlu0 %v1387_v10, %s4463_s9  ;;  %v1367_v54 = vmul.f32 %v1365_v63, %v4977_v20  ;;  %v1425_v10 = vmul.f32 %v1422_v7, %v5005_v29 }
 0x1fa   :  { %v5073_v22 = vpop.permute.xlu1 %925  ;;  %v5075_v55 = vpop.permute.xlu0 %967  ;;  %v1756_v48 = vstv %s4221_s18  ;;  %s4237_s18 = sld [smem:[#allocation5 + $0x61]] }
 0x1fb   :  { %7054 = vst [vmem:[#allocation68_spill] sm:$0xff] %v5073_v22  ;;  %7055 = vst [vmem:[#allocation69_spill] sm:$0xff] %v5075_v55 }
 0x1fc   :  { %1356 = vrot.lane.b32.xlu1 %v1348_v17, %s4461_s7  ;;  %1429 = vrot.lane.b32.xlu0 %v1423_v49, %s4458_s29  ;;  %v1386_v17 = vmul.f32 %v1385_v61, %v4931_v1  ;;  %v1444_v49 = vmul.f32 %v1442_v25, %v4977_v20 }
 0x1fe   :  { %v5081_v16 = vpop.permute.xlu1 %943  ;;  %v5083_v46 = vpop.permute.xlu0 %985 }
 0x1ff   :  { %7056 = vst [vmem:[#allocation70_spill] sm:$0xff] %v5081_v16  ;;  %7057 = vst [vmem:[#allocation71_spill] sm:$0xff] %v5083_v46  ;;  %v1462_v16 = vstv %s4206_s25  ;;  %s4222_s25 = sld [smem:[#allocation5 + $0x52]] }
 0x200   :  { %1374 = vrot.lane.b32.xlu1 %v1367_v54, %s4462_s8  ;;  %1433 = vrot.lane.b32.xlu0 %v1425_v10, %s4458_s29  ;;  %v1388_v10 = vmul.f32 %v1385_v61, %v5005_v29  ;;  %v1463_v46 = vmul.f32 %v1462_v16, %v4931_v1  ;;  %v1482_v61 = vstv %s4207_s26  ;;  %s4223_s26 = sld [smem:[#allocation5 + $0x53]] }
 0x202   :  { %v5089_v55 = vpop.permute.xlu1 %947  ;;  %v5091_v22 = vpop.permute.xlu0 %1003 }
 0x203   :  { %7058 = vst [vmem:[#allocation72_spill] sm:$0xff] %v5089_v55  ;;  %7059 = vst [vmem:[#allocation73_spill] sm:$0xff] %v5091_v22 }
 0x204   :  { %1392 = vrot.lane.b32.xlu1 %v1386_v17, %s4463_s9  ;;  %1451 = vrot.lane.b32.xlu0 %v1444_v49, %s4459_s3  ;;  %v1424_v17 = vmul.f32 %v1422_v7, %v4977_v20  ;;  %v1465_v49 = vmul.f32 %v1462_v16, %v5005_v29 }
 0x206   :  { %v5097_v63 = vpop.permute.xlu1 %965  ;;  %v5099_v54 = vpop.permute.xlu0 %1007 }
 0x207   :  { %7060 = vst [vmem:[#allocation74_spill] sm:$0xff] %v5097_v63  ;;  %7061 = vst [vmem:[#allocation75_spill] sm:$0xff] %v5099_v54 }
 0x208   :  { %1396 = vrot.lane.b32.xlu1 %v1388_v10, %s4463_s9  ;;  %1469 = vrot.lane.b32.xlu0 %v1463_v46, %s4460_s5  ;;  %v1443_v10 = vmul.f32 %v1442_v25, %v4931_v1  ;;  %v1484_v46 = vmul.f32 %v1482_v61, %v4977_v20 }
 0x20a   :  { %v5105_v22 = vpop.permute.xlu1 %983  ;;  %v5107_v55 = vpop.permute.xlu0 %1025 }
 0x20b   :  { %7062 = vst [vmem:[#allocation76_spill] sm:$0xff] %v5105_v22  ;;  %7063 = vst [vmem:[#allocation77_spill] sm:$0xff] %v5107_v55  ;;  %v1502_v22 = vstv %s4208_s27  ;;  %s4225_s27 = sld [smem:[#allocation5 + $0x55]] }
 0x20c   :  { %1431 = vrot.lane.b32.xlu1 %v1424_v17, %s4458_s29  ;;  %1473 = vrot.lane.b32.xlu0 %v1465_v49, %s4460_s5  ;;  %v1445_v49 = vmul.f32 %v1442_v25, %v5005_v29  ;;  %v1503_v55 = vmul.f32 %v1502_v22, %v4931_v1  ;;  %v1522_v25 = vstv %s4209_s28  ;;  %s4226_s28 = sld [smem:[#allocation5 + $0x56]] }
 0x20e   :  { %v5113_v54 = vpop.permute.xlu1 %987  ;;  %v5115_v63 = vpop.permute.xlu0 %1061 }
 0x20f   :  { %7064 = vst [vmem:[#allocation78_spill] sm:$0xff] %v5113_v54  ;;  %7065 = vst [vmem:[#allocation79_spill] sm:$0xff] %v5115_v63 }
 0x210   :  { %1449 = vrot.lane.b32.xlu1 %v1443_v10, %s4459_s3  ;;  %1491 = vrot.lane.b32.xlu0 %v1484_v46, %s4461_s7  ;;  %v1464_v10 = vmul.f32 %v1462_v16, %v4977_v20  ;;  %v1505_v46 = vmul.f32 %v1502_v22, %v5005_v29 }
 0x212   :  { %v5121_v7 = vpop.permute.xlu1 %1005  ;;  %v5123_v17 = vpop.permute.xlu0 %1065 }
 0x213   :  { %7066 = vst [vmem:[#allocation80_spill] sm:$0xff] %v5121_v7  ;;  %7067 = vst [vmem:[#allocation81_spill] sm:$0xff] %v5123_v17 }
 0x214   :  { %1453 = vrot.lane.b32.xlu1 %v1445_v49, %s4459_s3  ;;  %1509 = vrot.lane.b32.xlu0 %v1503_v55, %s4462_s8  ;;  %v1483_v49 = vmul.f32 %v1482_v61, %v4931_v1  ;;  %v1524_v55 = vmul.f32 %v1522_v25, %v4977_v20 }
 0x216   :  { %v5129_v54 = vpop.permute.xlu1 %1023  ;;  %v5131_v63 = vpop.permute.xlu0 %1083 }
 0x217   :  { %7068 = vst [vmem:[#allocation82_spill] sm:$0xff] %v5129_v54  ;;  %7069 = vst [vmem:[#allocation83_spill] sm:$0xff] %v5131_v63  ;;  %v1559_v54 = vstv %s4211_s30  ;;  %s4227_s30 = sld [smem:[#allocation5 + $0x57]] }
 0x218   :  { %1471 = vrot.lane.b32.xlu1 %v1464_v10, %s4460_s5  ;;  %1513 = vrot.lane.b32.xlu0 %v1505_v46, %s4462_s8  ;;  %v1485_v46 = vmul.f32 %v1482_v61, %v5005_v29  ;;  %v1579_v61 = vstv %s4212_s4  ;;  %s4228_s4 = sld [smem:[#allocation5 + $0x58]] }
 0x21a   :  { %v5137_v7 = vpop.permute.xlu1 %1027  ;;  %v5139_v17 = vpop.permute.xlu0 %1101 }
 0x21b   :  { %7070 = vst [vmem:[#allocation84_spill] sm:$0xff] %v5137_v7  ;;  %7071 = vst [vmem:[#allocation85_spill] sm:$0xff] %v5139_v17  ;;  %v1560_v7 = vmul.f32 %v1559_v54, %v4931_v1 }
 0x21c   :  { %1489 = vrot.lane.b32.xlu1 %v1483_v49, %s4461_s7  ;;  %1531 = vrot.lane.b32.xlu0 %v1524_v55, %s4463_s9  ;;  %v1504_v49 = vmul.f32 %v1502_v22, %v4977_v20  ;;  %v1562_v55 = vmul.f32 %v1559_v54, %v5005_v29 }
 0x21e   :  { %v5145_v16 = vpop.permute.xlu1 %1063  ;;  %v5147_v10 = vpop.permute.xlu0 %1105 }
 0x21f   :  { %7072 = vst [vmem:[#allocation86_spill] sm:$0xff] %v5145_v16  ;;  %7073 = vst [vmem:[#allocation87_spill] sm:$0xff] %v5147_v10 }
 0x220   :  { %1493 = vrot.lane.b32.xlu1 %v1485_v46, %s4461_s7  ;;  %1566 = vrot.lane.b32.xlu0 %v1560_v7, %s4458_s29  ;;  %v1523_v46 = vmul.f32 %v1522_v25, %v4931_v1  ;;  %v1581_v7 = vmul.f32 %v1579_v61, %v4977_v20 }
 0x222   :  { %v5153_v17 = vpop.permute.xlu1 %1081  ;;  %v5155_v63 = vpop.permute.xlu0 %1123 }
 0x223   :  { %7074 = vst [vmem:[#allocation88_spill] sm:$0xff] %v5153_v17  ;;  %7075 = vst [vmem:[#allocation89_spill] sm:$0xff] %v5155_v63  ;;  %v1599_v17 = vstv %s4213_s6  ;;  %s4229_s6 = sld [smem:[#allocation5 + $0x59]] }
 0x224   :  { %1511 = vrot.lane.b32.xlu1 %v1504_v49, %s4462_s8  ;;  %1570 = vrot.lane.b32.xlu0 %v1562_v55, %s4458_s29  ;;  %v1525_v55 = vmul.f32 %v1522_v25, %v5005_v29  ;;  %v1600_v63 = vmul.f32 %v1599_v17, %v4931_v1  ;;  %v5185_v25 = vld [vmem:[#allocation9 + $0x8] sm:$0xff] }
 0x226   :  { %v5161_v10 = vpop.permute.xlu1 %1085  ;;  %v5163_v16 = vpop.permute.xlu0 %1141 }
 0x227   :  { %7076 = vst [vmem:[#allocation90_spill] sm:$0xff] %v5161_v10  ;;  %7077 = vst [vmem:[#allocation91_spill] sm:$0xff] %v5163_v16 }
 0x228   :  { %1529 = vrot.lane.b32.xlu1 %v1523_v46, %s4463_s9  ;;  %1588 = vrot.lane.b32.xlu0 %v1581_v7, %s4459_s3  ;;  %v1561_v46 = vmul.f32 %v1559_v54, %v4977_v20  ;;  %v1602_v7 = vmul.f32 %v1599_v17, %v5005_v29 }
 0x22a   :  { %v5169_v22 = vpop.permute.xlu1 %1103  ;;  %v5171_v49 = vpop.permute.xlu0 %1145 }
 0x22b   :  { %7078 = vst [vmem:[#allocation92_spill] sm:$0xff] %v5169_v22  ;;  %7079 = vst [vmem:[#allocation93_spill] sm:$0xff] %v5171_v49  ;;  %v68_v49 = vld [vmem:[#allocation2 + $0x18] sm:$0xf]  ;;  %v1619_v22 = vstv %s4214_s10  ;;  %s4230_s10 = sld [smem:[#allocation5 + $0x5a]] }
 0x22c   :  { %1533 = vrot.lane.b32.xlu1 %v1525_v55, %s4463_s9  ;;  %1606 = vrot.lane.b32.xlu0 %v1600_v63, %s4460_s5  ;;  %v73_v55 = vadd.f32 %v68_v49, %v5185_v25  ;;  %v1621_v54 = vmul.f32 %v1619_v22, %v4977_v20  ;;  %v1582_v49 = vmul.f32 %v1579_v61, %v5005_v29 }
 0x22e   :  { %v5177_v16 = vpop.permute.xlu1 %1121  ;;  %v5179_v10 = vpop.permute.xlu0 %1163  ;;  %75 = vst [vmem:[#allocation2 + $0x18] sm:$0xf] %v73_v55 }
 0x22f   :  { %7080 = vst [vmem:[#allocation94_spill] sm:$0xff] %v5177_v16  ;;  %7081 = vst [vmem:[#allocation95_spill] sm:$0xff] %v5179_v10  ;;  %v1580_v10 = vmul.f32 %v1579_v61, %v4931_v1  ;;  %v1639_v16 = vstv %s4215_s11  ;;  %v1659_v61 = vstv %s4216_s12  ;;  %s4232_s11 = sld [smem:[#allocation5 + $0x5c]] }
 0x230   :  { %1568 = vrot.lane.b32.xlu1 %v1561_v46, %s4458_s29  ;;  %1610 = vrot.lane.b32.xlu0 %v1602_v7, %s4460_s5  ;;  %s4233_s12 = sld [smem:[#allocation5 + $0x5d]] }
 0x232   :  { %v5188_v34 = vpop.permute.xlu1 %1125  ;;  %v5190_v63 = vpop.permute.xlu0 %1199 }
 0x233   :  { %7082 = vst [vmem:[#allocation96_spill] sm:$0xff] %v5188_v34  ;;  %7083 = vst [vmem:[#allocation97_spill] sm:$0xff] %v5190_v63  ;;  %v1640_v34 = vmul.f32 %v1639_v16, %v4931_v1 }
 0x234   :  { %1586 = vrot.lane.b32.xlu1 %v1580_v10, %s4459_s3  ;;  %1628 = vrot.lane.b32.xlu0 %v1621_v54, %s4461_s7  ;;  %v1601_v10 = vmul.f32 %v1599_v17, %v4977_v20  ;;  %v1642_v54 = vmul.f32 %v1639_v16, %v5005_v29 }
 0x236   :  { %v5196_v46 = vpop.permute.xlu1 %1143  ;;  %v5198_v7 = vpop.permute.xlu0 %1213 }
 0x237   :  { %7084 = vst [vmem:[#allocation98_spill] sm:$0xff] %v5196_v46  ;;  %7085 = vst [vmem:[#allocation99_spill] sm:$0xff] %v5198_v7 }
 0x238   :  { %1590 = vrot.lane.b32.xlu1 %v1582_v49, %s4459_s3  ;;  %1646 = vrot.lane.b32.xlu0 %v1640_v34, %s4462_s8  ;;  %v1620_v49 = vmul.f32 %v1619_v22, %v4931_v1  ;;  %v1661_v34 = vmul.f32 %v1659_v61, %v4977_v20 }
 0x23a   :  { %v5204_v63 = vpop.permute.xlu1 %1161  ;;  %v5206_v55 = vpop.permute.xlu0 %1227 }
 0x23b   :  { %7086 = vst [vmem:[#allocation100_spill] sm:$0xff] %v5204_v63  ;;  %7087 = vst [vmem:[#allocation101_spill] sm:$0xff] %v5206_v55  ;;  %v1696_v63 = vstv %s4218_s13  ;;  %s4234_s13 = sld [smem:[#allocation5 + $0x5e]] }
 0x23c   :  { %1608 = vrot.lane.b32.xlu1 %v1601_v10, %s4460_s5  ;;  %1650 = vrot.lane.b32.xlu0 %v1642_v54, %s4462_s8  ;;  %v1622_v54 = vmul.f32 %v1619_v22, %v5005_v29  ;;  %v1697_v55 = vmul.f32 %v1696_v63, %v4931_v1  ;;  %v1716_v22 = vstv %s4219_s14  ;;  %s4235_s14 = sld [smem:[#allocation5 + $0x5f]] }
 0x23e   :  { %v5212_v7 = vpop.permute.xlu1 %1165  ;;  %v5214_v46 = vpop.permute.xlu0 %1241 }
 0x23f   :  { %7088 = vst [vmem:[#allocation102_spill] sm:$0xff] %v5212_v7  ;;  %7089 = vst [vmem:[#allocation103_spill] sm:$0xff] %v5214_v46 }
 0x240   :  { %1626 = vrot.lane.b32.xlu1 %v1620_v49, %s4461_s7  ;;  %1668 = vrot.lane.b32.xlu0 %v1661_v34, %s4463_s9  ;;  %v1641_v49 = vmul.f32 %v1639_v16, %v4977_v20  ;;  %v1699_v34 = vmul.f32 %v1696_v63, %v5005_v29 }
 0x242   :  { %v5220_v17 = vpop.permute.xlu1 %1201  ;;  %v5222_v10 = vpop.permute.xlu0 %1255 }
 0x243   :  { %7090 = vst [vmem:[#allocation104_spill] sm:$0xff] %v5220_v17  ;;  %7091 = vst [vmem:[#allocation105_spill] sm:$0xff] %v5222_v10 }
 0x244   :  { %1630 = vrot.lane.b32.xlu1 %v1622_v54, %s4461_s7  ;;  %1703 = vrot.lane.b32.xlu0 %v1697_v55, %s4458_s29  ;;  %v1660_v54 = vmul.f32 %v1659_v61, %v4931_v1  ;;  %v1718_v55 = vmul.f32 %v1716_v22, %v4977_v20 }
 0x246   :  { %v5228_v46 = vpop.permute.xlu1 %1215  ;;  %v5230_v7 = vpop.permute.xlu0 %1269 }
 0x247   :  { %7092 = vst [vmem:[#allocation106_spill] sm:$0xff] %v5228_v46  ;;  %7093 = vst [vmem:[#allocation107_spill] sm:$0xff] %v5230_v7  ;;  %v1736_v46 = vstv %s4220_s17  ;;  %s4236_s17 = sld [smem:[#allocation5 + $0x60]] }
 0x248   :  { %1648 = vrot.lane.b32.xlu1 %v1641_v49, %s4462_s8  ;;  %1707 = vrot.lane.b32.xlu0 %v1699_v34, %s4458_s29  ;;  %v1662_v34 = vmul.f32 %v1659_v61, %v5005_v29  ;;  %v1737_v7 = vmul.f32 %v1736_v46, %v4931_v1  ;;  %v1698_v61 = vmul.f32 %v1696_v63, %v4977_v20 }
 0x24a   :  { %v5236_v10 = vpop.permute.xlu1 %1229  ;;  %v5238_v17 = vpop.permute.xlu0 %1292 }
 0x24b   :  { %7094 = vst [vmem:[#allocation108_spill] sm:$0xff] %v5236_v10  ;;  %7095 = vst [vmem:[#allocation109_spill] sm:$0xff] %v5238_v17  ;;  %v69_v10 = vld [vmem:[#allocation2 + $0x8] sm:$0xf]  ;;  %v5252_v17 = vcombine.high %v5185_v25, %v5185_v25 }
 0x24c   :  { %1666 = vrot.lane.b32.xlu1 %v1660_v54, %s4463_s9  ;;  %1725 = vrot.lane.b32.xlu0 %v1718_v55, %s4459_s3 }
 0x24d   :  { %v74_v54 = vadd.f32 %v5252_v17, %v69_v10  ;;  %v1758_v10 = vmul.f32 %v1756_v48, %v4977_v20 }
 0x24e   :  { %v5244_v16 = vpop.permute.xlu1 %1243  ;;  %v5246_v49 = vpop.permute.xlu0 %1296 }
 0x24f   :  { %7096 = vst [vmem:[#allocation110_spill] sm:$0xff] %v5244_v16  ;;  %7097 = vst [vmem:[#allocation111_spill] sm:$0xff] %v5246_v49  ;;  %v1739_v49 = vmul.f32 %v1736_v46, %v5005_v29 }
 0x250   :  { %1670 = vrot.lane.b32.xlu1 %v1662_v34, %s4463_s9  ;;  %1743 = vrot.lane.b32.xlu0 %v1737_v7, %s4460_s5  ;;  %76 = vst [vmem:[#allocation2 + $0x8] sm:$0xf] %v74_v54  ;;  %v1717_v7 = vmul.f32 %v1716_v22, %v4931_v1 }
 0x252   :  { %v5257_v55 = vpop.permute.xlu1 %1257  ;;  %v5259_v16 = vpop.permute.xlu0 %1314 }
 0x253   :  { %7098 = vst [vmem:[#allocation112_spill] sm:$0xff] %v5257_v55  ;;  %7099 = vst [vmem:[#allocation113_spill] sm:$0xff] %v5259_v16  ;;  %v1776_v55 = vstv %s4222_s25  ;;  %s5473_s25 = sld [smem:[#allocation5]] }
 0x254   :  { %1705 = vrot.lane.b32.xlu1 %v1698_v61, %s4458_s29  ;;  %1747 = vrot.lane.b32.xlu0 %v1739_v49, %s4460_s5  ;;  %v1719_v49 = vmul.f32 %v1716_v22, %v5005_v29  ;;  %v1777_v61 = vmul.f32 %v1776_v55, %v4931_v1  ;;  %v1796_v22 = vstv %s4223_s26  ;;  %s5479_s26 = sld [smem:[#allocation5 + $0x7]] }
 0x256   :  { %v5265_v26 = vpop.permute.xlu1 %1271  ;;  %v5267_v34 = vpop.permute.xlu0 %1332 }
 0x257   :  { %7100 = vst [vmem:[#allocation114_spill] sm:$0xff] %v5265_v26  ;;  %7101 = vst [vmem:[#allocation115_spill] sm:$0xff] %v5267_v34 }
 0x258   :  { %1723 = vrot.lane.b32.xlu1 %v1717_v7, %s4459_s3  ;;  %1765 = vrot.lane.b32.xlu0 %v1758_v10, %s4461_s7  ;;  %v1738_v7 = vmul.f32 %v1736_v46, %v4977_v20  ;;  %v1779_v10 = vmul.f32 %v1776_v55, %v5005_v29 }
 0x25a   :  { %v5273_v63 = vpop.permute.xlu1 %1294  ;;  %v5275_v54 = vpop.permute.xlu0 %1336 }
 0x25b   :  { %7102 = vst [vmem:[#allocation116_spill] sm:$0xff] %v5273_v63  ;;  %7103 = vst [vmem:[#allocation117_spill] sm:$0xff] %v5275_v54 }
 0x25c   :  { %1727 = vrot.lane.b32.xlu1 %v1719_v49, %s4459_s3  ;;  %1783 = vrot.lane.b32.xlu0 %v1777_v61, %s4462_s8  ;;  %v1757_v49 = vmul.f32 %v1756_v48, %v4931_v1  ;;  %v1798_v61 = vmul.f32 %v1796_v22, %v4977_v20 }
 0x25e   :  { %v5281_v26 = vpop.permute.xlu1 %1312  ;;  %v5283_v34 = vpop.permute.xlu0 %1354 }
 0x25f   :  { %7104 = vst [vmem:[#allocation118_spill] sm:$0xff] %v5281_v26  ;;  %7105 = vst [vmem:[#allocation119_spill] sm:$0xff] %v5283_v34  ;;  %v1833_v26 = vstv %s4225_s27  ;;  %s5481_s27 = sld [smem:[#allocation5 + $0xe]] }
 0x260   :  { %1745 = vrot.lane.b32.xlu1 %v1738_v7, %s4460_s5  ;;  %1787 = vrot.lane.b32.xlu0 %v1779_v10, %s4462_s8  ;;  %v1759_v10 = vmul.f32 %v1756_v48, %v5005_v29  ;;  %v1853_v48 = vstv %s4226_s28  ;;  %s5486_s28 = sld [smem:[#allocation5 + $0x15]] }
 0x262   :  { %v5289_v54 = vpop.permute.xlu1 %1316  ;;  %v5291_v16 = vpop.permute.xlu0 %1372 }
 0x263   :  { %7106 = vst [vmem:[#allocation120_spill] sm:$0xff] %v5289_v54  ;;  %7107 = vst [vmem:[#allocation121_spill] sm:$0xff] %v5291_v16  ;;  %v1834_v54 = vmul.f32 %v1833_v26, %v4931_v1 }
 0x264   :  { %1763 = vrot.lane.b32.xlu1 %v1757_v49, %s4461_s7  ;;  %1805 = vrot.lane.b32.xlu0 %v1798_v61, %s4463_s9  ;;  %v1778_v49 = vmul.f32 %v1776_v55, %v4977_v20  ;;  %v1836_v61 = vmul.f32 %v1833_v26, %v5005_v29 }
 0x266   :  { %v5297_v46 = vpop.permute.xlu1 %1334  ;;  %v5299_v7 = vpop.permute.xlu0 %1376 }
 0x267   :  { %7108 = vst [vmem:[#allocation122_spill] sm:$0xff] %v5297_v46  ;;  %7109 = vst [vmem:[#allocation123_spill] sm:$0xff] %v5299_v7 }
 0x268   :  { %1767 = vrot.lane.b32.xlu1 %v1759_v10, %s4461_s7  ;;  %1840 = vrot.lane.b32.xlu0 %v1834_v54, %s4458_s29  ;;  %v1797_v10 = vmul.f32 %v1796_v22, %v4931_v1  ;;  %v1855_v54 = vmul.f32 %v1853_v48, %v4977_v20 }
 0x26a   :  { %v5305_v16 = vpop.permute.xlu1 %1352  ;;  %v5307_v34 = vpop.permute.xlu0 %1394 }
 0x26b   :  { %7110 = vst [vmem:[#allocation124_spill] sm:$0xff] %v5305_v16  ;;  %7111 = vst [vmem:[#allocation125_spill] sm:$0xff] %v5307_v34  ;;  %v1873_v16 = vstv %s4227_s30  ;;  %s5488_s30 = sld [smem:[#allocation5 + $0x1c]] }
 0x26c   :  { %1785 = vrot.lane.b32.xlu1 %v1778_v49, %s4462_s8  ;;  %1844 = vrot.lane.b32.xlu0 %v1836_v61, %s4458_s29  ;;  %v1799_v61 = vmul.f32 %v1796_v22, %v5005_v29  ;;  %v1893_v22 = vstv %s4228_s4  ;;  %s5494_s4 = sld [smem:[#allocation5 + $0x23]] }
 0x26e   :  { %v5313_v7 = vpop.permute.xlu1 %1356  ;;  %v5315_v46 = vpop.permute.xlu0 %1429 }
 0x26f   :  { %7112 = vst [vmem:[#allocation126_spill] sm:$0xff] %v5313_v7  ;;  %7113 = vst [vmem:[#allocation127_spill] sm:$0xff] %v5315_v46  ;;  %v1874_v7 = vmul.f32 %v1873_v16, %v4931_v1 }
 0x270   :  { %1803 = vrot.lane.b32.xlu1 %v1797_v10, %s4463_s9  ;;  %1862 = vrot.lane.b32.xlu0 %v1855_v54, %s4459_s3  ;;  %v1835_v10 = vmul.f32 %v1833_v26, %v4977_v20  ;;  %v1876_v54 = vmul.f32 %v1873_v16, %v5005_v29 }
 0x272   :  { %v5321_v55 = vpop.permute.xlu1 %1374  ;;  %v5323_v49 = vpop.permute.xlu0 %1433 }
 0x273   :  { %7114 = vst [vmem:[#allocation128_spill] sm:$0xff] %v5321_v55  ;;  %7115 = vst [vmem:[#allocation129_spill] sm:$0xff] %v5323_v49 }
 0x274   :  { %1807 = vrot.lane.b32.xlu1 %v1799_v61, %s4463_s9  ;;  %1880 = vrot.lane.b32.xlu0 %v1874_v7, %s4460_s5  ;;  %v1854_v61 = vmul.f32 %v1853_v48, %v4931_v1  ;;  %v1895_v7 = vmul.f32 %v1893_v22, %v4977_v20 }
 0x276   :  { %v5329_v34 = vpop.permute.xlu1 %1392  ;;  %v5331_v46 = vpop.permute.xlu0 %1451 }
 0x277   :  { %7116 = vst [vmem:[#allocation130_spill] sm:$0xff] %v5329_v34  ;;  %7117 = vst [vmem:[#allocation131_spill] sm:$0xff] %v5331_v46  ;;  %v1913_v34 = vstv %s4229_s6  ;;  %s5496_s6 = sld [smem:[#allocation5 + $0x31]] }
 0x278   :  { %1842 = vrot.lane.b32.xlu1 %v1835_v10, %s4458_s29  ;;  %1884 = vrot.lane.b32.xlu0 %v1876_v54, %s4460_s5  ;;  %v1856_v54 = vmul.f32 %v1853_v48, %v5005_v29  ;;  %v1933_v48 = vstv %s4230_s10  ;;  %s4196_s10 = sld [smem:[#allocation5 + $0x38]] }
 0x27a   :  { %v5337_v49 = vpop.permute.xlu1 %1396  ;;  %v5339_v55 = vpop.permute.xlu0 %1469 }
 0x27b   :  { %7118 = vst [vmem:[#allocation132_spill] sm:$0xff] %v5337_v49  ;;  %7119 = vst [vmem:[#allocation133_spill] sm:$0xff] %v5339_v55  ;;  %v1914_v49 = vmul.f32 %v1913_v34, %v4931_v1  ;;  %v78_v55 = vld [vmem:[#allocation3 + $0x8] sm:$0xf] }
 0x27c   :  { %1860 = vrot.lane.b32.xlu1 %v1854_v61, %s4459_s3  ;;  %1902 = vrot.lane.b32.xlu0 %v1895_v7, %s4461_s7  ;;  %v80_v46 = vmax.f32 %v78_v55, %v5185_v25  ;;  %v1894_v25 = vmul.f32 %v1893_v22, %v4931_v1  ;;  %v1935_v55 = vmul.f32 %v1933_v48, %v4977_v20 }
 0x27d   :  { %v7164_v41 = vstv %s5496_s6 }
 0x27e   :  { %v5345_v26 = vpop.permute.xlu1 %1431  ;;  %v5347_v10 = vpop.permute.xlu0 %1473  ;;  %82 = vst [vmem:[#allocation3 + $0x8] sm:$0xf] %v80_v46  ;;  %v5565_v14 = vmul.f32 %v4381_v15, %v7164_v41 }
 0x27f   :  { %7120 = vst [vmem:[#allocation134_spill] sm:$0xff] %v5345_v26  ;;  %7121 = vst [vmem:[#allocation135_spill] sm:$0xff] %v5347_v10  ;;  %v1875_v26 = vmul.f32 %v1873_v16, %v4977_v20  ;;  %v1916_v10 = vmul.f32 %v1913_v34, %v5005_v29 }
 0x280   :  { %1864 = vrot.lane.b32.xlu1 %v1856_v54, %s4459_s3  ;;  %1920 = vrot.lane.b32.xlu0 %v1914_v49, %s4462_s8  ;;  %v1970_v49 = vstv %s4232_s11  ;;  %s4203_s11 = sld [smem:[#allocation5 + $0x3f]]  ;;  %7165 = vst [vmem:[#allocation178_spill] sm:$0xff] %v5565_v14 }
 0x282   :  { %v5354_v61 = vpop.permute.xlu1 %1449  ;;  %v5356_v7 = vpop.permute.xlu0 %1491 }
 0x283   :  { %7122 = vst [vmem:[#allocation136_spill] sm:$0xff] %v5354_v61  ;;  %7123 = vst [vmem:[#allocation137_spill] sm:$0xff] %v5356_v7 }
 0x284   :  { %1882 = vrot.lane.b32.xlu1 %v1875_v26, %s4460_s5  ;;  %1924 = vrot.lane.b32.xlu0 %v1916_v10, %s4462_s8  ;;  %v1896_v26 = vmul.f32 %v1893_v22, %v5005_v29  ;;  %v1971_v10 = vmul.f32 %v1970_v49, %v4931_v1  ;;  %v1990_v22 = vstv %s4233_s12  ;;  %s5505_s12 = sld [smem:[#allocation5 + $0x46]] }
 0x285   :  { %v2132_v57 = vld [vmem:[#allocation3 + $0x8] sm:$0xff] }
 0x286   :  { %v5362_v63 = vpop.permute.xlu1 %1453  ;;  %v5364_v54 = vpop.permute.xlu0 %1509 }
 0x287   :  { %7124 = vst [vmem:[#allocation138_spill] sm:$0xff] %v5362_v63  ;;  %7125 = vst [vmem:[#allocation139_spill] sm:$0xff] %v5364_v54 }
 0x288   :  { %1900 = vrot.lane.b32.xlu1 %v1894_v25, %s4461_s7  ;;  %1942 = vrot.lane.b32.xlu0 %v1935_v55, %s4463_s9  ;;  %v1915_v25 = vmul.f32 %v1913_v34, %v4977_v20  ;;  %v1973_v55 = vmul.f32 %v1970_v49, %v5005_v29 }
 0x28a   :  { %v5370_v16 = vpop.permute.xlu1 %1471  ;;  %v5372_v46 = vpop.permute.xlu0 %1513 }
 0x28b   :  { %7126 = vst [vmem:[#allocation140_spill] sm:$0xff] %v5370_v16  ;;  %7127 = vst [vmem:[#allocation141_spill] sm:$0xff] %v5372_v46  ;;  %v2116_v46 = vld [vmem:[#allocation2 + $0x18] sm:$0xff] }
 0x28c   :  { %1904 = vrot.lane.b32.xlu1 %v1896_v26, %s4461_s7  ;;  %1977 = vrot.lane.b32.xlu0 %v1971_v10, %s4458_s29  ;;  %v1934_v26 = vmul.f32 %v1933_v48, %v4931_v1  ;;  %v1992_v10 = vmul.f32 %v1990_v22, %v4977_v20  ;;  %v2118_v34 = vrot.slane %v2116_v46, 4 }
 0x28e   :  { %v5378_v54 = vpop.permute.xlu1 %1489  ;;  %v5380_v7 = vpop.permute.xlu0 %1531 }
 0x28f   :  { %7128 = vst [vmem:[#allocation142_spill] sm:$0xff] %v5378_v54  ;;  %7129 = vst [vmem:[#allocation143_spill] sm:$0xff] %v5380_v7  ;;  %v2010_v54 = vstv %s4234_s13  ;;  %v1936_v7 = vmul.f32 %v1933_v48, %v5005_v29  ;;  %s5507_s13 = sld [smem:[#allocation5 + $0x4d]] }
 0x290   :  { %1922 = vrot.lane.b32.xlu1 %v1915_v25, %s4462_s8  ;;  %1981 = vrot.lane.b32.xlu0 %v1973_v55, %s4458_s29 }
 0x292   :  { %v5386_v16 = vpop.permute.xlu1 %1493  ;;  %v5388_v63 = vpop.permute.xlu0 %1566 }
 0x293   :  { %7130 = vst [vmem:[#allocation144_spill] sm:$0xff] %v5386_v16  ;;  %7131 = vst [vmem:[#allocation145_spill] sm:$0xff] %v5388_v63  ;;  %v2011_v16 = vmul.f32 %v2010_v54, %v4931_v1  ;;  %v2119_v63 = vadd.f32 %v2118_v34, %v2116_v46  ;;  %v2050_v34 = vstv %s4236_s17  ;;  %s5518_s17 = sld [smem:[#allocation5 + $0x5b]] }
 0x294   :  { %1940 = vrot.lane.b32.xlu1 %v1934_v26, %s4463_s9  ;;  %1999 = vrot.lane.b32.xlu0 %v1992_v10, %s4459_s3  ;;  %v1972_v10 = vmul.f32 %v1970_v49, %v4977_v20 }
 0x295   :  { %v2120_v48 = vrot.slane %v2119_v63, 2 }
 0x296   :  { %v5394_v25 = vpop.permute.xlu1 %1511  ;;  %v5396_v55 = vpop.permute.xlu0 %1570 }
 0x297   :  { %7132 = vst [vmem:[#allocation146_spill] sm:$0xff] %v5394_v25  ;;  %7133 = vst [vmem:[#allocation147_spill] sm:$0xff] %v5396_v55  ;;  %v2013_v25 = vmul.f32 %v2010_v54, %v5005_v29  ;;  %v2030_v55 = vstv %s4235_s14  ;;  %v2121_v49 = vadd.f32 %v2120_v48, %v2119_v63  ;;  %v2134_v48 = vrot.slane %v2132_v57, 4  ;;  %s5512_s14 = sld [smem:[#allocation5 + $0x54]] }
 0x298   :  { %1944 = vrot.lane.b32.xlu1 %v1936_v7, %s4463_s9  ;;  %2017 = vrot.lane.b32.xlu0 %v2011_v16, %s4460_s5  ;;  %v1991_v16 = vmul.f32 %v1990_v22, %v4931_v1  ;;  %v2032_v46 = vmul.f32 %v2030_v55, %v4977_v20 }
 0x299   :  { %v5560_v2 = vstv %s5518_s17  ;;  %s4263_s17 = sld [smem:[#allocation5 + $0x18]] }
 0x29a   :  { %v5402_v61 = vpop.permute.xlu1 %1529  ;;  %v5404_v26 = vpop.permute.xlu0 %1588 }
 0x29b   :  { %7134 = vst [vmem:[#allocation148_spill] sm:$0xff] %v5402_v61  ;;  %7135 = vst [vmem:[#allocation149_spill] sm:$0xff] %v5404_v26  ;;  %v79_v61 = vld [vmem:[#allocation3 + $0x10] sm:$0xf] }
 0x29c   :  { %1979 = vrot.lane.b32.xlu1 %v1972_v10, %s4458_s29  ;;  %2021 = vrot.lane.b32.xlu0 %v2013_v25, %s4460_s5  ;;  %v81_v10 = vmax.f32 %v79_v61, %v5252_v17  ;;  %v2012_v17 = vmul.f32 %v2010_v54, %v4977_v20  ;;  %v2053_v61 = vmul.f32 %v2050_v34, %v5005_v29 }
 0x29d   :  { %v5557_v3 = vstv %s5512_s14  ;;  %s4262_s14 = sld [smem:[#allocation5 + $0x17]] }
 0x29e   :  { %v5410_v40 = vpop.permute.xlu1 %1533  ;;  %v5412_v7 = vpop.permute.xlu0 %1606  ;;  %83 = vst [vmem:[#allocation3 + $0x10] sm:$0xf] %v81_v10  ;;  %v2070_v10 = vstv %s4237_s18  ;;  %s5520_s18 = sld [smem:[#allocation5 + $0x2a]] }
 0x29f   :  { %7136 = vst [vmem:[#allocation150_spill] sm:$0xff] %v5410_v40  ;;  %7137 = vst [vmem:[#allocation151_spill] sm:$0xff] %v5412_v7  ;;  %v1993_v40 = vmul.f32 %v1990_v22, %v5005_v29  ;;  %v2051_v7 = vmul.f32 %v2050_v34, %v4931_v1 }
 0x2a0   :  { %1997 = vrot.lane.b32.xlu1 %v1991_v16, %s4459_s3  ;;  %2039 = vrot.lane.b32.xlu0 %v2032_v46, %s4461_s7  ;;  %v2122_v16 = vrot.slane %v2121_v49, 1 }
 0x2a2   :  { %v5419_v25 = vpop.permute.xlu1 %1568  ;;  %v5421_v26 = vpop.permute.xlu0 %1610  ;;  %v2123_v22 = vadd.f32 %v2122_v16, %v2121_v49  ;;  %v2033_v49 = vmul.f32 %v2030_v55, %v5005_v29 }
 0x2a3   :  { %7138 = vst [vmem:[#allocation152_spill] sm:$0xff] %v5419_v25  ;;  %7139 = vst [vmem:[#allocation153_spill] sm:$0xff] %v5421_v26  ;;  %v2031_v26 = vmul.f32 %v2030_v55, %v4931_v1 }
 0x2a4   :  { %2001 = vrot.lane.b32.xlu1 %v1993_v40, %s4459_s3  ;;  %2057 = vrot.lane.b32.xlu0 %v2051_v7, %s4462_s8  ;;  %v2130_v54 = vmul.f32 0.25, %v2123_v22 }
 0x2a6   :  { %v5427_v46 = vpop.permute.xlu1 %1586  ;;  %v5429_v63 = vpop.permute.xlu0 %1628 }
 0x2a7   :  { %7140 = vst [vmem:[#allocation154_spill] sm:$0xff] %v5427_v46  ;;  %7141 = vst [vmem:[#allocation155_spill] sm:$0xff] %v5429_v63  ;;  %v2072_v46 = vmul.f32 %v2070_v10, %v4977_v20  ;;  %v2135_v63 = vmax.f32 %v2132_v57, %v2134_v48  ;;  %v2071_v48 = vmul.f32 %v2070_v10, %v4931_v1 }
 0x2a8   :  { %2019 = vrot.lane.b32.xlu1 %v2012_v17, %s4460_s5  ;;  %2061 = vrot.lane.b32.xlu0 %v2053_v61, %s4462_s8 }
 0x2a9   :  { %v2136_v16 = vrot.slane %v2135_v63, 2 }
 0x2aa   :  { %v5435_v40 = vpop.permute.xlu1 %1590  ;;  %v5437_v7 = vpop.permute.xlu0 %1646 }
 0x2ab   :  { %7142 = vst [vmem:[#allocation156_spill] sm:$0xff] %v5435_v40  ;;  %7143 = vst [vmem:[#allocation157_spill] sm:$0xff] %v5437_v7  ;;  %v2117_v7 = vld [vmem:[#allocation2 + $0x8] sm:$0xff] }
 0x2ac   :  { %2037 = vrot.lane.b32.xlu1 %v2031_v26, %s4461_s7  ;;  %2079 = vrot.lane.b32.xlu0 %v2072_v46, %s4463_s9  ;;  %v2052_v26 = vmul.f32 %v2050_v34, %v4977_v20  ;;  %v2124_v57 = vrot.slane %v2117_v7, 4  ;;  %v2137_v46 = vmax.f32 %v2135_v63, %v2136_v16  ;;  %v2073_v34 = vmul.f32 %v2070_v10, %v5005_v29 }
 0x2ae   :  { %v5443_v17 = vpop.permute.xlu1 %1608  ;;  %v5445_v61 = vpop.permute.xlu0 %1650 }
 0x2af   :  { %7144 = vst [vmem:[#allocation158_spill] sm:$0xff] %v5443_v17  ;;  %7145 = vst [vmem:[#allocation159_spill] sm:$0xff] %v5445_v61  ;;  %v2138_v61 = vrot.slane %v2137_v46, 1  ;;  %v4379_v17 = vld [vmem:[#allocation4 + $0x10] sm:$0xff] }
 0x2b0   :  { %2041 = vrot.lane.b32.xlu1 %v2033_v49, %s4461_s7  ;;  %2147 = vrot.lane.b32.xlu0 %v2130_v54, %s4451_s1  ;;  %v2125_v49 = vadd.f32 %v2124_v57, %v2117_v7  ;;  %v2133_v57 = vld [vmem:[#allocation3 + $0x10] sm:$0xff] }
 0x2b1   :  { %v5471_v16 = vmax.f32 %v2137_v46, %v2138_v61 }
 0x2b2   :  { %v5450_v40 = vpop.permute.xlu1 %1626  ;;  %v5452_v25 = vpop.permute.xlu0 %1668  ;;  %v2126_v63 = vrot.slane %v2125_v49, 2 }
 0x2b3   :  { %7146 = vst [vmem:[#allocation160_spill] sm:$0xff] %v5450_v40  ;;  %7147 = vst [vmem:[#allocation161_spill] sm:$0xff] %v5452_v25  ;;  %v5547_v40 = vstv %s5505_s12  ;;  %s4259_s12 = sld [smem:[#allocation5 + $0x14]] }
 0x2b4   :  { %2059 = vrot.lane.b32.xlu1 %v2052_v26, %s4462_s8  ;;  %2156 = vrot.lane.b32.xlu0 %v2130_v54, %s4450_s0  ;;  %v2127_v29 = vadd.f32 %v2126_v63, %v2125_v49 }
 0x2b6   :  { %v5457_v22 = vpop.permute.xlu1 %1630  ;;  %v5459_v55 = vpop.permute.xlu0 %1703  ;;  %v2128_v61 = vrot.slane %v2127_v29, 1 }
 0x2b7   :  { %7148 = vst [vmem:[#allocation162_spill] sm:$0xff] %v5457_v22  ;;  %7149 = vst [vmem:[#allocation163_spill] sm:$0xff] %v5459_v55  ;;  %v497_v22 = vstv %s5481_s27  ;;  %s4251_s27 = sld [smem:[#allocation5 + $0xc]] }
 0x2b8   :  { %2077 = vrot.lane.b32.xlu1 %v2071_v48, %s4463_s9  ;;  %2164 = vrot.lane.b32.xlu0 %v2130_v54, %s4452_s19  ;;  %v2129_v49 = vadd.f32 %v2128_v61, %v2127_v29 }
 0x2ba   :  { %v5464_v25 = vpop.permute.xlu1 %1648  ;;  %v5466_v20 = vpop.permute.xlu0 %1707  ;;  %v5523_v29 = vmul.f32 0.25, %v2129_v49  ;;  %v5539_v49 = vstv %s4203_s11  ;;  %s4258_s11 = sld [smem:[#allocation5 + $0x13]] }
 0x2bb   :  { %7150 = vst [vmem:[#allocation164_spill] sm:$0xff] %v5464_v25  ;;  %7151 = vst [vmem:[#allocation165_spill] sm:$0xff] %v5466_v20  ;;  %v5550_v20 = vstv %s5507_s13  ;;  %v5571_v6 = vmul.f32 %v4381_v15, %v5539_v49  ;;  %s4261_s13 = sld [smem:[#allocation5 + $0x16]] }
 0x2bc   :  { %2081 = vrot.lane.b32.xlu1 %v2073_v34, %s4463_s9  ;;  %2172 = vrot.lane.b32.xlu0 %v2130_v54, %s4453_s20  ;;  %v2140_v34 = vrot.slane %v2133_v57, 4  ;;  %v5585_v14 = vmul.f32 %v4381_v15, %v5550_v20 }
 0x2bd   :  { %7167 = vst [vmem:[#allocation180_spill] sm:$0xff] %v5571_v6 }
 0x2be   :  { %v5475_v1 = vpop.permute.xlu1 %1666  ;;  %v5477_v26 = vpop.permute.xlu0 %1725  ;;  %v2141_v61 = vmax.f32 %v2133_v57, %v2140_v34  ;;  %v4378_v34 = vld [vmem:[#allocation4] sm:$0xff]  ;;  %7169 = vst [vmem:[#allocation182_spill] sm:$0xff] %v5585_v14 }
 0x2bf   :  { %7152 = vst [vmem:[#allocation166_spill] sm:$0xff] %v5475_v1  ;;  %7153 = vst [vmem:[#allocation167_spill] sm:$0xff] %v5477_v26  ;;  %v269_v1 = vstv %s5473_s25  ;;  %v773_v26 = vstv %s5488_s30  ;;  %s4249_s25 = sld [smem:[#allocation5 + $0xa]] }
 0x2c0   :  { %2180 = vrot.lane.b32.xlu0 %v2130_v54, %s4454_s21  ;;  %2152 = vrot.lane.b32.xlu1 %v5471_v16, %s4451_s1  ;;  %v2142_v57 = vrot.slane %v2141_v61, 2  ;;  %s4254_s30 = sld [smem:[#allocation5 + $0xf]] }
 0x2c2   :  { %v5490_v10 = vpop.permute.xlu1 %1670  ;;  %v5492_v7 = vpop.permute.xlu0 %1743 }
 0x2c3   :  { %7154 = vst [vmem:[#allocation168_spill] sm:$0xff] %v5490_v10  ;;  %7155 = vst [vmem:[#allocation169_spill] sm:$0xff] %v5492_v7  ;;  %v635_v7 = vstv %s5486_s28  ;;  %s4252_s28 = sld [smem:[#allocation5 + $0xd]] }
 0x2c4   :  { %2188 = vrot.lane.b32.xlu0 %v2130_v54, %s4455_s22  ;;  %2160 = vrot.lane.b32.xlu1 %v5471_v16, %s4450_s0 }
 0x2c6   :  { %v5501_v46 = vpop.permute.xlu1 %1705  ;;  %v5503_v48 = vpop.permute.xlu0 %1747 }
 0x2c7   :  { %7156 = vst [vmem:[#allocation170_spill] sm:$0xff] %v5501_v46  ;;  %7157 = vst [vmem:[#allocation171_spill] sm:$0xff] %v5503_v48  ;;  %v359_v48 = vstv %s5479_s26  ;;  %v4380_v46 = vld [vmem:[#allocation4 + $0x8] sm:$0xff]  ;;  %s4250_s26 = sld [smem:[#allocation5 + $0xb]] }
 0x2c8   :  { %2196 = vrot.lane.b32.xlu0 %v2130_v54, %s4456_s23  ;;  %2168 = vrot.lane.b32.xlu1 %v5471_v16, %s4452_s19  ;;  %v361_v55 = vmul.f32 %v4380_v46, %v359_v48 }
 0x2ca   :  { %v5514_v63 = vpop.permute.xlu1 %1723  ;;  %v5516_v10 = vpop.permute.xlu0 %1765 }
 0x2cb   :  { %7158 = vst [vmem:[#allocation172_spill] sm:$0xff] %v5514_v63  ;;  %7159 = vst [vmem:[#allocation173_spill] sm:$0xff] %v5516_v10  ;;  %v362_v63 = vmul.f32 %v4379_v17, %v359_v48 }
 0x2cc   :  { %2204 = vrot.lane.b32.xlu0 %v2130_v54, %s4457_s24  ;;  %2176 = vrot.lane.b32.xlu1 %v5471_v16, %s4453_s20  ;;  %v5537_v54 = vstv %s4196_s10  ;;  %s4257_s10 = sld [smem:[#allocation5 + $0x12]] }
 0x2cd   :  { %v5568_v0 = vmul.f32 %v4381_v15, %v5537_v54 }
 0x2ce   :  { %v5529_v25 = vpop.permute.xlu1 %1727  ;;  %v5531_v10 = vpop.permute.xlu0 %1783 }
 0x2cf   :  { %7160 = vst [vmem:[#allocation174_spill] sm:$0xff] %v5529_v25  ;;  %7161 = vst [vmem:[#allocation175_spill] sm:$0xff] %v5531_v10  ;;  %v360_v10 = vmul.f32 %v4378_v34, %v359_v48  ;;  %v911_v25 = vstv %s5494_s4  ;;  %v382_v48 = vadd.f32 %v4739_v58, %v362_v63  ;;  %v5588_v58 = vmul.f32 %v4381_v15, %v5557_v3  ;;  %s4255_s4 = sld [smem:[#allocation5 + $0x10]] }
 0x2d0   :  { %2213 = vrot.lane.b32.xlu0 %v5523_v29, %s4451_s1  ;;  %2184 = vrot.lane.b32.xlu1 %v5471_v16, %s4454_s21  ;;  %7166 = vst [vmem:[#allocation179_spill] sm:$0xff] %v5568_v0  ;;  %v498_v63 = vmul.f32 %v4378_v34, %v497_v22 }
 0x2d1   :  { %v380_v56 = vadd.f32 %v4731_v53, %v360_v10  ;;  %v2143_v53 = vmax.f32 %v2141_v61, %v2142_v57  ;;  %v5582_v10 = vmul.f32 %v4381_v15, %v5547_v40  ;;  %7170 = vst [vmem:[#allocation183_spill] sm:$0xff] %v5588_v58  ;;  %v5596_v61 = vmul.f32 %v4381_v15, %v5560_v2 }
 0x2d2   :  { %v5552_v44 = vpop.permute.xlu1 %1745  ;;  %v5554_v38 = vpop.permute.xlu0 %1787  ;;  %v5602_v57 = vmul.f32 %v4378_v34, %v911_v25  ;;  %v271_v58 = vmul.f32 %v4380_v46, %v269_v1 }
 0x2d3   :  { %7162 = vst [vmem:[#allocation176_spill] sm:$0xff] %v5552_v44  ;;  %7163 = vst [vmem:[#allocation177_spill] sm:$0xff] %v5554_v38  ;;  %v381_v38 = vadd.f32 %v4761_v8, %v361_v55  ;;  %v1049_v44 = vstv %s5520_s18  ;;  %v400_v41 = vadd.f32 %v4769_v12, %v380_v56  ;;  %v270_v8 = vmul.f32 %v4378_v34, %v269_v1  ;;  %s4264_s18 = sld [smem:[#allocation5 + $0x19]] }
 0x2d4   :  { %2222 = vrot.lane.b32.xlu0 %v5523_v29, %s4450_s0  ;;  %2192 = vrot.lane.b32.xlu1 %v5471_v16, %s4455_s22  ;;  %7168 = vst [vmem:[#allocation181_spill] sm:$0xff] %v5582_v10  ;;  %v402_v55 = vadd.f32 %v4777_v18, %v382_v48  ;;  %7173 = vst [vmem:[#allocation186_spill] sm:$0xff] %v5596_v61  ;;  %v5598_v12 = vmul.f32 %v4378_v34, %v635_v7  ;;  %v2144_v15 = vrot.slane %v2143_v53, 1 }
 0x2d5   :  { %v5600_v56 = vmul.f32 %v4378_v34, %v773_v26  ;;  %7175 = vst [vmem:[#allocation188_spill] sm:$0xff] %v5602_v57  ;;  %v5604_v14 = vmul.f32 %v4378_v34, %v1049_v44  ;;  %v401_v10 = vadd.f32 %v4747_v62, %v381_v38  ;;  %v499_v18 = vmul.f32 %v4380_v46, %v497_v22 }
 0x2d6   :  { %v5591_v6 = vpop.permute.xlu1 %1763  ;;  %v5593_v0 = vpop.permute.xlu0 %1805  ;;  %v420_v48 = vadd.f32 %v4755_v4, %v400_v41  ;;  %v5612_v61 = vmul.f32 %v4379_v17, %v635_v7  ;;  %v422_v1 = vadd.f32 %v4763_v9, %v402_v55  ;;  %v5618_v62 = vmul.f32 %v4380_v46, %v773_v26 }
 0x2d7   :  { %7171 = vst [vmem:[#allocation184_spill] sm:$0xff] %v5591_v6  ;;  %7172 = vst [vmem:[#allocation185_spill] sm:$0xff] %v5593_v0  ;;  %v500_v0 = vmul.f32 %v4379_v17, %v497_v22  ;;  %v637_v6 = vmul.f32 %v4380_v46, %v635_v7  ;;  %v421_v34 = vadd.f32 %v4785_v23, %v401_v10  ;;  %v7177_v10 = vstv %s5496_s6  ;;  %s4256_s6 = sld [smem:[#allocation5 + $0x11]] }
 0x2d8   :  { %7174 = vst [vmem:[#allocation187_spill] sm:$0xff] %v5600_v56  ;;  %7176 = vst [vmem:[#allocation189_spill] sm:$0xff] %v5604_v14  ;;  %2230 = vrot.lane.b32.xlu0 %v5523_v29, %s4452_s19  ;;  %2200 = vrot.lane.b32.xlu1 %v5471_v16, %s4456_s23  ;;  %v5616_v14 = vmul.f32 %v4379_v17, %v773_v26  ;;  %v440_v56 = vadd.f32 %v4793_v28, %v420_v48 }
 0x2d9   :  { %v519_v4 = vadd.f32 %v4833_v5, %v499_v18  ;;  %v5626_v22 = vmul.f32 %v4379_v17, %v911_v25  ;;  %v5628_v7 = vmul.f32 %v4380_v46, %v911_v25  ;;  %v442_v23 = vadd.f32 %v4801_v36, %v422_v1  ;;  %v4382_v5 = vld [vmem:[#allocation4 + $0x20] sm:$0xff] }
 0x2da   :  { %v5620_v38 = vpop.permute.xlu1 %1767  ;;  %v5622_v57 = vpop.permute.xlu0 %1840  ;;  %v5631_v9 = vmul.f32 %v4379_v17, %v1049_v44  ;;  %v5637_v26 = vmax.f32 %v2143_v53, %v2144_v15  ;;  %v284_v28 = vadd.f32 %v4689_v27, %v270_v8  ;;  %v5640_v41 = vmul.f32 %v4380_v46, %v1049_v44 }
 0x2db   :  { %v5644_v25 = vmul.f32 %v4382_v5, %v7177_v10  ;;  %v5647_v36 = vmul.f32 %v4382_v5, %v5537_v54  ;;  %v518_v17 = vadd.f32 %v4803_v37, %v498_v63  ;;  %v441_v55 = vadd.f32 %v4771_v13, %v421_v34 }
 0x2dc   :  { %2238 = vrot.lane.b32.xlu0 %v5523_v29, %s4453_s20  ;;  %2208 = vrot.lane.b32.xlu1 %v5471_v16, %s4457_s24  ;;  %v5652_v18 = vmul.f32 %v4382_v5, %v5539_v49  ;;  %v5655_v16 = vmul.f32 %v4382_v5, %v5547_v40  ;;  %v298_v46 = vadd.f32 %v4695_v32, %v284_v28  ;;  %v7181_v28 = vld [vmem:[#allocation23_spill] sm:$0xff] }
 0x2dd   :  { %v520_v53 = vadd.f32 %v4811_v45, %v500_v0  ;;  %v460_v8 = vadd.f32 %v4779_v19, %v440_v56  ;;  %v539_v37 = vadd.f32 %v4819_v51, %v519_v4  ;;  %v461_v13 = vadd.f32 %v4809_v42, %v441_v55  ;;  %v7180_v4 = vld [vmem:[#allocation20_spill] sm:$0xff] }
 0x2de   :  { %v5657_v27 = vpop.permute.xlu1 %1785  ;;  %v5659_v44 = vpop.permute.xlu0 %1844  ;;  %v462_v63 = vadd.f32 %v4787_v24, %v442_v23  ;;  %v538_v15 = vadd.f32 %v4841_v11, %v518_v17  ;;  %v285_v32 = vadd.f32 %v4713_v43, %v271_v58  ;;  %v5676_v51 = vmul.f32 %v4382_v5, %v5550_v20 }
 0x2df   :  { %v540_v45 = vadd.f32 %v4849_v21, %v520_v53  ;;  %v559_v19 = vadd.f32 %v4857_v33, %v539_v37  ;;  %v312_v42 = vadd.f32 %v4701_v35, %v298_v46  ;;  %v480_v24 = vadd.f32 %v4817_v50, %v460_v8  ;;  %v5690_v33 = vld [vmem:[#allocation4 + $0x28] sm:$0xff]  ;;  %v7184_v46 = vld [vmem:[#allocation25_spill] sm:$0xff]  ;;  %v7186_v37 = vld [vmem:[#allocation34_spill] sm:$0xff] }
 0x2e0   :  { %2246 = vrot.lane.b32.xlu0 %v5523_v29, %s4454_s21  ;;  %2218 = vrot.lane.b32.xlu1 %v5637_v26, %s4451_s1  ;;  %v482_v11 = vadd.f32 %v4825_v59, %v462_v63  ;;  %v5686_v48 = vmul.f32 %v4382_v5, %v5557_v3  ;;  %v299_v43 = vadd.f32 %v4721_v47, %v285_v32  ;;  %v7185_v53 = vld [vmem:[#allocation27_spill] sm:$0xff]  ;;  %s6077_s1 = sld [smem:[#allocation5 + $0x2]] }
 0x2e1   :  { %v657_v21 = vadd.f32 %v4905_v31, %v637_v6  ;;  %v5694_v35 = vmul.f32 %v5690_v33, %v5537_v54  ;;  %v5697_v50 = vmul.f32 %v4382_v5, %v5560_v2  ;;  %v326_v59 = vadd.f32 %v4707_v39, %v312_v42  ;;  %v7178_v6 = vld [vmem:[#allocation19_spill] sm:$0xff]  ;;  %v7179_v54 = vld [vmem:[#allocation26_spill] sm:$0xff] }
 0x2e2   :  { %v5681_v0 = vpop.permute.xlu1 %1803  ;;  %v5683_v56 = vpop.permute.xlu0 %1862  ;;  %v481_v58 = vadd.f32 %v4795_v30, %v461_v13  ;;  %v558_v34 = vadd.f32 %v4827_v60, %v538_v15  ;;  %v313_v47 = vadd.f32 %v4729_v52, %v299_v43  ;;  %v560_v31 = vadd.f32 %v7178_v6, %v540_v45  ;;  %v7182_v60 = vld [vmem:[#allocation28_spill] sm:$0xff]  ;;  %v7188_v15 = vld [vmem:[#allocation14_spill] sm:$0xff]  ;;  %v7193_v6 = vld [vmem:[#allocation17_spill] sm:$0xff] }
 0x2e3   :  { %v656_v1 = vadd.f32 %v7179_v54, %v5598_v12  ;;  %v579_v39 = vadd.f32 %v7180_v4, %v559_v19  ;;  %v487_v23 = vrot.slane %v480_v24, 1  ;;  %v490_v30 = vrot.slane %v482_v11, 1  ;;  %v7187_v12 = vld [vmem:[#allocation30_spill] sm:$0xff]  ;;  %v7189_v45 = vld [vmem:[#allocation16_spill] sm:$0xff] }
 0x2e4   :  { %2254 = vrot.lane.b32.xlu0 %v5523_v29, %s4455_s22  ;;  %2226 = vrot.lane.b32.xlu1 %v5637_v26, %s4450_s0  ;;  %v578_v5 = vadd.f32 %v7181_v28, %v558_v34  ;;  %v658_v10 = vadd.f32 %v7182_v60, %v5612_v61  ;;  %v580_v52 = vadd.f32 %v7184_v46, %v560_v31  ;;  %v488_v42 = vrot.slane %v481_v58, 1  ;;  %v7190_v24 = vld [vmem:[#allocation36_spill] sm:$0xff]  ;;  %v7191_v61 = vld [vmem:[#allocation38_spill] sm:$0xff]  ;;  %v7192_v58 = vld [vmem:[#allocation15_spill] sm:$0xff]  ;;  %s6072_s0 = sld [smem:[#allocation5 + $0x1]] }
 0x2e5   :  { %v599_v8 = vadd.f32 %v7185_v53, %v579_v39  ;;  %v676_v13 = vadd.f32 %v7186_v37, %v656_v1  ;;  %v677_v63 = vadd.f32 %v7187_v12, %v657_v21  ;;  %v340_v32 = vadd.f32 %v7188_v15, %v326_v59  ;;  %v7194_v39 = vld [vmem:[#allocation24_spill] sm:$0xff]  ;;  %v7198_v37 = vld [vmem:[#allocation33_spill] sm:$0xff]  ;;  %v7200_v15 = vld [vmem:[#allocation43_spill] sm:$0xff] }
 0x2e6   :  { %v5714_v17 = vpop.permute.xlu1 %1807  ;;  %v5716_v55 = vpop.permute.xlu0 %1880  ;;  %v327_v19 = vadd.f32 %v7189_v45, %v313_v47  ;;  %v678_v11 = vadd.f32 %v7190_v24, %v658_v10  ;;  %v5732_v34 = vmul.f32 %v5690_v33, %v5539_v49  ;;  %v5736_v21 = vmul.f32 %v5690_v33, %v5547_v40  ;;  %v7195_v40 = vld [vmem:[#allocation21_spill] sm:$0xff]  ;;  %v7196_v10 = vld [vmem:[#allocation22_spill] sm:$0xff] }
 0x2e7   :  { %7183 = vst [vmem:[#allocation19_spill] sm:$0xff] %v5714_v17  ;;  %v697_v43 = vadd.f32 %v7191_v61, %v677_v63  ;;  %v5740_v59 = vmul.f32 %v5690_v33, %v5550_v20  ;;  %v354_v47 = vadd.f32 %v7192_v58, %v340_v32  ;;  %v489_v54 = vsel %vm486_vm3, %v487_v23, %v488_v42  ;;  %v7197_v20 = vld [vmem:[#allocation32_spill] sm:$0xff]  ;;  %v7199_v63 = vld [vmem:[#allocation187_spill] sm:$0xff] }
 0x2e8   :  { %2262 = vrot.lane.b32.xlu0 %v5523_v29, %s4456_s23  ;;  %2234 = vrot.lane.b32.xlu1 %v5637_v26, %s4452_s19  ;;  %v341_v31 = vadd.f32 %v7193_v6, %v327_v19  ;;  %v491_v1 = vsel %vm486_vm3, %v488_v42, %v490_v30  ;;  %v619_v28 = vadd.f32 %v7194_v39, %v599_v8  ;;  %v7201_v30 = vld [vmem:[#allocation50_spill] sm:$0xff]  ;;  %v7205_v42 = vld [vmem:[#allocation45_spill] sm:$0xff]  ;;  %v7207_v58 = vld [vmem:[#allocation31_spill] sm:$0xff]  ;;  %s6082_s19 = sld [smem:[#allocation5 + $0x3]] }
 0x2e9   :  { %v598_v60 = vadd.f32 %v7195_v40, %v578_v5  ;;  %v600_v46 = vadd.f32 %v7196_v10, %v580_v52  ;;  %v696_v53 = vadd.f32 %v7197_v20, %v676_v13  ;;  %v698_v12 = vadd.f32 %v7198_v37, %v678_v11  ;;  %v7202_v5 = vld [vmem:[#allocation29_spill] sm:$0xff]  ;;  %v7203_v52 = vld [vmem:[#allocation40_spill] sm:$0xff]  ;;  %v7204_v13 = vld [vmem:[#allocation35_spill] sm:$0xff] }
 0x2ea   :  { %v5746_v4 = vpop.permute.xlu1 %1842  ;;  %v5748_v49 = vpop.permute.xlu0 %1884  ;;  %v794_v23 = vadd.f32 %v7200_v15, %v7199_v63  ;;  %v795_v32 = vadd.f32 %v7201_v30, %v5618_v62  ;;  %v717_v19 = vadd.f32 %v7204_v13, %v697_v43  ;;  %v796_v24 = vadd.f32 %v7205_v42, %v5616_v14  ;;  %v7206_v11 = vld [vmem:[#allocation18_spill] sm:$0xff]  ;;  %v7209_v40 = vld [vmem:[#allocation52_spill] sm:$0xff]  ;;  %v7213_v15 = vld [vmem:[#allocation61_spill] sm:$0xff] }
 0x2eb   :  { %v618_v8 = vadd.f32 %v7202_v5, %v598_v60  ;;  %v716_v45 = vadd.f32 %v7203_v52, %v696_v53  ;;  %v355_v61 = vadd.f32 %v7206_v11, %v341_v31  ;;  %v620_v6 = vadd.f32 %v7207_v58, %v600_v46  ;;  %v7208_v62 = vld [vmem:[#allocation42_spill] sm:$0xff]  ;;  %v7210_v60 = vld [vmem:[#allocation44_spill] sm:$0xff]  ;;  %v7216_v42 = vld [vmem:[#allocation37_spill] sm:$0xff] }
 0x2ec   :  { %2270 = vrot.lane.b32.xlu0 %v5523_v29, %s4457_s24  ;;  %2242 = vrot.lane.b32.xlu1 %v5637_v26, %s4453_s20  ;;  %v718_v39 = vadd.f32 %v7208_v62, %v698_v12  ;;  %v814_v29 = vadd.f32 %v7209_v40, %v794_v23  ;;  %v737_v37 = vadd.f32 %v7210_v60, %v717_v19  ;;  %v7211_v53 = vld [vmem:[#allocation54_spill] sm:$0xff]  ;;  %v7212_v43 = vld [vmem:[#allocation188_spill] sm:$0xff]  ;;  %v7215_v12 = vld [vmem:[#allocation47_spill] sm:$0xff]  ;;  %v626_v13 = vrot.slane %v619_v28, 2  ;;  %s6092_s20 = sld [smem:[#allocation5 + $0x4]] }
 0x2ed   :  { %v816_v63 = vadd.f32 %v7211_v53, %v796_v24  ;;  %v932_v30 = vadd.f32 %v7213_v15, %v7212_v43  ;;  %v7214_v14 = vld [vmem:[#allocation68_spill] sm:$0xff]  ;;  %v5782_v5 = vadd.f32 %v489_v54, %v354_v47  ;;  %v5784_v46 = vadd.f32 %v491_v1, %v355_v61  ;;  %v7217_v11 = vld [vmem:[#allocation70_spill] sm:$0xff]  ;;  %v7218_v47 = vld [vmem:[#allocation39_spill] sm:$0xff] }
 0x2ee   :  { %v5772_v10 = vpop.permute.xlu1 %1860  ;;  %v5774_v20 = vpop.permute.xlu0 %1902  ;;  %v933_v31 = vadd.f32 %v7214_v14, %v5628_v7  ;;  %v815_v23 = vadd.f32 %v7215_v12, %v795_v32  ;;  %v5789_v52 = vmul.f32 %v5690_v33, %v5557_v3  ;;  %v625_v19 = vrot.slane %v618_v8, 2  ;;  %v7219_v1 = vld [vmem:[#allocation56_spill] sm:$0xff]  ;;  %v7220_v62 = vld [vmem:[#allocation49_spill] sm:$0xff]  ;;  %v7223_v28 = vld [vmem:[#allocation46_spill] sm:$0xff] }
 0x2ef   :  { %v736_v24 = vadd.f32 %v7216_v42, %v716_v45  ;;  %v952_v58 = vadd.f32 %v7217_v11, %v932_v30  ;;  %v628_v7 = vrot.slane %v620_v6, 2  ;;  %v738_v54 = vadd.f32 %v7218_v47, %v718_v39  ;;  %v7222_v60 = vld [vmem:[#allocation41_spill] sm:$0xff]  ;;  %v7224_v43 = vld [vmem:[#allocation51_spill] sm:$0xff]  ;;  %v7226_v6 = vld [vmem:[#allocation58_spill] sm:$0xff] }
 0x2f0   :  { %2250 = vrot.lane.b32.xlu1 %v5637_v26, %s4454_s21  ;;  %v835_v61 = vadd.f32 %v7219_v1, %v815_v23  ;;  %v834_v32 = vadd.f32 %v7220_v62, %v814_v29  ;;  %v757_v53 = vadd.f32 %v7222_v60, %v737_v37  ;;  %v836_v45 = vadd.f32 %v7224_v43, %v816_v63  ;;  %v7225_v15 = vld [vmem:[#allocation65_spill] sm:$0xff]  ;;  %v7227_v39 = vld [vmem:[#allocation63_spill] sm:$0xff]  ;;  %v7230_v11 = vld [vmem:[#allocation86_spill] sm:$0xff]  ;;  %s6101_s21 = sld [smem:[#allocation5 + $0x5]] }
 0x2f1   :  { %v756_v8 = vadd.f32 %v7223_v28, %v736_v24  ;;  %v953_v30 = vadd.f32 %v7225_v15, %v933_v31  ;;  %v934_v12 = vadd.f32 %v7227_v39, %v5626_v22  ;;  %v7228_v23 = vld [vmem:[#allocation189_spill] sm:$0xff]  ;;  %v7229_v29 = vld [vmem:[#allocation79_spill] sm:$0xff]  ;;  %v1071_v47 = vadd.f32 %v7230_v11, %v5640_v41  ;;  %v7231_v37 = vld [vmem:[#allocation48_spill] sm:$0xff] }
 0x2f2   :  { %v5798_v40 = vpop.permute.xlu1 %1864  ;;  %v5800_v3 = vpop.permute.xlu0 %1920  ;;  %v854_v14 = vadd.f32 %v7226_v6, %v834_v32  ;;  %v1070_v42 = vadd.f32 %v7229_v29, %v7228_v23  ;;  %v758_v24 = vadd.f32 %v7231_v37, %v738_v54  ;;  %v7232_v1 = vld [vmem:[#allocation60_spill] sm:$0xff]  ;;  %v7233_v62 = vld [vmem:[#allocation74_spill] sm:$0xff]  ;;  %v7234_v60 = vld [vmem:[#allocation67_spill] sm:$0xff]  ;;  %v627_v54 = vsel %vm624_vm4, %v625_v19, %v626_v13 }
 0x2f3   :  { %7221 = vst [vmem:[#allocation26_spill] sm:$0xff] %v5800_v3  ;;  %v856_v63 = vadd.f32 %v7232_v1, %v836_v45  ;;  %v973_v31 = vadd.f32 %v7233_v62, %v953_v30  ;;  %v972_v32 = vadd.f32 %v7234_v60, %v952_v58  ;;  %v7235_v28 = vld [vmem:[#allocation53_spill] sm:$0xff]  ;;  %v7236_v22 = vld [vmem:[#allocation72_spill] sm:$0xff]  ;;  %v629_v45 = vsel %vm624_vm4, %v626_v13, %v628_v7  ;;  %v7241_v1 = vld [vmem:[#allocation62_spill] sm:$0xff] }
 0x2f4   :  { %2258 = vrot.lane.b32.xlu1 %v5637_v26, %s4455_s22  ;;  %v855_v43 = vadd.f32 %v7235_v28, %v835_v61  ;;  %v954_v15 = vadd.f32 %v7236_v22, %v934_v12  ;;  %v7237_v6 = vld [vmem:[#allocation81_spill] sm:$0xff]  ;;  %v7238_v23 = vld [vmem:[#allocation88_spill] sm:$0xff]  ;;  %v764_v30 = vrot.slane %v757_v53, 3  ;;  %v7242_v12 = vld [vmem:[#allocation55_spill] sm:$0xff]  ;;  %v763_v22 = vrot.slane %v756_v8, 3  ;;  %s6110_s22 = sld [smem:[#allocation5 + $0x6]] }
 0x2f5   :  { %v1072_v39 = vadd.f32 %v7237_v6, %v5631_v9  ;;  %v1090_v41 = vadd.f32 %v7238_v23, %v1070_v42  ;;  %v7240_v37 = vld [vmem:[#allocation76_spill] sm:$0xff]  ;;  %v874_v62 = vadd.f32 %v7242_v12, %v854_v14  ;;  %v7243_v60 = vld [vmem:[#allocation90_spill] sm:$0xff]  ;;  %v7244_v28 = vld [vmem:[#allocation83_spill] sm:$0xff]  ;;  %v766_v6 = vrot.slane %v758_v24, 3 }
 0x2f6   :  { %v5824_v29 = vpop.permute.xlu1 %1882  ;;  %v5826_v11 = vpop.permute.xlu0 %1924  ;;  %v992_v58 = vadd.f32 %v7240_v37, %v972_v32  ;;  %v875_v61 = vadd.f32 %v7241_v1, %v855_v43  ;;  %v1091_v42 = vadd.f32 %v7244_v28, %v1071_v47  ;;  %v7245_v19 = vld [vmem:[#allocation57_spill] sm:$0xff]  ;;  %v7246_v13 = vld [vmem:[#allocation71_spill] sm:$0xff]  ;;  %v7247_v53 = vld [vmem:[#allocation64_spill] sm:$0xff] }
 0x2f7   :  { %7239 = vst [vmem:[#allocation20_spill] sm:$0xff] %v5826_v11  ;;  %v1092_v9 = vadd.f32 %v7243_v60, %v1072_v39  ;;  %v876_v23 = vadd.f32 %v7245_v19, %v856_v63  ;;  %v993_v7 = vadd.f32 %v7246_v13, %v973_v31  ;;  %v894_v32 = vadd.f32 %v7247_v53, %v874_v62  ;;  %v7248_v37 = vld [vmem:[#allocation69_spill] sm:$0xff]  ;;  %v7249_v1 = vld [vmem:[#allocation92_spill] sm:$0xff]  ;;  %v7254_v63 = vld [vmem:[#allocation179_spill] sm:$0xff] }
 0x2f8   :  { %2266 = vrot.lane.b32.xlu1 %v5637_v26, %s4456_s23  ;;  %v974_v43 = vadd.f32 %v7248_v37, %v954_v15  ;;  %v1111_v14 = vadd.f32 %v7249_v1, %v1091_v42  ;;  %v7250_v12 = vld [vmem:[#allocation85_spill] sm:$0xff]  ;;  %v7252_v28 = vld [vmem:[#allocation80_spill] sm:$0xff]  ;;  %v7257_v15 = vld [vmem:[#allocation59_spill] sm:$0xff]  ;;  %s4247_s23 = sld [smem:[#allocation5 + $0x8]] }
 0x2f9   :  { %v1110_v39 = vadd.f32 %v7250_v12, %v1090_v41  ;;  %v1013_v8 = vadd.f32 %v7252_v28, %v993_v7  ;;  %v7253_v24 = vld [vmem:[#allocation73_spill] sm:$0xff]  ;;  %v7256_v62 = vld [vmem:[#allocation116_spill] sm:$0xff]  ;;  %v895_v53 = vadd.f32 %v7257_v15, %v875_v61  ;;  %v7258_v37 = vld [vmem:[#allocation78_spill] sm:$0xff]  ;;  %v632_v7 = vadd.f32 %v627_v54, %v5782_v5 }
 0x2fa   :  { %v5843_v60 = vpop.permute.xlu1 %1900  ;;  %v5845_v47 = vpop.permute.xlu0 %1942  ;;  %v1012_v11 = vadd.f32 %v7253_v24, %v992_v58  ;;  %v7255_v19 = vld [vmem:[#allocation109_spill] sm:$0xff]  ;;  %v1302_v13 = vadd.f32 %v7256_v62, %v5647_v36  ;;  %v994_v42 = vadd.f32 %v7258_v37, %v974_v43  ;;  %v7259_v1 = vld [vmem:[#allocation94_spill] sm:$0xff]  ;;  %v7260_v12 = vld [vmem:[#allocation87_spill] sm:$0xff]  ;;  %v633_v36 = vadd.f32 %v629_v45, %v5784_v46 }
 0x2fb   :  { %7251 = vst [vmem:[#allocation23_spill] sm:$0xff] %v5845_v47  ;;  %v1301_v31 = vadd.f32 %v7255_v19, %v7254_v63  ;;  %v1130_v41 = vadd.f32 %v7259_v1, %v1110_v39  ;;  %v1112_v17 = vadd.f32 %v7260_v12, %v1092_v9  ;;  %v7261_v58 = vld [vmem:[#allocation66_spill] sm:$0xff]  ;;  %v765_v61 = vsel %vm762_vm5, %v763_v22, %v764_v30  ;;  %v7264_v43 = vld [vmem:[#allocation96_spill] sm:$0xff]  ;;  %v7265_v39 = vld [vmem:[#allocation89_spill] sm:$0xff] }
 0x2fc   :  { %2274 = vrot.lane.b32.xlu1 %v5637_v26, %s4457_s24  ;;  %v896_v28 = vadd.f32 %v7261_v58, %v876_v23  ;;  %v7262_v24 = vld [vmem:[#allocation82_spill] sm:$0xff]  ;;  %v1131_v15 = vadd.f32 %v7265_v39, %v1111_v14  ;;  %v767_v26 = vsel %vm762_vm5, %v764_v30, %v766_v6  ;;  %v901_v5 = vrot.slane %v894_v32, 4  ;;  %v7267_v54 = vld [vmem:[#allocation77_spill] sm:$0xff]  ;;  %v7269_v46 = vld [vmem:[#allocation75_spill] sm:$0xff]  ;;  %s4248_s24 = sld [smem:[#allocation5 + $0x9]] }
 0x2fd   :  { %v1032_v63 = vadd.f32 %v7262_v24, %v1012_v11  ;;  %v7263_v19 = vld [vmem:[#allocation118_spill] sm:$0xff]  ;;  %v1132_v62 = vadd.f32 %v7264_v43, %v1112_v17  ;;  %v1033_v23 = vadd.f32 %v7267_v54, %v1013_v8  ;;  %v7268_v11 = vld [vmem:[#allocation113_spill] sm:$0xff]  ;;  %v902_v1 = vrot.slane %v895_v53, 4  ;;  %v7271_v17 = vld [vmem:[#allocation91_spill] sm:$0xff] }
 0x2fe   :  { %v1321_v47 = vadd.f32 %v7263_v19, %v1301_v31  ;;  %v5867_v9 = vpop.permute.xlu1 %1904  ;;  %v5869_v37 = vpop.permute.xlu0 %1977  ;;  %v1322_v31 = vadd.f32 %v7268_v11, %v1302_v13  ;;  %v1014_v45 = vadd.f32 %v7269_v46, %v994_v42  ;;  %v7270_v22 = vld [vmem:[#allocation98_spill] sm:$0xff]  ;;  %v1150_v58 = vadd.f32 %v7271_v17, %v1130_v41  ;;  %v7273_v39 = vld [vmem:[#allocation115_spill] sm:$0xff]  ;;  %v7274_v30 = vld [vmem:[#allocation84_spill] sm:$0xff] }
 0x2ff   :  { %7266 = vst [vmem:[#allocation28_spill] sm:$0xff] %v5867_v9  ;;  %v1151_v12 = vadd.f32 %v7270_v22, %v1131_v15  ;;  %v904_v14 = vrot.slane %v896_v28, 4  ;;  %v1039_v24 = vrot.slane %v1032_v63, 5  ;;  %v7272_v19 = vld [vmem:[#allocation122_spill] sm:$0xff]  ;;  %v7276_v8 = vld [vmem:[#allocation97_spill] sm:$0xff]  ;;  %v7277_v3 = vld [vmem:[#allocation100_spill] sm:$0xff]  ;;  %v770_v41 = vadd.f32 %v765_v61, %v632_v7 }
 0x300   :  { %v1342_v43 = vadd.f32 %v7272_v19, %v1322_v31  ;;  %v1341_v9 = vadd.f32 %v7273_v39, %v1321_v47  ;;  %v1034_v6 = vadd.f32 %v7274_v30, %v1014_v45  ;;  %v7275_v32 = vld [vmem:[#allocation178_spill] sm:$0xff]  ;;  %v1170_v13 = vadd.f32 %v7277_v3, %v1150_v58  ;;  %v7278_v53 = vld [vmem:[#allocation93_spill] sm:$0xff]  ;;  %v7279_v31 = vld [vmem:[#allocation124_spill] sm:$0xff] }
 0x301   :  { %v1205_v54 = vadd.f32 %v7276_v8, %v7275_v32  ;;  %v1152_v11 = vadd.f32 %v7278_v53, %v1132_v62  ;;  %v903_v28 = vsel %vm900_vm6, %v901_v5, %v902_v1  ;;  %v1040_v63 = vrot.slane %v1033_v23, 5  ;;  %v7280_v47 = vld [vmem:[#allocation95_spill] sm:$0xff]  ;;  %v7282_v19 = vld [vmem:[#allocation102_spill] sm:$0xff]  ;;  %v7285_v8 = vld [vmem:[#allocation101_spill] sm:$0xff] }
 0x302   :  { %v5884_v42 = vpop.permute.xlu1 %1922  ;;  %v5886_v15 = vpop.permute.xlu0 %1981  ;;  %v1361_v46 = vadd.f32 %v7279_v31, %v1341_v9  ;;  %v1171_v22 = vadd.f32 %v7280_v47, %v1151_v12  ;;  %v7281_v45 = vld [vmem:[#allocation99_spill] sm:$0xff]  ;;  %v771_v62 = vadd.f32 %v767_v26, %v633_v36  ;;  %v905_v30 = vsel %vm900_vm6, %v902_v1, %v904_v14  ;;  %v7286_v53 = vld [vmem:[#allocation120_spill] sm:$0xff]  ;;  %v7289_v14 = vld [vmem:[#allocation121_spill] sm:$0xff] }
 0x303   :  { %v1219_v17 = vadd.f32 %v7281_v45, %v1205_v54  ;;  %v1172_v39 = vadd.f32 %v7282_v19, %v1152_v11  ;;  %v7283_v3 = vld [vmem:[#allocation111_spill] sm:$0xff]  ;;  %v1041_v32 = vsel %vm1038_vm7, %v1039_v24, %v1040_v63  ;;  %v1042_v5 = vrot.slane %v1034_v6, 5  ;;  %v7288_v26 = vld [vmem:[#allocation128_spill] sm:$0xff]  ;;  %v7291_v45 = vld [vmem:[#allocation134_spill] sm:$0xff] }
 0x304   :  { %v1303_v58 = vadd.f32 %v7283_v3, %v5694_v35  ;;  %v7284_v7 = vld [vmem:[#allocation119_spill] sm:$0xff]  ;;  %v1177_v23 = vrot.slane %v1170_v13, 6  ;;  %v908_v11 = vadd.f32 %v903_v28, %v770_v41  ;;  %v7287_v35 = vld [vmem:[#allocation104_spill] sm:$0xff]  ;;  %v1381_v24 = vadd.f32 %v7289_v14, %v1361_v46  ;;  %v7292_v3 = vld [vmem:[#allocation106_spill] sm:$0xff] }
 0x305   :  { %v1362_v61 = vadd.f32 %v7284_v7, %v1342_v43  ;;  %v1233_v9 = vadd.f32 %v7285_v8, %v1219_v17  ;;  %v1206_v36 = vadd.f32 %v7287_v35, %v5644_v25  ;;  %v1178_v47 = vrot.slane %v1171_v22, 6  ;;  %v7290_v6 = vld [vmem:[#allocation103_spill] sm:$0xff]  ;;  %v7293_v8 = vld [vmem:[#allocation130_spill] sm:$0xff]  ;;  %v7294_v25 = vld [vmem:[#allocation105_spill] sm:$0xff] }
 0x306   :  { %v1323_v12 = vadd.f32 %v7286_v53, %v1303_v58  ;;  %v5900_v31 = vpop.permute.xlu1 %1940  ;;  %v5902_v54 = vpop.permute.xlu0 %1999  ;;  %v1180_v43 = vrot.slane %v1172_v39, 6  ;;  %v1439_v17 = vadd.f32 %v7291_v45, %v5652_v18  ;;  %v909_v19 = vadd.f32 %v905_v30, %v771_v62  ;;  %v7295_v46 = vld [vmem:[#allocation117_spill] sm:$0xff]  ;;  %v7296_v35 = vld [vmem:[#allocation108_spill] sm:$0xff]  ;;  %v7298_v30 = vld [vmem:[#allocation127_spill] sm:$0xff] }
 0x307   :  { %v1382_v1 = vadd.f32 %v7288_v26, %v1362_v61  ;;  %v1247_v13 = vadd.f32 %v7290_v6, %v1233_v9  ;;  %v1220_v58 = vadd.f32 %v7292_v3, %v1206_v36  ;;  %v1046_v7 = vadd.f32 %v1041_v32, %v908_v11  ;;  %v7297_v62 = vld [vmem:[#allocation180_spill] sm:$0xff]  ;;  %v7299_v32 = vld [vmem:[#allocation125_spill] sm:$0xff]  ;;  %v7301_v26 = vld [vmem:[#allocation107_spill] sm:$0xff] }
 0x308   :  { %v1401_v41 = vadd.f32 %v7293_v8, %v1381_v24  ;;  %v1043_v28 = vsel %vm1038_vm7, %v1040_v63, %v1042_v5  ;;  %v1179_v61 = vsel %vm1176_vm8, %v1177_v23, %v1178_v47  ;;  %v1343_v22 = vadd.f32 %v7295_v46, %v1323_v12  ;;  %v7300_v63 = vld [vmem:[#allocation129_spill] sm:$0xff]  ;;  %v7302_v12 = vld [vmem:[#allocation126_spill] sm:$0xff]  ;;  %v7303_v6 = vld [vmem:[#allocation131_spill] sm:$0xff] }
 0x309   :  { %v1261_v53 = vadd.f32 %v7294_v25, %v1247_v13  ;;  %v1234_v18 = vadd.f32 %v7296_v35, %v1220_v58  ;;  %v1438_v36 = vadd.f32 %v7298_v30, %v7297_v62  ;;  %v5925_v11 = vadd.f32 %v7299_v32, %v1382_v1  ;;  %v7304_v45 = vld [vmem:[#allocation110_spill] sm:$0xff]  ;;  %v7305_v8 = vld [vmem:[#allocation136_spill] sm:$0xff] }
 0x30a   :  { %v5917_v39 = vpop.permute.xlu1 %1944  ;;  %v5919_v9 = vpop.permute.xlu0 %2017  ;;  %v1440_v5 = vadd.f32 %v7300_v63, %v5732_v34  ;;  %v1181_v23 = vsel %vm1176_vm8, %v1178_v47, %v1180_v43  ;;  %v1363_v24 = vadd.f32 %v7302_v12, %v1343_v22  ;;  %v1459_v13 = vadd.f32 %v7303_v6, %v1439_v17  ;;  %v7306_v46 = vld [vmem:[#allocation138_spill] sm:$0xff]  ;;  %v7307_v30 = vld [vmem:[#allocation140_spill] sm:$0xff]  ;;  %v7308_v34 = vld [vmem:[#allocation181_spill] sm:$0xff] }
 0x30b   :  { %v1275_v14 = vadd.f32 %v7301_v26, %v1261_v53  ;;  %v1248_v3 = vadd.f32 %v7304_v45, %v1234_v18  ;;  %v1407_v58 = vrot.slane %v1401_v41, 1  ;;  %v1458_v25 = vadd.f32 %v7305_v8, %v1438_v36  ;;  %v7309_v63 = vld [vmem:[#allocation145_spill] sm:$0xff]  ;;  %v7310_v43 = vld [vmem:[#allocation112_spill] sm:$0xff]  ;;  %v7314_v6 = vld [vmem:[#allocation114_spill] sm:$0xff] }
 0x30c   :  { %v1460_v35 = vadd.f32 %v7306_v46, %v1440_v5  ;;  %v1184_v1 = vadd.f32 %v1179_v61, %v1046_v7  ;;  %v1047_v62 = vadd.f32 %v1043_v28, %v909_v19  ;;  %v1479_v32 = vadd.f32 %v7307_v30, %v1459_v13  ;;  %v7311_v41 = vld [vmem:[#allocation152_spill] sm:$0xff]  ;;  %v7312_v28 = vld [vmem:[#allocation123_spill] sm:$0xff]  ;;  %v7313_v5 = vld [vmem:[#allocation154_spill] sm:$0xff] }
 0x30d   :  { %v1575_v53 = vadd.f32 %v7309_v63, %v7308_v34  ;;  %v1262_v22 = vadd.f32 %v7310_v43, %v1248_v3  ;;  %v1408_v17 = vrot.slane %v5925_v11, 1  ;;  %v1576_v18 = vadd.f32 %v7311_v41, %v5655_v16  ;;  %v7315_v3 = vld [vmem:[#allocation133_spill] sm:$0xff]  ;;  %v7316_v46 = vld [vmem:[#allocation135_spill] sm:$0xff]  ;;  %v7317_v30 = vld [vmem:[#allocation132_spill] sm:$0xff] }
 0x30e   :  { %v1980_v26 = vpop.permute.xlu1 %1979  ;;  %v5939_v47 = vpop.permute.xlu0 %2021  ;;  %v5947_v36 = vmul.f32 %v5690_v33, %v5560_v2  ;;  %v1277_v19 = vadd.f32 %v1275_v14, %v1184_v1  ;;  %v1185_v7 = vadd.f32 %v1181_v23, %v1047_v62  ;;  %v1383_v61 = vadd.f32 %v7312_v28, %v1363_v24  ;;  %v7318_v2 = vld [vmem:[#allocation137_spill] sm:$0xff]  ;;  %v7319_v14 = vld [vmem:[#allocation182_spill] sm:$0xff]  ;;  %v7320_v23 = vld [vmem:[#allocation163_spill] sm:$0xff] }
 0x30f   :  { %v1595_v12 = vadd.f32 %v7313_v5, %v1575_v53  ;;  %v1276_v13 = vadd.f32 %v7314_v6, %v1262_v22  ;;  %v1409_v45 = vsel %vm486_vm3, %v1407_v58, %v1408_v17  ;;  %v1478_v8 = vadd.f32 %v7315_v3, %v1458_v25  ;;  %v7321_v1 = vld [vmem:[#allocation170_spill] sm:$0xff]  ;;  %v7323_v22 = vld [vmem:[#allocation144_spill] sm:$0xff]  ;;  %v7325_v28 = vld [vmem:[#allocation149_spill] sm:$0xff] }
 0x310   :  { %v1480_v16 = vadd.f32 %v7316_v46, %v1460_v35  ;;  %v5958_v34 = vadd.f32 %v7317_v30, %v1383_v61  ;;  %v1499_v33 = vadd.f32 %v7318_v2, %v1479_v32  ;;  %v1712_v24 = vadd.f32 %v7320_v23, %v7319_v14  ;;  %v7322_v43 = vld [vmem:[#allocation142_spill] sm:$0xff]  ;;  %v7324_v35 = vld [vmem:[#allocation147_spill] sm:$0xff]  ;;  %v7328_v46 = vld [vmem:[#allocation172_spill] sm:$0xff] }
 0x311   :  { %v1713_v62 = vadd.f32 %v7321_v1, %v5676_v51  ;;  %v1498_v58 = vadd.f32 %v7322_v43, %v1478_v8  ;;  %v1577_v41 = vadd.f32 %v7324_v35, %v5736_v21  ;;  %v1596_v61 = vadd.f32 %v7325_v28, %v1576_v18  ;;  %v7326_v5 = vld [vmem:[#allocation146_spill] sm:$0xff]  ;;  %v7327_v6 = vld [vmem:[#allocation151_spill] sm:$0xff]  ;;  %v7330_v23 = vld [vmem:[#allocation156_spill] sm:$0xff] }
 0x312   :  { %v1998_v63 = vpop.permute.xlu1 %1997  ;;  %v5965_v53 = vpop.permute.xlu0 %2039  ;;  %v1500_v25 = vadd.f32 %v7323_v22, %v1480_v16  ;;  %v1519_v32 = vadd.f32 %v7326_v5, %v1499_v33  ;;  %v1615_v3 = vadd.f32 %v7327_v6, %v1595_v12  ;;  %v1732_v30 = vadd.f32 %v7328_v46, %v1712_v24  ;;  %v7329_v2 = vld [vmem:[#allocation183_spill] sm:$0xff]  ;;  %v7331_v1 = vld [vmem:[#allocation158_spill] sm:$0xff]  ;;  %v7332_v43 = vld [vmem:[#allocation160_spill] sm:$0xff] }
 0x313   :  { %v1849_v51 = vadd.f32 %v5622_v57, %v7329_v2  ;;  %v5977_v14 = vadd.f32 %v1276_v13, %v1185_v7  ;;  %v1597_v8 = vadd.f32 %v7330_v23, %v1577_v41  ;;  %v1616_v16 = vadd.f32 %v7331_v1, %v1596_v61  ;;  %v7333_v33 = vld [vmem:[#allocation165_spill] sm:$0xff]  ;;  %v7334_v12 = vld [vmem:[#allocation167_spill] sm:$0xff]  ;;  %v7339_v46 = vld [vmem:[#allocation176_spill] sm:$0xff] }
 0x314   :  { %v1850_v21 = vadd.f32 %v5746_v4, %v5686_v48  ;;  %v1635_v18 = vadd.f32 %v7332_v43, %v1615_v3  ;;  %v1714_v22 = vadd.f32 %v7333_v33, %v5740_v59  ;;  %v1733_v35 = vadd.f32 %v7334_v12, %v1713_v62  ;;  %v7335_v41 = vld [vmem:[#allocation139_spill] sm:$0xff]  ;;  %v7336_v5 = vld [vmem:[#allocation141_spill] sm:$0xff]  ;;  %v7338_v3 = vld [vmem:[#allocation174_spill] sm:$0xff] }
 0x315   :  { %v1869_v24 = vadd.f32 %v5772_v10, %v1849_v51  ;;  %v5990_v7 = vadd.f32 %v1409_v45, %v1277_v19  ;;  %v1410_v13 = vrot.slane %v5958_v34, 1  ;;  %v1518_v61 = vadd.f32 %v7335_v41, %v1498_v58  ;;  %v7337_v4 = vld [vmem:[#allocation143_spill] sm:$0xff]  ;;  %v7340_v2 = vld [vmem:[#allocation169_spill] sm:$0xff]  ;;  %v7341_v51 = vld [vmem:[#allocation148_spill] sm:$0xff] }
 0x316   :  { %v2002_v28 = vpop.permute.xlu1 %2001  ;;  %v5988_v57 = vpop.permute.xlu0 %2057  ;;  %v1520_v48 = vadd.f32 %v7336_v5, %v1500_v25  ;;  %v5996_v6 = vadd.f32 %v7337_v4, %v1519_v32  ;;  %v1734_v59 = vadd.f32 %v7338_v3, %v1714_v22  ;;  %v1753_v62 = vadd.f32 %v7339_v46, %v1733_v35  ;;  %v7342_v1 = vld [vmem:[#allocation153_spill] sm:$0xff]  ;;  %v7343_v43 = vld [vmem:[#allocation155_spill] sm:$0xff]  ;;  %v7345_v12 = vld [vmem:[#allocation184_spill] sm:$0xff] }
 0x317   :  { %v1752_v10 = vadd.f32 %v7340_v2, %v1732_v30  ;;  %v1538_v23 = vadd.f32 %v7341_v51, %v1518_v61  ;;  %v1617_v19 = vadd.f32 %v7342_v1, %v1597_v8  ;;  %v1851_v45 = vadd.f32 %v5659_v44, %v5789_v52  ;;  %v7344_v33 = vld [vmem:[#allocation157_spill] sm:$0xff]  ;;  %v7346_v30 = vld [vmem:[#allocation162_spill] sm:$0xff] }
 0x318   :  { %v1870_v58 = vadd.f32 %v5683_v56, %v1850_v21  ;;  %v1636_v25 = vadd.f32 %v7343_v43, %v1616_v16  ;;  %v1655_v32 = vadd.f32 %v7344_v33, %v1635_v18  ;;  %v1889_v22 = vadd.f32 %v5716_v55, %v1869_v24  ;;  %v7347_v56 = vld [vmem:[#allocation164_spill] sm:$0xff]  ;;  %v7348_v16 = vld [vmem:[#allocation171_spill] sm:$0xff]  ;;  %v7349_v18 = vld [vmem:[#allocation173_spill] sm:$0xff] }
 0x319   :  { %v1772_v41 = vadd.f32 %v7345_v12, %v1752_v10  ;;  %v1637_v61 = vadd.f32 %v7346_v30, %v1617_v19  ;;  %v1871_v8 = vadd.f32 %v5798_v40, %v1851_v45  ;;  %v1987_v44 = vadd.f32 %v1980_v26, %v5697_v50  ;;  %v7350_v2 = vld [vmem:[#allocation150_spill] sm:$0xff]  ;;  %v7353_v19 = vld [vmem:[#allocation175_spill] sm:$0xff] }
 0x31a   :  { %v2020_v35 = vpop.permute.xlu1 %2019  ;;  %v6010_v5 = vpop.permute.xlu0 %2061  ;;  %v1890_v4 = vadd.f32 %v5824_v29, %v1870_v58  ;;  %v1656_v52 = vadd.f32 %v7347_v56, %v1636_v25  ;;  %v1754_v21 = vadd.f32 %v7348_v16, %v1734_v59  ;;  %v1773_v3 = vadd.f32 %v7349_v18, %v1753_v62  ;;  %v7351_v51 = vld [vmem:[#allocation186_spill] sm:$0xff]  ;;  %v7354_v58 = vld [vmem:[#allocation161_spill] sm:$0xff] }
 0x31b   :  { %v1909_v46 = vadd.f32 %v5843_v60, %v1889_v22  ;;  %v1545_v55 = vrot.slane %v5996_v6, 2  ;;  %v1544_v24 = vrot.slane %v1538_v23, 2  ;;  %v1540_v10 = vadd.f32 %v7350_v2, %v1520_v48  ;;  %v7352_v1 = vld [vmem:[#allocation166_spill] sm:$0xff]  ;;  %v7363_v2 = vld [vmem:[#allocation20_spill] sm:$0xff] }
 0x31c   :  { %v1986_v40 = vadd.f32 %v5869_v37, %v7351_v51  ;;  %v1675_v29 = vadd.f32 %v7352_v1, %v1655_v32  ;;  %v1774_v50 = vadd.f32 %v5620_v38, %v1754_v21  ;;  %v1793_v26 = vadd.f32 %v5657_v27, %v1773_v3  ;;  %v7355_v37 = vld [vmem:[#allocation159_spill] sm:$0xff]  ;;  %v7356_v38 = vld [vmem:[#allocation26_spill] sm:$0xff]  ;;  %v7357_v27 = vld [vmem:[#allocation28_spill] sm:$0xff] }
 0x31d   :  { %v1792_v59 = vadd.f32 %v7353_v19, %v1772_v41  ;;  %v1891_v60 = vadd.f32 %v5748_v49, %v1871_v8  ;;  %v1910_v6 = vadd.f32 %v5774_v20, %v1890_v4  ;;  %v2007_v48 = vadd.f32 %v5902_v54, %v1987_v44  ;;  %v7359_v54 = vld [vmem:[#allocation185_spill] sm:$0xff]  ;;  %v7361_v21 = vld [vmem:[#allocation19_spill] sm:$0xff] }
 0x31e   :  { %v2038_v45 = vpop.permute.xlu1 %2037  ;;  %v2080_v62 = vpop.permute.xlu0 %2079  ;;  %v2006_v23 = vadd.f32 %v1998_v63, %v1986_v40  ;;  %v1676_v43 = vadd.f32 %v7354_v58, %v1656_v52  ;;  %v1657_v25 = vadd.f32 %v7355_v37, %v1637_v61  ;;  %v1929_v32 = vadd.f32 %v7356_v38, %v1909_v46  ;;  %v7358_v63 = vld [vmem:[#allocation168_spill] sm:$0xff]  ;;  %v7360_v4 = vld [vmem:[#allocation177_spill] sm:$0xff]  ;;  %v7362_v3 = vld [vmem:[#allocation23_spill] sm:$0xff] }
 0x31f   :  { %v1812_v33 = vadd.f32 %v5681_v0, %v1792_v59  ;;  %v1911_v12 = vadd.f32 %v7357_v27, %v1891_v60  ;;  %v1930_v41 = vadd.f32 %v5884_v42, %v1910_v6  ;;  %v1988_v49 = vadd.f32 %v5886_v15, %v5947_v36 }
 0x320   :  { %v2027_v22 = vadd.f32 %v2020_v35, %v2007_v48  ;;  %v1681_v20 = vrot.slane %v1675_v29, 3  ;;  %v1677_v30 = vadd.f32 %v7358_v63, %v1657_v25  ;;  %v1813_v8 = vadd.f32 %v7359_v54, %v1793_v26 }
 0x321   :  { %v1794_v44 = vadd.f32 %v7360_v4, %v1774_v50  ;;  %v1546_v0 = vsel %vm624_vm4, %v1544_v24, %v1545_v55  ;;  %v1949_v52 = vadd.f32 %v5900_v31, %v1929_v32  ;;  %v2008_v16 = vadd.f32 %v2002_v28, %v1988_v49 }
 0x322   :  { %v2042_v61 = vpop.permute.xlu1 %2041  ;;  %v2148_v56 = vpop.permute.xlu0 %2147  ;;  %v2026_v42 = vadd.f32 %v5919_v9, %v2006_v23  ;;  %v1547_v15 = vrot.slane %v1540_v10, 2  ;;  %v1682_v36 = vrot.slane %v1676_v43, 3  ;;  %v1818_v35 = vrot.slane %v1812_v33, 4 }
 0x323   :  { %2150 = vst.msk [vmem:[#allocation4 + $0x3] sm:$0x1] %vm136_vm2, %v2148_v56  ;;  %v1814_v18 = vadd.f32 %v7361_v21, %v1794_v44  ;;  %v1950_v46 = vadd.f32 %v7362_v3, %v1930_v41  ;;  %v1931_v51 = vadd.f32 %v7363_v2, %v1911_v12  ;;  %v2047_v1 = vadd.f32 %v5965_v53, %v2027_v22 }
 0x324   :  { %v2046_v40 = vadd.f32 %v2038_v45, %v2026_v42  ;;  %v1411_v31 = vsel %vm486_vm3, %v1408_v17, %v1410_v13  ;;  %v1683_v9 = vsel %vm762_vm5, %v1681_v20, %v1682_v36  ;;  %v1684_v28 = vrot.slane %v1677_v30, 3 }
 0x325   :  { %v1819_v24 = vrot.slane %v1813_v8, 4  ;;  %v1955_v50 = vrot.slane %v1949_v52, 5  ;;  %v1951_v26 = vadd.f32 %v5917_v39, %v1931_v51  ;;  %v2028_v19 = vadd.f32 %v5939_v47, %v2008_v16 }
 0x326   :  { %v2060_v10 = vpop.permute.xlu1 %2059  ;;  %v2157_v29 = vpop.permute.xlu0 %2156  ;;  %v1551_v34 = vadd.f32 %v1546_v0, %v5990_v7  ;;  %v1548_v11 = vsel %vm624_vm4, %v1545_v55, %v1547_v15  ;;  %v1821_v53 = vrot.slane %v1814_v18, 4  ;;  %v1956_v13 = vrot.slane %v1950_v46, 5 }
 0x327   :  { %v2067_v59 = vadd.f32 %v2060_v10, %v2047_v1  ;;  %2159 = vst.msk [vmem:[#allocation4 + $0x4] sm:$0x1] %vm136_vm2, %v2157_v29  ;;  %v1820_v17 = vsel %vm900_vm6, %v1818_v35, %v1819_v24  ;;  %v2048_v45 = vadd.f32 %v2042_v61, %v2028_v19  ;;  %v2066_v6 = vadd.f32 %v5988_v57, %v2046_v40 }
 0x328   :  { %v1415_v23 = vadd.f32 %v1411_v31, %v5977_v14  ;;  %v1688_v39 = vadd.f32 %v1683_v9, %v1551_v34  ;;  %v1685_v58 = vsel %vm762_vm5, %v1682_v36, %v1684_v28  ;;  %v1957_v43 = vsel %vm1038_vm7, %v1955_v50, %v1956_v13 }
 0x329   :  { %v2087_v60 = vadd.f32 %v2080_v62, %v2067_v59  ;;  %v1958_v7 = vrot.slane %v1951_v26, 5  ;;  %v1822_v33 = vsel %vm900_vm6, %v1819_v24, %v1821_v53  ;;  %v2068_v57 = vadd.f32 %v6010_v5, %v2048_v45 }
 0x32a   :  { %v2078_v48 = vpop.permute.xlu1 %2077  ;;  %v2165_v47 = vpop.permute.xlu0 %2164  ;;  %v1552_v55 = vadd.f32 %v1548_v11, %v1415_v23  ;;  %v1825_v25 = vadd.f32 %v1820_v17, %v1688_v39  ;;  %v2286_v16 = vstv %s6072_s0  ;;  %v2300_v21 = vstv %s6077_s1  ;;  %s4265_s0 = sld [smem:[#allocation5 + $0x1a]] }
 0x32b   :  { %v2086_v37 = vadd.f32 %v2078_v48, %v2066_v6  ;;  %2167 = vst.msk [vmem:[#allocation4 + $0x5] sm:$0x1] %vm136_vm2, %v2165_v47  ;;  %v2093_v62 = vrot.slane %v2087_v60, 6  ;;  %v1959_v41 = vsel %vm1038_vm7, %v1956_v13, %v1958_v7  ;;  %v2314_v2 = vstv %s6082_s19  ;;  %s4266_s1 = sld [smem:[#allocation5 + $0x1b]] }
 0x32c   :  { %v1689_v14 = vadd.f32 %v1685_v58, %v1552_v55  ;;  %v1962_v32 = vadd.f32 %v1957_v43, %v1825_v25  ;;  %v2328_v28 = vstv %s6092_s20  ;;  %v2342_v19 = vstv %s6101_s21  ;;  %s4268_s19 = sld [smem:[#allocation5 + $0x1d]] }
 0x32d   :  { %v2092_v38 = vrot.slane %v2086_v37, 6  ;;  %v2356_v17 = vstv %s6110_s22  ;;  %v2377_v60 = vstv %s4247_s23  ;;  %s4269_s20 = sld [smem:[#allocation5 + $0x1e]] }
 0x32e   :  { %v2082_v27 = vpop.permute.xlu1 %2081  ;;  %v2173_v12 = vpop.permute.xlu0 %2172  ;;  %v1826_v20 = vadd.f32 %v1822_v33, %v1689_v14  ;;  %s4270_s21 = sld [smem:[#allocation5 + $0x1f]] }
 0x32f   :  { %v2094_v49 = vsel %vm1176_vm8, %v2092_v38, %v2093_v62  ;;  %v2088_v22 = vadd.f32 %v2082_v27, %v2068_v57  ;;  %2175 = vst.msk [vmem:[#allocation4 + $0x6] sm:$0x1] %vm136_vm2, %v2173_v12  ;;  %s4271_s22 = sld [smem:[#allocation5 + $0x20]] }
 0x330   :  { %v2099_v63 = vadd.f32 %v2094_v49, %v1962_v32  ;;  %v1963_v54 = vadd.f32 %v1959_v41, %v1826_v20  ;;  %v2397_v49 = vstv %s4248_s24  ;;  %s4272_s23 = sld [smem:[#allocation5 + $0x21]] }
 0x331   :  { %v2095_v30 = vrot.slane %v2088_v22, 6  ;;  %s4273_s24 = sld [smem:[#allocation5 + $0x22]] }
 0x332   :  { %v4238_v8 = vmul.f32 -1.442695, %v2099_v63  ;;  %v2181_v5 = vpop.permute.xlu0 %2180  ;;  %v2153_v4 = vpop.permute.xlu1 %2152 }
 0x333   :  { %v2096_v44 = vsel %vm1176_vm8, %v2093_v62, %v2095_v30  ;;  %2183 = vst.msk [vmem:[#allocation4 + $0x7] sm:$0x1] %vm136_vm2, %v2181_v5  ;;  %2155 = vst.msk [vmem:[#allocation4 + $0x1b] sm:$0x1] %vm136_vm2, %v2153_v4  ;;  %v2417_v30 = vstv %s4249_s25  ;;  %s4275_s25 = sld [smem:[#allocation5 + $0x24]] }
 0x334   :  { %4362 = vpow2.f32 %v4238_v8  ;;  %v2100_v61 = vadd.f32 %v2096_v44, %v1963_v54 }
 0x336   :  { %v4239_v56 = vmul.f32 -1.442695, %v2100_v61  ;;  %v2189_v0 = vpop.permute.xlu0 %2188  ;;  %v2161_v52 = vpop.permute.xlu1 %2160  ;;  %v2437_v61 = vstv %s4250_s26  ;;  %s4246_s26 = sld [smem:[#allocation5 + $0x7]] }
 0x337   :  { %2191 = vst.msk [vmem:[#allocation4 + $0x8] sm:$0x1] %vm136_vm2, %v2189_v0  ;;  %2163 = vst.msk [vmem:[#allocation4 + $0x1c] sm:$0x1] %vm136_vm2, %v2161_v52  ;;  %v2457_v52 = vstv %s4251_s27  ;;  %s6331_s27 = sld [smem:[#allocation5]] }
 0x338   :  { %4364 = vpow2.f32 %v4239_v56 }
 0x33a   :  { %v6084_v42 = vld [vmem:[#allocation4] sm:$0xff]  ;;  %v2197_v15 = vpop.permute.xlu0 %2196  ;;  %v2169_v36 = vpop.permute.xlu1 %2168 }
 0x33b   :  { %2199 = vst.msk [vmem:[#allocation4 + $0x9] sm:$0x1] %vm136_vm2, %v2197_v15  ;;  %v2287_v35 = vmul.f32 %v2286_v16, %v6084_v42  ;;  %2171 = vst.msk [vmem:[#allocation4 + $0x1d] sm:$0x1] %vm136_vm2, %v2169_v36  ;;  %v2301_v46 = vmul.f32 %v2300_v21, %v6084_v42  ;;  %v2315_v9 = vmul.f32 %v2314_v2, %v6084_v42 }
 0x33c   :  { %v2329_v26 = vmul.f32 %v2328_v28, %v6084_v42  ;;  %v2343_v11 = vmul.f32 %v2342_v19, %v6084_v42  ;;  %v2357_v45 = vmul.f32 %v2356_v17, %v6084_v42  ;;  %v2378_v48 = vmul.f32 %v2377_v60, %v6084_v42 }
 0x33d   :  { %2291 = vrot.lane.b32.xlu0 %v2287_v35, %s4458_s29  ;;  %v2418_v5 = vmul.f32 %v2417_v30, %v6084_v42  ;;  %v2398_v56 = vmul.f32 %v2397_v49, %v6084_v42  ;;  %v2458_v15 = vmul.f32 %v2457_v52, %v6084_v42 }
 0x33e   :  { %v2205_v18 = vpop.permute.xlu0 %2204  ;;  %v2177_v3 = vpop.permute.xlu1 %2176 }
 0x33f   :  { %2207 = vst.msk [vmem:[#allocation4 + $0xa] sm:$0x1] %vm136_vm2, %v2205_v18  ;;  %2179 = vst.msk [vmem:[#allocation4 + $0x1e] sm:$0x1] %vm136_vm2, %v2177_v3  ;;  %v2438_v18 = vmul.f32 %v2437_v61, %v6084_v42 }
 0x341   :  { %v4363_v51 = vpop.eup %4362  ;;  %2305 = vrot.lane.b32.xlu0 %v2301_v46, %s4459_s3  ;;  %v2514_v46 = vstv %s4254_s30  ;;  %s4277_s30 = sld [smem:[#allocation5 + $0x26]] }
 0x342   :  { %v2107_v40 = vadd.f32 1.0, %v4363_v51  ;;  %v2214_v1 = vpop.permute.xlu0 %2213  ;;  %v2185_v31 = vpop.permute.xlu1 %2184  ;;  %v2515_v51 = vmul.f32 %v2514_v46, %v6084_v42 }
 0x343   :  { %2216 = vst.msk [vmem:[#allocation4 + $0xb] sm:$0x1] %vm136_vm2, %v2214_v1  ;;  %2187 = vst.msk [vmem:[#allocation4 + $0x1f] sm:$0x1] %vm136_vm2, %v2185_v31  ;;  %v2534_v31 = vstv %s4255_s4  ;;  %s6368_s4 = sld [smem:[#allocation5 + $0x27]] }
 0x344   :  { %4366 = vrcp.f32 %v2107_v40 }
 0x345   :  { %v4365_v24 = vpop.eup %4364  ;;  %2319 = vrot.lane.b32.xlu0 %v2315_v9, %s4460_s5 }
 0x346   :  { %v2108_v10 = vadd.f32 1.0, %v4365_v24  ;;  %v2223_v29 = vpop.permute.xlu0 %2222  ;;  %v2193_v50 = vpop.permute.xlu1 %2192  ;;  %v2554_v24 = vstv %s4256_s6  ;;  %s6378_s6 = sld [smem:[#allocation5 + $0x28]] }
 0x347   :  { %2225 = vst.msk [vmem:[#allocation4 + $0xc] sm:$0x1] %vm136_vm2, %v2223_v29  ;;  %2195 = vst.msk [vmem:[#allocation4 + $0x20] sm:$0x1] %vm136_vm2, %v2193_v50  ;;  %v2555_v29 = vmul.f32 %v2554_v24, %v6084_v42 }
 0x348   :  { %4368 = vrcp.f32 %v2108_v10 }
 0x349   :  { %2333 = vrot.lane.b32.xlu0 %v2329_v26, %s4461_s7 }
 0x34a   :  { %v2231_v59 = vpop.permute.xlu0 %2230  ;;  %v2201_v34 = vpop.permute.xlu1 %2200 }
 0x34b   :  { %2233 = vst.msk [vmem:[#allocation4 + $0xd] sm:$0x1] %vm136_vm2, %v2231_v59  ;;  %2203 = vst.msk [vmem:[#allocation4 + $0x21] sm:$0x1] %vm136_vm2, %v2201_v34  ;;  %v2535_v59 = vmul.f32 %v2534_v31, %v6084_v42 }
 0x34d   :  { %2347 = vrot.lane.b32.xlu0 %v2343_v11, %s4462_s8  ;;  %v2594_v11 = vstv %s4258_s11  ;;  %s4282_s11 = sld [smem:[#allocation5 + $0x2b]] }
 0x34e   :  { %v2239_v53 = vpop.permute.xlu0 %2238  ;;  %v2209_v13 = vpop.permute.xlu1 %2208 }
 0x34f   :  { %2241 = vst.msk [vmem:[#allocation4 + $0xe] sm:$0x1] %vm136_vm2, %v2239_v53  ;;  %2211 = vst.msk [vmem:[#allocation4 + $0x22] sm:$0x1] %vm136_vm2, %v2209_v13  ;;  %v2595_v53 = vmul.f32 %v2594_v11, %v6084_v42 }
 0x351   :  { %v4367_v6 = vpop.eup %4366  ;;  %2361 = vrot.lane.b32.xlu0 %v2357_v45, %s4463_s9 }
 0x352   :  { %v2247_v23 = vpop.permute.xlu0 %2246  ;;  %v2219_v39 = vpop.permute.xlu1 %2218  ;;  %2114 = vst.msk [vmem:[#allocation10] sm:$0xff] %vm2113_vm9, %v4367_v6 }
 0x353   :  { %2249 = vst.msk [vmem:[#allocation4 + $0xf] sm:$0x1] %vm136_vm2, %v2247_v23  ;;  %2221 = vst.msk [vmem:[#allocation4 + $0x23] sm:$0x1] %vm136_vm2, %v2219_v39  ;;  %v2651_v39 = vstv %s4261_s13  ;;  %s4283_s13 = sld [smem:[#allocation5 + $0x2c]] }
 0x355   :  { %v4369_v47 = vpop.eup %4368  ;;  %2384 = vrot.lane.b32.xlu0 %v2378_v48, %s4458_s29 }
 0x356   :  { %v2255_v58 = vpop.permute.xlu0 %2254  ;;  %v2227_v43 = vpop.permute.xlu1 %2226  ;;  %2115 = vst.msk [vmem:[#allocation10 + $0x8] sm:$0xff] %vm2113_vm9, %v4369_v47  ;;  %v2652_v47 = vmul.f32 %v2651_v39, %v6084_v42 }
 0x357   :  { %2257 = vst.msk [vmem:[#allocation4 + $0x10] sm:$0x1] %vm136_vm2, %v2255_v58  ;;  %2229 = vst.msk [vmem:[#allocation4 + $0x24] sm:$0x1] %vm136_vm2, %v2227_v43 }
 0x35a   :  { %v6137_v7 = vld [vmem:[#allocation4 + $0x8] sm:$0xff]  ;;  %v2263_v37 = vpop.permute.xlu0 %2262  ;;  %v2235_v55 = vpop.permute.xlu1 %2234 }
 0x35b   :  { %2265 = vst.msk [vmem:[#allocation4 + $0x11] sm:$0x1] %vm136_vm2, %v2263_v37  ;;  %v2288_v25 = vmul.f32 %v2286_v16, %v6137_v7  ;;  %2237 = vst.msk [vmem:[#allocation4 + $0x25] sm:$0x1] %vm136_vm2, %v2235_v55  ;;  %v2302_v38 = vmul.f32 %v2300_v21, %v6137_v7  ;;  %v2316_v14 = vmul.f32 %v2314_v2, %v6137_v7  ;;  %v2477_v21 = vstv %s4252_s28  ;;  %s4276_s28 = sld [smem:[#allocation5 + $0x25]] }
 0x35c   :  { %v2330_v12 = vmul.f32 %v2328_v28, %v6137_v7  ;;  %v2344_v20 = vmul.f32 %v2342_v19, %v6137_v7  ;;  %v2399_v63 = vmul.f32 %v2397_v49, %v6137_v7  ;;  %v2358_v8 = vmul.f32 %v2356_v17, %v6137_v7 }
 0x35d   :  { %2293 = vrot.lane.b32.xlu1 %v2288_v25, %s4458_s29  ;;  %v2379_v4 = vmul.f32 %v2377_v60, %v6137_v7  ;;  %v2439_v0 = vmul.f32 %v2437_v61, %v6137_v7  ;;  %v2419_v36 = vmul.f32 %v2417_v30, %v6137_v7  ;;  %v2479_v3 = vmul.f32 %v2477_v21, %v6137_v7 }
 0x35e   :  { %v2271_v33 = vpop.permute.xlu0 %2270  ;;  %v2243_v62 = vpop.permute.xlu1 %2242  ;;  %v2459_v40 = vmul.f32 %v2457_v52, %v6137_v7  ;;  %v2478_v9 = vmul.f32 %v2477_v21, %v6084_v42  ;;  %v2536_v28 = vmul.f32 %v2534_v31, %v6137_v7  ;;  %v2516_v50 = vmul.f32 %v2514_v46, %v6137_v7 }
 0x35f   :  { %2273 = vst.msk [vmem:[#allocation4 + $0x12] sm:$0x1] %vm136_vm2, %v2271_v33  ;;  %2245 = vst.msk [vmem:[#allocation4 + $0x26] sm:$0x1] %vm136_vm2, %v2243_v62  ;;  %v2574_v19 = vstv %s4257_s10  ;;  %v2556_v13 = vmul.f32 %v2554_v24, %v6137_v7  ;;  %v2596_v58 = vmul.f32 %v2594_v11, %v6137_v7  ;;  %v2671_v37 = vstv %s4262_s14  ;;  %s4280_s10 = sld [smem:[#allocation5 + $0x29]] }
 0x360   :  { %v2576_v34 = vmul.f32 %v2574_v19, %v6137_v7  ;;  %v2575_v6 = vmul.f32 %v2574_v19, %v6084_v42  ;;  %v2673_v33 = vmul.f32 %v2671_v37, %v6137_v7  ;;  %v2691_v62 = vstv %s4263_s17  ;;  %s4284_s14 = sld [smem:[#allocation5 + $0x2d]] }
 0x361   :  { %2307 = vrot.lane.b32.xlu1 %v2302_v38, %s4459_s3  ;;  %s4285_s17 = sld [smem:[#allocation5 + $0x2e]] }
 0x362   :  { %v2251_v57 = vpop.permute.xlu1 %2250 }
 0x363   :  { %2253 = vst.msk [vmem:[#allocation4 + $0x27] sm:$0x1] %vm136_vm2, %v2251_v57  ;;  %v2692_v57 = vmul.f32 %v2691_v62, %v6084_v42 }
 0x365   :  { %2321 = vrot.lane.b32.xlu1 %v2316_v14, %s4460_s5 }
 0x366   :  { %v6156_v32 = vld [vmem:[#allocation4 + $0x10] sm:$0xff]  ;;  %v2259_v27 = vpop.permute.xlu1 %2258 }
 0x367   :  { %v2380_v41 = vmul.f32 %v2377_v60, %v6156_v32  ;;  %2261 = vst.msk [vmem:[#allocation4 + $0x28] sm:$0x1] %vm136_vm2, %v2259_v27  ;;  %v2420_v44 = vmul.f32 %v2417_v30, %v6156_v32  ;;  %v2400_v16 = vmul.f32 %v2397_v49, %v6156_v32  ;;  %v2460_v35 = vmul.f32 %v2457_v52, %v6156_v32 }
 0x368   :  { %v2440_v2 = vmul.f32 %v2437_v61, %v6156_v32  ;;  %v2517_v1 = vmul.f32 %v2514_v46, %v6156_v32  ;;  %v2480_v10 = vmul.f32 %v2477_v21, %v6156_v32  ;;  %v2557_v26 = vmul.f32 %v2554_v24, %v6156_v32 }
 0x369   :  { %2335 = vrot.lane.b32.xlu1 %v2330_v12, %s4461_s7  ;;  %2388 = vrot.lane.b32.xlu0 %v2380_v41, %s4458_s29  ;;  %v2537_v17 = vmul.f32 %v2534_v31, %v6156_v32  ;;  %v2597_v45 = vmul.f32 %v2594_v11, %v6156_v32  ;;  %v2614_v60 = vstv %s4259_s12  ;;  %v2577_v48 = vmul.f32 %v2574_v19, %v6156_v32  ;;  %s4253_s12 = sld [smem:[#allocation5 + $0xe]] }
 0x36a   :  { %v2267_v22 = vpop.permute.xlu1 %2266  ;;  %v2616_v23 = vmul.f32 %v2614_v60, %v6137_v7  ;;  %v2654_v43 = vmul.f32 %v2651_v39, %v6156_v32  ;;  %v2615_v25 = vmul.f32 %v2614_v60, %v6084_v42  ;;  %v2617_v38 = vmul.f32 %v2614_v60, %v6156_v32 }
 0x36b   :  { %2269 = vst.msk [vmem:[#allocation4 + $0x29] sm:$0x1] %vm136_vm2, %v2267_v22  ;;  %v2653_v27 = vmul.f32 %v2651_v39, %v6137_v7  ;;  %v2694_v12 = vmul.f32 %v2691_v62, %v6156_v32  ;;  %v2711_v41 = vstv %s4264_s18  ;;  %v2672_v22 = vmul.f32 %v2671_v37, %v6084_v42  ;;  %s4286_s18 = sld [smem:[#allocation5 + $0x2f]] }
 0x36c   :  { %v2674_v30 = vmul.f32 %v2671_v37, %v6156_v32  ;;  %v2788_v52 = vstv %s4268_s19  ;;  %v2808_v46 = vstv %s4269_s20  ;;  %v2828_v31 = vstv %s4270_s21  ;;  %s4260_s19 = sld [smem:[#allocation5 + $0x15]] }
 0x36d   :  { %2349 = vrot.lane.b32.xlu1 %v2344_v20, %s4462_s8  ;;  %2406 = vrot.lane.b32.xlu0 %v2399_v63, %s4459_s3  ;;  %v2713_v20 = vmul.f32 %v2711_v41, %v6137_v7  ;;  %v2731_v63 = vstv %s4265_s0  ;;  %v2831_v19 = vmul.f32 %v2828_v31, %v6156_v32  ;;  %s4287_s0 = sld [smem:[#allocation5 + $0x30]] }
 0x36e   :  { %v2275_v54 = vpop.permute.xlu1 %2274  ;;  %s6490_s20 = sld [smem:[#allocation5 + $0x33]] }
 0x36f   :  { %2277 = vst.msk [vmem:[#allocation4 + $0x2a] sm:$0x1] %vm136_vm2, %v2275_v54  ;;  %v2732_v54 = vmul.f32 %v2731_v63, %v6084_v42  ;;  %s6499_s21 = sld [smem:[#allocation5 + $0x34]] }
 0x371   :  { %2363 = vrot.lane.b32.xlu1 %v2358_v8, %s4463_s9  ;;  %2424 = vrot.lane.b32.xlu0 %v2418_v5, %s4460_s5  ;;  %v2693_v5 = vmul.f32 %v2691_v62, %v6137_v7 }
 0x375   :  { %2386 = vrot.lane.b32.xlu1 %v2379_v4, %s4458_s29  ;;  %2428 = vrot.lane.b32.xlu0 %v2420_v44, %s4460_s5  ;;  %v2734_v4 = vmul.f32 %v2731_v63, %v6156_v32  ;;  %v2751_v44 = vstv %s4266_s1  ;;  %s6481_s1 = sld [smem:[#allocation5 + $0x32]] }
 0x376   :  { %v2754_v24 = vmul.f32 %v2751_v44, %v6156_v32 }
 0x379   :  { %2404 = vrot.lane.b32.xlu1 %v2398_v56, %s4459_s3  ;;  %2446 = vrot.lane.b32.xlu0 %v2439_v0, %s4461_s7  ;;  %v2712_v56 = vmul.f32 %v2711_v41, %v6084_v42  ;;  %v2753_v0 = vmul.f32 %v2751_v44, %v6137_v7 }
 0x37d   :  { %2408 = vrot.lane.b32.xlu1 %v2400_v16, %s4459_s3  ;;  %2464 = vrot.lane.b32.xlu0 %v2458_v15, %s4462_s8  ;;  %v2714_v15 = vmul.f32 %v2711_v41, %v6156_v32 }
 0x381   :  { %2426 = vrot.lane.b32.xlu1 %v2419_v36, %s4460_s5  ;;  %2468 = vrot.lane.b32.xlu0 %v2460_v35, %s4462_s8  ;;  %v2789_v36 = vmul.f32 %v2788_v52, %v6084_v42 }
 0x385   :  { %2444 = vrot.lane.b32.xlu1 %v2438_v18, %s4461_s7  ;;  %2486 = vrot.lane.b32.xlu0 %v2479_v3, %s4463_s9  ;;  %v2733_v18 = vmul.f32 %v2731_v63, %v6137_v7  ;;  %v2791_v3 = vmul.f32 %v2788_v52, %v6156_v32 }
 0x389   :  { %2448 = vrot.lane.b32.xlu1 %v2440_v2, %s4461_s7  ;;  %2521 = vrot.lane.b32.xlu0 %v2515_v51, %s4458_s29 }
 0x38d   :  { %2466 = vrot.lane.b32.xlu1 %v2459_v40, %s4462_s8  ;;  %2525 = vrot.lane.b32.xlu0 %v2517_v1, %s4458_s29  ;;  %v2752_v40 = vmul.f32 %v2751_v44, %v6084_v42  ;;  %v2810_v1 = vmul.f32 %v2808_v46, %v6137_v7 }
 0x391   :  { %2484 = vrot.lane.b32.xlu1 %v2478_v9, %s4463_s9  ;;  %2543 = vrot.lane.b32.xlu0 %v2536_v28, %s4459_s3 }
 0x395   :  { %2488 = vrot.lane.b32.xlu1 %v2480_v10, %s4463_s9  ;;  %2561 = vrot.lane.b32.xlu0 %v2555_v29, %s4460_s5  ;;  %v2829_v10 = vmul.f32 %v2828_v31, %v6084_v42 }
 0x399   :  { %2523 = vrot.lane.b32.xlu1 %v2516_v50, %s4458_s29  ;;  %2565 = vrot.lane.b32.xlu0 %v2557_v26, %s4460_s5  ;;  %v2790_v26 = vmul.f32 %v2788_v52, %v6137_v7 }
 0x39d   :  { %2541 = vrot.lane.b32.xlu1 %v2535_v59, %s4459_s3  ;;  %2583 = vrot.lane.b32.xlu0 %v2576_v34, %s4461_s7  ;;  %v2848_v59 = vstv %s4271_s22  ;;  %s6510_s22 = sld [smem:[#allocation5 + $0x35]] }
 0x3a1   :  { %2545 = vrot.lane.b32.xlu1 %v2537_v17, %s4459_s3  ;;  %2601 = vrot.lane.b32.xlu0 %v2595_v53, %s4462_s8  ;;  %v2809_v17 = vmul.f32 %v2808_v46, %v6084_v42  ;;  %v2850_v53 = vmul.f32 %v2848_v59, %v6137_v7 }
 0x3a5   :  { %2563 = vrot.lane.b32.xlu1 %v2556_v13, %s4460_s5  ;;  %2605 = vrot.lane.b32.xlu0 %v2597_v45, %s4462_s8  ;;  %v2868_v13 = vstv %s4272_s23  ;;  %s6520_s23 = sld [smem:[#allocation5 + $0x36]] }
 0x3a6   :  { %v2870_v44 = vmul.f32 %v2868_v13, %v6137_v7 }
 0x3a9   :  { %2581 = vrot.lane.b32.xlu1 %v2575_v6, %s4461_s7  ;;  %2623 = vrot.lane.b32.xlu0 %v2616_v23, %s4463_s9  ;;  %v2811_v6 = vmul.f32 %v2808_v46, %v6156_v32  ;;  %v2869_v23 = vmul.f32 %v2868_v13, %v6084_v42  ;;  %v6355_v46 = vstv %s4276_s28  ;;  %s4267_s28 = sld [smem:[#allocation5 + $0x1c]] }
 0x3ad   :  { %2585 = vrot.lane.b32.xlu1 %v2577_v48, %s4461_s7  ;;  %2658 = vrot.lane.b32.xlu0 %v2652_v47, %s4458_s29  ;;  %v2830_v47 = vmul.f32 %v2828_v31, %v6137_v7 }
 0x3af   :  { %v6239_v55 = vpop.permute.xlu0 %2291 }
 0x3b1   :  { %2603 = vrot.lane.b32.xlu1 %v2596_v58, %s4462_s8  ;;  %2662 = vrot.lane.b32.xlu0 %v2654_v43, %s4458_s29  ;;  %v2871_v58 = vmul.f32 %v2868_v13, %v6156_v32  ;;  %v2888_v43 = vstv %s4273_s24  ;;  %s6531_s24 = sld [smem:[#allocation5 + $0x37]] }
 0x3b2   :  { %v2890_v62 = vmul.f32 %v2888_v43, %v6137_v7  ;;  %v2889_v31 = vmul.f32 %v2888_v43, %v6084_v42 }
 0x3b3   :  { %v6247_v14 = vpop.permute.xlu0 %2305 }
 0x3b5   :  { %2621 = vrot.lane.b32.xlu1 %v2615_v25, %s4463_s9  ;;  %2680 = vrot.lane.b32.xlu0 %v2673_v33, %s4459_s3  ;;  %v2849_v33 = vmul.f32 %v2848_v59, %v6084_v42 }
 0x3b7   :  { %v6255_v49 = vpop.permute.xlu0 %2319 }
 0x3b9   :  { %2625 = vrot.lane.b32.xlu1 %v2617_v38, %s4463_s9  ;;  %2698 = vrot.lane.b32.xlu0 %v2692_v57, %s4460_s5  ;;  %v6333_v38 = vstv %s4275_s25  ;;  %v2372_v57 = vstv %s4246_s26  ;;  %s4296_s25 = sld [smem:[#allocation5 + $0x39]] }
 0x3ba   :  { %v2373_v63 = vmul.f32 %v2372_v57, %v6084_v42  ;;  %v2375_v52 = vmul.f32 %v2372_v57, %v6156_v32  ;;  %s4297_s26 = sld [smem:[#allocation5 + $0x3a]] }
 0x3bb   :  { %v6263_v8 = vpop.permute.xlu0 %2333 }
 0x3bd   :  { %2660 = vrot.lane.b32.xlu1 %v2653_v27, %s4458_s29  ;;  %2702 = vrot.lane.b32.xlu0 %v2694_v12, %s4460_s5  ;;  %v2374_v27 = vmul.f32 %v2372_v57, %v6137_v7 }
 0x3bf   :  { %v6271_v61 = vpop.permute.xlu0 %2347 }
 0x3c1   :  { %2678 = vrot.lane.b32.xlu1 %v2672_v22, %s4459_s3  ;;  %2720 = vrot.lane.b32.xlu0 %v2713_v20, %s4461_s7  ;;  %v2851_v22 = vmul.f32 %v2848_v59, %v6156_v32  ;;  %v2926_v20 = vmul.f32 %v6333_v38, %v6084_v42 }
 0x3c3   :  { %v6281_v35 = vpop.permute.xlu0 %2361 }
 0x3c5   :  { %2682 = vrot.lane.b32.xlu1 %v2674_v30, %s4459_s3  ;;  %2738 = vrot.lane.b32.xlu0 %v2732_v54, %s4462_s8 }
 0x3c7   :  { %v6291_v2 = vpop.permute.xlu0 %2384 }
 0x3c8   :  { %v2393_v54 = vadd.f32 %v6291_v2, %v2373_v63 }
 0x3c9   :  { %2700 = vrot.lane.b32.xlu1 %v2693_v5, %s4460_s5  ;;  %2742 = vrot.lane.b32.xlu0 %v2734_v4, %s4462_s8 }
 0x3cd   :  { %2718 = vrot.lane.b32.xlu1 %v2712_v56, %s4461_s7  ;;  %2760 = vrot.lane.b32.xlu0 %v2753_v0, %s4463_s9  ;;  %v2928_v56 = vmul.f32 %v6333_v38, %v6156_v32  ;;  %v2282_v0 = vstv %s6331_s27  ;;  %s4298_s27 = sld [smem:[#allocation5 + $0x3b]] }
 0x3ce   :  { %v2283_v2 = vmul.f32 %v2282_v0, %v6084_v42 }
 0x3cf   :  { %v6277_v16 = vpop.permute.xlu1 %2293 }
 0x3d1   :  { %2722 = vrot.lane.b32.xlu1 %v2714_v15, %s4461_s7  ;;  %2795 = vrot.lane.b32.xlu0 %v2789_v36, %s4458_s29 }
 0x3d3   :  { %v6285_v21 = vpop.permute.xlu1 %2307 }
 0x3d5   :  { %2740 = vrot.lane.b32.xlu1 %v2733_v18, %s4462_s8  ;;  %2799 = vrot.lane.b32.xlu0 %v2791_v3, %s4458_s29 }
 0x3d7   :  { %v6293_v51 = vpop.permute.xlu1 %2321 }
 0x3d9   :  { %2758 = vrot.lane.b32.xlu1 %v2752_v40, %s4463_s9  ;;  %2817 = vrot.lane.b32.xlu0 %v2810_v1, %s4459_s3 }
 0x3db   :  { %v6299_v9 = vpop.permute.xlu1 %2335  ;;  %v6301_v28 = vpop.permute.xlu0 %2388 }
 0x3dc   :  { %v2395_v18 = vadd.f32 %v6301_v28, %v2375_v52 }
 0x3dd   :  { %2762 = vrot.lane.b32.xlu1 %v2754_v24, %s4463_s9  ;;  %2835 = vrot.lane.b32.xlu0 %v2829_v10, %s4460_s5  ;;  %v2947_v24 = vmul.f32 %v6355_v46, %v6137_v7 }
 0x3df   :  { %v6307_v29 = vpop.permute.xlu1 %2349  ;;  %v2407_v50 = vpop.permute.xlu0 %2406 }
 0x3e1   :  { %2797 = vrot.lane.b32.xlu1 %v2790_v26, %s4458_s29  ;;  %2839 = vrot.lane.b32.xlu0 %v2831_v19, %s4460_s5  ;;  %v6363_v26 = vstv %s4277_s30  ;;  %v2297_v19 = vadd.f32 %v6239_v55, %v2283_v2  ;;  %s4299_s30 = sld [smem:[#allocation5 + $0x3c]] }
 0x3e2   :  { %v2966_v55 = vmul.f32 %v6363_v26, %v6084_v42 }
 0x3e3   :  { %v6313_v34 = vpop.permute.xlu1 %2363  ;;  %v2425_v11 = vpop.permute.xlu0 %2424 }
 0x3e5   :  { %2815 = vrot.lane.b32.xlu1 %v2809_v17, %s4459_s3  ;;  %2857 = vrot.lane.b32.xlu0 %v2850_v53, %s4461_s7  ;;  %v2311_v17 = vadd.f32 %v6247_v14, %v2297_v19  ;;  %v2284_v53 = vmul.f32 %v2282_v0, %v6137_v7  ;;  %v2948_v0 = vmul.f32 %v6355_v46, %v6156_v32 }
 0x3e7   :  { %v2387_v45 = vpop.permute.xlu1 %2386  ;;  %v6319_v60 = vpop.permute.xlu0 %2428 }
 0x3e8   :  { %v2394_v30 = vadd.f32 %v2387_v45, %v2374_v27 }
 0x3e9   :  { %2819 = vrot.lane.b32.xlu1 %v2811_v6, %s4459_s3  ;;  %2875 = vrot.lane.b32.xlu0 %v2869_v23, %s4462_s8 }
 0x3ea   :  { %v2414_v36 = vadd.f32 %v2407_v50, %v2394_v30 }
 0x3eb   :  { %v2405_v39 = vpop.permute.xlu1 %2404  ;;  %v2447_v48 = vpop.permute.xlu0 %2446 }
 0x3ec   :  { %v2413_v15 = vadd.f32 %v2405_v39, %v2393_v54  ;;  %v2325_v39 = vadd.f32 %v6255_v49, %v2311_v17  ;;  %v2927_v49 = vmul.f32 %v6333_v38, %v6137_v7 }
 0x3ed   :  { %2837 = vrot.lane.b32.xlu1 %v2830_v47, %s4460_s5  ;;  %2879 = vrot.lane.b32.xlu0 %v2871_v58, %s4462_s8 }
 0x3ee   :  { %v2433_v50 = vadd.f32 %v2425_v11, %v2413_v15  ;;  %v2891_v11 = vmul.f32 %v2888_v43, %v6156_v32  ;;  %v2339_v43 = vadd.f32 %v6263_v8, %v2325_v39 }
 0x3ef   :  { %v2409_v37 = vpop.permute.xlu1 %2408  ;;  %v2465_v25 = vpop.permute.xlu0 %2464 }
 0x3f0   :  { %v2415_v10 = vadd.f32 %v2409_v37, %v2395_v18  ;;  %v2353_v57 = vadd.f32 %v6271_v61, %v2339_v43  ;;  %v2946_v61 = vmul.f32 %v6355_v46, %v6084_v42  ;;  %v2967_v18 = vmul.f32 %v6363_v26, %v6137_v7 }
 0x3f1   :  { %2855 = vrot.lane.b32.xlu1 %v2849_v33, %s4461_s7  ;;  %2897 = vrot.lane.b32.xlu0 %v2890_v62, %s4463_s9  ;;  %v3025_v46 = vstv %s4280_s10  ;;  %s4303_s10 = sld [smem:[#allocation5 + $0x40]] }
 0x3f2   :  { %v2435_v6 = vadd.f32 %v6319_v60, %v2415_v10  ;;  %v2367_v38 = vadd.f32 %v6281_v35, %v2353_v57  ;;  %v3062_v10 = vstv %s4282_s11  ;;  %s4304_s11 = sld [smem:[#allocation5 + $0x41]] }
 0x3f3   :  { %v2427_v12 = vpop.permute.xlu1 %2426  ;;  %v6338_v41 = vpop.permute.xlu0 %2468  ;;  %v3063_v17 = vmul.f32 %v3062_v10, %v6084_v42  ;;  %v3065_v39 = vmul.f32 %v3062_v10, %v6156_v32 }
 0x3f4   :  { %v2434_v3 = vadd.f32 %v2427_v12, %v2414_v36  ;;  %v2985_v12 = vstv %s6368_s4  ;;  %s4300_s4 = sld [smem:[#allocation5 + $0x3d]] }
 0x3f5   :  { %2859 = vrot.lane.b32.xlu1 %v2851_v22, %s4461_s7  ;;  %2932 = vrot.lane.b32.xlu0 %v2926_v20, %s4458_s29 }
 0x3f6   :  { %v2454_v59 = vadd.f32 %v2447_v48, %v2434_v3  ;;  %v2298_v48 = vadd.f32 %v6277_v16, %v2284_v53  ;;  %v2968_v16 = vmul.f32 %v6363_v26, %v6156_v32 }
 0x3f7   :  { %v2445_v5 = vpop.permute.xlu1 %2444  ;;  %v2487_v4 = vpop.permute.xlu0 %2486 }
 0x3f8   :  { %v2453_v28 = vadd.f32 %v2445_v5, %v2433_v50  ;;  %v2312_v37 = vadd.f32 %v6285_v21, %v2298_v48  ;;  %v3005_v5 = vstv %s6378_s6  ;;  %v2509_v50 = vstv %s4253_s12  ;;  %s4301_s6 = sld [smem:[#allocation5 + $0x3e]] }
 0x3f9   :  { %2877 = vrot.lane.b32.xlu1 %v2870_v44, %s4462_s8  ;;  %2936 = vrot.lane.b32.xlu0 %v2928_v56, %s4458_s29  ;;  %v3006_v52 = vmul.f32 %v3005_v5, %v6084_v42  ;;  %v3008_v3 = vmul.f32 %v3005_v5, %v6156_v32  ;;  %v2511_v26 = vmul.f32 %v2509_v50, %v6137_v7  ;;  %s4305_s12 = sld [smem:[#allocation5 + $0x42]] }
 0x3fa   :  { %v2473_v58 = vadd.f32 %v2465_v25, %v2453_v28  ;;  %v2326_v27 = vadd.f32 %v6293_v51, %v2312_v37  ;;  %v2987_v51 = vmul.f32 %v2985_v12, %v6137_v7  ;;  %v2510_v53 = vmul.f32 %v2509_v50, %v6084_v42 }
 0x3fb   :  { %v2449_v40 = vpop.permute.xlu1 %2448  ;;  %v6358_v1 = vpop.permute.xlu0 %2521  ;;  %v2512_v48 = vmul.f32 %v2509_v50, %v6156_v32  ;;  %v3082_v37 = vstv %s4283_s13  ;;  %s4274_s13 = sld [smem:[#allocation5 + $0x23]] }
 0x3fc   :  { %v2455_v14 = vadd.f32 %v2449_v40, %v2435_v6  ;;  %v2340_v22 = vadd.f32 %v6299_v9, %v2326_v27  ;;  %v3102_v27 = vstv %s4284_s14  ;;  %s4306_s14 = sld [smem:[#allocation5 + $0x43]] }
 0x3fd   :  { %2895 = vrot.lane.b32.xlu1 %v2889_v31, %s4463_s9  ;;  %2954 = vrot.lane.b32.xlu0 %v2947_v24, %s4459_s3  ;;  %v2986_v31 = vmul.f32 %v2985_v12, %v6084_v42  ;;  %v3027_v24 = vmul.f32 %v3025_v46, %v6137_v7 }
 0x3fe   :  { %v2475_v25 = vadd.f32 %v6338_v41, %v2455_v14 }
 0x3ff   :  { %v2467_v13 = vpop.permute.xlu1 %2466  ;;  %v6372_v45 = vpop.permute.xlu0 %2525 }
 0x400   :  { %v2474_v23 = vadd.f32 %v2467_v13, %v2454_v59  ;;  %v2988_v59 = vmul.f32 %v2985_v12, %v6156_v32  ;;  %v3103_v12 = vmul.f32 %v3102_v27, %v6084_v42 }
 0x401   :  { %2899 = vrot.lane.b32.xlu1 %v2891_v11, %s4463_s9  ;;  %2972 = vrot.lane.b32.xlu0 %v2966_v55, %s4460_s5  ;;  %v2530_v11 = vadd.f32 %v6358_v1, %v2510_v53 }
 0x402   :  { %v2494_v47 = vadd.f32 %v2487_v4, %v2474_v23  ;;  %v2354_v4 = vadd.f32 %v6307_v29, %v2340_v22  ;;  %v3007_v23 = vmul.f32 %v3005_v5, %v6137_v7  ;;  %v3105_v5 = vmul.f32 %v3102_v27, %v6156_v32 }
 0x403   :  { %v2485_v60 = vpop.permute.xlu1 %2484  ;;  %v6386_v33 = vpop.permute.xlu0 %2543 }
 0x404   :  { %v2493_v62 = vadd.f32 %v2485_v60, %v2473_v58  ;;  %v2500_v8 = vrot.slane %v2494_v47, 1  ;;  %v2368_v9 = vadd.f32 %v6313_v34, %v2354_v4  ;;  %v2532_v58 = vadd.f32 %v6372_v45, %v2512_v48 }
 0x405   :  { %2934 = vrot.lane.b32.xlu1 %v2927_v49, %s4458_s29  ;;  %2976 = vrot.lane.b32.xlu0 %v2968_v16, %s4460_s5  ;;  %v3026_v49 = vmul.f32 %v3025_v46, %v6084_v42  ;;  %v3084_v16 = vmul.f32 %v3082_v37, %v6137_v7 }
 0x406   :  { %v2499_v21 = vrot.slane %v2493_v62, 1 }
 0x407   :  { %v2489_v20 = vpop.permute.xlu1 %2488  ;;  %v6400_v63 = vpop.permute.xlu0 %2561 }
 0x408   :  { %v2501_v30 = vsel %vm486_vm3, %v2499_v21, %v2500_v8  ;;  %v2495_v54 = vadd.f32 %v2489_v20, %v2475_v25  ;;  %v3028_v25 = vmul.f32 %v3025_v46, %v6156_v32 }
 0x409   :  { %v6408_v41 = vadd.f32 %v2501_v30, %v2367_v38  ;;  %2952 = vrot.lane.b32.xlu1 %v2946_v61, %s4459_s3  ;;  %2994 = vrot.lane.b32.xlu0 %v2987_v51, %s4461_s7 }
 0x40a   :  { %v2502_v35 = vrot.slane %v2495_v54, 1  ;;  %v3064_v54 = vmul.f32 %v3062_v10, %v6137_v7 }
 0x40b   :  { %v2524_v44 = vpop.permute.xlu1 %2523  ;;  %v6413_v56 = vpop.permute.xlu0 %2565 }
 0x40c   :  { %v2503_v29 = vsel %vm486_vm3, %v2500_v8, %v2502_v35  ;;  %v2531_v13 = vadd.f32 %v2524_v44, %v2511_v26 }
 0x40d   :  { %v6419_v15 = vadd.f32 %v2503_v29, %v2368_v9  ;;  %2956 = vrot.lane.b32.xlu1 %v2948_v0, %s4459_s3  ;;  %3012 = vrot.lane.b32.xlu0 %v3006_v52, %s4462_s8  ;;  %v3083_v29 = vmul.f32 %v3082_v37, %v6084_v42 }
 0x40e   :  { %v2551_v47 = vadd.f32 %v6386_v33, %v2531_v13 }
 0x40f   :  { %v2542_v36 = vpop.permute.xlu1 %2541  ;;  %v2584_v34 = vpop.permute.xlu0 %2583 }
 0x410   :  { %v2550_v14 = vadd.f32 %v2542_v36, %v2530_v11 }
 0x411   :  { %2974 = vrot.lane.b32.xlu1 %v2967_v18, %s4460_s5  ;;  %3016 = vrot.lane.b32.xlu0 %v3008_v3, %s4462_s8  ;;  %v3142_v3 = vstv %s4286_s18  ;;  %s4308_s18 = sld [smem:[#allocation5 + $0x45]] }
 0x412   :  { %v2570_v57 = vadd.f32 %v6400_v63, %v2550_v14  ;;  %v3143_v10 = vmul.f32 %v3142_v3, %v6084_v42 }
 0x413   :  { %v2546_v2 = vpop.permute.xlu1 %2545  ;;  %v2602_v40 = vpop.permute.xlu0 %2601 }
 0x414   :  { %v2552_v62 = vadd.f32 %v2546_v2, %v2532_v58  ;;  %v6506_v58 = vld [vmem:[#allocation4] sm:$0xff] }
 0x415   :  { %2992 = vrot.lane.b32.xlu1 %v2986_v31, %s4461_s7  ;;  %3034 = vrot.lane.b32.xlu0 %v3027_v24, %s4463_s9  ;;  %v3085_v24 = vmul.f32 %v3082_v37, %v6156_v32 }
 0x416   :  { %v2572_v38 = vadd.f32 %v6413_v56, %v2552_v62  ;;  %v3122_v56 = vstv %s4285_s17  ;;  %s4307_s17 = sld [smem:[#allocation5 + $0x44]] }
 0x417   :  { %v2564_v19 = vpop.permute.xlu1 %2563  ;;  %v2606_v28 = vpop.permute.xlu0 %2605  ;;  %v3124_v36 = vmul.f32 %v3122_v56, %v6137_v7  ;;  %v3123_v13 = vmul.f32 %v3122_v56, %v6084_v42 }
 0x418   :  { %v2571_v43 = vadd.f32 %v2564_v19, %v2551_v47  ;;  %v3125_v47 = vmul.f32 %v3122_v56, %v6156_v32 }
 0x419   :  { %2996 = vrot.lane.b32.xlu1 %v2988_v59, %s4461_s7  ;;  %3069 = vrot.lane.b32.xlu0 %v3063_v17, %s4458_s29  ;;  %v3145_v59 = vmul.f32 %v3142_v3, %v6156_v32  ;;  %v3162_v17 = vstv %s4287_s0  ;;  %s4310_s0 = sld [smem:[#allocation5 + $0x47]] }
 0x41a   :  { %v2591_v8 = vadd.f32 %v2584_v34, %v2571_v43  ;;  %v3164_v11 = vmul.f32 %v3162_v17, %v6137_v7 }
 0x41b   :  { %v2582_v55 = vpop.permute.xlu1 %2581  ;;  %v2624_v6 = vpop.permute.xlu0 %2623 }
 0x41c   :  { %v2590_v33 = vadd.f32 %v2582_v55, %v2570_v57  ;;  %v6496_v55 = vld [vmem:[#allocation4 + $0x18] sm:$0xff]  ;;  %v3144_v57 = vmul.f32 %v3142_v3, %v6137_v7 }
 0x41d   :  { %3014 = vrot.lane.b32.xlu1 %v3007_v23, %s4462_s8  ;;  %3073 = vrot.lane.b32.xlu0 %v3065_v39, %s4458_s29  ;;  %v2646_v23 = vstv %s4260_s19  ;;  %s4312_s19 = sld [smem:[#allocation5 + $0x49]] }
 0x41e   :  { %v2610_v61 = vadd.f32 %v2602_v40, %v2590_v33  ;;  %v2648_v39 = vmul.f32 %v2646_v23, %v6137_v7  ;;  %v2647_v43 = vmul.f32 %v6506_v58, %v2646_v23  ;;  %v2649_v33 = vmul.f32 %v2646_v23, %v6156_v32 }
 0x41f   :  { %v2586_v1 = vpop.permute.xlu1 %2585  ;;  %v6446_v60 = vpop.permute.xlu0 %2658 }
 0x420   :  { %v2592_v20 = vadd.f32 %v2586_v1, %v2572_v38  ;;  %v3215_v1 = vstv %s6490_s20  ;;  %s4281_s20 = sld [smem:[#allocation5 + $0x2a]] }
 0x421   :  { %3032 = vrot.lane.b32.xlu1 %v3026_v49, %s4463_s9  ;;  %3091 = vrot.lane.b32.xlu0 %v3084_v16, %s4459_s3  ;;  %v2667_v49 = vadd.f32 %v6446_v60, %v2647_v43 }
 0x422   :  { %v2612_v44 = vadd.f32 %v2606_v28, %v2592_v20  ;;  %v3104_v28 = vmul.f32 %v3102_v27, %v6137_v7  ;;  %v3216_v27 = vmul.f32 %v3215_v1, %v6496_v55 }
 0x423   :  { %v2604_v45 = vpop.permute.xlu1 %2603  ;;  %v6453_v21 = vpop.permute.xlu0 %2662 }
 0x424   :  { %v2611_v22 = vadd.f32 %v2604_v45, %v2591_v8  ;;  %v2669_v60 = vadd.f32 %v6453_v21, %v2649_v33  ;;  %v6582_v33 = vld [vmem:[#allocation4 + $0x8] sm:$0xff] }
 0x425   :  { %3036 = vrot.lane.b32.xlu1 %v3028_v25, %s4463_s9  ;;  %3109 = vrot.lane.b32.xlu0 %v3103_v12, %s4460_s5  ;;  %v3229_v25 = vstv %s6499_s21  ;;  %s4313_s21 = sld [smem:[#allocation5 + $0x4a]] }
 0x426   :  { %v2631_v63 = vadd.f32 %v2624_v6, %v2611_v22  ;;  %v3201_v6 = vstv %s6481_s1  ;;  %v3163_v22 = vmul.f32 %v6506_v58, %v3162_v17  ;;  %v3230_v20 = vmul.f32 %v3229_v25, %v6496_v55  ;;  %s4311_s1 = sld [smem:[#allocation5 + $0x48]] }
 0x427   :  { %v2622_v51 = vpop.permute.xlu1 %2621  ;;  %v6460_v30 = vpop.permute.xlu0 %2680  ;;  %v3202_v42 = vmul.f32 %v3201_v6, %v6496_v55 }
 0x428   :  { %v2630_v4 = vadd.f32 %v2622_v51, %v2610_v61  ;;  %v2637_v35 = vrot.slane %v2631_v63, 2  ;;  %v3243_v51 = vstv %s6510_s22  ;;  %s4314_s22 = sld [smem:[#allocation5 + $0x4b]] }
 0x429   :  { %3071 = vrot.lane.b32.xlu1 %v3064_v54, %s4458_s29  ;;  %3113 = vrot.lane.b32.xlu0 %v3105_v5, %s4460_s5 }
 0x42a   :  { %v2636_v9 = vrot.slane %v2630_v4, 2  ;;  %v3165_v4 = vmul.f32 %v3162_v17, %v6156_v32 }
 0x42b   :  { %v2626_v0 = vpop.permute.xlu1 %2625  ;;  %v6466_v52 = vpop.permute.xlu0 %2698 }
 0x42c   :  { %v2638_v34 = vsel %vm624_vm4, %v2636_v9, %v2637_v35  ;;  %v2632_v18 = vadd.f32 %v2626_v0, %v2612_v44  ;;  %v6539_v9 = vld [vmem:[#allocation4 + $0x20] sm:$0xff]  ;;  %v3257_v0 = vstv %s6520_s23  ;;  %s4317_s23 = sld [smem:[#allocation5 + $0x4e]] }
 0x42d   :  { %v6472_v46 = vadd.f32 %v2638_v34, %v6408_v41  ;;  %3089 = vrot.lane.b32.xlu1 %v3083_v29, %s4459_s3  ;;  %3131 = vrot.lane.b32.xlu0 %v3124_v36, %s4461_s7  ;;  %v3203_v32 = vmul.f32 %v3201_v6, %v6539_v9  ;;  %v3258_v3 = vmul.f32 %v3257_v0, %v6496_v55 }
 0x42e   :  { %v2639_v2 = vrot.slane %v2632_v18, 2  ;;  %v3231_v23 = vmul.f32 %v3229_v25, %v6539_v9  ;;  %v3245_v43 = vmul.f32 %v3243_v51, %v6539_v9 }
 0x42f   :  { %v2661_v40 = vpop.permute.xlu1 %2660  ;;  %v6476_v31 = vpop.permute.xlu0 %2702 }
 0x430   :  { %v2640_v50 = vsel %vm624_vm4, %v2637_v35, %v2639_v2  ;;  %v2668_v37 = vadd.f32 %v2661_v40, %v2648_v39  ;;  %v3244_v35 = vmul.f32 %v3243_v51, %v6496_v55  ;;  %v3271_v40 = vstv %s6531_s24  ;;  %s4318_s24 = sld [smem:[#allocation5 + $0x4f]] }
 0x431   :  { %v6484_v41 = vadd.f32 %v2640_v50, %v6419_v15  ;;  %3093 = vrot.lane.b32.xlu1 %v3085_v24, %s4459_s3  ;;  %3149 = vrot.lane.b32.xlu0 %v3143_v10, %s4462_s8 }
 0x432   :  { %v2688_v45 = vadd.f32 %v6460_v30, %v2668_v37 }
 0x433   :  { %v2679_v26 = vpop.permute.xlu1 %2678  ;;  %v2721_v19 = vpop.permute.xlu0 %2720 }
 0x434   :  { %v2687_v8 = vadd.f32 %v2679_v26, %v2667_v49 }
 0x435   :  { %3111 = vrot.lane.b32.xlu1 %v3104_v28, %s4460_s5  ;;  %3153 = vrot.lane.b32.xlu0 %v3145_v59, %s4462_s8  ;;  %v3272_v28 = vmul.f32 %v3271_v40, %v6496_v55 }
 0x436   :  { %v2707_v61 = vadd.f32 %v6466_v52, %v2687_v8 }
 0x437   :  { %v2683_v15 = vpop.permute.xlu1 %2682  ;;  %v2739_v53 = vpop.permute.xlu0 %2738 }
 0x438   :  { %v2689_v63 = vadd.f32 %v2683_v15, %v2669_v60  ;;  %v3292_v15 = vstv %s4296_s25  ;;  %v3273_v60 = vmul.f32 %v3271_v40, %v6539_v9  ;;  %s4315_s25 = sld [smem:[#allocation5 + $0x4c]] }
 0x439   :  { %3129 = vrot.lane.b32.xlu1 %v3123_v13, %s4461_s7  ;;  %3171 = vrot.lane.b32.xlu0 %v3164_v11, %s4463_s9  ;;  %v3293_v39 = vmul.f32 %v3292_v15, %v6496_v55  ;;  %v3294_v51 = vmul.f32 %v3292_v15, %v6539_v9 }
 0x43a   :  { %v2709_v44 = vadd.f32 %v6476_v31, %v2689_v63 }
 0x43b   :  { %v2701_v48 = vpop.permute.xlu1 %2700  ;;  %v2743_v14 = vpop.permute.xlu0 %2742 }
 0x43c   :  { %v2708_v12 = vadd.f32 %v2701_v48, %v2688_v45  ;;  %v6566_v48 = vld [vmem:[#allocation4 + $0x28] sm:$0xff] }
 0x43d   :  { %3133 = vrot.lane.b32.xlu1 %v3125_v47, %s4461_s7  ;;  %3206 = vrot.lane.b32.xlu0 %v3202_v42, %s4458_s29  ;;  %v3295_v37 = vmul.f32 %v3292_v15, %v6566_v48 }
 0x43e   :  { %v2728_v30 = vadd.f32 %v2721_v19, %v2708_v12  ;;  %v3217_v19 = vmul.f32 %v3215_v1, %v6539_v9  ;;  %v3312_v1 = vstv %s4297_s26  ;;  %s4324_s26 = sld [smem:[#allocation5 + $0x55]] }
 0x43f   :  { %v2719_v16 = vpop.permute.xlu1 %2718  ;;  %v2761_v62 = vpop.permute.xlu0 %2760 }
 0x440   :  { %v2727_v21 = vadd.f32 %v2719_v16, %v2707_v61 }
 0x441   :  { %3151 = vrot.lane.b32.xlu1 %v3144_v57, %s4462_s8  ;;  %3220 = vrot.lane.b32.xlu0 %v3216_v27, %s4459_s3  ;;  %v3332_v57 = vstv %s4298_s27  ;;  %v2783_v27 = vstv %s4267_s28  ;;  %s6754_s27 = sld [smem:[#allocation5 + $0x31]] }
 0x442   :  { %v2747_v36 = vadd.f32 %v2739_v53, %v2727_v21  ;;  %v2785_v8 = vmul.f32 %v6582_v33, %v2783_v27  ;;  %v3333_v12 = vmul.f32 %v3332_v57, %v6496_v55  ;;  %v3335_v21 = vmul.f32 %v3332_v57, %v6566_v48  ;;  %s4319_s28 = sld [smem:[#allocation5 + $0x50]] }
 0x443   :  { %v2723_v38 = vpop.permute.xlu1 %2722  ;;  %v6525_v7 = vpop.permute.xlu0 %2795  ;;  %v3334_v15 = vmul.f32 %v3332_v57, %v6539_v9 }
 0x444   :  { %v2729_v52 = vadd.f32 %v2723_v38, %v2709_v44  ;;  %v2784_v38 = vmul.f32 %v6506_v58, %v2783_v27 }
 0x445   :  { %3169 = vrot.lane.b32.xlu1 %v3163_v22, %s4463_s9  ;;  %3234 = vrot.lane.b32.xlu0 %v3230_v20, %s4460_s5 }
 0x446   :  { %v2749_v10 = vadd.f32 %v2743_v14, %v2729_v52  ;;  %v2804_v20 = vadd.f32 %v6525_v7, %v2784_v38 }
 0x447   :  { %v2741_v54 = vpop.permute.xlu1 %2740  ;;  %v6535_v5 = vpop.permute.xlu0 %2799 }
 0x448   :  { %v2748_v56 = vadd.f32 %v2741_v54, %v2728_v30  ;;  %v6593_v30 = vld [vmem:[#allocation4 + $0x10] sm:$0xff] }
 0x449   :  { %3173 = vrot.lane.b32.xlu1 %v3165_v4, %s4463_s9  ;;  %3248 = vrot.lane.b32.xlu0 %v3244_v35, %s4461_s7  ;;  %v2786_v54 = vmul.f32 %v6593_v30, %v2783_v27 }
 0x44a   :  { %v2768_v29 = vadd.f32 %v2761_v62, %v2748_v56  ;;  %v3314_v62 = vmul.f32 %v3312_v1, %v6539_v9  ;;  %v3352_v56 = vstv %s4299_s30  ;;  %s4325_s30 = sld [smem:[#allocation5 + $0x56]] }
 0x44b   :  { %v2759_v34 = vpop.permute.xlu1 %2758  ;;  %v6545_v18 = vpop.permute.xlu0 %2817  ;;  %v2806_v44 = vadd.f32 %v6535_v5, %v2786_v54  ;;  %v2920_v54 = vstv %s4274_s13  ;;  %s4302_s13 = sld [smem:[#allocation5 + $0x3f]] }
 0x44c   :  { %v2767_v2 = vadd.f32 %v2759_v34, %v2747_v36  ;;  %v2774_v31 = vrot.slane %v2768_v29, 3  ;;  %v3313_v29 = vmul.f32 %v3312_v1, %v6496_v55  ;;  %v3354_v36 = vmul.f32 %v3352_v56, %v6539_v9 }
 0x44d   :  { %3208 = vrot.lane.b32.xlu1 %v3203_v32, %s4458_s29  ;;  %3262 = vrot.lane.b32.xlu0 %v3258_v3, %s4462_s8  ;;  %v3372_v3 = vstv %s4300_s4  ;;  %s4331_s4 = sld [smem:[#allocation5 + $0x5c]] }
 0x44e   :  { %v2773_v24 = vrot.slane %v2767_v2, 3  ;;  %v3374_v38 = vmul.f32 %v3372_v3, %v6539_v9 }
 0x44f   :  { %v2763_v50 = vpop.permute.xlu1 %2762  ;;  %v6552_v26 = vpop.permute.xlu0 %2835 }
 0x450   :  { %v2775_v59 = vsel %vm762_vm5, %v2773_v24, %v2774_v31  ;;  %v2769_v17 = vadd.f32 %v2763_v50, %v2749_v10  ;;  %v3373_v24 = vmul.f32 %v3372_v3, %v6496_v55 }
 0x451   :  { %v6558_v53 = vadd.f32 %v2775_v59, %v6472_v46  ;;  %3222 = vrot.lane.b32.xlu1 %v3217_v19, %s4459_s3  ;;  %3276 = vrot.lane.b32.xlu0 %v3272_v28, %s4463_s9 }
 0x452   :  { %v2776_v13 = vrot.slane %v2769_v17, 3 }
 0x453   :  { %v2798_v11 = vpop.permute.xlu1 %2797  ;;  %v6562_v6 = vpop.permute.xlu0 %2839 }
 0x454   :  { %v2777_v14 = vsel %vm762_vm5, %v2774_v31, %v2776_v13  ;;  %v2805_v22 = vadd.f32 %v2798_v11, %v2785_v8  ;;  %v3315_v31 = vmul.f32 %v3312_v1, %v6566_v48  ;;  %v3375_v13 = vmul.f32 %v3372_v3, %v6566_v48 }
 0x455   :  { %v6570_v46 = vadd.f32 %v2777_v14, %v6484_v41  ;;  %3236 = vrot.lane.b32.xlu1 %v3231_v23, %s4460_s5  ;;  %3299 = vrot.lane.b32.xlu0 %v3293_v39, %s4458_s29  ;;  %v3259_v41 = vmul.f32 %v3257_v0, %v6539_v9  ;;  %v3392_v14 = vstv %s4301_s6  ;;  %v3355_v8 = vmul.f32 %v3352_v56, %v6566_v48  ;;  %s4295_s6 = sld [smem:[#allocation5 + $0x38]] }
 0x456   :  { %v2825_v35 = vadd.f32 %v6545_v18, %v2805_v22 }
 0x457   :  { %v2816_v47 = vpop.permute.xlu1 %2815  ;;  %v2858_v42 = vpop.permute.xlu0 %2857 }
 0x458   :  { %v2824_v4 = vadd.f32 %v2816_v47, %v2804_v20  ;;  %v3449_v20 = vstv %s4304_s11  ;;  %s4326_s11 = sld [smem:[#allocation5 + $0x57]] }
 0x459   :  { %3250 = vrot.lane.b32.xlu1 %v3245_v43, %s4461_s7  ;;  %3303 = vrot.lane.b32.xlu0 %v3295_v37, %s4458_s29  ;;  %v3353_v43 = vmul.f32 %v3352_v56, %v6496_v55  ;;  %v3394_v37 = vmul.f32 %v3392_v14, %v6539_v9 }
 0x45a   :  { %v2844_v32 = vadd.f32 %v6552_v26, %v2824_v4  ;;  %v2922_v4 = vmul.f32 %v6582_v33, %v2920_v54 }
 0x45b   :  { %v2820_v49 = vpop.permute.xlu1 %2819  ;;  %v2876_v16 = vpop.permute.xlu0 %2875 }
 0x45c   :  { %v2826_v34 = vadd.f32 %v2820_v49, %v2806_v44 }
 0x45d   :  { %3264 = vrot.lane.b32.xlu1 %v3259_v41, %s4462_s8  ;;  %3321 = vrot.lane.b32.xlu0 %v3314_v62, %s4459_s3 }
 0x45e   :  { %v2846_v10 = vadd.f32 %v6562_v6, %v2826_v34 }
 0x45f   :  { %v2838_v45 = vpop.permute.xlu1 %2837  ;;  %v2880_v25 = vpop.permute.xlu0 %2879 }
 0x460   :  { %v2845_v7 = vadd.f32 %v2838_v45, %v2825_v35 }
 0x461   :  { %3278 = vrot.lane.b32.xlu1 %v3273_v60, %s4463_s9  ;;  %3339 = vrot.lane.b32.xlu0 %v3333_v12, %s4460_s5 }
 0x462   :  { %v2865_v2 = vadd.f32 %v2858_v42, %v2845_v7  ;;  %v3395_v7 = vmul.f32 %v3392_v14, %v6566_v48 }
 0x463   :  { %v2856_v63 = vpop.permute.xlu1 %2855  ;;  %v2898_v61 = vpop.permute.xlu0 %2897 }
 0x464   :  { %v2864_v18 = vadd.f32 %v2856_v63, %v2844_v32 }
 0x465   :  { %3301 = vrot.lane.b32.xlu1 %v3294_v51, %s4458_s29  ;;  %3343 = vrot.lane.b32.xlu0 %v3335_v21, %s4460_s5  ;;  %v3451_v51 = vmul.f32 %v3449_v20, %v6539_v9  ;;  %v3469_v21 = vstv %s4305_s12  ;;  %s4332_s12 = sld [smem:[#allocation5 + $0x5d]] }
 0x466   :  { %v2884_v28 = vadd.f32 %v2876_v16, %v2864_v18  ;;  %v3429_v16 = vstv %s4303_s10  ;;  %v3470_v56 = vmul.f32 %v3469_v21, %v6496_v55  ;;  %v3472_v18 = vmul.f32 %v3469_v21, %v6566_v48  ;;  %s4320_s10 = sld [smem:[#allocation5 + $0x51]] }
 0x467   :  { %v2860_v0 = vpop.permute.xlu1 %2859  ;;  %v6600_v52 = vpop.permute.xlu0 %2932  ;;  %v3430_v45 = vmul.f32 %v3429_v16, %v6496_v55  ;;  %v3432_v22 = vmul.f32 %v3429_v16, %v6566_v48  ;;  %v3431_v3 = vmul.f32 %v3429_v16, %v6539_v9  ;;  %v3471_v16 = vmul.f32 %v3469_v21, %v6539_v9 }
 0x468   :  { %v2866_v26 = vadd.f32 %v2860_v0, %v2846_v10  ;;  %v2921_v0 = vmul.f32 %v6506_v58, %v2920_v54 }
 0x469   :  { %3319 = vrot.lane.b32.xlu1 %v3313_v29, %s4459_s3  ;;  %3361 = vrot.lane.b32.xlu0 %v3354_v36, %s4461_s7 }
 0x46a   :  { %v2886_v39 = vadd.f32 %v2880_v25, %v2866_v26  ;;  %v2941_v36 = vadd.f32 %v6600_v52, %v2921_v0 }
 0x46b   :  { %v2878_v5 = vpop.permute.xlu1 %2877  ;;  %v6607_v40 = vpop.permute.xlu0 %2936 }
 0x46c   :  { %v2885_v50 = vadd.f32 %v2878_v5, %v2865_v2  ;;  %v2923_v2 = vmul.f32 %v6593_v30, %v2920_v54 }
 0x46d   :  { %3323 = vrot.lane.b32.xlu1 %v3315_v31, %s4459_s3  ;;  %3379 = vrot.lane.b32.xlu0 %v3373_v24, %s4462_s8 }
 0x46e   :  { %v2905_v19 = vadd.f32 %v2898_v61, %v2885_v50  ;;  %v2943_v24 = vadd.f32 %v6607_v40, %v2923_v2  ;;  %v3489_v50 = vstv %s4306_s14  ;;  %v3606_v2 = vstv %s4312_s19  ;;  %s4321_s14 = sld [smem:[#allocation5 + $0x52]] }
 0x46f   :  { %v2896_v59 = vpop.permute.xlu1 %2895  ;;  %v6614_v17 = vpop.permute.xlu0 %2954  ;;  %s4329_s19 = sld [smem:[#allocation5 + $0x5a]] }
 0x470   :  { %v2904_v11 = vadd.f32 %v2896_v59, %v2884_v28  ;;  %v2911_v6 = vrot.slane %v2905_v19, 4  ;;  %v3450_v19 = vmul.f32 %v3449_v20, %v6496_v55  ;;  %v3491_v28 = vmul.f32 %v3489_v50, %v6539_v9 }
 0x471   :  { %3341 = vrot.lane.b32.xlu1 %v3334_v15, %s4460_s5  ;;  %3383 = vrot.lane.b32.xlu0 %v3375_v13, %s4462_s8  ;;  %v3509_v13 = vstv %s4307_s17  ;;  %s4327_s17 = sld [smem:[#allocation5 + $0x58]] }
 0x472   :  { %v2910_v23 = vrot.slane %v2904_v11, 4  ;;  %v3511_v0 = vmul.f32 %v3509_v13, %v6539_v9 }
 0x473   :  { %v2900_v47 = vpop.permute.xlu1 %2899  ;;  %v6620_v42 = vpop.permute.xlu0 %2972 }
 0x474   :  { %v2912_v1 = vsel %vm900_vm6, %v2910_v23, %v2911_v6  ;;  %v2906_v49 = vadd.f32 %v2900_v47, %v2886_v39  ;;  %v3452_v23 = vmul.f32 %v3449_v20, %v6566_v48  ;;  %v3510_v39 = vmul.f32 %v3509_v13, %v6496_v55 }
 0x475   :  { %v6626_v41 = vadd.f32 %v2912_v1, %v6558_v53  ;;  %3359 = vrot.lane.b32.xlu1 %v3353_v43, %s4461_s7  ;;  %3401 = vrot.lane.b32.xlu0 %v3394_v37, %s4463_s9 }
 0x476   :  { %v2913_v62 = vrot.slane %v2906_v49, 4 }
 0x477   :  { %v2935_v57 = vpop.permute.xlu1 %2934  ;;  %v6630_v27 = vpop.permute.xlu0 %2976 }
 0x478   :  { %v2914_v25 = vsel %vm900_vm6, %v2911_v6, %v2913_v62  ;;  %v2942_v29 = vadd.f32 %v2935_v57, %v2922_v4  ;;  %v3512_v62 = vmul.f32 %v3509_v13, %v6566_v48  ;;  %v3492_v4 = vmul.f32 %v3489_v50, %v6566_v48 }
 0x479   :  { %v6636_v53 = vadd.f32 %v2914_v25, %v6570_v46  ;;  %3363 = vrot.lane.b32.xlu1 %v3355_v8, %s4461_s7  ;;  %3436 = vrot.lane.b32.xlu0 %v3430_v45, %s4458_s29  ;;  %v3393_v46 = vmul.f32 %v3392_v14, %v6496_v55  ;;  %v3529_v25 = vstv %s4308_s18  ;;  %v3609_v13 = vmul.f32 %v3606_v2, %v6566_v48  ;;  %s4322_s18 = sld [smem:[#allocation5 + $0x53]] }
 0x47a   :  { %v2962_v31 = vadd.f32 %v6614_v17, %v2942_v29 }
 0x47b   :  { %v2953_v60 = vpop.permute.xlu1 %2952  ;;  %v2995_v12 = vpop.permute.xlu0 %2994 }
 0x47c   :  { %v2961_v5 = vadd.f32 %v2953_v60, %v2941_v36  ;;  %v3586_v36 = vstv %s4311_s1  ;;  %s4309_s1 = sld [smem:[#allocation5 + $0x46]] }
 0x47d   :  { %3381 = vrot.lane.b32.xlu1 %v3374_v38, %s4462_s8  ;;  %3440 = vrot.lane.b32.xlu0 %v3432_v22, %s4458_s29  ;;  %v3490_v38 = vmul.f32 %v3489_v50, %v6496_v55  ;;  %v3531_v22 = vmul.f32 %v3529_v25, %v6539_v9  ;;  %v3607_v50 = vmul.f32 %v3606_v2, %v6496_v55 }
 0x47e   :  { %v2981_v15 = vadd.f32 %v6620_v42, %v2961_v5 }
 0x47f   :  { %v2957_v63 = vpop.permute.xlu1 %2956  ;;  %v3013_v61 = vpop.permute.xlu0 %3012 }
 0x480   :  { %v2963_v59 = vadd.f32 %v2957_v63, %v2943_v24 }
 0x481   :  { %3399 = vrot.lane.b32.xlu1 %v3393_v46, %s4463_s9  ;;  %3458 = vrot.lane.b32.xlu0 %v3451_v51, %s4459_s3 }
 0x482   :  { %v2983_v14 = vadd.f32 %v6630_v27, %v2963_v59 }
 0x483   :  { %v2975_v35 = vpop.permute.xlu1 %2974  ;;  %v3017_v44 = vpop.permute.xlu0 %3016 }
 0x484   :  { %v2982_v10 = vadd.f32 %v2975_v35, %v2962_v31 }
 0x485   :  { %3403 = vrot.lane.b32.xlu1 %v3395_v7, %s4463_s9  ;;  %3476 = vrot.lane.b32.xlu0 %v3470_v56, %s4460_s5 }
 0x486   :  { %v3002_v11 = vadd.f32 %v2995_v12, %v2982_v10  ;;  %v3532_v10 = vmul.f32 %v3529_v25, %v6566_v48 }
 0x487   :  { %v2993_v34 = vpop.permute.xlu1 %2992  ;;  %v3035_v32 = vpop.permute.xlu0 %3034 }
 0x488   :  { %v3001_v17 = vadd.f32 %v2993_v34, %v2981_v15 }
 0x489   :  { %3438 = vrot.lane.b32.xlu1 %v3431_v3, %s4458_s29  ;;  %3480 = vrot.lane.b32.xlu0 %v3472_v18, %s4460_s5  ;;  %v3530_v3 = vmul.f32 %v3529_v25, %v6496_v55  ;;  %v3588_v18 = vmul.f32 %v3586_v36, %v6539_v9 }
 0x48a   :  { %v3021_v37 = vadd.f32 %v3013_v61, %v3001_v17  ;;  %v3566_v61 = vstv %s4310_s0  ;;  %s4334_s0 = sld [smem:[#allocation5 + $0x5f]] }
 0x48b   :  { %v2997_v52 = vpop.permute.xlu1 %2996  ;;  %v6662_v26 = vpop.permute.xlu0 %3069  ;;  %v3567_v35 = vmul.f32 %v3566_v61, %v6496_v55  ;;  %v3569_v29 = vmul.f32 %v3566_v61, %v6566_v48 }
 0x48c   :  { %v3003_v42 = vadd.f32 %v2997_v52, %v2983_v14 }
 0x48d   :  { %3456 = vrot.lane.b32.xlu1 %v3450_v19, %s4459_s3  ;;  %3498 = vrot.lane.b32.xlu0 %v3491_v28, %s4461_s7 }
 0x48e   :  { %v3023_v45 = vadd.f32 %v3017_v44, %v3003_v42 }
 0x48f   :  { %v3015_v40 = vpop.permute.xlu1 %3014  ;;  %v6669_v6 = vpop.permute.xlu0 %3073 }
 0x490   :  { %v3022_v47 = vadd.f32 %v3015_v40, %v3002_v11 }
 0x491   :  { %3460 = vrot.lane.b32.xlu1 %v3452_v23, %s4459_s3  ;;  %3516 = vrot.lane.b32.xlu0 %v3510_v39, %s4462_s8  ;;  %v3626_v39 = vstv %s4313_s21  ;;  %s4316_s21 = sld [smem:[#allocation5 + $0x4d]] }
 0x492   :  { %v3042_v43 = vadd.f32 %v3035_v32, %v3022_v47  ;;  %v3587_v47 = vmul.f32 %v3586_v36, %v6496_v55  ;;  %v3628_v42 = vmul.f32 %v3626_v39, %v6539_v9 }
 0x493   :  { %v3033_v1 = vpop.permute.xlu1 %3032  ;;  %v6676_v49 = vpop.permute.xlu0 %3091 }
 0x494   :  { %v3041_v57 = vadd.f32 %v3033_v1, %v3021_v37  ;;  %v3048_v27 = vrot.slane %v3042_v43, 5  ;;  %v3646_v37 = vstv %s4314_s22 }
 0x495   :  { %3478 = vrot.lane.b32.xlu1 %v3471_v16, %s4460_s5  ;;  %3520 = vrot.lane.b32.xlu0 %v3512_v62, %s4462_s8  ;;  %v3589_v62 = vmul.f32 %v3586_v36, %v6566_v48 }
 0x496   :  { %v3047_v8 = vrot.slane %v3041_v57, 5  ;;  %v3647_v57 = vmul.f32 %v3646_v37, %v6496_v55 }
 0x497   :  { %v3037_v60 = vpop.permute.xlu1 %3036  ;;  %v6682_v12 = vpop.permute.xlu0 %3109 }
 0x498   :  { %v3049_v20 = vsel %vm1038_vm7, %v3047_v8, %v3048_v27  ;;  %v3043_v63 = vadd.f32 %v3037_v60, %v3023_v45 }
 0x499   :  { %3496 = vrot.lane.b32.xlu1 %v3490_v38, %s4461_s7  ;;  %3538 = vrot.lane.b32.xlu0 %v3531_v22, %s4463_s9  ;;  %v6690_v46 = vadd.f32 %v3049_v20, %v6626_v41  ;;  %v3608_v22 = vmul.f32 %v3606_v2, %v6539_v9  ;;  %v3649_v20 = vmul.f32 %v3646_v37, %v6566_v48 }
 0x49a   :  { %v3050_v51 = vrot.slane %v3043_v63, 5 }
 0x49b   :  { %v3072_v21 = vpop.permute.xlu1 %3071  ;;  %v6692_v54 = vpop.permute.xlu0 %3113 }
 0x49c   :  { %v3051_v44 = vsel %vm1038_vm7, %v3048_v27, %v3050_v51 }
 0x49d   :  { %3500 = vrot.lane.b32.xlu1 %v3492_v4, %s4461_s7  ;;  %3573 = vrot.lane.b32.xlu0 %v3567_v35, %s4458_s29  ;;  %v6700_v41 = vadd.f32 %v3051_v44, %v6636_v53  ;;  %v3057_v53 = vstv %s4281_s20  ;;  %v3627_v44 = vmul.f32 %v3626_v39, %v6496_v55  ;;  %s4335_s20 = sld [smem:[#allocation5 + $0x60]] }
 0x49e   :  { %v3059_v5 = vmul.f32 %v6582_v33, %v3057_v53  ;;  %v3058_v52 = vmul.f32 %v6506_v58, %v3057_v53  ;;  %v3568_v33 = vmul.f32 %v3566_v61, %v6539_v9  ;;  %v3060_v17 = vmul.f32 %v6593_v30, %v3057_v53 }
 0x49f   :  { %v3090_v7 = vpop.permute.xlu1 %3089  ;;  %v3132_v56 = vpop.permute.xlu0 %3131  ;;  %v3703_v61 = vstv %s4317_s23  ;;  %v3723_v53 = vstv %s4318_s24 }
 0x4a0   :  { %v3079_v19 = vadd.f32 %v3072_v21, %v3059_v5  ;;  %v3078_v28 = vadd.f32 %v6662_v26, %v3058_v52  ;;  %v3080_v58 = vadd.f32 %v6669_v6, %v3060_v17  ;;  %v3840_v52 = vstv %s4324_s26 }
 0x4a1   :  { %3518 = vrot.lane.b32.xlu1 %v3511_v0, %s4462_s8  ;;  %3577 = vrot.lane.b32.xlu0 %v3569_v29, %s4458_s29 }
 0x4a2   :  { %v3098_v11 = vadd.f32 %v3090_v7, %v3078_v28  ;;  %v3099_v40 = vadd.f32 %v6676_v49, %v3079_v19  ;;  %v3704_v7 = vmul.f32 %v3703_v61, %v6496_v55  ;;  %v3197_v19 = vstv %s6754_s27 }
 0x4a3   :  { %v3094_v34 = vpop.permute.xlu1 %3093  ;;  %v3150_v32 = vpop.permute.xlu0 %3149 }
 0x4a4   :  { %v3100_v43 = vadd.f32 %v3094_v34, %v3080_v58  ;;  %v3118_v30 = vadd.f32 %v6682_v12, %v3098_v11  ;;  %v3843_v58 = vmul.f32 %v3840_v52, %v6566_v48 }
 0x4a5   :  { %3536 = vrot.lane.b32.xlu1 %v3530_v3, %s4463_s9  ;;  %3595 = vrot.lane.b32.xlu0 %v3588_v18, %s4459_s3  ;;  %v3629_v3 = vmul.f32 %v3626_v39, %v6566_v48  ;;  %v3706_v18 = vmul.f32 %v3703_v61, %v6566_v48 }
 0x4a6   :  { %v3120_v27 = vadd.f32 %v6692_v54, %v3100_v43  ;;  %v3724_v43 = vmul.f32 %v3723_v53, %v6496_v55 }
 0x4a7   :  { %v3112_v31 = vpop.permute.xlu1 %3111  ;;  %v3154_v24 = vpop.permute.xlu0 %3153 }
 0x4a8   :  { %v3119_v23 = vadd.f32 %v3112_v31, %v3099_v40  ;;  %v3705_v40 = vmul.f32 %v3703_v61, %v6539_v9 }
 0x4a9   :  { %3540 = vrot.lane.b32.xlu1 %v3532_v10, %s4463_s9  ;;  %3613 = vrot.lane.b32.xlu0 %v3607_v50, %s4460_s5  ;;  %v3725_v10 = vmul.f32 %v3723_v53, %v6539_v9  ;;  %v6768_v50 = vstv %s4315_s25 }
 0x4aa   :  { %v3139_v6 = vadd.f32 %v3132_v56, %v3119_v23 }
 0x4ab   :  { %v3130_v59 = vpop.permute.xlu1 %3129  ;;  %v3172_v15 = vpop.permute.xlu0 %3171 }
 0x4ac   :  { %v3138_v1 = vadd.f32 %v3130_v59, %v3118_v30  ;;  %v3667_v59 = vmul.f32 %v6768_v50, %v6496_v55 }
 0x4ad   :  { %3575 = vrot.lane.b32.xlu1 %v3568_v33, %s4458_s29  ;;  %3617 = vrot.lane.b32.xlu0 %v3609_v13, %s4460_s5  ;;  %v3199_v33 = vmul.f32 %v3197_v19, %v6539_v9 }
 0x4ae   :  { %v3158_v60 = vadd.f32 %v3150_v32, %v3138_v1  ;;  %v3860_v1 = vstv %s4325_s30 }
 0x4af   :  { %v3134_v26 = vpop.permute.xlu1 %3133  ;;  %v6724_v14 = vpop.permute.xlu0 %3206 }
 0x4b0   :  { %v3140_v45 = vadd.f32 %v3134_v26, %v3120_v27  ;;  %v3743_v26 = vstv %s4319_s28  ;;  %v3861_v27 = vmul.f32 %v3860_v1, %v6496_v55 }
 0x4b1   :  { %3593 = vrot.lane.b32.xlu1 %v3587_v47, %s4459_s3  ;;  %3635 = vrot.lane.b32.xlu0 %v3628_v42, %s4461_s7  ;;  %v3745_v30 = vmul.f32 %v3743_v26, %v6539_v9 }
 0x4b2   :  { %v3160_v54 = vadd.f32 %v3154_v24, %v3140_v45  ;;  %v3648_v24 = vmul.f32 %v3646_v37, %v6539_v9 }
 0x4b3   :  { %v3152_v49 = vpop.permute.xlu1 %3151  ;;  %v6731_v16 = vpop.permute.xlu0 %3220 }
 0x4b4   :  { %v3159_v8 = vadd.f32 %v3152_v49, %v3139_v6 }
 0x4b5   :  { %3597 = vrot.lane.b32.xlu1 %v3589_v62, %s4459_s3  ;;  %3653 = vrot.lane.b32.xlu0 %v3647_v57, %s4462_s8  ;;  %v3726_v57 = vmul.f32 %v3723_v53, %v6566_v48  ;;  %v3862_v53 = vmul.f32 %v3860_v1, %v6539_v9 }
 0x4b6   :  { %v3179_v25 = vadd.f32 %v3172_v15, %v3159_v8  ;;  %v3841_v15 = vmul.f32 %v3840_v52, %v6496_v55 }
 0x4b7   :  { %v3170_v12 = vpop.permute.xlu1 %3169  ;;  %v6738_v38 = vpop.permute.xlu0 %3234 }
 0x4b8   :  { %v3178_v63 = vadd.f32 %v3170_v12, %v3158_v60  ;;  %v3185_v51 = vrot.slane %v3179_v25, 6  ;;  %v3842_v12 = vmul.f32 %v3840_v52, %v6539_v9 }
 0x4b9   :  { %3615 = vrot.lane.b32.xlu1 %v3608_v22, %s4460_s5  ;;  %3657 = vrot.lane.b32.xlu0 %v3649_v20, %s4462_s8  ;;  %v3863_v22 = vmul.f32 %v3860_v1, %v6566_v48  ;;  %v3977_v20 = vstv %s4331_s4 }
 0x4ba   :  { %v3184_v21 = vrot.slane %v3178_v63, 6  ;;  %v3287_v63 = vstv %s4295_s6 }
 0x4bb   :  { %v3174_v4 = vpop.permute.xlu1 %3173  ;;  %v6744_v35 = vpop.permute.xlu0 %3248 }
 0x4bc   :  { %v3180_v56 = vadd.f32 %v3174_v4, %v3160_v54  ;;  %v3186_v0 = vsel %vm1176_vm8, %v3184_v21, %v3185_v51  ;;  %v3744_v21 = vmul.f32 %v3743_v26, %v6496_v55  ;;  %v3979_v54 = vmul.f32 %v3977_v20, %v6539_v9 }
 0x4bd   :  { %3633 = vrot.lane.b32.xlu1 %v3627_v44, %s4461_s7  ;;  %3710 = vrot.lane.b32.xlu0 %v3704_v7, %s4458_s29  ;;  %v6752_v29 = vadd.f32 %v3186_v0, %v6690_v46  ;;  %v3289_v4 = vmul.f32 %v3287_v63, %v6539_v9  ;;  %v3763_v44 = vstv %s4320_s10 }
 0x4be   :  { %v3187_v36 = vrot.slane %v3180_v56, 6 }
 0x4bf   :  { %v3209_v34 = vpop.permute.xlu1 %3208  ;;  %v6756_v32 = vpop.permute.xlu0 %3262 }
 0x4c0   :  { %v3188_v2 = vsel %vm1176_vm8, %v3185_v51, %v3187_v36  ;;  %v3213_v13 = vadd.f32 %v3209_v34, %v3199_v33  ;;  %v3746_v36 = vmul.f32 %v3743_v26, %v6566_v48  ;;  %v3764_v34 = vmul.f32 %v3763_v44, %v6496_v55 }
 0x4c1   :  { %3637 = vrot.lane.b32.xlu1 %v3629_v3, %s4461_s7  ;;  %3714 = vrot.lane.b32.xlu0 %v3706_v18, %s4458_s29  ;;  %v3192_v46 = vadd.f32 %v3188_v2, %v6700_v41  ;;  %v3290_v3 = vmul.f32 %v3287_v63, %v6566_v48 }
 0x4c3   :  { %v3223_v5 = vpop.permute.xlu1 %3222  ;;  %v6764_v31 = vpop.permute.xlu0 %3276 }
 0x4c4   :  { %v3227_v23 = vadd.f32 %v3223_v5, %v3213_v13  ;;  %v3766_v5 = vmul.f32 %v3763_v44, %v6566_v48  ;;  %v3198_v13 = vmul.f32 %v3197_v19, %v6496_v55  ;;  %v3980_v19 = vmul.f32 %v3977_v20, %v6566_v48 }
 0x4c5   :  { %3655 = vrot.lane.b32.xlu1 %v3648_v24, %s4462_s8  ;;  %3732 = vrot.lane.b32.xlu0 %v3725_v10, %s4459_s3  ;;  %v3288_v24 = vmul.f32 %v3287_v63, %v6496_v55 }
 0x4c6   :  { %v3212_v26 = vadd.f32 %v6724_v14, %v3198_v13  ;;  %v3424_v14 = vstv %s4302_s13 }
 0x4c7   :  { %v3237_v28 = vpop.permute.xlu1 %3236  ;;  %v6773_v41 = vpop.permute.xlu0 %3299 }
 0x4c8   :  { %v3241_v39 = vadd.f32 %v3237_v28, %v3227_v23  ;;  %v3308_v28 = vadd.f32 %v6773_v41, %v3288_v24 }
 0x4c9   :  { %3673 = vrot.lane.b32.xlu1 %v3667_v59, %s4463_s9  ;;  %3847 = vrot.lane.b32.xlu0 %v3841_v15, %s4458_s29  ;;  %v3880_v15 = vstv %s4326_s11 }
 0x4cb   :  { %v3251_v17 = vpop.permute.xlu1 %3250  ;;  %v3304_v11 = vpop.permute.xlu0 %3303 }
 0x4cc   :  { %v3255_v37 = vadd.f32 %v3251_v17, %v3241_v39  ;;  %v3310_v10 = vadd.f32 %v3304_v11, %v3290_v3  ;;  %v3882_v11 = vmul.f32 %v3880_v15, %v6539_v9  ;;  %v3997_v39 = vstv %s4332_s12 }
 0x4cd   :  { %3712 = vrot.lane.b32.xlu1 %v3705_v40, %s4458_s29  ;;  %3851 = vrot.lane.b32.xlu0 %v3843_v58, %s4458_s29  ;;  %v3978_v58 = vmul.f32 %v3977_v20, %v6496_v55  ;;  %v3999_v24 = vmul.f32 %v3997_v39, %v6539_v9 }
 0x4cf   :  { %v3265_v47 = vpop.permute.xlu1 %3264  ;;  %v3322_v42 = vpop.permute.xlu0 %3321 }
 0x4d0   :  { %v3269_v6 = vadd.f32 %v3265_v47, %v3255_v37  ;;  %v3226_v47 = vadd.f32 %v6731_v16, %v3212_v26  ;;  %v3427_v16 = vmul.f32 %v3424_v14, %v6566_v48 }
 0x4d1   :  { %3730 = vrot.lane.b32.xlu1 %v3724_v43, %s4459_s3  ;;  %3752 = vrot.lane.b32.xlu0 %v3745_v30, %s4460_s5  ;;  %v3998_v30 = vmul.f32 %v3997_v39, %v6496_v55 }
 0x4d3   :  { %v3279_v49 = vpop.permute.xlu1 %3278  ;;  %v6791_v62 = vpop.permute.xlu0 %3339 }
 0x4d4   :  { %v3283_v8 = vadd.f32 %v3279_v49, %v3269_v6  ;;  %v3240_v6 = vadd.f32 %v6738_v38, %v3226_v47 }
 0x4d5   :  { %3734 = vrot.lane.b32.xlu1 %v3726_v57, %s4459_s3  ;;  %3867 = vrot.lane.b32.xlu0 %v3861_v27, %s4459_s3 }
 0x4d6   :  { %v6797_v45 = vadd.f32 %v3283_v8, %v3192_v46  ;;  %v3254_v27 = vadd.f32 %v6744_v35, %v3240_v6 }
 0x4d7   :  { %v3302_v25 = vpop.permute.xlu1 %3301  ;;  %v3344_v60 = vpop.permute.xlu0 %3343 }
 0x4d8   :  { %v3309_v7 = vadd.f32 %v3302_v25, %v3289_v4 }
 0x4d9   :  { %3849 = vrot.lane.b32.xlu1 %v3842_v12, %s4458_s29  ;;  %3871 = vrot.lane.b32.xlu0 %v3863_v22, %s4459_s3  ;;  %v3268_v22 = vadd.f32 %v6756_v32, %v3254_v27  ;;  %v6883_v27 = vld [vmem:[#allocation4 + $0x20] sm:$0xff] }
 0x4da   :  { %v3329_v18 = vadd.f32 %v3322_v42, %v3309_v7  ;;  %v3783_v7 = vstv %s4321_s14 }
 0x4db   :  { %v3320_v61 = vpop.permute.xlu1 %3319  ;;  %v3362_v51 = vpop.permute.xlu0 %3361  ;;  %v3786_v6 = vmul.f32 %v3783_v7, %v6566_v48 }
 0x4dc   :  { %v3328_v23 = vadd.f32 %v3320_v61, %v3308_v28  ;;  %v3282_v61 = vadd.f32 %v6764_v31, %v3268_v22  ;;  %v3883_v31 = vmul.f32 %v3880_v15, %v6566_v48 }
 0x4dd   :  { %3750 = vrot.lane.b32.xlu1 %v3744_v21, %s4460_s5  ;;  %3986 = vrot.lane.b32.xlu0 %v3979_v54, %s4458_s29  ;;  %v3881_v21 = vmul.f32 %v3880_v15, %v6496_v55  ;;  %v3669_v54 = vmul.f32 %v6768_v50, %v6566_v48 }
 0x4de   :  { %v3348_v37 = vadd.f32 %v6791_v62, %v3328_v23  ;;  %v4000_v62 = vmul.f32 %v3997_v39, %v6566_v48 }
 0x4df   :  { %v3324_v56 = vpop.permute.xlu1 %3323  ;;  %v3380_v0 = vpop.permute.xlu0 %3379 }
 0x4e0   :  { %v3330_v59 = vadd.f32 %v3324_v56, %v3310_v10  ;;  %v3284_v56 = vadd.f32 %v3282_v61, %v6752_v29  ;;  %v6859_v10 = vld [vmem:[#allocation4 + $0x18] sm:$0xff] }
 0x4e1   :  { %3754 = vrot.lane.b32.xlu1 %v3746_v36, %s4460_s5  ;;  %3770 = vrot.lane.b32.xlu0 %v3764_v34, %s4461_s7  ;;  %v3785_v34 = vmul.f32 %v3783_v7, %v6539_v9  ;;  %v3425_v28 = vmul.f32 %v6859_v10, %v3424_v14 }
 0x4e2   :  { %v3350_v41 = vadd.f32 %v3344_v60, %v3330_v59  ;;  %v3765_v60 = vmul.f32 %v3763_v44, %v6539_v9 }
 0x4e3   :  { %v3342_v2 = vpop.permute.xlu1 %3341  ;;  %v3384_v46 = vpop.permute.xlu0 %3383 }
 0x4e4   :  { %v3349_v52 = vadd.f32 %v3342_v2, %v3329_v18  ;;  %v3900_v18 = vstv %s4327_s17 }
 0x4e5   :  { %3869 = vrot.lane.b32.xlu1 %v3862_v53, %s4459_s3  ;;  %3774 = vrot.lane.b32.xlu0 %v3766_v5, %s4461_s7  ;;  %v3426_v53 = vmul.f32 %v3424_v14, %v6539_v9  ;;  %v3903_v23 = vmul.f32 %v3900_v18, %v6566_v48 }
 0x4e6   :  { %v3369_v33 = vadd.f32 %v3362_v51, %v3349_v52  ;;  %v3901_v52 = vmul.f32 %v6859_v10, %v3900_v18 }
 0x4e7   :  { %v3360_v17 = vpop.permute.xlu1 %3359  ;;  %v3402_v40 = vpop.permute.xlu0 %3401 }
 0x4e8   :  { %v3368_v49 = vadd.f32 %v3360_v17, %v3348_v37 }
 0x4e9   :  { %3984 = vrot.lane.b32.xlu1 %v3978_v58, %s4458_s29  ;;  %3889 = vrot.lane.b32.xlu0 %v3882_v11, %s4460_s5  ;;  %v3668_v11 = vmul.f32 %v6768_v50, %v6539_v9 }
 0x4ea   :  { %v3388_v63 = vadd.f32 %v3380_v0, %v3368_v49 }
 0x4eb   :  { %v3364_v42 = vpop.permute.xlu1 %3363  ;;  %v6828_v43 = vpop.permute.xlu0 %3436 }
 0x4ec   :  { %v3370_v1 = vadd.f32 %v3364_v42, %v3350_v41  ;;  %v3445_v13 = vadd.f32 %v6828_v43, %v3425_v28  ;;  %v3784_v42 = vmul.f32 %v6859_v10, %v3783_v7 }
 0x4ed   :  { %3988 = vrot.lane.b32.xlu1 %v3980_v19, %s4458_s29  ;;  %4004 = vrot.lane.b32.xlu0 %v3998_v30, %s4459_s3  ;;  %s4333_s29 = sld [smem:[#allocation5 + $0x5e]]  ;;  %v3803_v30 = vstv %s4322_s18 }
 0x4ee   :  { %v3390_v57 = vadd.f32 %v3384_v46, %v3370_v1  ;;  %v3804_v14 = vmul.f32 %v6859_v10, %v3803_v30 }
 0x4ef   :  { %v3382_v8 = vpop.permute.xlu1 %3381  ;;  %v3441_v25 = vpop.permute.xlu0 %3440 }
 0x4f0   :  { %v3389_v12 = vadd.f32 %v3382_v8, %v3369_v33  ;;  %v3447_v38 = vadd.f32 %v3441_v25, %v3427_v16  ;;  %v3902_v8 = vmul.f32 %v6883_v27, %v3900_v18  ;;  %v3806_v25 = vmul.f32 %v3803_v30, %v6566_v48 }
 0x4f1   :  { %3772 = vrot.lane.b32.xlu1 %v3765_v60, %s4461_s7  ;;  %4008 = vrot.lane.b32.xlu0 %v4000_v62, %s4459_s3 }
 0x4f2   :  { %v3409_v20 = vadd.f32 %v3402_v40, %v3389_v12 }
 0x4f3   :  { %v3400_v35 = vpop.permute.xlu1 %3399  ;;  %v3459_v51 = vpop.permute.xlu0 %3458 }
 0x4f4   :  { %v3408_v4 = vadd.f32 %v3400_v35, %v3388_v63  ;;  %v3415_v32 = vrot.slane %v3409_v20, 1  ;;  %v4037_v35 = vstv %s4334_s0 }
 0x4f5   :  { %3887 = vrot.lane.b32.xlu1 %v3881_v21, %s4460_s5  ;;  %3677 = vrot.lane.b32.xlu0 %v3669_v54, %s4463_s9 }
 0x4f6   :  { %v3414_v44 = vrot.slane %v3408_v4, 1 }
 0x4f7   :  { %v3404_v0 = vpop.permute.xlu1 %3403  ;;  %v3477_v36 = vpop.permute.xlu0 %3476 }
 0x4f8   :  { %v3416_v55 = vsel %vm486_vm3, %v3414_v44, %v3415_v32  ;;  %v3410_v3 = vadd.f32 %v3404_v0, %v3390_v57  ;;  %v6894_v44 = vld [vmem:[#allocation4 + $0x28] sm:$0xff] }
 0x4f9   :  { %v6853_v2 = vadd.f32 %v3416_v55, %v3284_v56  ;;  %3891 = vrot.lane.b32.xlu1 %v3883_v31, %s4460_s5  ;;  %3792 = vrot.lane.b32.xlu0 %v3785_v34, %s4462_s8  ;;  %v4038_v56 = vmul.f32 %v6859_v10, %v4037_v35  ;;  %v3805_v55 = vmul.f32 %v6883_v27, %v3803_v30 }
 0x4fa   :  { %v3417_v46 = vrot.slane %v3410_v3, 1  ;;  %v4040_v3 = vmul.f32 %v6894_v44, %v4037_v35 }
 0x4fb   :  { %v3439_v29 = vpop.permute.xlu1 %3438  ;;  %v3481_v5 = vpop.permute.xlu0 %3480 }
 0x4fc   :  { %v3418_v59 = vsel %vm486_vm3, %v3415_v32, %v3417_v46  ;;  %v3446_v15 = vadd.f32 %v3439_v29, %v3426_v53  ;;  %v3940_v29 = vstv %s4329_s19 }
 0x4fd   :  { %v6865_v33 = vadd.f32 %v3418_v59, %v6797_v45  ;;  %4006 = vrot.lane.b32.xlu1 %v3999_v24, %s4459_s3  ;;  %3907 = vrot.lane.b32.xlu0 %v3901_v52, %s4461_s7  ;;  %v4017_v45 = vstv %s4333_s29  ;;  %s4328_s3 = sld [smem:[#allocation5 + $0x59]]  ;;  %v3942_v28 = vmul.f32 %v6883_v27, %v3940_v29 }
 0x4fe   :  { %v3466_v17 = vadd.f32 %v3459_v51, %v3446_v15  ;;  %v4019_v43 = vmul.f32 %v4017_v45, %v6539_v9  ;;  %v4018_v20 = vmul.f32 %v6859_v10, %v4017_v45  ;;  %v3561_v51 = vstv %s4309_s1 }
 0x4ff   :  { %v3457_v40 = vpop.permute.xlu1 %3456  ;;  %v3499_v58 = vpop.permute.xlu0 %3498  ;;  %v3564_v21 = vmul.f32 %v3561_v51, %v6566_v48  ;;  %v4020_v7 = vmul.f32 %v6894_v44, %v4017_v45 }
 0x500   :  { %v3465_v39 = vadd.f32 %v3457_v40, %v3445_v13  ;;  %v4057_v13 = vstv %s4335_s20 }
 0x501   :  { %3675 = vrot.lane.b32.xlu1 %v3668_v11, %s4463_s9  ;;  %3911 = vrot.lane.b32.xlu0 %v3903_v23, %s4461_s7  ;;  %v4058_v45 = vmul.f32 %v6859_v10, %v4057_v13 }
 0x502   :  { %v3485_v26 = vadd.f32 %v3477_v36, %v3465_v39 }
 0x503   :  { %v3461_v41 = vpop.permute.xlu1 %3460  ;;  %v3517_v47 = vpop.permute.xlu0 %3516  ;;  %v3920_v62 = vstv %s4328_s3 }
 0x504   :  { %v3467_v19 = vadd.f32 %v3461_v41, %v3447_v38  ;;  %v3922_v63 = vmul.f32 %v6883_v27, %v3920_v62  ;;  %v3921_v52 = vmul.f32 %v6859_v10, %v3920_v62  ;;  %v3923_v39 = vmul.f32 %v6894_v44, %v3920_v62 }
 0x505   :  { %3790 = vrot.lane.b32.xlu1 %v3784_v42, %s4462_s8  ;;  %4026 = vrot.lane.b32.xlu0 %v4019_v43, %s4460_s5  ;;  %v3943_v62 = vmul.f32 %v6894_v44, %v3940_v29 }
 0x506   :  { %v3487_v50 = vadd.f32 %v3481_v5, %v3467_v19 }
 0x507   :  { %v3479_v37 = vpop.permute.xlu1 %3478  ;;  %v3521_v1 = vpop.permute.xlu0 %3520 }
 0x508   :  { %v3486_v49 = vadd.f32 %v3479_v37, %v3466_v17  ;;  %v4060_v37 = vmul.f32 %v6894_v44, %v4057_v13 }
 0x509   :  { %3794 = vrot.lane.b32.xlu1 %v3786_v6, %s4462_s8  ;;  %3810 = vrot.lane.b32.xlu0 %v3804_v14, %s4463_s9 }
 0x50a   :  { %v3506_v9 = vadd.f32 %v3499_v58, %v3486_v49  ;;  %v3563_v58 = vmul.f32 %v6883_v27, %v3561_v51 }
 0x50b   :  { %v3497_v16 = vpop.permute.xlu1 %3496  ;;  %v3539_v57 = vpop.permute.xlu0 %3538 }
 0x50c   :  { %v3505_v60 = vadd.f32 %v3497_v16, %v3485_v26  ;;  %v3562_v26 = vmul.f32 %v6859_v10, %v3561_v51 }
 0x50d   :  { %3909 = vrot.lane.b32.xlu1 %v3902_v8, %s4461_s7  ;;  %3814 = vrot.lane.b32.xlu0 %v3806_v25, %s4463_s9 }
 0x50e   :  { %v3525_v12 = vadd.f32 %v3517_v47, %v3505_v60 }
 0x50f   :  { %v3501_v38 = vpop.permute.xlu1 %3500  ;;  %v3574_v22 = vpop.permute.xlu0 %3573 }
 0x510   :  { %v3507_v61 = vadd.f32 %v3501_v38, %v3487_v50  ;;  %v3582_v42 = vadd.f32 %v3574_v22, %v3562_v26  ;;  %v4039_v50 = vmul.f32 %v6883_v27, %v4037_v35  ;;  %v3698_v35 = vstv %s4316_s21 }
 0x511   :  { %4024 = vrot.lane.b32.xlu1 %v4018_v20, %s4460_s5  ;;  %3929 = vrot.lane.b32.xlu0 %v3922_v63, %s4462_s8  ;;  %v4059_v63 = vmul.f32 %v6883_v27, %v4057_v13  ;;  %v3701_v51 = vmul.f32 %v6894_v44, %v3698_v35 }
 0x512   :  { %v3527_v54 = vadd.f32 %v3521_v1, %v3507_v61 }
 0x513   :  { %v3519_v4 = vpop.permute.xlu1 %3518  ;;  %v3578_v32 = vpop.permute.xlu0 %3577 }
 0x514   :  { %v3526_v0 = vadd.f32 %v3519_v4, %v3506_v9  ;;  %v3584_v36 = vadd.f32 %v3578_v32, %v3564_v21  ;;  %v3941_v9 = vmul.f32 %v6859_v10, %v3940_v29 }
 0x515   :  { %4028 = vrot.lane.b32.xlu1 %v4020_v7, %s4460_s5  ;;  %4044 = vrot.lane.b32.xlu0 %v4038_v56, %s4461_s7  ;;  %s4336_s5 = sld [smem:[#allocation5 + $0x61]] }
 0x516   :  { %v3546_v31 = vadd.f32 %v3539_v57, %v3526_v0 }
 0x517   :  { %v3537_v34 = vpop.permute.xlu1 %3536  ;;  %v3596_v48 = vpop.permute.xlu0 %3595 }
 0x518   :  { %v3545_v18 = vadd.f32 %v3537_v34, %v3525_v12  ;;  %v3552_v46 = vrot.slane %v3546_v31, 2 }
 0x519   :  { %3812 = vrot.lane.b32.xlu1 %v3805_v55, %s4463_s9  ;;  %4048 = vrot.lane.b32.xlu0 %v4040_v3, %s4461_s7 }
 0x51a   :  { %v3551_v53 = vrot.slane %v3545_v18, 2 }
 0x51b   :  { %v3541_v5 = vpop.permute.xlu1 %3540  ;;  %v3614_v24 = vpop.permute.xlu0 %3613  ;;  %v4077_v6 = vstv %s4336_s5 }
 0x51c   :  { %v3553_v59 = vsel %vm624_vm4, %v3551_v53, %v3552_v46  ;;  %v3547_v15 = vadd.f32 %v3541_v5, %v3527_v54  ;;  %v4079_v16 = vmul.f32 %v6883_v27, %v4077_v6  ;;  %v4078_v32 = vmul.f32 %v6859_v10, %v4077_v6 }
 0x51d   :  { %v6908_v17 = vadd.f32 %v3553_v59, %v6853_v2  ;;  %3927 = vrot.lane.b32.xlu1 %v3921_v52, %s4462_s8  ;;  %3949 = vrot.lane.b32.xlu0 %v3942_v28, %s4463_s9  ;;  %v4080_v34 = vmul.f32 %v6894_v44, %v4077_v6  ;;  %v3700_v53 = vmul.f32 %v6883_v27, %v3698_v35 }
 0x51e   :  { %v3554_v40 = vrot.slane %v3547_v15, 2  ;;  %v3699_v52 = vmul.f32 %v6859_v10, %v3698_v35 }
 0x51f   :  { %v3576_v11 = vpop.permute.xlu1 %3575  ;;  %v3618_v23 = vpop.permute.xlu0 %3617 }
 0x520   :  { %v3555_v41 = vsel %vm624_vm4, %v3552_v46, %v3554_v40  ;;  %v3583_v2 = vadd.f32 %v3576_v11, %v3563_v58 }
 0x521   :  { %v6918_v47 = vadd.f32 %v3555_v41, %v6865_v33  ;;  %3931 = vrot.lane.b32.xlu1 %v3923_v39, %s4462_s8  ;;  %4064 = vrot.lane.b32.xlu0 %v4058_v45, %s4462_s8 }
 0x522   :  { %v3603_v43 = vadd.f32 %v3596_v48, %v3583_v2 }
 0x523   :  { %v3594_v19 = vpop.permute.xlu1 %3593  ;;  %v3636_v30 = vpop.permute.xlu0 %3635 }
 0x524   :  { %v3602_v1 = vadd.f32 %v3594_v19, %v3582_v42 }
 0x525   :  { %4046 = vrot.lane.b32.xlu1 %v4039_v50, %s4461_s7  ;;  %4068 = vrot.lane.b32.xlu0 %v4060_v37, %s4462_s8  ;;  %s4323_s7 = sld [smem:[#allocation5 + $0x54]] }
 0x526   :  { %v3622_v33 = vadd.f32 %v3614_v24, %v3602_v1 }
 0x527   :  { %v3598_v14 = vpop.permute.xlu1 %3597  ;;  %v3654_v49 = vpop.permute.xlu0 %3653 }
 0x528   :  { %v3604_v57 = vadd.f32 %v3598_v14, %v3584_v36 }
 0x529   :  { %3947 = vrot.lane.b32.xlu1 %v3941_v9, %s4463_s9  ;;  %4086 = vrot.lane.b32.xlu0 %v4079_v16, %s4463_s9 }
 0x52a   :  { %v3624_v8 = vadd.f32 %v3618_v23, %v3604_v57 }
 0x52b   :  { %v3616_v25 = vpop.permute.xlu1 %3615  ;;  %v3658_v60 = vpop.permute.xlu0 %3657  ;;  %v3835_v46 = vstv %s4323_s7 }
 0x52c   :  { %v3623_v12 = vadd.f32 %v3616_v25, %v3603_v43  ;;  %v3838_v29 = vmul.f32 %v6894_v44, %v3835_v46  ;;  %v3836_v11 = vmul.f32 %v6859_v10, %v3835_v46  ;;  %v3837_v43 = vmul.f32 %v6883_v27, %v3835_v46 }
 0x52d   :  { %3951 = vrot.lane.b32.xlu1 %v3943_v62, %s4463_s9 }
 0x52e   :  { %v3643_v38 = vadd.f32 %v3636_v30, %v3623_v12 }
 0x52f   :  { %v3634_v22 = vpop.permute.xlu1 %3633  ;;  %v3711_v20 = vpop.permute.xlu0 %3710 }
 0x530   :  { %v3642_v61 = vadd.f32 %v3634_v22, %v3622_v33  ;;  %v3719_v15 = vadd.f32 %v3711_v20, %v3699_v52 }
 0x531   :  { %4066 = vrot.lane.b32.xlu1 %v4059_v63, %s4462_s8  ;;  %s4330_s8 = sld [smem:[#allocation5 + $0x5b]] }
 0x532   :  { %v3662_v21 = vadd.f32 %v3654_v49, %v3642_v61 }
 0x533   :  { %v3638_v54 = vpop.permute.xlu1 %3637  ;;  %v3715_v4 = vpop.permute.xlu0 %3714 }
 0x534   :  { %v3644_v7 = vadd.f32 %v3638_v54, %v3624_v8  ;;  %v3721_v56 = vadd.f32 %v3715_v4, %v3701_v51 }
 0x535   :  { %4084 = vrot.lane.b32.xlu1 %v4078_v32, %s4463_s9 }
 0x536   :  { %v6937_v0 = vadd.f32 %v3658_v60, %v3644_v7 }
 0x537   :  { %v3656_v36 = vpop.permute.xlu1 %3655  ;;  %v3733_v31 = vpop.permute.xlu0 %3732  ;;  %v6952_v1 = vstv %s4330_s8 }
 0x538   :  { %v3663_v48 = vadd.f32 %v3656_v36, %v3643_v38  ;;  %v3974_v6 = vmul.f32 %v6883_v27, %v6952_v1  ;;  %v3975_v63 = vmul.f32 %v6894_v44, %v6952_v1 }
 0x539   :  { %4088 = vrot.lane.b32.xlu1 %v4080_v34, %s4463_s9  ;;  %s4464_s9 = smov [#allocation10]  }
 0x53a   :  { %s4128_s22 = sshll.u32 %s4464_s9, 4  ;;  %s4129_s22 = int_to_ptr.vmem [resolvable:$true] %s4128_s22 }
 0x53b   :  { %v3674_v55 = vpop.permute.xlu1 %3673  ;;  %v3848_v3 = vpop.permute.xlu0 %3847  ;;  %s4418_s23 = scalar_lea.vmem %s4129_s22, 512  ;;  %p4423_p6 = scmp.lt.s32.totalorder %s4129_s22, %s4129_s22 }
 0x53c   :  { %v6941_v18 = vadd.f32 %v3674_v55, %v3662_v21  ;;  %v3856_v45 = vadd.f32 %v3848_v3, %v3836_v11  ;;  %p4419_p5 = scmp.ne.s32.totalorder %s4129_s22, %s4418_s23  ;;  %p4424_p7 = scmp.lt.s32.totalorder %s4418_s23, %s4418_s23 }
 0x53e   :  { %v3688_v44 = vrot.slane %v6941_v18, 3  ;;  %p4425_p8 = por %p4424_p7, %p4423_p6 }
 0x53f   :  { %v3713_v5 = vpop.permute.xlu1 %3712  ;;  %v3852_v24 = vpop.permute.xlu0 %3851 }
 0x540   :  { %v3720_v28 = vadd.f32 %v3713_v5, %v3700_v53  ;;  %v3858_v59 = vadd.f32 %v3852_v24, %v3838_v29  ;;  %p4426_p9 = pnand %p4425_p8, %p4419_p5 }
 0x542   :  { %v3740_v13 = vadd.f32 %v3733_v31, %v3720_v28 }
 0x543   :  { %v3731_v40 = vpop.permute.xlu1 %3730  ;;  %v3753_v58 = vpop.permute.xlu0 %3752 }
 0x544   :  { %v3739_v23 = vadd.f32 %v3731_v40, %v3719_v15  ;;  %v3760_v39 = vadd.f32 %v3753_v58, %v3740_v13 }
 0x547   :  { %v3735_v26 = vpop.permute.xlu1 %3734  ;;  %v3868_v41 = vpop.permute.xlu0 %3867 }
 0x548   :  { %v3741_v2 = vadd.f32 %v3735_v26, %v3721_v56  ;;  %v6947_v42 = vadd.f32 %v3868_v41, %v3856_v45 }
 0x54b   :  { %v3850_v19 = vpop.permute.xlu1 %3849  ;;  %v3872_v30 = vpop.permute.xlu0 %3871 }
 0x54c   :  { %v3857_v50 = vadd.f32 %v3850_v19, %v3837_v43  ;;  %v6950_v37 = vadd.f32 %v3872_v30, %v3858_v59 }
 0x54f   :  { %v3751_v33 = vpop.permute.xlu1 %3750  ;;  %v3987_v14 = vpop.permute.xlu0 %3986 }
 0x550   :  { %v3759_v49 = vadd.f32 %v3751_v33, %v3739_v23  ;;  %v6956_v9 = vadd.f32 %v3987_v14, %v3974_v6 }
 0x553   :  { %v3755_v16 = vpop.permute.xlu1 %3754  ;;  %v3771_v57 = vpop.permute.xlu0 %3770 }
 0x554   :  { %v3761_v8 = vadd.f32 %v3755_v16, %v3741_v2  ;;  %v3779_v25 = vadd.f32 %v3771_v57, %v3759_v49 }
 0x557   :  { %v3870_v60 = vpop.permute.xlu1 %3869  ;;  %v3775_v62 = vpop.permute.xlu0 %3774 }
 0x558   :  { %v3877_v12 = vadd.f32 %v3870_v60, %v3857_v50  ;;  %v3781_v38 = vadd.f32 %v3775_v62, %v3761_v8 }
 0x55b   :  { %v6958_v22 = vpop.permute.xlu1 %3984  ;;  %v3890_v20 = vpop.permute.xlu0 %3889 }
 0x55f   :  { %v3989_v27 = vpop.permute.xlu1 %3988  ;;  %v6962_v61 = vpop.permute.xlu0 %4004 }
 0x560   :  { %v6964_v35 = vadd.f32 %v3989_v27, %v3975_v63 }
 0x563   :  { %v3773_v51 = vpop.permute.xlu1 %3772  ;;  %v6966_v21 = vpop.permute.xlu0 %4008 }
 0x564   :  { %v3780_v23 = vadd.f32 %v3773_v51, %v3760_v39 }
 0x567   :  { %v3888_v54 = vpop.permute.xlu1 %3887  ;;  %v3678_v4 = vpop.permute.xlu0 %3677 }
 0x568   :  { %v3684_v31 = vadd.f32 %v3678_v4, %v6937_v0  ;;  %v3896_v60 = vadd.f32 %v3888_v54, %v6947_v42 }
 0x56a   :  { %v3691_v46 = vrot.slane %v3684_v31, 3 }
 0x56b   :  { %v3892_v32 = vpop.permute.xlu1 %3891  ;;  %v3793_v7 = vpop.permute.xlu0 %3792 }
 0x56c   :  { %v3800_v41 = vadd.f32 %v3793_v7, %v3780_v23  ;;  %v3898_v4 = vadd.f32 %v3892_v32, %v6950_v37 }
 0x56f   :  { %v4007_v56 = vpop.permute.xlu1 %4006  ;;  %v3908_v36 = vpop.permute.xlu0 %3907 }
 0x570   :  { %v3916_v63 = vadd.f32 %v3908_v36, %v3896_v60 }
 0x573   :  { %v3676_v34 = vpop.permute.xlu1 %3675  ;;  %v3912_v55 = vpop.permute.xlu0 %3911 }
 0x574   :  { %v3683_v3 = vadd.f32 %v3676_v34, %v3663_v48  ;;  %v3973_v34 = vmul.f32 %v6859_v10, %v6952_v1 }
 0x576   :  { %v3689_v53 = vrot.slane %v3683_v3, 3 }
 0x577   :  { %v3791_v29 = vpop.permute.xlu1 %3790  ;;  %v4027_v5 = vpop.permute.xlu0 %4026 }
 0x578   :  { %v3690_v24 = vsel %vm762_vm5, %v3688_v44, %v3689_v53  ;;  %v3692_v52 = vsel %vm762_vm5, %v3689_v53, %v3691_v46  ;;  %v3799_v45 = vadd.f32 %v3791_v29, %v3779_v25  ;;  %v3897_v25 = vadd.f32 %v3890_v20, %v3877_v12 }
 0x579   :  { %v3695_v28 = vadd.f32 %v3690_v24, %v6908_v17  ;;  %v3696_v59 = vadd.f32 %v3692_v52, %v6918_v47  ;;  %v3918_v44 = vadd.f32 %v3912_v55, %v3898_v4  ;;  %v3993_v53 = vadd.f32 %v6958_v22, %v3973_v34 }
 0x57a   :  { %v4014_v12 = vadd.f32 %v4007_v56, %v6956_v9  ;;  %v4015_v22 = vadd.f32 %v6966_v21, %v6964_v35 }
 0x57b   :  { %v3795_v15 = vpop.permute.xlu1 %3794  ;;  %v3811_v13 = vpop.permute.xlu0 %3810  ;;  %v4013_v24 = vadd.f32 %v6962_v61, %v3993_v53 }
 0x57c   :  { %v3801_v26 = vadd.f32 %v3795_v15, %v3781_v38  ;;  %v3819_v2 = vadd.f32 %v3811_v13, %v3799_v45  ;;  %v4034_v37 = vadd.f32 %v4027_v5, %v4014_v12 }
 0x57e   :  { %v3825_v17 = vrot.slane %v3819_v2, 4 }
 0x57f   :  { %v3910_v0 = vpop.permute.xlu1 %3909  ;;  %v3815_v40 = vpop.permute.xlu0 %3814 }
 0x580   :  { %v3821_v43 = vadd.f32 %v3815_v40, %v3801_v26  ;;  %v3917_v62 = vadd.f32 %v3910_v0, %v3897_v25 }
 0x582   :  { %v3828_v6 = vrot.slane %v3821_v43, 4 }
 0x583   :  { %v4025_v58 = vpop.permute.xlu1 %4024  ;;  %v3930_v48 = vpop.permute.xlu0 %3929 }
 0x584   :  { %v3937_v27 = vadd.f32 %v3930_v48, %v3917_v62  ;;  %v4033_v10 = vadd.f32 %v4025_v58, %v4013_v24 }
 0x587   :  { %v4029_v11 = vpop.permute.xlu1 %4028  ;;  %v4045_v18 = vpop.permute.xlu0 %4044 }
 0x588   :  { %v4053_v9 = vadd.f32 %v4045_v18, %v4033_v10  ;;  %v4035_v40 = vadd.f32 %v4029_v11, %v4015_v22 }
 0x58b   :  { %v3813_v19 = vpop.permute.xlu1 %3812  ;;  %v4049_v50 = vpop.permute.xlu0 %4048 }
 0x58c   :  { %v3820_v30 = vadd.f32 %v3813_v19, %v3800_v41  ;;  %v4055_v23 = vadd.f32 %v4049_v50, %v4035_v40 }
 0x58e   :  { %v3826_v47 = vrot.slane %v3820_v30, 4 }
 0x58f   :  { %v3928_v33 = vpop.permute.xlu1 %3927  ;;  %v3950_v8 = vpop.permute.xlu0 %3949 }
 0x590   :  { %v3827_v14 = vsel %vm900_vm6, %v3825_v17, %v3826_v47  ;;  %v3829_v49 = vsel %vm900_vm6, %v3826_v47, %v3828_v6  ;;  %v3936_v7 = vadd.f32 %v3928_v33, %v3916_v63  ;;  %v3957_v31 = vadd.f32 %v3950_v8, %v3937_v27 }
 0x591   :  { %v3832_v16 = vadd.f32 %v3827_v14, %v3695_v28  ;;  %v3833_v57 = vadd.f32 %v3829_v49, %v3696_v59 }
 0x592   :  { %v3963_v42 = vrot.slane %v3957_v31, 5 }
 0x593   :  { %v3932_v39 = vpop.permute.xlu1 %3931  ;;  %v4065_v51 = vpop.permute.xlu0 %4064 }
 0x594   :  { %v3938_v20 = vadd.f32 %v3932_v39, %v3918_v44  ;;  %v4073_v61 = vadd.f32 %v4065_v51, %v4053_v9 }
 0x597   :  { %v4047_v38 = vpop.permute.xlu1 %4046  ;;  %v4069_v36 = vpop.permute.xlu0 %4068 }
 0x598   :  { %v4054_v1 = vadd.f32 %v4047_v38, %v4034_v37  ;;  %v4075_v26 = vadd.f32 %v4069_v36, %v4055_v23 }
 0x59b   :  { %v3948_v3 = vpop.permute.xlu1 %3947  ;;  %v4087_v13 = vpop.permute.xlu0 %4086 }
 0x59c   :  { %v3956_v46 = vadd.f32 %v3948_v3, %v3936_v7 }
 0x59e   :  { %v3962_v54 = vrot.slane %v3956_v46, 5 }
 0x59f   :  { %v3952_v29 = vpop.permute.xlu1 %3951 }
 0x5a0   :  { %v3964_v32 = vsel %vm1038_vm7, %v3962_v54, %v3963_v42  ;;  %v3958_v52 = vadd.f32 %v3952_v29, %v3938_v20 }
 0x5a1   :  { %v3969_v28 = vadd.f32 %v3964_v32, %v3832_v16 }
 0x5a2   :  { %v3965_v55 = vrot.slane %v3958_v52, 5 }
 0x5a3   :  { %v4067_v59 = vpop.permute.xlu1 %4066 }
 0x5a4   :  { %v3966_v56 = vsel %vm1038_vm7, %v3963_v42, %v3965_v55  ;;  %v4074_v15 = vadd.f32 %v4067_v59, %v4054_v1 }
 0x5a5   :  { %v3970_v0 = vadd.f32 %v3966_v56, %v3833_v57 }
 0x5a6   :  { %v4094_v5 = vadd.f32 %v4087_v13, %v4074_v15 }
 0x5a7   :  { %v4085_v48 = vpop.permute.xlu1 %4084 }
 0x5a8   :  { %v4093_v45 = vadd.f32 %v4085_v48, %v4073_v61  ;;  %v4100_v58 = vrot.slane %v4094_v5, 6 }
 0x5aa   :  { %v4099_v41 = vrot.slane %v4093_v45, 6 }
 0x5ab   :  { %v4089_v2 = vpop.permute.xlu1 %4088 }
 0x5ac   :  { %v4101_v43 = vsel %vm1176_vm8, %v4099_v41, %v4100_v58  ;;  %v4095_v19 = vadd.f32 %v4089_v2, %v4075_v26 }
 0x5ad   :  { %v4106_v35 = vadd.f32 %v4101_v43, %v3969_v28 }
 0x5ae   :  { %v4102_v21 = vrot.slane %v4095_v19, 6 }
 0x5af   :  { %v4337_v18 = vmul.f32 -1.442695, %v4106_v35 }
 0x5b0   :  { %v4103_v30 = vsel %vm1176_vm8, %v4100_v58, %v4102_v21 }
 0x5b1   :  { %4370 = vpow2.f32 %v4337_v18  ;;  %v4107_v17 = vadd.f32 %v4103_v30, %v3970_v0 }
 0x5b3   :  { %v4338_v11 = vmul.f32 -1.442695, %v4107_v17 }
 0x5b5   :  { %4372 = vpow2.f32 %v4338_v11 }
 0x5be   :  { %v4371_v6 = vpop.eup %4370 }
 0x5bf   :  { %v4114_v47 = vadd.f32 1.0, %v4371_v6 }
 0x5c1   :  { %4374 = vrcp.f32 %v4114_v47 }
 0x5c2   :  { %v4373_v50 = vpop.eup %4372 }
 0x5c3   :  { %v4115_v33 = vadd.f32 1.0, %v4373_v50 }
 0x5c5   :  { %4376 = vrcp.f32 %v4115_v33 }
 0x5ce   :  { %v4375_v14 = vpop.eup %4374 }
 0x5cf   :  { %4121 = vst.msk [vmem:[#allocation10 + $0x10] sm:$0xff] %vm2113_vm9, %v4375_v14 }
 0x5d2   :  { %v4377_v49 = vpop.eup %4376 }
 0x5d3   :  { %4122 = vst.msk [vmem:[#allocation10 + $0x18] sm:$0xff] %vm2113_vm9, %v4377_v49 }
 0x5d4   :  { %4429 = shalt.err (!%p4426_p9)
}
 0x5d5   :  { %4134 = dma.vmem_to_hbm [thread:$0]  %s4129_s22, 512, %s6999_s2, [#allocation7], %s4446_s15, %s4446_s15, %s4447_s16  }
 0x5d6   :  { %4442 = dma.done.wait [#allocation7], 512  }
 0x5d7   :  { %4443 = vsyncadd [#allocation7], 4294966784 }
 0x5d8   :  { %4138 = vsyncpa [#allocation6], 1 }
 0x5d9   :  { %4139 = vsyncpa [#allocation7], 1 }
 0x5da   :  { %4140 = vsyncpa [#allocation8], 1 }

</bundles_post_ra>
